<compile_context>
chip_gen: v5e
topology: v5e:2x2
jax: 0.10.0
libtpu: 0.0.40
codegen_flags: <defaults>
</compile_context>

<pallas_src>
import jax
import jax.numpy as jnp
from jax.experimental import pallas as pl
from jax.experimental.pallas import tpu as pltpu

# ---- config (consistent with the module's forward) ---------------------------
N_CLASSES = 10
N_Z = 16
N_C = 1
IMAGE_SIZE = 8
BATCH = 128                      # MXU-row aligned batch (perf feedback)
BN_EPS = 0.8                     # nn.BatchNorm1d(out_feat, 0.8) -> eps = 0.8

IMG_FLAT = N_C * IMAGE_SIZE * IMAGE_SIZE     # 64
OUT_PAD = 128                                # lane-dense padded output width
CLS_PAD = 128                                # padded class / embedding axes
HIDDEN = (128, 256, 512, 1024)
SLAB_ROWS = 16                               # packed bias / gamma / beta slab


# ---- Pallas kernel: fused embedding + 5-layer MLP + BN + LeakyReLU + Tanh ----
def _generator_kernel(label_ref, noise_ref, emb_ref, w1e_ref, w1n_ref,
                      w2_ref, w3_ref, slab_ref, w4_hbm, w5_hbm,
                      out_ref, w4_buf, w5_buf, sem):
    # Stream the two big weights (w4 ~1 MiB, w5 ~0.25 MiB in bf16) behind the
    # layer 1-3 compute instead of serializing them before the body starts.
    cp4 = pltpu.make_async_copy(w4_hbm, w4_buf, sem.at[0])
    cp5 = pltpu.make_async_copy(w5_hbm, w5_buf, sem.at[1])
    cp4.start()
    cp5.start()

    def leaky(v):
        return jnp.where(v > 0, v, 0.2 * v)

    def batchnorm(v, gamma, beta):
        # training-mode BatchNorm1d: batch mean / biased batch variance (f32)
        mean = jnp.mean(v, axis=0, keepdims=True)
        var = jnp.mean((v - mean) ** 2, axis=0, keepdims=True)
        return gamma * (v - mean) * jax.lax.rsqrt(var + BN_EPS) + beta

    def mm(a, b):
        # bf16 MXU matmul, f32 accumulation
        return jnp.dot(a.astype(jnp.bfloat16), b,
                       preferred_element_type=jnp.float32)

    def slab(row, width):
        # packed 1-row params: (1, width) f32 slice of the (16, 1024) slab
        return slab_ref[row:row + 1, 0:width]

    B = noise_ref.shape[0]

    # fused embedding lookup: exact 0/1 one-hot(label) @ padded emb table
    lab = label_ref[...]                                             # (B, 1) i32
    class_ids = jax.lax.broadcasted_iota(jnp.int32, (B, CLS_PAD), 1)
    onehot = (class_ids == lab).astype(jnp.bfloat16)                 # (B, 128)
    emb_sel = mm(onehot, emb_ref[...])                               # (B, 128)

    # block(N_Z + N_CLASSES, 128, normalize=False)
    # concat(emb(label), noise) folded into two partial dots (w1 split by rows)
    h = leaky(mm(emb_sel, w1e_ref[...]) + mm(noise_ref[...], w1n_ref[...])
              + slab(0, HIDDEN[0]))

    # block(128, 256)
    h = mm(h, w2_ref[...]) + slab(1, HIDDEN[1])
    h = leaky(batchnorm(h, slab(2, HIDDEN[1]), slab(3, HIDDEN[1])))

    # block(256, 512)
    h = mm(h, w3_ref[...]) + slab(4, HIDDEN[2])
    h = leaky(batchnorm(h, slab(5, HIDDEN[2]), slab(6, HIDDEN[2])))

    # block(512, 1024) — weights arrive via the manual DMA started above
    cp4.wait()
    h = mm(h, w4_buf[...]) + slab(7, HIDDEN[3])
    h = leaky(batchnorm(h, slab(8, HIDDEN[3]), slab(9, HIDDEN[3])))

    # Linear(1024, 64 padded to 128) + Tanh — lane-dense, unmasked store
    cp5.wait()
    out_ref[...] = jnp.tanh(mm(h, w5_buf[...]) + slab(10, OUT_PAD))
    # TODO(synk): at much larger batch, grid the 1024-feature axis of layer 4
    # and mark it parallel so v7x's second TensorCore participates.


def _vmem_spec():
    return pl.BlockSpec(memory_space=pltpu.MemorySpace.VMEM)


def _hbm_spec():
    return pl.BlockSpec(memory_space=pl.ANY)


@jax.jit
def generator_forward(noise, label, params):
    B = noise.shape[0]
    label2d = label.astype(jnp.int32).reshape(B, 1)

    out = pl.pallas_call(
        _generator_kernel,
        out_shape=jax.ShapeDtypeStruct((B, OUT_PAD), jnp.float32),
        in_specs=[_vmem_spec() for _ in range(8)] + [_hbm_spec(), _hbm_spec()],
        out_specs=_vmem_spec(),
        scratch_shapes=[
            pltpu.VMEM((HIDDEN[2], HIDDEN[3]), jnp.bfloat16),   # w4 buffer
            pltpu.VMEM((HIDDEN[3], OUT_PAD), jnp.bfloat16),     # w5 buffer
            pltpu.SemaphoreType.DMA((2,)),
        ],
    )(label2d, noise, params["emb"], params["w1e"], params["w1n"],
      params["w2"], params["w3"], params["slab"], params["w4"], params["w5"])

    return out[:, :IMG_FLAT].reshape(B, N_C, IMAGE_SIZE, IMAGE_SIZE)


# ---- deterministic parameter initialization (PyTorch defaults) ---------------
def init_params(key):
    ks = jax.random.split(key, 11)

    def linear(kw, kb, fan_in, fan_out):
        bound = 1.0 / jnp.sqrt(fan_in)
        w = jax.random.uniform(kw, (fan_in, fan_out), jnp.float32, -bound, bound)
        b = jax.random.uniform(kb, (fan_out,), jnp.float32, -bound, bound)
        return w, b

    # nn.Embedding default init: N(0, 1); padded to (128, 128)
    emb = jax.random.normal(ks[0], (N_CLASSES, N_CLASSES), jnp.float32)
    emb_pad = jnp.zeros((CLS_PAD, CLS_PAD), jnp.float32)
    emb_pad = emb_pad.at[:N_CLASSES, :N_CLASSES].set(emb)

    in_feat = N_Z + N_CLASSES
    w1, b1 = linear(ks[1], ks[2], in_feat, HIDDEN[0])
    w2, b2 = linear(ks[3], ks[4], HIDDEN[0], HIDDEN[1])
    w3, b3 = linear(ks[5], ks[6], HIDDEN[1], HIDDEN[2])
    w4, b4 = linear(ks[7], ks[8], HIDDEN[2], HIDDEN[3])
    w5, b5 = linear(ks[9], ks[10], HIDDEN[3], IMG_FLAT)

    # gen_input = cat(emb(label), noise): rows 0..9 of w1 see the embedding,
    # rows 10..25 see the noise.  Split + pad the embedding half to 128 rows.
    w1e = jnp.zeros((CLS_PAD, HIDDEN[0]), jnp.float32)
    w1e = w1e.at[:N_CLASSES].set(w1[:N_CLASSES])
    w1n = w1[N_CLASSES:]                                   # (N_Z, 128)

    # pad the final Linear to a lane-dense 128-wide output (cols 64..127 zero)
    w5p = jnp.zeros((HIDDEN[3], OUT_PAD), jnp.float32).at[:, :IMG_FLAT].set(w5)

    # pack all biases + BN gamma/beta (gamma=1, beta=0 like PyTorch) in one slab
    slab = jnp.zeros((SLAB_ROWS, HIDDEN[3]), jnp.float32)
    slab = slab.at[0, :HIDDEN[0]].set(b1)
    slab = slab.at[1, :HIDDEN[1]].set(b2)
    slab = slab.at[2, :HIDDEN[1]].set(jnp.ones((HIDDEN[1],), jnp.float32))
    slab = slab.at[3, :HIDDEN[1]].set(jnp.zeros((HIDDEN[1],), jnp.float32))
    slab = slab.at[4, :HIDDEN[2]].set(b3)
    slab = slab.at[5, :HIDDEN[2]].set(jnp.ones((HIDDEN[2],), jnp.float32))
    slab = slab.at[6, :HIDDEN[2]].set(jnp.zeros((HIDDEN[2],), jnp.float32))
    slab = slab.at[7, :HIDDEN[3]].set(b4)
    slab = slab.at[8, :HIDDEN[3]].set(jnp.ones((HIDDEN[3],), jnp.float32))
    slab = slab.at[9, :HIDDEN[3]].set(jnp.zeros((HIDDEN[3],), jnp.float32))
    slab = slab.at[10, :IMG_FLAT].set(b5)

    bf = jnp.bfloat16
    return {
        "emb": emb_pad.astype(bf),
        "w1e": w1e.astype(bf), "w1n": w1n.astype(bf),
        "w2": w2.astype(bf), "w3": w3.astype(bf),
        "w4": w4.astype(bf), "w5": w5p.astype(bf),
        "slab": slab,
    }


# ---- pure-JAX reference (same bf16 weights / f32 accumulation) ---------------
def reference_forward(noise, label, params):
    def leaky(v):
        return jnp.where(v > 0, v, 0.2 * v)

    def bn(v, g, b):
        m = jnp.mean(v, axis=0, keepdims=True)
        var = jnp.mean((v - m) ** 2, axis=0, keepdims=True)
        return g * (v - m) * jax.lax.rsqrt(var + BN_EPS) + b

    s = params["slab"]
    emb_rows = jnp.take(params["emb"], label, axis=0)                  # (B, 128)
    h = (jnp.dot(emb_rows, params["w1e"], preferred_element_type=jnp.float32)
         + jnp.dot(noise.astype(jnp.bfloat16), params["w1n"],
                   preferred_element_type=jnp.float32)
         + s[0:1, :HIDDEN[0]])
    h = leaky(h)
    h = jnp.dot(h.astype(jnp.bfloat16), params["w2"],
                preferred_element_type=jnp.float32) + s[1:2, :HIDDEN[1]]
    h = leaky(bn(h, s[2:3, :HIDDEN[1]], s[3:4, :HIDDEN[1]]))
    h = jnp.dot(h.astype(jnp.bfloat16), params["w3"],
                preferred_element_type=jnp.float32) + s[4:5, :HIDDEN[2]]
    h = leaky(bn(h, s[5:6, :HIDDEN[2]], s[6:7, :HIDDEN[2]]))
    h = jnp.dot(h.astype(jnp.bfloat16), params["w4"],
                preferred_element_type=jnp.float32) + s[7:8, :HIDDEN[3]]
    h = leaky(bn(h, s[8:9, :HIDDEN[3]], s[9:10, :HIDDEN[3]]))
    out = jnp.tanh(jnp.dot(h.astype(jnp.bfloat16), params["w5"],
                           preferred_element_type=jnp.float32) + s[10:11, :OUT_PAD])
    return out[:, :IMG_FLAT].reshape(-1, N_C, IMAGE_SIZE, IMAGE_SIZE)


if __name__ == "__main__":
    key = jax.random.PRNGKey(0)
    k_params, k_noise, k_label = jax.random.split(key, 3)

    params = init_params(k_params)
    noise = jax.random.normal(k_noise, (BATCH, N_Z), jnp.float32)
    label = jax.random.randint(k_label, (BATCH,), 0, N_CLASSES, jnp.int32)

    img = generator_forward(noise, label, params)
    jax.block_until_ready(img)

    ref = reference_forward(noise, label, params)

    assert img.shape == (BATCH, N_C, IMAGE_SIZE, IMAGE_SIZE)
    assert bool(jnp.all(jnp.isfinite(img)))
    assert bool(jnp.max(jnp.abs(img - ref)) < 5e-2)
    print("KERNEL_OK")
</pallas_src>

<mosaic_0001>
module attributes {stable_mosaic.version = 11 : i64} {
  func.func @_generator_kernel(%arg0: memref<128x1xi32, #tpu.memory_space<vmem>>, %arg1: memref<128x16xf32, #tpu.memory_space<vmem>>, %arg2: memref<128x128xbf16, #tpu.memory_space<vmem>>, %arg3: memref<128x128xbf16, #tpu.memory_space<vmem>>, %arg4: memref<16x128xbf16, #tpu.memory_space<vmem>>, %arg5: memref<128x256xbf16, #tpu.memory_space<vmem>>, %arg6: memref<256x512xbf16, #tpu.memory_space<vmem>>, %arg7: memref<16x1024xf32, #tpu.memory_space<vmem>>, %arg8: memref<512x1024xbf16, #tpu.memory_space<any>>, %arg9: memref<1024x128xbf16, #tpu.memory_space<any>>, %arg10: memref<128x128xf32, #tpu.memory_space<vmem>>, %arg11: memref<512x1024xbf16, #tpu.memory_space<vmem>>, %arg12: memref<1024x128xbf16, #tpu.memory_space<vmem>>, %arg13: memref<2x!tpu.dma_semaphore, #tpu.memory_space<semaphore_mem>>) attributes {dimension_semantics = [], scalar_prefetch = 0 : i64, scratch_operands = 3 : i64, tpu.core_type = #tpu.core_type<tc>} {
    %c0_i32 = arith.constant 0 : i32
    %0 = tpu.memref_slice %arg13[%c0_i32] : memref<2x!tpu.dma_semaphore, #tpu.memory_space<semaphore_mem>> -> memref<1x!tpu.dma_semaphore, #tpu.memory_space<semaphore_mem>>
    %1 = tpu.memref_squeeze %0 : memref<1x!tpu.dma_semaphore, #tpu.memory_space<semaphore_mem>> -> memref<!tpu.dma_semaphore, #tpu.memory_space<semaphore_mem>>
    tpu.enqueue_dma source(%arg8 : memref<512x1024xbf16, #tpu.memory_space<any>>) target(%arg11 : memref<512x1024xbf16, #tpu.memory_space<vmem>>) target_semaphore(%1 : memref<!tpu.dma_semaphore, #tpu.memory_space<semaphore_mem>>)
    %c1_i32 = arith.constant 1 : i32
    %2 = tpu.memref_slice %arg13[%c1_i32] : memref<2x!tpu.dma_semaphore, #tpu.memory_space<semaphore_mem>> -> memref<1x!tpu.dma_semaphore, #tpu.memory_space<semaphore_mem>>
    %3 = tpu.memref_squeeze %2 : memref<1x!tpu.dma_semaphore, #tpu.memory_space<semaphore_mem>> -> memref<!tpu.dma_semaphore, #tpu.memory_space<semaphore_mem>>
    tpu.enqueue_dma source(%arg9 : memref<1024x128xbf16, #tpu.memory_space<any>>) target(%arg12 : memref<1024x128xbf16, #tpu.memory_space<vmem>>) target_semaphore(%3 : memref<!tpu.dma_semaphore, #tpu.memory_space<semaphore_mem>>)
    %c0 = arith.constant 0 : index
    %c0_0 = arith.constant 0 : index
    %4 = vector.load %arg0[%c0, %c0_0] : memref<128x1xi32, #tpu.memory_space<vmem>>, vector<128x1xi32>
    %5 = tpu.iota {dimensions = array<i32: 1>} : vector<128x128xi32>
    %6 = vector.broadcast %4 : vector<128x1xi32> to vector<128x128xi32>
    %7 = arith.cmpi eq, %5, %6 : vector<128x128xi32>
    %8 = arith.extui %7 : vector<128x128xi1> to vector<128x128xi32>
    %9 = arith.sitofp %8 : vector<128x128xi32> to vector<128x128xf32>
    %10 = arith.truncf %9 : vector<128x128xf32> to vector<128x128xbf16>
    %c0_1 = arith.constant 0 : index
    %c0_2 = arith.constant 0 : index
    %11 = vector.load %arg2[%c0_1, %c0_2] : memref<128x128xbf16, #tpu.memory_space<vmem>>, vector<128x128xbf16>
    %cst = arith.constant dense<0.000000e+00> : vector<128x128xf32>
    %12 = tpu.matmul %10, %11, %cst {dimension_numbers = #tpu.dot_dimension_numbers<[1], [0], [0], [1], [0, 0, 1, 1], [], []>} : vector<128x128xbf16>, vector<128x128xbf16>, vector<128x128xf32> -> vector<128x128xf32>
    %c0_3 = arith.constant 0 : index
    %c0_4 = arith.constant 0 : index
    %13 = vector.load %arg3[%c0_3, %c0_4] : memref<128x128xbf16, #tpu.memory_space<vmem>>, vector<128x128xbf16>
    %14 = arith.truncf %12 : vector<128x128xf32> to vector<128x128xbf16>
    %cst_5 = arith.constant dense<0.000000e+00> : vector<128x128xf32>
    %15 = tpu.matmul %14, %13, %cst_5 {dimension_numbers = #tpu.dot_dimension_numbers<[1], [0], [0], [1], [0, 0, 1, 1], [], []>} : vector<128x128xbf16>, vector<128x128xbf16>, vector<128x128xf32> -> vector<128x128xf32>
    %c0_6 = arith.constant 0 : index
    %c0_7 = arith.constant 0 : index
    %16 = vector.load %arg1[%c0_6, %c0_7] : memref<128x16xf32, #tpu.memory_space<vmem>>, vector<128x16xf32>
    %c0_8 = arith.constant 0 : index
    %c0_9 = arith.constant 0 : index
    %17 = vector.load %arg4[%c0_8, %c0_9] : memref<16x128xbf16, #tpu.memory_space<vmem>>, vector<16x128xbf16>
    %18 = arith.truncf %16 : vector<128x16xf32> to vector<128x16xbf16>
    %cst_10 = arith.constant dense<0.000000e+00> : vector<128x128xf32>
    %19 = tpu.matmul %18, %17, %cst_10 {dimension_numbers = #tpu.dot_dimension_numbers<[1], [0], [0], [1], [0, 0, 1, 1], [], []>} : vector<128x16xbf16>, vector<16x128xbf16>, vector<128x128xf32> -> vector<128x128xf32>
    %20 = arith.addf %15, %19 : vector<128x128xf32>
    %c0_11 = arith.constant 0 : index
    %c0_12 = arith.constant 0 : index
    %21 = vector.load %arg7[%c0_11, %c0_12] : memref<16x1024xf32, #tpu.memory_space<vmem>>, vector<1x128xf32>
    %22 = vector.broadcast %21 : vector<1x128xf32> to vector<128x128xf32>
    %23 = arith.addf %20, %22 : vector<128x128xf32>
    %cst_13 = arith.constant 0.000000e+00 : f32
    %24 = vector.broadcast %cst_13 : f32 to vector<128x128xf32>
    %25 = arith.cmpf ogt, %23, %24 : vector<128x128xf32>
    %cst_14 = arith.constant 2.000000e-01 : f32
    %26 = vector.broadcast %cst_14 : f32 to vector<128x128xf32>
    %27 = arith.mulf %26, %23 : vector<128x128xf32>
    %28 = arith.select %25, %23, %27 : vector<128x128xi1>, vector<128x128xf32>
    %c0_15 = arith.constant 0 : index
    %c0_16 = arith.constant 0 : index
    %29 = vector.load %arg5[%c0_15, %c0_16] : memref<128x256xbf16, #tpu.memory_space<vmem>>, vector<128x256xbf16>
    %30 = arith.truncf %28 : vector<128x128xf32> to vector<128x128xbf16>
    %cst_17 = arith.constant dense<0.000000e+00> : vector<128x256xf32>
    %31 = tpu.matmul %30, %29, %cst_17 {dimension_numbers = #tpu.dot_dimension_numbers<[1], [0], [0], [1], [0, 0, 1, 1], [], []>} : vector<128x128xbf16>, vector<128x256xbf16>, vector<128x256xf32> -> vector<128x256xf32>
    %c1 = arith.constant 1 : index
    %c0_18 = arith.constant 0 : index
    %32 = vector.load %arg7[%c1, %c0_18] : memref<16x1024xf32, #tpu.memory_space<vmem>>, vector<1x256xf32>
    %33 = vector.broadcast %32 : vector<1x256xf32> to vector<128x256xf32>
    %34 = arith.addf %31, %33 : vector<128x256xf32>
    %c2 = arith.constant 2 : index
    %c0_19 = arith.constant 0 : index
    %35 = vector.load %arg7[%c2, %c0_19] : memref<16x1024xf32, #tpu.memory_space<vmem>>, vector<1x256xf32>
    %c3 = arith.constant 3 : index
    %c0_20 = arith.constant 0 : index
    %36 = vector.load %arg7[%c3, %c0_20] : memref<16x1024xf32, #tpu.memory_space<vmem>>, vector<1x256xf32>
    %cst_21 = arith.constant dense<0.000000e+00> : vector<256xf32>
    %37 = vector.multi_reduction <add>, %34, %cst_21 [0] : vector<128x256xf32> to vector<256xf32>
    %38 = vector.shape_cast %37 : vector<256xf32> to vector<1x256xf32>
    %cst_22 = arith.constant 1.280000e+02 : f32
    %39 = vector.broadcast %cst_22 : f32 to vector<1x256xf32>
    %40 = arith.divf %38, %39 : vector<1x256xf32>
    %41 = vector.broadcast %40 : vector<1x256xf32> to vector<128x256xf32>
    %42 = arith.subf %34, %41 : vector<128x256xf32>
    %43 = arith.mulf %42, %42 : vector<128x256xf32>
    %cst_23 = arith.constant dense<0.000000e+00> : vector<256xf32>
    %44 = vector.multi_reduction <add>, %43, %cst_23 [0] : vector<128x256xf32> to vector<256xf32>
    %45 = vector.shape_cast %44 : vector<256xf32> to vector<1x256xf32>
    %cst_24 = arith.constant 1.280000e+02 : f32
    %46 = vector.broadcast %cst_24 : f32 to vector<1x256xf32>
    %47 = arith.divf %45, %46 : vector<1x256xf32>
    %48 = vector.broadcast %40 : vector<1x256xf32> to vector<128x256xf32>
    %49 = arith.subf %34, %48 : vector<128x256xf32>
    %50 = vector.broadcast %35 : vector<1x256xf32> to vector<128x256xf32>
    %51 = arith.mulf %50, %49 : vector<128x256xf32>
    %cst_25 = arith.constant 8.000000e-01 : f32
    %52 = vector.broadcast %cst_25 : f32 to vector<1x256xf32>
    %53 = arith.addf %47, %52 : vector<1x256xf32>
    %54 = math.rsqrt %53 : vector<1x256xf32>
    %55 = vector.broadcast %54 : vector<1x256xf32> to vector<128x256xf32>
    %56 = arith.mulf %51, %55 : vector<128x256xf32>
    %57 = vector.broadcast %36 : vector<1x256xf32> to vector<128x256xf32>
    %58 = arith.addf %56, %57 : vector<128x256xf32>
    %cst_26 = arith.constant 0.000000e+00 : f32
    %59 = vector.broadcast %cst_26 : f32 to vector<128x256xf32>
    %60 = arith.cmpf ogt, %58, %59 : vector<128x256xf32>
    %cst_27 = arith.constant 2.000000e-01 : f32
    %61 = vector.broadcast %cst_27 : f32 to vector<128x256xf32>
    %62 = arith.mulf %61, %58 : vector<128x256xf32>
    %63 = arith.select %60, %58, %62 : vector<128x256xi1>, vector<128x256xf32>
    %c0_28 = arith.constant 0 : index
    %c0_29 = arith.constant 0 : index
    %64 = vector.load %arg6[%c0_28, %c0_29] : memref<256x512xbf16, #tpu.memory_space<vmem>>, vector<256x512xbf16>
    %65 = arith.truncf %63 : vector<128x256xf32> to vector<128x256xbf16>
    %cst_30 = arith.constant dense<0.000000e+00> : vector<128x512xf32>
    %66 = tpu.matmul %65, %64, %cst_30 {dimension_numbers = #tpu.dot_dimension_numbers<[1], [0], [0], [1], [0, 0, 1, 1], [], []>} : vector<128x256xbf16>, vector<256x512xbf16>, vector<128x512xf32> -> vector<128x512xf32>
    %c4 = arith.constant 4 : index
    %c0_31 = arith.constant 0 : index
    %67 = vector.load %arg7[%c4, %c0_31] : memref<16x1024xf32, #tpu.memory_space<vmem>>, vector<1x512xf32>
    %68 = vector.broadcast %67 : vector<1x512xf32> to vector<128x512xf32>
    %69 = arith.addf %66, %68 : vector<128x512xf32>
    %c5 = arith.constant 5 : index
    %c0_32 = arith.constant 0 : index
    %70 = vector.load %arg7[%c5, %c0_32] : memref<16x1024xf32, #tpu.memory_space<vmem>>, vector<1x512xf32>
    %c6 = arith.constant 6 : index
    %c0_33 = arith.constant 0 : index
    %71 = vector.load %arg7[%c6, %c0_33] : memref<16x1024xf32, #tpu.memory_space<vmem>>, vector<1x512xf32>
    %cst_34 = arith.constant dense<0.000000e+00> : vector<512xf32>
    %72 = vector.multi_reduction <add>, %69, %cst_34 [0] : vector<128x512xf32> to vector<512xf32>
    %73 = vector.shape_cast %72 : vector<512xf32> to vector<1x512xf32>
    %cst_35 = arith.constant 1.280000e+02 : f32
    %74 = vector.broadcast %cst_35 : f32 to vector<1x512xf32>
    %75 = arith.divf %73, %74 : vector<1x512xf32>
    %76 = vector.broadcast %75 : vector<1x512xf32> to vector<128x512xf32>
    %77 = arith.subf %69, %76 : vector<128x512xf32>
    %78 = arith.mulf %77, %77 : vector<128x512xf32>
    %cst_36 = arith.constant dense<0.000000e+00> : vector<512xf32>
    %79 = vector.multi_reduction <add>, %78, %cst_36 [0] : vector<128x512xf32> to vector<512xf32>
    %80 = vector.shape_cast %79 : vector<512xf32> to vector<1x512xf32>
    %cst_37 = arith.constant 1.280000e+02 : f32
    %81 = vector.broadcast %cst_37 : f32 to vector<1x512xf32>
    %82 = arith.divf %80, %81 : vector<1x512xf32>
    %83 = vector.broadcast %75 : vector<1x512xf32> to vector<128x512xf32>
    %84 = arith.subf %69, %83 : vector<128x512xf32>
    %85 = vector.broadcast %70 : vector<1x512xf32> to vector<128x512xf32>
    %86 = arith.mulf %85, %84 : vector<128x512xf32>
    %cst_38 = arith.constant 8.000000e-01 : f32
    %87 = vector.broadcast %cst_38 : f32 to vector<1x512xf32>
    %88 = arith.addf %82, %87 : vector<1x512xf32>
    %89 = math.rsqrt %88 : vector<1x512xf32>
    %90 = vector.broadcast %89 : vector<1x512xf32> to vector<128x512xf32>
    %91 = arith.mulf %86, %90 : vector<128x512xf32>
    %92 = vector.broadcast %71 : vector<1x512xf32> to vector<128x512xf32>
    %93 = arith.addf %91, %92 : vector<128x512xf32>
    %cst_39 = arith.constant 0.000000e+00 : f32
    %94 = vector.broadcast %cst_39 : f32 to vector<128x512xf32>
    %95 = arith.cmpf ogt, %93, %94 : vector<128x512xf32>
    %cst_40 = arith.constant 2.000000e-01 : f32
    %96 = vector.broadcast %cst_40 : f32 to vector<128x512xf32>
    %97 = arith.mulf %96, %93 : vector<128x512xf32>
    %98 = arith.select %95, %93, %97 : vector<128x512xi1>, vector<128x512xf32>
    %c0_i32_41 = arith.constant 0 : i32
    %99 = tpu.memref_slice %arg13[%c0_i32_41] : memref<2x!tpu.dma_semaphore, #tpu.memory_space<semaphore_mem>> -> memref<1x!tpu.dma_semaphore, #tpu.memory_space<semaphore_mem>>
    %100 = tpu.memref_squeeze %99 : memref<1x!tpu.dma_semaphore, #tpu.memory_space<semaphore_mem>> -> memref<!tpu.dma_semaphore, #tpu.memory_space<semaphore_mem>>
    tpu.wait_dma2 semaphore(%100 : memref<!tpu.dma_semaphore, #tpu.memory_space<semaphore_mem>>) src(%arg8 : memref<512x1024xbf16, #tpu.memory_space<any>>) dst(%arg11 : memref<512x1024xbf16, #tpu.memory_space<vmem>>)
    %c0_42 = arith.constant 0 : index
    %c0_43 = arith.constant 0 : index
    %101 = vector.load %arg11[%c0_42, %c0_43] : memref<512x1024xbf16, #tpu.memory_space<vmem>>, vector<512x1024xbf16>
    %102 = arith.truncf %98 : vector<128x512xf32> to vector<128x512xbf16>
    %cst_44 = arith.constant dense<0.000000e+00> : vector<128x1024xf32>
    %103 = tpu.matmul %102, %101, %cst_44 {dimension_numbers = #tpu.dot_dimension_numbers<[1], [0], [0], [1], [0, 0, 1, 1], [], []>} : vector<128x512xbf16>, vector<512x1024xbf16>, vector<128x1024xf32> -> vector<128x1024xf32>
    %c7 = arith.constant 7 : index
    %c0_45 = arith.constant 0 : index
    %104 = vector.load %arg7[%c7, %c0_45] : memref<16x1024xf32, #tpu.memory_space<vmem>>, vector<1x1024xf32>
    %105 = vector.broadcast %104 : vector<1x1024xf32> to vector<128x1024xf32>
    %106 = arith.addf %103, %105 : vector<128x1024xf32>
    %c8 = arith.constant 8 : index
    %c0_46 = arith.constant 0 : index
    %107 = vector.load %arg7[%c8, %c0_46] : memref<16x1024xf32, #tpu.memory_space<vmem>>, vector<1x1024xf32>
    %c9 = arith.constant 9 : index
    %c0_47 = arith.constant 0 : index
    %108 = vector.load %arg7[%c9, %c0_47] : memref<16x1024xf32, #tpu.memory_space<vmem>>, vector<1x1024xf32>
    %cst_48 = arith.constant dense<0.000000e+00> : vector<1024xf32>
    %109 = vector.multi_reduction <add>, %106, %cst_48 [0] : vector<128x1024xf32> to vector<1024xf32>
    %110 = vector.shape_cast %109 : vector<1024xf32> to vector<1x1024xf32>
    %cst_49 = arith.constant 1.280000e+02 : f32
    %111 = vector.broadcast %cst_49 : f32 to vector<1x1024xf32>
    %112 = arith.divf %110, %111 : vector<1x1024xf32>
    %113 = vector.broadcast %112 : vector<1x1024xf32> to vector<128x1024xf32>
    %114 = arith.subf %106, %113 : vector<128x1024xf32>
    %115 = arith.mulf %114, %114 : vector<128x1024xf32>
    %cst_50 = arith.constant dense<0.000000e+00> : vector<1024xf32>
    %116 = vector.multi_reduction <add>, %115, %cst_50 [0] : vector<128x1024xf32> to vector<1024xf32>
    %117 = vector.shape_cast %116 : vector<1024xf32> to vector<1x1024xf32>
    %cst_51 = arith.constant 1.280000e+02 : f32
    %118 = vector.broadcast %cst_51 : f32 to vector<1x1024xf32>
    %119 = arith.divf %117, %118 : vector<1x1024xf32>
    %120 = vector.broadcast %112 : vector<1x1024xf32> to vector<128x1024xf32>
    %121 = arith.subf %106, %120 : vector<128x1024xf32>
    %122 = vector.broadcast %107 : vector<1x1024xf32> to vector<128x1024xf32>
    %123 = arith.mulf %122, %121 : vector<128x1024xf32>
    %cst_52 = arith.constant 8.000000e-01 : f32
    %124 = vector.broadcast %cst_52 : f32 to vector<1x1024xf32>
    %125 = arith.addf %119, %124 : vector<1x1024xf32>
    %126 = math.rsqrt %125 : vector<1x1024xf32>
    %127 = vector.broadcast %126 : vector<1x1024xf32> to vector<128x1024xf32>
    %128 = arith.mulf %123, %127 : vector<128x1024xf32>
    %129 = vector.broadcast %108 : vector<1x1024xf32> to vector<128x1024xf32>
    %130 = arith.addf %128, %129 : vector<128x1024xf32>
    %cst_53 = arith.constant 0.000000e+00 : f32
    %131 = vector.broadcast %cst_53 : f32 to vector<128x1024xf32>
    %132 = arith.cmpf ogt, %130, %131 : vector<128x1024xf32>
    %cst_54 = arith.constant 2.000000e-01 : f32
    %133 = vector.broadcast %cst_54 : f32 to vector<128x1024xf32>
    %134 = arith.mulf %133, %130 : vector<128x1024xf32>
    %135 = arith.select %132, %130, %134 : vector<128x1024xi1>, vector<128x1024xf32>
    %c1_i32_55 = arith.constant 1 : i32
    %136 = tpu.memref_slice %arg13[%c1_i32_55] : memref<2x!tpu.dma_semaphore, #tpu.memory_space<semaphore_mem>> -> memref<1x!tpu.dma_semaphore, #tpu.memory_space<semaphore_mem>>
    %137 = tpu.memref_squeeze %136 : memref<1x!tpu.dma_semaphore, #tpu.memory_space<semaphore_mem>> -> memref<!tpu.dma_semaphore, #tpu.memory_space<semaphore_mem>>
    tpu.wait_dma2 semaphore(%137 : memref<!tpu.dma_semaphore, #tpu.memory_space<semaphore_mem>>) src(%arg9 : memref<1024x128xbf16, #tpu.memory_space<any>>) dst(%arg12 : memref<1024x128xbf16, #tpu.memory_space<vmem>>)
    %c0_56 = arith.constant 0 : index
    %c0_57 = arith.constant 0 : index
    %138 = vector.load %arg12[%c0_56, %c0_57] : memref<1024x128xbf16, #tpu.memory_space<vmem>>, vector<1024x128xbf16>
    %139 = arith.truncf %135 : vector<128x1024xf32> to vector<128x1024xbf16>
    %cst_58 = arith.constant dense<0.000000e+00> : vector<128x128xf32>
    %140 = tpu.matmul %139, %138, %cst_58 {dimension_numbers = #tpu.dot_dimension_numbers<[1], [0], [0], [1], [0, 0, 1, 1], [], []>} : vector<128x1024xbf16>, vector<1024x128xbf16>, vector<128x128xf32> -> vector<128x128xf32>
    %c10 = arith.constant 10 : index
    %c0_59 = arith.constant 0 : index
    %141 = vector.load %arg7[%c10, %c0_59] : memref<16x1024xf32, #tpu.memory_space<vmem>>, vector<1x128xf32>
    %142 = vector.broadcast %141 : vector<1x128xf32> to vector<128x128xf32>
    %143 = arith.addf %140, %142 : vector<128x128xf32>
    %144 = math.tanh %143 : vector<128x128xf32>
    %c0_60 = arith.constant 0 : index
    %c0_61 = arith.constant 0 : index
    %145 = vector.load %arg10[%c0_60, %c0_61] : memref<128x128xf32, #tpu.memory_space<vmem>>, vector<128x128xf32>
    tpu.vector_store %arg10[%c0_60, %c0_61], %144 {strides = array<i32>} : memref<128x128xf32, #tpu.memory_space<vmem>>, vector<128x128xf32>,
    return
  }
}

</mosaic_0001>

<bundles_post_ra>
// kernel: generator_forward.1
= control target key start
LH: loop header
LB: loop body
LE: loop exit
PB: predicated region body
PF: predicated region fallthrough
CT: control target
= control target key end

     0   :  { %15 = vsyncpa [#allocation6], 0  ;;  %s16151_s0 = inlined_call_operand.vmem [shape: s32[128,1], index: 0, kind: input, shape index: {}]   ;;  %s16152_s1 = inlined_call_operand.vmem [shape: f32[128,16], index: 1, kind: input, shape index: {}]   ;;  %s16153_s2 = inlined_call_operand.hbm [shape: bf16[128,128], index: 2, kind: input, shape index: {}]   ;;  %s16154_s3 = inlined_call_operand.hbm [shape: bf16[128,128], index: 3, kind: input, shape index: {}]   ;;  %s16155_s4 = inlined_call_operand.vmem [shape: bf16[16,128], index: 4, kind: input, shape index: {}]   ;;  %s16156_s5 = inlined_call_operand.vmem [shape: bf16[128,256], index: 5, kind: input, shape index: {}]   ;;  %s16157_s6 = inlined_call_operand.hbm [shape: bf16[256,512], index: 6, kind: input, shape index: {}]   ;;  %s16158_s7 = inlined_call_operand.vmem [shape: f32[16,1024], index: 7, kind: input, shape index: {}]   ;;  %s16159_s8 = inlined_call_operand.hbm [shape: bf16[512,1024], index: 8, kind: input, shape index: {}]   ;;  %s16160_s9 = inlined_call_operand.hbm [shape: bf16[1024,128], index: 9, kind: input, shape index: {}]   ;;  %s16161_s10 = inlined_call_operand.vmem [shape: f32[128,128], index: 10, kind: output, shape index: {}]  }
   0x1   :  { %16 = vsyncpa [#allocation8], 0  ;;  %s38_s15 = sshll.u32 %s16154_s3, 4  ;;  %s10832_s16 = smov [#allocation7]   ;;  %s39_s15 = int_to_ptr.hbm [resolvable:$true] %s38_s15 }
   0x2   :  { %s40_s17 = sshll.u32 %s10832_s16, 4  ;;  %s25_s20 = sshll.u32 %s16153_s2, 4  ;;  %s41_s17 = int_to_ptr.vmem [resolvable:$true] %s40_s17  ;;  %s26_s20 = int_to_ptr.hbm [resolvable:$true] %s25_s20 }
   0x3   :  { %s10833_s21 = smov 64   ;;  %s10834_s22 = smov 4  }
   0x4   :  { %46 = dma.hbm_to_vmem [thread:$0]  %s39_s15, 1024, %s41_s17, [#allocation8], %s10833_s21, %s10833_s21, %s10834_s22  }
   0x5   :  { %s10835_s23 = smov [#allocation5]   ;;  %s55_s27 = sshll.u32 %s16157_s6, 4  ;;  %s56_s27 = int_to_ptr.hbm [resolvable:$true] %s55_s27 }
   0x6   :  { %s27_s24 = sshll.u32 %s10835_s23, 4  ;;  %s10836_s3 = smov [#allocation9]   ;;  %s28_s24 = int_to_ptr.vmem [resolvable:$true] %s27_s24 }
   0x7   :  { %33 = dma.hbm_to_vmem [thread:$0]  %s26_s20, 1024, %s28_s24, [#allocation6], %s10833_s21, %s10833_s21, %s10834_s22  }
   0x8   :  { %s57_s28 = sshll.u32 %s10836_s3, 4  ;;  %s10837_s29 = smov 256   ;;  %s58_s28 = int_to_ptr.vmem [resolvable:$true] %s57_s28 }
   0x9   :  { %s10838_s30 = smov 16  }
   0xa   :  { %63 = dma.hbm_to_vmem [thread:$0]  %s56_s27, 8192, %s58_s28, [#allocation8], %s10837_s29, %s10837_s29, %s10838_s30  }
   0xb   :  { %10824 = dma.done.wait [#allocation6], 1024  }
   0xc   :  { %10825 = vsyncadd [#allocation6], 4294966272 }
   0xd   :  { %10826 = dma.done.wait [#allocation8], 9216  }
   0xe   :  { %10827 = vsyncadd [#allocation8], 4294958080  ;;  %v10839_v0 = vmov 0   ;;  %v108_v1 = vld [vmem:[%s16151_s0 + $0x10] sm:$0xff]  ;;  %v106_v2 = vld [vmem:[%s16151_s0] sm:$0xff]  ;;  %v122_v29 = vlaneseq  ;;  %s86_s26 = sshll.u32 %s16159_s8, 4  ;;  %s87_s26 = int_to_ptr.hbm [resolvable:$true] %s86_s26 }
   0xf   :  { %10639 = vset.pattern.permute.xlu1 %v10839_v0  ;;  %10638 = vset.pattern.permute.xlu0 %v10839_v0  ;;  %v110_v3 = vld [vmem:[%s16151_s0 + $0x20] sm:$0xff]  ;;  %v109_v4 = vld [vmem:[%s16151_s0 + $0x18] sm:$0xff]  ;;  %v107_v5 = vld [vmem:[%s16151_s0 + $0x8] sm:$0xff]  ;;  %v10840_v34 = vmov 1.0|1.0   ;;  %s10842_s27 = smov [#allocation2]  }
  0x10   :  { %10640 = vset.pattern.permute.xlu2 %v10839_v0  ;;  %131 = vperm.xlu1 %10639, %v108_v1   ;;  %v111_v6 = vld [vmem:[%s16151_s0 + $0x28] sm:$0xff]  ;;  %v10206_v7 = vld [vmem:[#allocation5 + $0x38] sm:$0xff]  ;;  %v10205_v8 = vld [vmem:[#allocation5 + $0x30] sm:$0xff]  ;;  %v123_v30 = vand.u32 127, %v122_v29  ;;  %s88_s3 = sshll.u32 %s10842_s27, 4  ;;  %s10843_s30 = smov [#allocation3]   ;;  %s89_s3 = int_to_ptr.vmem [resolvable:$true] %s88_s3 }
  0x11   :  { %125 = vperm.xlu0 %10638, %v106_v2   ;;  %137 = vperm.xlu2 %10640, %v110_v3   ;;  %v113_v9 = vld [vmem:[%s16151_s0 + $0x38] sm:$0xff]  ;;  %v112_v10 = vld [vmem:[%s16151_s0 + $0x30] sm:$0xff]  ;;  %v10204_v11 = vld [vmem:[#allocation5 + $0x28] sm:$0xff]  ;;  %91 = dma.hbm_to_vmem [thread:$0]  %s87_s26, 32768, %s89_s3, [#allocation4] }
  0x12   :  { %292 = vmatpush.bf16.msra.mxu0 %v10206_v7  ;;  %10616 = vmatpush.bf16.msra.mxu2 %v10206_v7  ;;  %v114_v12 = vld [vmem:[%s16151_s0 + $0x40] sm:$0xff]  ;;  %v116_v14 = vld [vmem:[%s16151_s0 + $0x50] sm:$0xff]  ;;  %v115_v15 = vld [vmem:[%s16151_s0 + $0x48] sm:$0xff]  ;;  %s102_s2 = sshll.u32 %s10843_s30, 4  ;;  %s103_s2 = int_to_ptr.vmem [resolvable:$true] %s102_s2 }
  0x13   :  { %v10203_v13 = vld [vmem:[#allocation5 + $0x20] sm:$0xff]  ;;  %v10202_v16 = vld [vmem:[#allocation5 + $0x18] sm:$0xff]  ;;  %v10201_v18 = vld [vmem:[#allocation5 + $0x10] sm:$0xff] }
  0x14   :  { %v117_v17 = vld [vmem:[%s16151_s0 + $0x58] sm:$0xff]  ;;  %v119_v19 = vld [vmem:[%s16151_s0 + $0x68] sm:$0xff]  ;;  %v118_v20 = vld [vmem:[%s16151_s0 + $0x60] sm:$0xff] }
  0x15   :  { %v120_v21 = vld [vmem:[%s16151_s0 + $0x70] sm:$0xff]  ;;  %v121_v22 = vld [vmem:[%s16151_s0 + $0x78] sm:$0xff]  ;;  %v10200_v23 = vld [vmem:[#allocation5 + $0x8] sm:$0xff] }
  0x16   :  { %293 = vmatpush.bf16.msra.mxu0 %v10205_v8  ;;  %10617 = vmatpush.bf16.msra.mxu2 %v10205_v8  ;;  %v10199_v24 = vld [vmem:[#allocation5] sm:$0xff]  ;;  %v10214_v46 = vld [vmem:[#allocation7 + $0x38] sm:$0xff]  ;;  %v10213_v47 = vld [vmem:[#allocation7 + $0x30] sm:$0xff] }
  0x17   :  { %v10215_v37 = vld [vmem:[%s16155_s4] sm:$0xff]  ;;  %v10212_v48 = vld [vmem:[#allocation7 + $0x28] sm:$0xff]  ;;  %v10210_v50 = vld [vmem:[#allocation7 + $0x18] sm:$0xff] }
  0x18   :  { %134 = vperm.xlu1 %10639, %v109_v4   ;;  %10624 = vmatpush.bf16.msra.mxu1 %v10215_v37  ;;  %v10211_v49 = vld [vmem:[#allocation7 + $0x20] sm:$0xff]  ;;  %v10209_v51 = vld [vmem:[#allocation7 + $0x10] sm:$0xff]  ;;  %v10208_v52 = vld [vmem:[#allocation7 + $0x8] sm:$0xff] }
  0x19   :  { %128 = vperm.xlu0 %10638, %v107_v5   ;;  %140 = vperm.xlu2 %10640, %v111_v6   ;;  %v10207_v53 = vld [vmem:[#allocation7] sm:$0xff]  ;;  %v366_v55 = vld [vmem:[%s16152_s1 + $0x8] sm:$0xff]  ;;  %v367_v57 = vld [vmem:[%s16152_s1 + $0x10] sm:$0xff] }
  0x1a   :  { %294 = vmatpush.bf16.msra.mxu0 %v10204_v11  ;;  %10618 = vmatpush.bf16.msra.mxu2 %v10204_v11  ;;  %v365_v54 = vld [vmem:[%s16152_s1] sm:$0xff]  ;;  %v368_v58 = vld [vmem:[%s16152_s1 + $0x18] sm:$0xff]  ;;  %v370_v62 = vld [vmem:[%s16152_s1 + $0x28] sm:$0xff] }
  0x1b   :  { %10625 = vmatpush.bf16.msra.mxu3 %v10215_v37  ;;  %v383_v56 = vpack.c.bf16 %v366_v55, %v365_v54  ;;  %v384_v59 = vpack.c.bf16 %v368_v58, %v367_v57  ;;  %v369_v61 = vld [vmem:[%s16152_s1 + $0x20] sm:$0xff]  ;;  %v371_v3 = vld [vmem:[%s16152_s1 + $0x30] sm:$0xff]  ;;  %v372_v4 = vld [vmem:[%s16152_s1 + $0x38] sm:$0xff] }
  0x1c   :  { %v385_v63 = vpack.c.bf16 %v370_v62, %v369_v61  ;;  %v386_v5 = vpack.c.bf16 %v372_v4, %v371_v3  ;;  %v10228_v41 = vld [vmem:[%s16156_s5 + $0x64] sm:$0xf]  ;;  %v8622_v55 = vld [vmem:[%s16156_s5 + $0x48] sm:$0xf0]  ;;  %v10223_v61 = vld [vmem:[%s16156_s5 + $0x34] sm:$0xf0] }
  0x1d   :  { %v10224_v54 = vld [vmem:[%s16156_s5 + $0x44] sm:$0xf]  ;;  %v10222_v62 = vld [vmem:[%s16156_s5 + $0x34] sm:$0xf]  ;;  %v10221_v3 = vld [vmem:[%s16156_s5 + $0x24] sm:$0xf0] }
  0x1e   :  { %295 = vmatpush.bf16.msra.mxu0 %v10203_v13  ;;  %10619 = vmatpush.bf16.msra.mxu2 %v10203_v13  ;;  %v8625_v57 = vor.u32 %v10224_v54, %v8622_v55  ;;  %v10220_v4 = vld [vmem:[%s16156_s5 + $0x24] sm:$0xf] }
  0x20   :  { %146 = vperm.xlu1 %10639, %v113_v9   ;;  %v373_v9 = vld [vmem:[%s16152_s1 + $0x40] sm:$0xff] }
  0x21   :  { %143 = vperm.xlu0 %10638, %v112_v10   ;;  %149 = vperm.xlu2 %10640, %v114_v12   ;;  %v374_v10 = vld [vmem:[%s16152_s1 + $0x48] sm:$0xff] }
  0x22   :  { %296 = vmatpush.bf16.msra.mxu0 %v10202_v16  ;;  %10620 = vmatpush.bf16.msra.mxu2 %v10202_v16  ;;  %v387_v11 = vpack.c.bf16 %v374_v10, %v373_v9  ;;  %v376_v16 = vld [vmem:[%s16152_s1 + $0x58] sm:$0xff]  ;;  %v8596_v9 = vld [vmem:[%s16156_s5 + $0x10] sm:$0xf] }
  0x23   :  { %v10219_v10 = vld [vmem:[%s16156_s5 + $0x14] sm:$0xf0] }
  0x26   :  { %297 = vmatpush.bf16.msra.mxu0 %v10201_v18  ;;  %10621 = vmatpush.bf16.msra.mxu2 %v10201_v18 }
  0x28   :  { %155 = vperm.xlu1 %10639, %v116_v14  }
  0x29   :  { %152 = vperm.xlu0 %10638, %v115_v15   ;;  %158 = vperm.xlu2 %10640, %v117_v17   ;;  %v375_v15 = vld [vmem:[%s16152_s1 + $0x50] sm:$0xff] }
  0x2a   :  { %298 = vmatpush.bf16.msra.mxu0 %v10200_v23  ;;  %10622 = vmatpush.bf16.msra.mxu2 %v10200_v23  ;;  %v388_v17 = vpack.c.bf16 %v376_v16, %v375_v15  ;;  %v8588_v16 = vld [vmem:[%s16156_s5] sm:$0xf] }
  0x2e   :  { %299 = vmatpush.bf16.msra.mxu0 %v10199_v24  ;;  %10623 = vmatpush.bf16.msra.mxu2 %v10199_v24 }
  0x30   :  { %164 = vperm.xlu1 %10639, %v119_v19  }
  0x31   :  { %161 = vperm.xlu0 %10638, %v118_v20   ;;  %167 = vperm.xlu2 %10640, %v120_v21   ;;  %v377_v20 = vld [vmem:[%s16152_s1 + $0x60] sm:$0xff]  ;;  %v378_v21 = vld [vmem:[%s16152_s1 + $0x68] sm:$0xff] }
  0x32   :  { %429 = vmatpush.bf16.msrb.mxu0 %v10215_v37  ;;  %519 = vmatpush.bf16.msrb.mxu2 %v10214_v46  ;;  %v8646_v37 = vld [vmem:[%s16156_s5 + $0x78] sm:$0xf0]  ;;  %v10227_v46 = vld [vmem:[%s16156_s5 + $0x54] sm:$0xf0] }
  0x36   :  { %520 = vmatpush.bf16.msrb.mxu2 %v10213_v47  ;;  %v10226_v47 = vld [vmem:[%s16156_s5 + $0x54] sm:$0xf] }
  0x39   :  { %170 = vperm.xlu0 %10638, %v121_v22   ;;  %v389_v22 = vpack.c.bf16 %v378_v21, %v377_v20  ;;  %v8590_v20 = vld [vmem:[%s16156_s5 + $0x8] sm:$0xf0] }
  0x3a   :  { %521 = vmatpush.bf16.msrb.mxu2 %v10212_v48  ;;  %v8630_v48 = vld [vmem:[%s16156_s5 + $0x58] sm:$0xf0] }
  0x3e   :  { %522 = vmatpush.bf16.msrb.mxu2 %v10211_v49 }
  0x42   :  { %523 = vmatpush.bf16.msrb.mxu2 %v10210_v50 }
  0x46   :  { %524 = vmatpush.bf16.msrb.mxu2 %v10209_v51  ;;  %v8633_v51 = vor.u32 %v10226_v47, %v8630_v48 }
  0x4a   :  { %525 = vmatpush.bf16.msrb.mxu2 %v10208_v52  ;;  %v8620_v52 = vld [vmem:[%s16156_s5 + $0x40] sm:$0xf] }
  0x4e   :  { %526 = vmatpush.bf16.msrb.mxu2 %v10207_v53  ;;  %v10225_v53 = vld [vmem:[%s16156_s5 + $0x44] sm:$0xf0] }
  0x6b   :  { %v138_v25 = vpop.permute.xlu2 %137 }
  0x6c   :  { %vm176_vm12 = vcmp.eq.s32.totalorder %v123_v30, %v138_v25 }
  0x73   :  { %v141_v26 = vpop.permute.xlu2 %140 }
  0x74   :  { %vm177_vm13 = vcmp.eq.s32.totalorder %v123_v30, %v141_v26  ;;  %v379_v26 = vld [vmem:[%s16152_s1 + $0x70] sm:$0xff] }
  0x75   :  { %vm8529_vm14 = vmpackc.low %vm177_vm13, %vm176_vm12 }
  0x7b   :  { %v150_v33 = vpop.permute.xlu2 %149 }
  0x82   :  { %v132_v27 = vpop.permute.xlu1 %131 }
  0x83   :  { %v126_v28 = vpop.permute.xlu0 %125  ;;  %v159_v38 = vpop.permute.xlu2 %158  ;;  %vm174_vm4 = vcmp.eq.s32.totalorder %v123_v30, %v132_v27  ;;  %v380_v27 = vld [vmem:[%s16152_s1 + $0x78] sm:$0xff]  ;;  %s100_s1 = sshll.u32 %s16160_s9, 4  ;;  %s101_s1 = int_to_ptr.hbm [resolvable:$true] %s100_s1 }
  0x84   :  { %vm172_vm1 = vcmp.eq.s32.totalorder %v123_v30, %v126_v28  ;;  %vm183_vm3 = vcmp.eq.s32.totalorder %v123_v30, %v159_v38  ;;  %v390_v28 = vpack.c.bf16 %v380_v27, %v379_v26  ;;  %v8636_v38 = vld [vmem:[%s16156_s5 + $0x60] sm:$0xf]  ;;  %105 = dma.hbm_to_vmem [thread:$0]  %s101_s1, 8192, %s103_s2, [#allocation4 + $0x1] }
  0x85   :  { %v11120_v26 = vld [vmem:[%s16158_s7] ss:$0 sm:$0xff] }
  0x8a   :  { %v135_v31 = vpop.permute.xlu1 %134 }
  0x8b   :  { %v129_v32 = vpop.permute.xlu0 %128  ;;  %vm175_vm5 = vcmp.eq.s32.totalorder %v123_v30, %v135_v31  ;;  %v168_v45 = vpop.permute.xlu2 %167 }
  0x8c   :  { %vm173_vm0 = vcmp.eq.s32.totalorder %v123_v30, %v129_v32  ;;  %vm8527_vm8 = vmpackc.low %vm175_vm5, %vm174_vm4  ;;  %vm180_vm5 = vcmp.eq.s32.totalorder %v123_v30, %v150_v33  ;;  %v8644_v33 = vld [vmem:[%s16156_s5 + $0x70] sm:$0xf] }
  0x8d   :  { %vm8525_vm2 = vmpackc.low %vm173_vm0, %vm172_vm1  ;;  %vm186_vm0 = vcmp.eq.s32.totalorder %v123_v30, %v168_v45  ;;  %v8628_v45 = vld [vmem:[%s16156_s5 + $0x50] sm:$0xf] }
  0x8e   :  { %8526 = vmatmul.msk.bf16.vlgmr.msra.gmra.mxu0 %vm8525_vm2, %v10840_v34  ;;  %v8629_v50 = vor.u32 %v10227_v46, %v8628_v45 }
  0x92   :  { %v147_v35 = vpop.permute.xlu1 %146 }
  0x93   :  { %v144_v36 = vpop.permute.xlu0 %143  ;;  %vm179_vm2 = vcmp.eq.s32.totalorder %v123_v30, %v147_v35  ;;  %v10230_v35 = vld [vmem:[%s16156_s5 + $0x74] sm:$0xf] }
  0x9a   :  { %v156_v39 = vpop.permute.xlu1 %155 }
  0x9b   :  { %v153_v40 = vpop.permute.xlu0 %152  ;;  %vm182_vm6 = vcmp.eq.s32.totalorder %v123_v30, %v156_v39  ;;  %v10229_v39 = vld [vmem:[%s16156_s5 + $0x64] sm:$0xf0] }
  0x9c   :  { %vm10959_vm7 = vmpackc.low %vm183_vm3, %vm182_vm6  ;;  %vm178_vm3 = vcmp.eq.s32.totalorder %v123_v30, %v144_v36  ;;  %vm181_vm6 = vcmp.eq.s32.totalorder %v123_v30, %v153_v40  ;;  %v8649_v40 = vor.u32 %v10230_v35, %v8646_v37 }
  0x9d   :  { %vm8531_vm4 = vmpackc.low %vm179_vm2, %vm178_vm3 }
  0x9e   :  { %8528 = vmatmul.msk.bf16.gmra.mxu0 %vm8527_vm8, %v10840_v34  ;;  %vm8533_vm8 = vmpackc.low %vm181_vm6, %vm180_vm5  ;;  %793 = vmatpush.bf16.msrb.mxu1 %v8649_v40 }
  0xa2   :  { %v165_v42 = vpop.permute.xlu1 %164 }
  0xa3   :  { %v162_v43 = vpop.permute.xlu0 %161  ;;  %vm185_vm9 = vcmp.eq.s32.totalorder %v123_v30, %v165_v42  ;;  %v8638_v42 = vld [vmem:[%s16156_s5 + $0x68] sm:$0xf0] }
  0xa4   :  { %vm184_vm10 = vcmp.eq.s32.totalorder %v123_v30, %v162_v43  ;;  %v8637_v43 = vor.u32 %v10229_v39, %v8636_v38 }
  0xa5   :  { %vm8537_vm11 = vmpackc.low %vm185_vm9, %vm184_vm10  ;;  %vm397_vm9 = vcmask 130048  }
  0xa6   :  { %8538 = vmatmul.msk.bf16.vlgmr.msra.gmra.mxu2 %vm8537_vm11, %v10840_v34  ;;  %8549 = vmatmul.msk.bf16.vlgmr.msra.gmra.mxu1 %vm397_vm9, %v387_v11  ;;  %v10218_v11 = vld [vmem:[%s16156_s5 + $0x14] sm:$0xf] }
  0xa7   :  { %8551 = vmatmul.msk.bf16.vlgmr.msra.gmra.mxu3 %vm397_vm9, %v389_v22 }
  0xab   :  { %v171_v44 = vpop.permute.xlu0 %170 }
  0xac   :  { %vm187_vm15 = vcmp.eq.s32.totalorder %v123_v30, %v171_v44  ;;  %v8641_v44 = vor.u32 %v10228_v41, %v8638_v42 }
  0xad   :  { %vm8539_vm1 = vmpackc.low %vm187_vm15, %vm186_vm0 }
  0xae   :  { %8530 = vmatmul.msk.bf16.gmra.mxu0 %vm8529_vm14, %v10840_v34  ;;  %794 = vmatpush.bf16.msrb.mxu1 %v8641_v44 }
  0xb2   :  { %795 = vmatpush.bf16.msrb.mxu1 %v8633_v51 }
  0xb6   :  { %8540 = vmatmul.msk.bf16.gmra.mxu2 %vm8539_vm1, %v10840_v34  ;;  %8550 = vmatmul.msk.bf16.gmra.mxu1 %vm397_vm9, %v388_v17  ;;  %v10217_v17 = vld [vmem:[%s16156_s5 + $0x4] sm:$0xf0] }
  0xb7   :  { %8552 = vmatmul.msk.bf16.gmra.mxu3 %vm397_vm9, %v390_v28  ;;  %796 = vmatpush.bf16.msrb.mxu1 %v8625_v57 }
  0xbe   :  { %8532 = vmatmul.msk.bf16.gmra.mxu0 %vm8531_vm4, %v10840_v34 }
  0xce   :  { %8534 = vmatmul.msk.bf16.gmra.mxu0 %vm8533_vm8, %v10840_v34 }
  0xde   :  { %8536 = vmatmul.msk.bf16.gmra.mxu0 %vm10959_vm7, %v10840_v34  ;;  %v10231_v34 = vld [vmem:[%s16156_s5 + $0x74] sm:$0xf0] }
  0xdf   :  { %v8645_v36 = vor.u32 %v10231_v34, %v8644_v33 }
  0xe1   :  { %744 = vmatpush.bf16.msrb.mxu3 %v8645_v36 }
  0xe5   :  { %745 = vmatpush.bf16.msrb.mxu3 %v8637_v43 }
  0xe9   :  { %746 = vmatpush.bf16.msrb.mxu3 %v8629_v50 }
  0xee   :  { %8545 = vmatmul.msk.bf16.vlgmr.msrb.gmra.mxu0 %vm397_vm9, %v383_v56  ;;  %v8621_v56 = vor.u32 %v10225_v53, %v8620_v52 }
  0xf0   :  { %747 = vmatpush.bf16.msrb.mxu3 %v8621_v56 }
  0xfe   :  { %8546 = vmatmul.msk.bf16.gmra.mxu0 %vm397_vm9, %v384_v59 }
 0x10b   :  { %v301_v60 = vpop.f32.mrf.mxu0 }
 0x10e   :  { %8547 = vmatmul.msk.bf16.gmra.mxu0 %vm397_vm9, %v385_v63 }
 0x113   :  { %v303_v0 = vpop.f32.mrf.mxu0 }
 0x114   :  { %v357_v1 = vpack.c.bf16 %v303_v0, %v301_v60  ;;  %v8612_v60 = vld [vmem:[%s16156_s5 + $0x30] sm:$0xf]  ;;  %v8614_v0 = vld [vmem:[%s16156_s5 + $0x38] sm:$0xf0] }
 0x115   :  { %v8613_v63 = vor.u32 %v10223_v61, %v8612_v60 }
 0x116   :  { %527 = vmatmul.bf16.vlgmr.msrb.gmra.mxu2 %v357_v1  ;;  %v8617_v1 = vor.u32 %v10222_v62, %v8614_v0 }
 0x117   :  { %748 = vmatpush.bf16.msrb.mxu3 %v8613_v63 }
 0x118   :  { %797 = vmatpush.bf16.msrb.mxu1 %v8617_v1 }
 0x11b   :  { %v306_v2 = vpop.f32.mrf.mxu0 }
 0x11e   :  { %8548 = vmatmul.msk.bf16.gmra.mxu0 %vm397_vm9, %v386_v5 }
 0x123   :  { %v308_v6 = vpop.f32.mrf.mxu0 }
 0x124   :  { %v358_v7 = vpack.c.bf16 %v308_v6, %v306_v2  ;;  %v8604_v2 = vld [vmem:[%s16156_s5 + $0x20] sm:$0xf]  ;;  %v8606_v6 = vld [vmem:[%s16156_s5 + $0x28] sm:$0xf0] }
 0x125   :  { %v8605_v5 = vor.u32 %v10221_v3, %v8604_v2 }
 0x126   :  { %532 = vmatmul.bf16.gmra.mxu2 %v358_v7  ;;  %v8609_v7 = vor.u32 %v10220_v4, %v8606_v6 }
 0x127   :  { %749 = vmatpush.bf16.msrb.mxu3 %v8605_v5  ;;  %v451_v5 = vpop.f32.mrf.mxu1 }
 0x128   :  { %798 = vmatpush.bf16.msrb.mxu1 %v8609_v7 }
 0x129   :  { %v331_v30 = vpop.f32.mrf.mxu2 }
 0x12b   :  { %v311_v8 = vpop.f32.mrf.mxu0 }
 0x131   :  { %v333_v49 = vpop.f32.mrf.mxu2 }
 0x132   :  { %v363_v58 = vpack.c.bf16 %v333_v49, %v331_v30 }
 0x133   :  { %v313_v12 = vpop.f32.mrf.mxu0 }
 0x134   :  { %v359_v13 = vpack.c.bf16 %v313_v12, %v311_v8  ;;  %v8597_v12 = vor.u32 %v10219_v10, %v8596_v9 }
 0x136   :  { %537 = vmatmul.bf16.gmra.mxu2 %v359_v13  ;;  %v8598_v13 = vld [vmem:[%s16156_s5 + $0x18] sm:$0xf0]  ;;  %750 = vmatpush.bf16.msrb.mxu3 %v8597_v12 }
 0x139   :  { %v336_v59 = vpop.f32.mrf.mxu2 }
 0x13b   :  { %v316_v14 = vpop.f32.mrf.mxu0 }
 0x141   :  { %v338_v8 = vpop.f32.mrf.mxu2 }
 0x142   :  { %v364_v15 = vpack.c.bf16 %v338_v8, %v336_v59 }
 0x143   :  { %v318_v18 = vpop.f32.mrf.mxu0 }
 0x144   :  { %v360_v19 = vpack.c.bf16 %v318_v18, %v316_v14  ;;  %v8601_v14 = vor.u32 %v10218_v11, %v8598_v13  ;;  %v10216_v18 = vld [vmem:[%s16156_s5 + $0x4] sm:$0xf] }
 0x145   :  { %v8593_v21 = vor.u32 %v10216_v18, %v8590_v20 }
 0x146   :  { %542 = vmatmul.bf16.gmra.mxu2 %v360_v19  ;;  %799 = vmatpush.bf16.msrb.mxu1 %v8601_v14  ;;  %v8589_v19 = vor.u32 %v10217_v17, %v8588_v16  ;;  %v453_v14 = vpop.f32.mrf.mxu1 }
 0x148   :  { %751 = vmatpush.bf16.msrb.mxu3 %v8589_v19 }
 0x14a   :  { %800 = vmatpush.bf16.msrb.mxu1 %v8593_v21 }
 0x14b   :  { %v321_v23 = vpop.f32.mrf.mxu0 }
 0x14e   :  { %v456_v21 = vpop.f32.mrf.mxu1 }
 0x153   :  { %v323_v24 = vpop.f32.mrf.mxu0 }
 0x154   :  { %v361_v25 = vpack.c.bf16 %v323_v24, %v321_v23 }
 0x156   :  { %547 = vmatmul.bf16.gmra.mxu2 %v361_v25 }
 0x15b   :  { %v326_v29 = vpop.f32.mrf.mxu0 }
 0x163   :  { %v328_v31 = vpop.f32.mrf.mxu0 }
 0x164   :  { %v362_v32 = vpack.c.bf16 %v328_v31, %v326_v29 }
 0x166   :  { %552 = vmatmul.bf16.gmra.mxu2 %v362_v32 }
 0x16b   :  { %v431_v22 = vpop.f32.mrf.mxu0 }
 0x173   :  { %v433_v23 = vpop.f32.mrf.mxu0 }
 0x176   :  { %557 = vmatmul.bf16.gmra.mxu2 %v363_v58 }
 0x17b   :  { %v436_v27 = vpop.f32.mrf.mxu0 }
 0x183   :  { %v438_v36 = vpop.f32.mrf.mxu0 }
 0x186   :  { %562 = vmatmul.bf16.gmra.mxu2 %v364_v15 }
 0x18b   :  { %v441_v43 = vpop.f32.mrf.mxu0 }
 0x193   :  { %v443_v52 = vpop.f32.mrf.mxu0 }
 0x199   :  { %v528_v24 = vpop.f32.mrf.mxu2 }
 0x19a   :  { %v529_v25 = vadd.f32 %v528_v24, %v431_v22 }
 0x19b   :  { %v446_v59 = vpop.f32.mrf.mxu0 }
 0x19c   :  { %v569_v28 = vadd.f32 %v11120_v26, %v529_v25 }
 0x19e   :  { %v601_v31 = vmul.f32 0.2, %v569_v28  ;;  %vm585_vm7 = vcmp.gt.f32.partialorder %v569_v28, 0.0 }
 0x1a0   :  { %v617_v34 = vsel %vm585_vm7, %v569_v28, %v601_v31 }
 0x1a1   :  { %v530_v29 = vpop.f32.mrf.mxu2 }
 0x1a2   :  { %v531_v30 = vadd.f32 %v530_v29, %v433_v23  ;;  %v458_v29 = vpop.f32.mrf.mxu1 }
 0x1a3   :  { %v448_v2 = vpop.f32.mrf.mxu0 }
 0x1a4   :  { %v570_v32 = vadd.f32 %v11120_v26, %v531_v30 }
 0x1a6   :  { %v602_v33 = vmul.f32 0.2, %v570_v32  ;;  %vm586_vm10 = vcmp.gt.f32.partialorder %v570_v32, 0.0 }
 0x1a8   :  { %v618_v35 = vsel %vm586_vm10, %v570_v32, %v602_v33  ;;  %v461_v32 = vpop.f32.mrf.mxu3 }
 0x1a9   :  { %v533_v37 = vpop.f32.mrf.mxu2  ;;  %v649_v38 = vpack.c.bf16 %v618_v35, %v617_v34 }
 0x1aa   :  { %v534_v39 = vadd.f32 %v533_v37, %v436_v27 }
 0x1ab   :  { %752 = vmatmul.bf16.vlgmr.msrb.gmra.mxu3 %v649_v38  ;;  %801 = vmatmul.bf16.vlgmr.msrb.gmra.mxu1 %v649_v38 }
 0x1ac   :  { %v571_v40 = vadd.f32 %v11120_v26, %v534_v39 }
 0x1ae   :  { %v603_v45 = vmul.f32 0.2, %v571_v40  ;;  %vm587_vm11 = vcmp.gt.f32.partialorder %v571_v40, 0.0 }
 0x1b0   :  { %v619_v47 = vsel %vm587_vm11, %v571_v40, %v603_v45 }
 0x1b1   :  { %v535_v41 = vpop.f32.mrf.mxu2 }
 0x1b2   :  { %v536_v42 = vadd.f32 %v535_v41, %v438_v36  ;;  %v463_v41 = vpop.f32.mrf.mxu3 }
 0x1b4   :  { %v572_v44 = vadd.f32 %v11120_v26, %v536_v42 }
 0x1b6   :  { %vm588_vm12 = vcmp.gt.f32.partialorder %v572_v44, 0.0  ;;  %v604_v46 = vmul.f32 0.2, %v572_v44 }
 0x1b8   :  { %v620_v48 = vsel %vm588_vm12, %v572_v44, %v604_v46 }
 0x1b9   :  { %v538_v49 = vpop.f32.mrf.mxu2  ;;  %v650_v50 = vpack.c.bf16 %v620_v48, %v619_v47 }
 0x1ba   :  { %v539_v51 = vadd.f32 %v538_v49, %v441_v43  ;;  %v466_v48 = vpop.f32.mrf.mxu3 }
 0x1bb   :  { %757 = vmatmul.bf16.gmra.mxu3 %v650_v50  ;;  %806 = vmatmul.bf16.gmra.mxu1 %v650_v50 }
 0x1bc   :  { %v573_v53 = vadd.f32 %v11120_v26, %v539_v51 }
 0x1be   :  { %v605_v57 = vmul.f32 0.2, %v573_v53  ;;  %vm589_vm13 = vcmp.gt.f32.partialorder %v573_v53, 0.0 }
 0x1c0   :  { %v621_v60 = vsel %vm589_vm13, %v573_v53, %v605_v57 }
 0x1c1   :  { %v540_v54 = vpop.f32.mrf.mxu2 }
 0x1c2   :  { %v541_v55 = vadd.f32 %v540_v54, %v443_v52 }
 0x1c4   :  { %v574_v56 = vadd.f32 %v11120_v26, %v541_v55  ;;  %v468_v55 = vpop.f32.mrf.mxu3 }
 0x1c6   :  { %vm590_vm14 = vcmp.gt.f32.partialorder %v574_v56, 0.0  ;;  %v606_v58 = vmul.f32 0.2, %v574_v56 }
 0x1c8   :  { %v622_v61 = vsel %vm590_vm14, %v574_v56, %v606_v58 }
 0x1c9   :  { %v543_v62 = vpop.f32.mrf.mxu2  ;;  %v651_v63 = vpack.c.bf16 %v622_v61, %v621_v60 }
 0x1ca   :  { %v544_v0 = vadd.f32 %v543_v62, %v446_v59 }
 0x1cb   :  { %762 = vmatmul.bf16.gmra.mxu3 %v651_v63  ;;  %811 = vmatmul.bf16.gmra.mxu1 %v651_v63 }
 0x1cc   :  { %v575_v1 = vadd.f32 %v11120_v26, %v544_v0 }
 0x1ce   :  { %v607_v7 = vmul.f32 0.2, %v575_v1  ;;  %vm591_vm15 = vcmp.gt.f32.partialorder %v575_v1, 0.0 }
 0x1d0   :  { %v623_v9 = vsel %vm591_vm15, %v575_v1, %v607_v7 }
 0x1d1   :  { %v545_v3 = vpop.f32.mrf.mxu2 }
 0x1d2   :  { %v546_v4 = vadd.f32 %v545_v3, %v448_v2  ;;  %v8585_v2 = vld [vmem:[%s16158_s7 + $0x1] ss:$8 sm:$0x3] }
 0x1d4   :  { %v576_v6 = vadd.f32 %v11120_v26, %v546_v4  ;;  %v11141_v4 = vperm.slane %v8585_v2, 1 }
 0x1d6   :  { %vm592_vm0 = vcmp.gt.f32.partialorder %v576_v6, 0.0  ;;  %v608_v8 = vmul.f32 0.2, %v576_v6 }
 0x1d8   :  { %v624_v10 = vsel %vm592_vm0, %v576_v6, %v608_v8  ;;  %v11149_v8 = vperm.slane %v8585_v2, 0 }
 0x1d9   :  { %v548_v11 = vpop.f32.mrf.mxu2  ;;  %v652_v12 = vpack.c.bf16 %v624_v10, %v623_v9 }
 0x1da   :  { %v549_v13 = vadd.f32 %v548_v11, %v451_v5 }
 0x1db   :  { %767 = vmatmul.bf16.gmra.mxu3 %v652_v12  ;;  %816 = vmatmul.bf16.gmra.mxu1 %v652_v12 }
 0x1dc   :  { %v577_v15 = vadd.f32 %v11120_v26, %v549_v13 }
 0x1de   :  { %v609_v19 = vmul.f32 0.2, %v577_v15  ;;  %vm593_vm1 = vcmp.gt.f32.partialorder %v577_v15, 0.0 }
 0x1e0   :  { %v625_v22 = vsel %vm593_vm1, %v577_v15, %v609_v19 }
 0x1e1   :  { %v550_v16 = vpop.f32.mrf.mxu2 }
 0x1e2   :  { %v551_v17 = vadd.f32 %v550_v16, %v453_v14 }
 0x1e4   :  { %v578_v18 = vadd.f32 %v11120_v26, %v551_v17 }
 0x1e6   :  { %vm594_vm2 = vcmp.gt.f32.partialorder %v578_v18, 0.0  ;;  %v610_v20 = vmul.f32 0.2, %v578_v18 }
 0x1e8   :  { %v626_v23 = vsel %vm594_vm2, %v578_v18, %v610_v20 }
 0x1e9   :  { %v553_v24 = vpop.f32.mrf.mxu2  ;;  %v653_v25 = vpack.c.bf16 %v626_v23, %v625_v22 }
 0x1ea   :  { %v554_v27 = vadd.f32 %v553_v24, %v456_v21 }
 0x1eb   :  { %772 = vmatmul.bf16.gmra.mxu3 %v653_v25  ;;  %821 = vmatmul.bf16.gmra.mxu1 %v653_v25 }
 0x1ec   :  { %v579_v28 = vadd.f32 %v11120_v26, %v554_v27 }
 0x1ee   :  { %v611_v34 = vmul.f32 0.2, %v579_v28  ;;  %vm595_vm3 = vcmp.gt.f32.partialorder %v579_v28, 0.0 }
 0x1f0   :  { %v627_v36 = vsel %vm595_vm3, %v579_v28, %v611_v34 }
 0x1f1   :  { %v555_v30 = vpop.f32.mrf.mxu2 }
 0x1f2   :  { %v556_v31 = vadd.f32 %v555_v30, %v458_v29 }
 0x1f4   :  { %v580_v33 = vadd.f32 %v11120_v26, %v556_v31 }
 0x1f6   :  { %vm596_vm4 = vcmp.gt.f32.partialorder %v580_v33, 0.0  ;;  %v612_v35 = vmul.f32 0.2, %v580_v33 }
 0x1f8   :  { %v628_v37 = vsel %vm596_vm4, %v580_v33, %v612_v35 }
 0x1f9   :  { %v558_v38 = vpop.f32.mrf.mxu2  ;;  %v654_v39 = vpack.c.bf16 %v628_v37, %v627_v36 }
 0x1fa   :  { %v559_v40 = vadd.f32 %v558_v38, %v461_v32  ;;  %v10260_v38 = vld [vmem:[#allocation9 + $0xe4] sm:$0xf] }
 0x1fb   :  { %777 = vmatmul.bf16.gmra.mxu3 %v654_v39  ;;  %826 = vmatmul.bf16.gmra.mxu1 %v654_v39  ;;  %v8769_v39 = vld [vmem:[#allocation9 + $0xf0] sm:$0xf0] }
 0x1fc   :  { %v581_v42 = vadd.f32 %v11120_v26, %v559_v40  ;;  %v8772_v40 = vor.u32 %v10260_v38, %v8769_v39 }
 0x1fe   :  { %v613_v46 = vmul.f32 0.2, %v581_v42  ;;  %vm597_vm5 = vcmp.gt.f32.partialorder %v581_v42, 0.0  ;;  %1738 = vmatpush.bf16.msra.mxu3 %v8772_v40 }
 0x200   :  { %v629_v49 = vsel %vm597_vm5, %v581_v42, %v613_v46  ;;  %v10294_v42 = vld [vmem:[#allocation9 + $0x1ec] sm:$0xf0]  ;;  %v10292_v46 = vld [vmem:[#allocation9 + $0x1e4] sm:$0xf] }
 0x201   :  { %v560_v43 = vpop.f32.mrf.mxu2 }
 0x202   :  { %v561_v44 = vadd.f32 %v560_v43, %v463_v41  ;;  %v8895_v41 = vld [vmem:[#allocation9 + $0x1e0] sm:$0xf] }
 0x203   :  { %v8896_v43 = vor.u32 %v10294_v42, %v8895_v41 }
 0x204   :  { %v582_v45 = vadd.f32 %v11120_v26, %v561_v44 }
 0x205   :  { %1689 = vmatpush.bf16.msra.mxu2 %v8896_v43 }
 0x206   :  { %vm598_vm6 = vcmp.gt.f32.partialorder %v582_v45, 0.0  ;;  %v614_v47 = vmul.f32 0.2, %v582_v45 }
 0x208   :  { %v630_v50 = vsel %vm598_vm6, %v582_v45, %v614_v47  ;;  %v8897_v47 = vld [vmem:[#allocation9 + $0x1f0] sm:$0xf0] }
 0x209   :  { %v563_v51 = vpop.f32.mrf.mxu2  ;;  %v655_v52 = vpack.c.bf16 %v630_v50, %v629_v49 }
 0x20a   :  { %v564_v53 = vadd.f32 %v563_v51, %v466_v48  ;;  %v8900_v48 = vor.u32 %v10292_v46, %v8897_v47  ;;  %v10256_v51 = vld [vmem:[#allocation9 + $0xc4] sm:$0xf] }
 0x20b   :  { %782 = vmatmul.bf16.gmra.mxu3 %v655_v52  ;;  %831 = vmatmul.bf16.gmra.mxu1 %v655_v52  ;;  %v8753_v52 = vld [vmem:[#allocation9 + $0xd0] sm:$0xf0] }
 0x20c   :  { %v583_v54 = vadd.f32 %v11120_v26, %v564_v53  ;;  %1787 = vmatpush.bf16.msra.mxu1 %v8900_v48  ;;  %v8756_v53 = vor.u32 %v10256_v51, %v8753_v52 }
 0x20e   :  { %v615_v59 = vmul.f32 0.2, %v583_v54  ;;  %vm599_vm8 = vcmp.gt.f32.partialorder %v583_v54, 0.0  ;;  %1739 = vmatpush.bf16.msra.mxu3 %v8756_v53 }
 0x210   :  { %v631_v61 = vsel %vm599_vm8, %v583_v54, %v615_v59  ;;  %v8879_v54 = vld [vmem:[#allocation9 + $0x1c0] sm:$0xf]  ;;  %v10288_v59 = vld [vmem:[#allocation9 + $0x1c4] sm:$0xf] }
 0x211   :  { %v565_v56 = vpop.f32.mrf.mxu2 }
 0x212   :  { %v566_v57 = vadd.f32 %v565_v56, %v468_v55  ;;  %v10290_v55 = vld [vmem:[#allocation9 + $0x1cc] sm:$0xf0] }
 0x213   :  { %v8880_v56 = vor.u32 %v10290_v55, %v8879_v54 }
 0x214   :  { %v584_v58 = vadd.f32 %v11120_v26, %v566_v57 }
 0x215   :  { %1690 = vmatpush.bf16.msra.mxu2 %v8880_v56 }
 0x216   :  { %vm600_vm9 = vcmp.gt.f32.partialorder %v584_v58, 0.0  ;;  %v616_v60 = vmul.f32 0.2, %v584_v58 }
 0x218   :  { %v632_v62 = vsel %vm600_vm9, %v584_v58, %v616_v60  ;;  %v8881_v60 = vld [vmem:[#allocation9 + $0x1d0] sm:$0xf0] }
 0x219   :  { %v656_v63 = vpack.c.bf16 %v632_v62, %v631_v61  ;;  %v8884_v61 = vor.u32 %v10288_v59, %v8881_v60 }
 0x21b   :  { %787 = vmatmul.bf16.gmra.mxu3 %v656_v63  ;;  %836 = vmatmul.bf16.gmra.mxu1 %v656_v63 }
 0x21c   :  { %1788 = vmatpush.bf16.msra.mxu1 %v8884_v61 }
 0x228   :  { %v802_v0 = vpop.f32.mrf.mxu1 }
 0x229   :  { %v11147_v6 = vadd.f32 %v802_v0, %v11141_v4 }
 0x22e   :  { %v753_v1 = vpop.f32.mrf.mxu3 }
 0x22f   :  { %v11161_v13 = vadd.f32 %v753_v1, %v11149_v8 }
 0x230   :  { %v804_v3 = vpop.f32.mrf.mxu1 }
 0x231   :  { %v11144_v26 = vadd.f32 %v804_v3, %v11141_v4 }
 0x233   :  { %v867_v9 = vadd.f32 %v11144_v26, %v11147_v6 }
 0x236   :  { %v755_v5 = vpop.f32.mrf.mxu3 }
 0x237   :  { %v11157_v11 = vadd.f32 %v755_v5, %v11149_v8 }
 0x238   :  { %v807_v7 = vpop.f32.mrf.mxu1 }
 0x239   :  { %v11154_v10 = vadd.f32 %v807_v7, %v11141_v4  ;;  %v846_v15 = vadd.f32 %v11157_v11, %v11161_v13 }
 0x23b   :  { %v868_v12 = vadd.f32 %v867_v9, %v11154_v10 }
 0x23e   :  { %v758_v14 = vpop.f32.mrf.mxu3 }
 0x23f   :  { %v11166_v16 = vadd.f32 %v758_v14, %v11149_v8 }
 0x240   :  { %v809_v17 = vpop.f32.mrf.mxu1 }
 0x241   :  { %v847_v18 = vadd.f32 %v846_v15, %v11166_v16  ;;  %v11170_v19 = vadd.f32 %v809_v17, %v11141_v4 }
 0x243   :  { %v869_v22 = vadd.f32 %v868_v12, %v11170_v19 }
 0x246   :  { %v760_v20 = vpop.f32.mrf.mxu3 }
 0x247   :  { %v11177_v24 = vadd.f32 %v760_v20, %v11149_v8 }
 0x248   :  { %v812_v21 = vpop.f32.mrf.mxu1 }
 0x249   :  { %v11174_v23 = vadd.f32 %v812_v21, %v11141_v4  ;;  %v848_v28 = vadd.f32 %v847_v18, %v11177_v24 }
 0x24b   :  { %v870_v25 = vadd.f32 %v869_v22, %v11174_v23 }
 0x24e   :  { %v763_v27 = vpop.f32.mrf.mxu3 }
 0x24f   :  { %v11182_v29 = vadd.f32 %v763_v27, %v11149_v8  ;;  %v10841_v27 = vmov 128.0  }
 0x250   :  { %v814_v30 = vpop.f32.mrf.mxu1  ;;  %10641 = vrcp.f32 %v10841_v27 }
 0x251   :  { %v849_v31 = vadd.f32 %v848_v28, %v11182_v29  ;;  %v11186_v0 = vadd.f32 %v814_v30, %v11141_v4 }
 0x253   :  { %v871_v3 = vadd.f32 %v870_v25, %v11186_v0 }
 0x256   :  { %v765_v32 = vpop.f32.mrf.mxu3  ;;  %v10642_v39 = vpop.eup %10641 }
 0x257   :  { %v11196_v7 = vadd.f32 %v765_v32, %v11149_v8  ;;  %vm893_vm7 = vweird.f32 %v10642_v39 }
 0x258   :  { %v817_v33 = vpop.f32.mrf.mxu1 }
 0x259   :  { %v11189_v1 = vadd.f32 %v817_v33, %v11141_v4  ;;  %v850_v20 = vadd.f32 %v849_v31, %v11196_v7 }
 0x25b   :  { %v872_v12 = vadd.f32 %v871_v3, %v11189_v1 }
 0x25e   :  { %v768_v34 = vpop.f32.mrf.mxu3 }
 0x25f   :  { %v11203_v15 = vadd.f32 %v768_v34, %v11149_v8 }
 0x260   :  { %v819_v35 = vpop.f32.mrf.mxu1 }
 0x261   :  { %v11193_v5 = vadd.f32 %v819_v35, %v11141_v4  ;;  %v851_v30 = vadd.f32 %v850_v20, %v11203_v15 }
 0x263   :  { %v873_v17 = vadd.f32 %v872_v12, %v11193_v5 }
 0x266   :  { %v770_v36 = vpop.f32.mrf.mxu3 }
 0x267   :  { %v11211_v21 = vadd.f32 %v770_v36, %v11149_v8 }
 0x268   :  { %v822_v37 = vpop.f32.mrf.mxu1 }
 0x269   :  { %v11200_v14 = vadd.f32 %v822_v37, %v11141_v4  ;;  %v852_v35 = vadd.f32 %v851_v30, %v11211_v21 }
 0x26b   :  { %v874_v22 = vadd.f32 %v873_v17, %v11200_v14 }
 0x26e   :  { %v773_v44 = vpop.f32.mrf.mxu3 }
 0x26f   :  { %v11219_v32 = vadd.f32 %v773_v44, %v11149_v8 }
 0x270   :  { %v824_v45 = vpop.f32.mrf.mxu1 }
 0x271   :  { %v11207_v18 = vadd.f32 %v824_v45, %v11141_v4  ;;  %v853_v40 = vadd.f32 %v852_v35, %v11219_v32 }
 0x273   :  { %v875_v33 = vadd.f32 %v874_v22, %v11207_v18 }
 0x276   :  { %v775_v49 = vpop.f32.mrf.mxu3 }
 0x277   :  { %v11227_v36 = vadd.f32 %v775_v49, %v11149_v8  ;;  %v889_v49 = vmul.f32 128.0, %v10642_v39 }
 0x278   :  { %v827_v50 = vpop.f32.mrf.mxu1 }
 0x279   :  { %v11215_v25 = vadd.f32 %v827_v50, %v11141_v4  ;;  %v854_v44 = vadd.f32 %v853_v40, %v11227_v36 }
 0x27b   :  { %v876_v37 = vadd.f32 %v875_v33, %v11215_v25 }
 0x27e   :  { %v778_v57 = vpop.f32.mrf.mxu3 }
 0x27f   :  { %v11235_v41 = vadd.f32 %v778_v57, %v11149_v8 }
 0x280   :  { %v829_v58 = vpop.f32.mrf.mxu1 }
 0x281   :  { %v11223_v31 = vadd.f32 %v829_v58, %v11141_v4  ;;  %v855_v50 = vadd.f32 %v854_v44, %v11235_v41  ;;  %v890_v58 = vsub.f32 1.0, %v889_v49 }
 0x283   :  { %v877_v42 = vadd.f32 %v876_v37, %v11223_v31 }
 0x286   :  { %v780_v62 = vpop.f32.mrf.mxu3 }
 0x287   :  { %v11241_v45 = vadd.f32 %v780_v62, %v11149_v8 }
 0x288   :  { %v832_v63 = vpop.f32.mrf.mxu1 }
 0x289   :  { %v11231_v38 = vadd.f32 %v832_v63, %v11141_v4  ;;  %v856_v54 = vadd.f32 %v855_v50, %v11241_v45 }
 0x28b   :  { %v878_v46 = vadd.f32 %v877_v42, %v11231_v38 }
 0x28e   :  { %v783_v2 = vpop.f32.mrf.mxu3 }
 0x28f   :  { %v11247_v51 = vadd.f32 %v783_v2, %v11149_v8  ;;  %v891_v2 = vmul.f32 %v10642_v39, %v890_v58 }
 0x290   :  { %v834_v9 = vpop.f32.mrf.mxu1 }
 0x291   :  { %v835_v43 = vadd.f32 %v834_v9, %v11141_v4  ;;  %v857_v59 = vadd.f32 %v856_v54, %v11247_v51  ;;  %v892_v22 = vadd.f32 %v10642_v39, %v891_v2 }
 0x293   :  { %v879_v52 = vadd.f32 %v878_v46, %v835_v43  ;;  %v11264_v33 = vsel %vm893_vm7, %v10642_v39, %v892_v22 }
 0x294   :  { %16281 = vst [vmem:[#allocation20_spill] sm:$0xff] %v11264_v33 }
 0x296   :  { %v785_v28 = vpop.f32.mrf.mxu3 }
 0x297   :  { %v11251_v55 = vadd.f32 %v785_v28, %v11149_v8 }
 0x298   :  { %v837_v34 = vpop.f32.mrf.mxu1 }
 0x299   :  { %v838_v47 = vadd.f32 %v837_v34, %v11141_v4  ;;  %v858_v62 = vadd.f32 %v857_v59, %v11251_v55 }
 0x29b   :  { %v880_v56 = vadd.f32 %v879_v52, %v838_v47 }
 0x29e   :  { %v788_v48 = vpop.f32.mrf.mxu3 }
 0x29f   :  { %v11256_v60 = vadd.f32 %v788_v48, %v11149_v8 }
 0x2a0   :  { %v839_v53 = vpop.f32.mrf.mxu1 }
 0x2a1   :  { %v840_v57 = vadd.f32 %v839_v53, %v11141_v4  ;;  %v859_v9 = vadd.f32 %v858_v62, %v11256_v60 }
 0x2a3   :  { %v881_v61 = vadd.f32 %v880_v56, %v840_v57 }
 0x2a5   :  { %v882_v63 = vrot.slane %v881_v61, 4 }
 0x2a6   :  { %v790_v3 = vpop.f32.mrf.mxu3 }
 0x2a7   :  { %v883_v12 = vadd.f32 %v882_v63, %v881_v61  ;;  %v11261_v17 = vadd.f32 %v790_v3, %v11149_v8  ;;  %v8650_v8 = vld [vmem:[%s16158_s7 + $0x2] ss:$8 sm:$0x3] }
 0x2a8   :  { %v11282_v48 = vperm.slane %v8650_v8, 1 }
 0x2a9   :  { %v884_v20 = vrot.slane %v883_v12, 2  ;;  %v860_v4 = vadd.f32 %v859_v9, %v11261_v17 }
 0x2ab   :  { %v885_v27 = vadd.f32 %v884_v20, %v883_v12  ;;  %v861_v28 = vrot.slane %v860_v4, 4 }
 0x2ad   :  { %v886_v30 = vrot.slane %v885_v27, 1  ;;  %v862_v34 = vadd.f32 %v861_v28, %v860_v4 }
 0x2af   :  { %v887_v35 = vadd.f32 %v886_v30, %v885_v27  ;;  %v863_v40 = vrot.slane %v862_v34, 2 }
 0x2b1   :  { %v896_v37 = vmul.f32 %v11264_v33, %v887_v35  ;;  %v864_v49 = vadd.f32 %v863_v40, %v862_v34 }
 0x2b3   :  { %v11271_v42 = vsub.f32 %v11147_v6, %v896_v37  ;;  %v11274_v44 = vsub.f32 %v11144_v26, %v896_v37  ;;  %v11277_v46 = vsub.f32 %v11154_v10, %v896_v37  ;;  %v11280_v39 = vsub.f32 %v11174_v23, %v896_v37 }
 0x2b4   :  { %v11284_v50 = vsub.f32 %v838_v47, %v896_v37  ;;  %v11286_v52 = vsub.f32 %v840_v57, %v896_v37  ;;  %v11293_v53 = vsub.f32 %v11170_v19, %v896_v37  ;;  %v914_v10 = vsub.f32 %v11200_v14, %v896_v37 }
 0x2b5   :  { %v930_v6 = vmul.f32 %v11271_v42, %v11271_v42  ;;  %v932_v26 = vmul.f32 %v11274_v44, %v11274_v44  ;;  %v916_v23 = vsub.f32 %v11207_v18, %v896_v37  ;;  %v918_v54 = vsub.f32 %v11215_v25, %v896_v37 }
 0x2b6   :  { %v920_v47 = vsub.f32 %v11223_v31, %v896_v37  ;;  %v934_v56 = vmul.f32 %v11277_v46, %v11277_v46  ;;  %v11303_v58 = vmul.f32 %v11282_v48, %v11284_v50  ;;  %v11307_v19 = vmul.f32 %v11282_v48, %v11286_v52 }
 0x2b7   :  { %v982_v57 = vadd.f32 %v932_v26, %v930_v6  ;;  %v865_v59 = vrot.slane %v864_v49, 1  ;;  %v922_v14 = vsub.f32 %v11231_v38, %v896_v37  ;;  %v11310_v18 = vsub.f32 %v835_v43, %v896_v37 }
 0x2b8   :  { %16282 = vst [vmem:[#allocation21_spill] sm:$0xff] %v11303_v58  ;;  %v11313_v25 = vsub.f32 %v11186_v0, %v896_v37  ;;  %v936_v31 = vmul.f32 %v11293_v53, %v11293_v53  ;;  %v11318_v63 = vsub.f32 %v11189_v1, %v896_v37  ;;  %v938_v2 = vmul.f32 %v11280_v39, %v11280_v39  ;;  %v10258_v58 = vld [vmem:[#allocation9 + $0xcc] sm:$0xf0] }
 0x2b9   :  { %v983_v61 = vadd.f32 %v982_v57, %v934_v56  ;;  %v866_v62 = vadd.f32 %v865_v59, %v864_v49  ;;  %v11323_v3 = vmul.f32 %v11282_v48, %v914_v10  ;;  %v11326_v38 = vmul.f32 %v11282_v48, %v916_v23 }
 0x2ba   :  { %v11330_v9 = vmul.f32 %v11282_v48, %v918_v54  ;;  %v11333_v12 = vmul.f32 %v11282_v48, %v920_v47  ;;  %v11336_v1 = vsub.f32 %v11193_v5, %v896_v37  ;;  %v11339_v20 = vmul.f32 %v11282_v48, %v922_v14 }
 0x2bb   :  { %v984_v43 = vadd.f32 %v983_v61, %v936_v31  ;;  %v895_v0 = vmul.f32 %v11264_v33, %v866_v62  ;;  %v11343_v4 = vmul.f32 %v11282_v48, %v11310_v18  ;;  %v940_v22 = vmul.f32 %v11313_v25, %v11313_v25 }
 0x2bc   :  { %v942_v35 = vmul.f32 %v11318_v63, %v11318_v63  ;;  %v944_v40 = vmul.f32 %v11336_v1, %v11336_v1  ;;  %v11363_v6 = vperm.slane %v8650_v8, 0  ;;  %v946_v26 = vmul.f32 %v914_v10, %v914_v10 }
 0x2bd   :  { %v985_v27 = vadd.f32 %v984_v43, %v938_v2  ;;  %v11348_v28 = vsub.f32 %v11161_v13, %v895_v0  ;;  %v11351_v30 = vsub.f32 %v11166_v16, %v895_v0  ;;  %v11354_v5 = vsub.f32 %v11157_v11, %v895_v0 }
 0x2be   :  { %v11357_v34 = vsub.f32 %v11182_v29, %v895_v0  ;;  %v11366_v13 = vsub.f32 %v11256_v60, %v895_v0  ;;  %v11369_v16 = vsub.f32 %v11261_v17, %v895_v0  ;;  %v948_v57 = vmul.f32 %v916_v23, %v916_v23 }
 0x2bf   :  { %v986_v37 = vadd.f32 %v985_v27, %v940_v22  ;;  %v929_v11 = vmul.f32 %v11348_v28, %v11348_v28  ;;  %v931_v29 = vmul.f32 %v11354_v5, %v11354_v5  ;;  %v11376_v59 = vsub.f32 %v11177_v24, %v895_v0 }
 0x2c0   :  { %v913_v8 = vsub.f32 %v11219_v32, %v895_v0  ;;  %v915_v60 = vsub.f32 %v11227_v36, %v895_v0  ;;  %v917_v17 = vsub.f32 %v11235_v41, %v895_v0  ;;  %v11382_v61 = vsub.f32 %v11241_v45, %v895_v0 }
 0x2c1   :  { %v987_v49 = vadd.f32 %v986_v37, %v942_v35  ;;  %v933_v62 = vmul.f32 %v11351_v30, %v11351_v30  ;;  %v961_v2 = vadd.f32 %v931_v29, %v929_v11  ;;  %v11388_v10 = vmul.f32 %v11363_v6, %v11366_v13 }
 0x2c2   :  { %v11392_v24 = vmul.f32 %v11363_v6, %v11369_v16  ;;  %v950_v32 = vmul.f32 %v918_v54, %v918_v54  ;;  %v11395_v36 = vsub.f32 %v11247_v51, %v895_v0  ;;  %v11398_v41 = vsub.f32 %v11251_v55, %v895_v0 }
 0x2c3   :  { %v988_v56 = vadd.f32 %v987_v49, %v944_v40  ;;  %16283 = vst [vmem:[#allocation22_spill] sm:$0xff] %v11388_v10  ;;  %v952_v45 = vmul.f32 %v920_v47, %v920_v47  ;;  %v11401_v43 = vsub.f32 %v11196_v7, %v895_v0  ;;  %v935_v22 = vmul.f32 %v11376_v59, %v11376_v59  ;;  %v8865_v10 = vld [vmem:[#allocation9 + $0x1b0] sm:$0xf0] }
 0x2c4   :  { %v962_v27 = vadd.f32 %v961_v2, %v933_v62  ;;  %v11406_v37 = vsub.f32 %v11203_v15, %v895_v0  ;;  %v937_v54 = vmul.f32 %v11357_v34, %v11357_v34  ;;  %v11411_v51 = vmul.f32 %v11363_v6, %v913_v8 }
 0x2c5   :  { %v989_v31 = vadd.f32 %v988_v56, %v946_v26  ;;  %v11414_v47 = vmul.f32 %v11363_v6, %v915_v60  ;;  %v11417_v7 = vmul.f32 %v11363_v6, %v917_v17  ;;  %v11421_v40 = vmul.f32 %v11363_v6, %v11382_v61 }
 0x2c6   :  { %v963_v55 = vadd.f32 %v962_v27, %v935_v22  ;;  %v954_v49 = vmul.f32 %v922_v14, %v922_v14  ;;  %v11425_v11 = vmul.f32 %v11363_v6, %v11395_v36  ;;  %v11429_v29 = vmul.f32 %v11363_v6, %v11398_v41  ;;  %v10262_v22 = vld [vmem:[#allocation9 + $0xec] sm:$0xf0] }
 0x2c7   :  { %v990_v23 = vadd.f32 %v989_v31, %v948_v57  ;;  %v11432_v26 = vsub.f32 %v11211_v21, %v895_v0  ;;  %v939_v56 = vmul.f32 %v11401_v43, %v11401_v43  ;;  %v956_v31 = vmul.f32 %v11310_v18, %v11310_v18 }
 0x2c8   :  { %16284 = vst [vmem:[#allocation23_spill] sm:$0xff] %v11425_v11  ;;  %v964_v57 = vadd.f32 %v963_v55, %v937_v54  ;;  %v941_v62 = vmul.f32 %v11406_v37, %v11406_v37  ;;  %v8863_v54 = vld [vmem:[#allocation9 + $0x1a0] sm:$0xf]  ;;  %v10286_v55 = vld [vmem:[#allocation9 + $0x1ac] sm:$0xf0] }
 0x2c9   :  { %v991_v35 = vadd.f32 %v990_v23, %v950_v32  ;;  %16285 = vst [vmem:[#allocation24_spill] sm:$0xff] %v11429_v29  ;;  %v958_v32 = vmul.f32 %v11284_v50, %v11284_v50  ;;  %v943_v21 = vmul.f32 %v11432_v26, %v11432_v26  ;;  %v947_v29 = vmul.f32 %v915_v60, %v915_v60 }
 0x2ca   :  { %v965_v2 = vadd.f32 %v964_v57, %v939_v56  ;;  %v8864_v57 = vor.u32 %v10286_v55, %v8863_v54  ;;  %v951_v60 = vmul.f32 %v11382_v61, %v11382_v61  ;;  %v10254_v55 = vld [vmem:[#allocation9 + $0xac] sm:$0xf0]  ;;  %v10248_v61 = vld [vmem:[#allocation9 + $0x84] sm:$0xf] }
 0x2cb   :  { %v992_v15 = vadd.f32 %v991_v35, %v952_v45  ;;  %v8767_v45 = vld [vmem:[#allocation9 + $0xe0] sm:$0xf]  ;;  %v960_v35 = vmul.f32 %v11286_v52, %v11286_v52 }
 0x2cc   :  { %v966_v0 = vadd.f32 %v965_v2, %v941_v62  ;;  %v8768_v27 = vor.u32 %v10262_v22, %v8767_v45  ;;  %1691 = vmatpush.bf16.msra.mxu2 %v8864_v57  ;;  %v8847_v52 = vld [vmem:[#allocation9 + $0x180] sm:$0xf] }
 0x2cd   :  { %v993_v14 = vadd.f32 %v992_v15, %v954_v49  ;;  %v10284_v49 = vld [vmem:[#allocation9 + $0x1a4] sm:$0xf]  ;;  %v945_v15 = vmul.f32 %v913_v8, %v913_v8 }
 0x2ce   :  { %v967_v56 = vadd.f32 %v966_v0, %v943_v21  ;;  %1640 = vmatpush.bf16.msra.mxu0 %v8768_v27  ;;  %v10280_v8 = vld [vmem:[#allocation9 + $0x184] sm:$0xf]  ;;  %v8849_v21 = vld [vmem:[#allocation9 + $0x190] sm:$0xf0] }
 0x2cf   :  { %v994_v23 = vadd.f32 %v993_v14, %v956_v31  ;;  %v8868_v31 = vor.u32 %v10284_v49, %v8865_v10  ;;  %v8751_v14 = vld [vmem:[#allocation9 + $0xc0] sm:$0xf]  ;;  %v10252_v27 = vld [vmem:[#allocation9 + $0xa4] sm:$0xf]  ;;  %v8852_v10 = vor.u32 %v10280_v8, %v8849_v21  ;;  %v10274_v21 = vld [vmem:[#allocation9 + $0x14c] sm:$0xf0] }
 0x2d0   :  { %v968_v11 = vadd.f32 %v967_v56, %v945_v15  ;;  %v8752_v62 = vor.u32 %v10258_v58, %v8751_v14  ;;  %v8735_v58 = vld [vmem:[#allocation9 + $0xa0] sm:$0xf]  ;;  %v953_v15 = vmul.f32 %v11395_v36, %v11395_v36 }
 0x2d1   :  { %v995_v18 = vadd.f32 %v994_v23, %v958_v32  ;;  %1789 = vmatpush.bf16.msra.mxu1 %v8868_v31  ;;  %v10282_v32 = vld [vmem:[#allocation9 + $0x18c] sm:$0xf0]  ;;  %v949_v23 = vmul.f32 %v917_v17, %v917_v17  ;;  %v8831_v17 = vld [vmem:[#allocation9 + $0x160] sm:$0xf]  ;;  %v8833_v31 = vld [vmem:[#allocation9 + $0x170] sm:$0xf0] }
 0x2d2   :  { %v969_v45 = vadd.f32 %v968_v11, %v947_v29  ;;  %v8848_v22 = vor.u32 %v10282_v32, %v8847_v52  ;;  %1641 = vmatpush.bf16.msra.mxu0 %v8752_v62  ;;  %v10278_v11 = vld [vmem:[#allocation9 + $0x16c] sm:$0xf0]  ;;  %v8736_v29 = vor.u32 %v10254_v55, %v8735_v58  ;;  %v8721_v62 = vld [vmem:[#allocation9 + $0x90] sm:$0xf0]  ;;  %v8719_v52 = vld [vmem:[#allocation9 + $0x80] sm:$0xf]  ;;  %v955_v32 = vmul.f32 %v11398_v41, %v11398_v41 }
 0x2d3   :  { %v996_v50 = vadd.f32 %v995_v18, %v960_v35  ;;  %v8737_v35 = vld [vmem:[#allocation9 + $0xb0] sm:$0xf0]  ;;  %v8832_v57 = vor.u32 %v10278_v11, %v8831_v17  ;;  %v8815_v36 = vld [vmem:[#allocation9 + $0x140] sm:$0xf]  ;;  %v10244_v58 = vld [vmem:[#allocation9 + $0x64] sm:$0xf]  ;;  %v959_v17 = vmul.f32 %v11369_v16, %v11369_v16 }
 0x2d4   :  { %v970_v18 = vadd.f32 %v969_v45, %v949_v23  ;;  %v8740_v54 = vor.u32 %v10252_v27, %v8737_v35  ;;  %1692 = vmatpush.bf16.msra.mxu2 %v8848_v22  ;;  %v8724_v45 = vor.u32 %v10248_v61, %v8721_v62  ;;  %v10250_v22 = vld [vmem:[#allocation9 + $0x8c] sm:$0xf0]  ;;  %v8705_v41 = vld [vmem:[#allocation9 + $0x70] sm:$0xf0] }
 0x2d5   :  { %v997_v2 = vrot.slane %v996_v50, 4  ;;  %1790 = vmatpush.bf16.msra.mxu1 %v8852_v10  ;;  %v8720_v27 = vor.u32 %v10250_v22, %v8719_v52  ;;  %v8816_v10 = vor.u32 %v10274_v21, %v8815_v36  ;;  %v8801_v62 = vld [vmem:[#allocation9 + $0x130] sm:$0xf0]  ;;  %v10240_v52 = vld [vmem:[#allocation9 + $0x44] sm:$0xf] }
 0x2d6   :  { %v971_v56 = vadd.f32 %v970_v18, %v951_v60  ;;  %1740 = vmatpush.bf16.msra.mxu3 %v8740_v54  ;;  %1642 = vmatpush.bf16.msra.mxu0 %v8736_v29  ;;  %v10272_v60 = vld [vmem:[#allocation9 + $0x144] sm:$0xf]  ;;  %v8817_v18 = vld [vmem:[#allocation9 + $0x150] sm:$0xf0]  ;;  %v8708_v29 = vor.u32 %v10244_v58, %v8705_v41  ;;  %v8687_v22 = vld [vmem:[#allocation9 + $0x40] sm:$0xf] }
 0x2d7   :  { %v998_v0 = vadd.f32 %v997_v2, %v996_v50  ;;  %v10276_v50 = vld [vmem:[#allocation9 + $0x164] sm:$0xf]  ;;  %v8820_v55 = vor.u32 %v10272_v60, %v8817_v18  ;;  %v8783_v21 = vld [vmem:[#allocation9 + $0x100] sm:$0xf]  ;;  %v8785_v60 = vld [vmem:[#allocation9 + $0x110] sm:$0xf0] }
 0x2d8   :  { %v8836_v2 = vor.u32 %v10276_v50, %v8833_v31  ;;  %v972_v23 = vadd.f32 %v971_v56, %v953_v15  ;;  %1693 = vmatpush.bf16.msra.mxu2 %v8832_v57  ;;  %v10246_v15 = vld [vmem:[#allocation9 + $0x6c] sm:$0xf0]  ;;  %v8799_v56 = vld [vmem:[#allocation9 + $0x120] sm:$0xf]  ;;  %v10268_v31 = vld [vmem:[#allocation9 + $0x124] sm:$0xf] }
 0x2d9   :  { %v999_v49 = vrot.slane %v998_v0, 2  ;;  %v10270_v57 = vld [vmem:[#allocation9 + $0x12c] sm:$0xf0]  ;;  %v8804_v16 = vor.u32 %v10268_v31, %v8801_v62  ;;  %v10236_v18 = vld [vmem:[#allocation9 + $0x24] sm:$0xf] }
 0x2da   :  { %1791 = vmatpush.bf16.msra.mxu1 %v8836_v2  ;;  %v973_v35 = vadd.f32 %v972_v23, %v955_v32  ;;  %1741 = vmatpush.bf16.msra.mxu3 %v8724_v45  ;;  %v8800_v61 = vor.u32 %v10270_v57, %v8799_v56  ;;  %v8689_v32 = vld [vmem:[#allocation9 + $0x50] sm:$0xf0]  ;;  %v8671_v58 = vld [vmem:[#allocation9 + $0x20] sm:$0xf] }
 0x2db   :  { %v1000_v14 = vadd.f32 %v999_v49, %v998_v0  ;;  %v957_v0 = vmul.f32 %v11366_v13, %v11366_v13  ;;  %1643 = vmatpush.bf16.msra.mxu0 %v8720_v27  ;;  %v8703_v49 = vld [vmem:[#allocation9 + $0x60] sm:$0xf]  ;;  %v8692_v45 = vor.u32 %v10240_v52, %v8689_v32  ;;  %v10266_v27 = vld [vmem:[#allocation9 + $0x10c] sm:$0xf0] }
 0x2dc   :  { %1694 = vmatpush.bf16.msra.mxu2 %v8816_v10  ;;  %v8704_v50 = vor.u32 %v10246_v15, %v8703_v49  ;;  %v8784_v10 = vor.u32 %v10266_v27, %v8783_v21  ;;  %v8655_v15 = vld [vmem:[#allocation9] sm:$0xf] }
 0x2dd   :  { %v1001_v8 = vrot.slane %v1000_v14, 1  ;;  %v974_v11 = vadd.f32 %v973_v35, %v957_v0  ;;  %v10264_v0 = vld [vmem:[#allocation9 + $0x104] sm:$0xf] }
 0x2de   :  { %1792 = vmatpush.bf16.msra.mxu1 %v8820_v55  ;;  %1742 = vmatpush.bf16.msra.mxu3 %v8708_v29  ;;  %v8788_v41 = vor.u32 %v10264_v0, %v8785_v60  ;;  %v10238_v29 = vld [vmem:[#allocation9 + $0x2c] sm:$0xf0]  ;;  %v1017_v60 = vmul.f32 %v11282_v48, %v11293_v53 }
 0x2df   :  { %v1002_v54 = vadd.f32 %v1001_v8, %v1000_v14  ;;  %v975_v14 = vadd.f32 %v974_v11, %v959_v17  ;;  %1644 = vmatpush.bf16.msra.mxu0 %v8704_v50  ;;  %v10242_v8 = vld [vmem:[#allocation9 + $0x4c] sm:$0xf0]  ;;  %v10232_v17 = vld [vmem:[#allocation9 + $0x4] sm:$0xf]  ;;  %v8657_v11 = vld [vmem:[#allocation9 + $0x10] sm:$0xf0]  ;;  %v8672_v50 = vor.u32 %v10238_v29, %v8671_v58  ;;  %v1019_v58 = vmul.f32 %v11282_v48, %v11280_v39 }
 0x2e0   :  { %1695 = vmatpush.bf16.msra.mxu2 %v8800_v61  ;;  %v8688_v36 = vor.u32 %v10242_v8, %v8687_v22  ;;  %v8660_v57 = vor.u32 %v10232_v17, %v8657_v11  ;;  %v8777_v22 = vld [vmem:[#allocation9 + $0xf8] sm:$0xf0]  ;;  %v8903_v8 = vld [vmem:[#allocation9 + $0x1e8] sm:$0xf]  ;;  %v11481_v11 = vmul.f32 %v11363_v6, %v11348_v28  ;;  %v11485_v39 = vmul.f32 %v11363_v6, %v11354_v5 }
 0x2e1   :  { %v1004_v13 = vmul.f32 %v1002_v54, %v11264_v33  ;;  %v976_v23 = vrot.slane %v975_v14, 4  ;;  %v8673_v54 = vld [vmem:[#allocation9 + $0x30] sm:$0xf0]  ;;  %v1025_v29 = vmul.f32 %v11282_v48, %v11336_v1  ;;  %v11495_v28 = vmul.f32 %v11363_v6, %v11351_v30 }
 0x2e2   :  { %1793 = vmatpush.bf16.msra.mxu1 %v8804_v16  ;;  %1743 = vmatpush.bf16.msra.mxu3 %v8692_v45  ;;  %v8676_v49 = vor.u32 %v10236_v18, %v8673_v54  ;;  %v1011_v16 = vmul.f32 %v11282_v48, %v11271_v42  ;;  %v10261_v45 = vld [vmem:[#allocation9 + $0xec] sm:$0xf]  ;;  %v10263_v18 = vld [vmem:[#allocation9 + $0xf4] sm:$0xf0]  ;;  %v8905_v54 = vld [vmem:[#allocation9 + $0x1f8] sm:$0xf0]  ;;  %v11510_v1 = vmul.f32 %v11363_v6, %v11401_v43 }
 0x2e3   :  { %v11457_v2 = vadd.f32 0.8, %v1004_v13  ;;  %v977_v35 = vadd.f32 %v976_v23, %v975_v14  ;;  %1645 = vmatpush.bf16.msra.mxu0 %v8688_v36  ;;  %v10234_v13 = vld [vmem:[#allocation9 + $0xc] sm:$0xf0]  ;;  %v1013_v23 = vmul.f32 %v11282_v48, %v11274_v44  ;;  %v1015_v36 = vmul.f32 %v11282_v48, %v11277_v46  ;;  %v10293_v44 = vld [vmem:[#allocation9 + $0x1ec] sm:$0xf] }
 0x2e4   :  { %1696 = vmatpush.bf16.msra.mxu2 %v8784_v10  ;;  %v8656_v62 = vor.u32 %v10234_v13, %v8655_v15  ;;  %v8780_v0 = vor.u32 %v10261_v45, %v8777_v22  ;;  %v8775_v10 = vld [vmem:[#allocation9 + $0xe8] sm:$0xf]  ;;  %v1021_v46 = vmul.f32 %v11282_v48, %v11313_v25  ;;  %v8908_v17 = vor.u32 %v10293_v44, %v8905_v54  ;;  %v10257_v54 = vld [vmem:[#allocation9 + $0xcc] sm:$0xf] }
 0x2e5   :  { %10643 = vrsqrt.f32 %v11457_v2  ;;  %v978_v55 = vrot.slane %v977_v35, 2  ;;  %v8776_v53 = vor.u32 %v10263_v18, %v8775_v10  ;;  %v1023_v25 = vmul.f32 %v11282_v48, %v11318_v63 }
 0x2e6   :  { %1794 = vmatpush.bf16.msra.mxu1 %v8788_v41  ;;  %1744 = vmatpush.bf16.msra.mxu3 %v8676_v49  ;;  %v8651_v41 = vld [vmem:[%s16158_s7 + $0x3] ss:$8 sm:$0x3]  ;;  %vm1060_vm11 = vweird.f32 %v11457_v2  ;;  %v11502_v63 = vmul.f32 %v11363_v6, %v11376_v59  ;;  %v11506_v48 = vmul.f32 %v11363_v6, %v11357_v34  ;;  %v11518_v13 = vmul.f32 %v11363_v6, %v11406_v37 }
 0x2e7   :  { %v979_v56 = vadd.f32 %v978_v55, %v977_v35  ;;  %1646 = vmatpush.bf16.msra.mxu0 %v8672_v50  ;;  %v10295_v35 = vld [vmem:[#allocation9 + $0x1f4] sm:$0xf0]  ;;  %v11498_v5 = vperm.slane %v8651_v41, 1  ;;  %v11514_v30 = vperm.slane %v8651_v41, 0  ;;  %v11522_v59 = vmul.f32 %v11363_v6, %v11432_v26 }
 0x2e8   :  { %v8904_v42 = vor.u32 %v10295_v35, %v8903_v8 }
 0x2e9   :  { %v980_v61 = vrot.slane %v979_v56, 1 }
 0x2ea   :  { %1745 = vmatpush.bf16.msra.mxu3 %v8660_v57  ;;  %1885 = vmatpush.bf16.msrb.mxu2 %v8904_v42 }
 0x2eb   :  { %v10644_v31 = vpop.eup %10643  ;;  %v981_v32 = vadd.f32 %v980_v61, %v979_v56  ;;  %1647 = vmatpush.bf16.msra.mxu0 %v8656_v62  ;;  %1983 = vmatpush.bf16.msrb.mxu1 %v8908_v17  ;;  %v8759_v17 = vld [vmem:[#allocation9 + $0xc8] sm:$0xf] }
 0x2ec   :  { %v1055_v14 = vmul.f32 %v10644_v31, %v11457_v2  ;;  %vm1061_vm10 = vweird.f32 %v10644_v31 }
 0x2ed   :  { %v1003_v27 = vmul.f32 %v981_v32, %v11264_v33  ;;  %vm1062_vm12 = vmor %vm1060_vm11, %vm1061_vm10 }
 0x2ee   :  { %v1056_v52 = vmul.f32 %v10644_v31, %v1055_v14  ;;  %1934 = vmatpush.bf16.msrb.mxu3 %v8780_v0 }
 0x2ef   :  { %v11477_v49 = vadd.f32 0.8, %v1003_v27  ;;  %1836 = vmatpush.bf16.msrb.mxu0 %v8776_v53  ;;  %v10291_v53 = vld [vmem:[#allocation9 + $0x1d4] sm:$0xf0] }
 0x2f0   :  { %v1057_v21 = vmul.f32 0.5, %v1056_v52 }
 0x2f1   :  { %10645 = vrsqrt.f32 %v11477_v49  ;;  %vm1050_vm13 = vweird.f32 %v11477_v49 }
 0x2f2   :  { %v1058_v55 = vsub.f32 1.5, %v1057_v21 }
 0x2f4   :  { %v1059_v15 = vmul.f32 %v10644_v31, %v1058_v55  ;;  %v8887_v55 = vld [vmem:[#allocation9 + $0x1c8] sm:$0xf] }
 0x2f6   :  { %v11512_v2 = vsel %vm1062_vm12, %v10644_v31, %v1059_v15 }
 0x2f7   :  { %v1095_v34 = vmul.f32 %v11512_v2, %v11307_v19  ;;  %v1065_v56 = vmul.f32 %v11512_v2, %v1011_v16  ;;  %v1067_v43 = vmul.f32 %v11512_v2, %v1013_v23  ;;  %v1069_v57 = vmul.f32 %v11512_v2, %v1015_v36  ;;  %v10646_v62 = vpop.eup %10645 }
 0x2f8   :  { %v1071_v50 = vmul.f32 %v11512_v2, %v1017_v60  ;;  %v1073_v31 = vmul.f32 %v11512_v2, %v1019_v58  ;;  %v1075_v37 = vmul.f32 %v11512_v2, %v1021_v46  ;;  %v1077_v14 = vmul.f32 %v11512_v2, %v1023_v25  ;;  %v8761_v58 = vld [vmem:[#allocation9 + $0xd8] sm:$0xf0] }
 0x2f9   :  { %v11534_v6 = vadd.f32 %v11498_v5, %v1095_v34  ;;  %v1102_v26 = vadd.f32 %v11498_v5, %v1065_v56  ;;  %v1104_v19 = vadd.f32 %v11498_v5, %v1067_v43  ;;  %v1106_v61 = vadd.f32 %v11498_v5, %v1069_v57  ;;  %v10259_v56 = vld [vmem:[#allocation9 + $0xd4] sm:$0xf0]  ;;  %v10289_v43 = vld [vmem:[#allocation9 + $0x1cc] sm:$0xf] }
 0x2fa   :  { %v1108_v52 = vadd.f32 %v11498_v5, %v1071_v50  ;;  %v1110_v32 = vadd.f32 %v11498_v5, %v1073_v31  ;;  %v1112_v16 = vadd.f32 %v11498_v5, %v1075_v37  ;;  %v1079_v23 = vmul.f32 %v11512_v2, %v1025_v29  ;;  %v8889_v37 = vld [vmem:[#allocation9 + $0x1d8] sm:$0xf0] }
 0x2fb   :  { %v1045_v45 = vmul.f32 %v10646_v62, %v11477_v49  ;;  %vm1051_vm14 = vweird.f32 %v10646_v62  ;;  %vm1134_vm15 = vcmp.gt.f32.partialorder %v1102_v26, 0.0  ;;  %vm1136_vm0 = vcmp.gt.f32.partialorder %v1104_v19, 0.0 }
 0x2fc   :  { %v1166_v22 = vmul.f32 0.2, %v1102_v26  ;;  %v1168_v8 = vmul.f32 0.2, %v1104_v19  ;;  %vm1138_vm1 = vcmp.gt.f32.partialorder %v1106_v61, 0.0  ;;  %vm1140_vm2 = vcmp.gt.f32.partialorder %v1108_v52, 0.0  ;;  %vm1052_vm8 = vmor %vm1050_vm13, %vm1051_vm14 }
 0x2fd   :  { %v1046_v36 = vmul.f32 %v10646_v62, %v1045_v45  ;;  %v1170_v21 = vmul.f32 0.2, %v1106_v61  ;;  %v1172_v27 = vmul.f32 0.2, %v1108_v52  ;;  %vm1142_vm3 = vcmp.gt.f32.partialorder %v1110_v32, 0.0 }
 0x2fe   :  { %v1198_v0 = vsel %vm1134_vm15, %v1102_v26, %v1166_v22  ;;  %v1200_v35 = vsel %vm1136_vm0, %v1104_v19, %v1168_v8  ;;  %vm1144_vm4 = vcmp.gt.f32.partialorder %v1112_v16, 0.0  ;;  %v1174_v10 = vmul.f32 0.2, %v1110_v32 }
 0x2ff   :  { %v1047_v60 = vmul.f32 0.5, %v1046_v36  ;;  %v11545_v42 = vpack.c.bf16 %v1200_v35, %v1198_v0  ;;  %v1202_v18 = vsel %vm1138_vm1, %v1106_v61, %v1170_v21  ;;  %v1204_v44 = vsel %vm1140_vm2, %v1108_v52, %v1172_v27 }
 0x300   :  { %v11547_v46 = vpack.c.bf16 %v1204_v44, %v1202_v18  ;;  %v8764_v41 = vor.u32 %v10257_v54, %v8761_v58  ;;  %v1206_v25 = vsel %vm1142_vm3, %v1110_v32, %v1174_v10  ;;  %v1114_v29 = vadd.f32 %v11498_v5, %v1077_v14 }
 0x301   :  { %v1048_v15 = vsub.f32 1.5, %v1047_v60  ;;  %1697 = vmatmul.bf16.vlgmr.msra.gmra.mxu2 %v11545_v42  ;;  %1795 = vmatmul.bf16.vlgmr.msra.gmra.mxu1 %v11545_v42  ;;  %v8888_v34 = vor.u32 %v10291_v53, %v8887_v55  ;;  %v1116_v57 = vadd.f32 %v11498_v5, %v1079_v23  ;;  %v1081_v50 = vmul.f32 %v11512_v2, %v11323_v3 }
 0x302   :  { %1935 = vmatpush.bf16.msrb.mxu3 %v8764_v41  ;;  %v8760_v31 = vor.u32 %v10259_v56, %v8759_v17  ;;  %v1176_v26 = vmul.f32 0.2, %v1112_v16  ;;  %vm1146_vm5 = vcmp.gt.f32.partialorder %v1114_v29, 0.0  ;;  %v1083_v14 = vmul.f32 %v11512_v2, %v11326_v38 }
 0x303   :  { %v1049_v19 = vmul.f32 %v10646_v62, %v1048_v15  ;;  %1886 = vmatpush.bf16.msrb.mxu2 %v8888_v34  ;;  %v8892_v61 = vor.u32 %v10289_v43, %v8889_v37  ;;  %vm1148_vm6 = vcmp.gt.f32.partialorder %v1116_v57, 0.0  ;;  %v1178_v52 = vmul.f32 0.2, %v1114_v29 }
 0x304   :  { %1837 = vmatpush.bf16.msrb.mxu0 %v8760_v31  ;;  %v1208_v3 = vsel %vm1144_vm4, %v1112_v16, %v1176_v26  ;;  %v1180_v32 = vmul.f32 0.2, %v1116_v57  ;;  %v11563_v23 = vadd.f32 %v11498_v5, %v1081_v50  ;;  %v11566_v45 = vadd.f32 %v11498_v5, %v1083_v14  ;;  %v8745_v50 = vld [vmem:[#allocation9 + $0xb8] sm:$0xf0]  ;;  %v8871_v31 = vld [vmem:[#allocation9 + $0x1a8] sm:$0xf] }
 0x305   :  { %v11568_v38 = vsel %vm1052_vm8, %v10646_v62, %v1049_v19  ;;  %1984 = vmatpush.bf16.msrb.mxu1 %v8892_v61  ;;  %v11570_v22 = vpack.c.bf16 %v1208_v3, %v1206_v25  ;;  %v1210_v8 = vsel %vm1146_vm5, %v1114_v29, %v1178_v52  ;;  %v11575_v49 = vmul.f32 %v11512_v2, %v11330_v9  ;;  %v10287_v19 = vld [vmem:[#allocation9 + $0x1b4] sm:$0xf0]  ;;  %v8743_v61 = vld [vmem:[#allocation9 + $0xa8] sm:$0xf] }
 0x306   :  { %v1094_v16 = vmul.f32 %v11568_v38, %v11392_v24  ;;  %v1064_v36 = vmul.f32 %v11568_v38, %v11481_v11  ;;  %v1066_v21 = vmul.f32 %v11568_v38, %v11485_v39  ;;  %v1068_v62 = vmul.f32 %v11568_v38, %v11495_v28 }
 0x307   :  { %v1070_v27 = vmul.f32 %v11568_v38, %v11502_v63  ;;  %v1072_v0 = vmul.f32 %v11568_v38, %v11506_v48  ;;  %v1074_v9 = vmul.f32 %v11568_v38, %v11510_v1  ;;  %v1212_v24 = vsel %vm1148_vm6, %v1116_v57, %v1180_v32  ;;  %v10253_v57 = vld [vmem:[#allocation9 + $0xac] sm:$0xf] }
 0x308   :  { %v11593_v35 = vadd.f32 %v11514_v30, %v1094_v16  ;;  %v1101_v11 = vadd.f32 %v11514_v30, %v1064_v36  ;;  %v1103_v39 = vadd.f32 %v11514_v30, %v1066_v21  ;;  %v1105_v28 = vadd.f32 %v11514_v30, %v1068_v62  ;;  %v10285_v16 = vld [vmem:[#allocation9 + $0x1ac] sm:$0xf] }
 0x309   :  { %v1107_v10 = vadd.f32 %v11514_v30, %v1070_v27  ;;  %v1109_v63 = vadd.f32 %v11514_v30, %v1072_v0  ;;  %v1111_v48 = vadd.f32 %v11514_v30, %v1074_v9  ;;  %v11601_v60 = vpack.c.bf16 %v1212_v24, %v1210_v8 }
 0x30a   :  { %vm1133_vm9 = vcmp.gt.f32.partialorder %v1101_v11, 0.0  ;;  %vm1135_vm7 = vcmp.gt.f32.partialorder %v1103_v39, 0.0  ;;  %v1165_v1 = vmul.f32 0.2, %v1101_v11  ;;  %v1167_v18 = vmul.f32 0.2, %v1103_v39 }
 0x30b   :  { %vm1137_vm10 = vcmp.gt.f32.partialorder %v1105_v28, 0.0  ;;  %vm1139_vm11 = vcmp.gt.f32.partialorder %v1107_v10, 0.0  ;;  %v1169_v44 = vmul.f32 0.2, %v1105_v28  ;;  %v1171_v54 = vmul.f32 0.2, %v1107_v10 }
 0x30c   :  { %v1197_v58 = vsel %vm1133_vm9, %v1101_v11, %v1165_v1  ;;  %v1199_v41 = vsel %vm1135_vm7, %v1103_v39, %v1167_v18  ;;  %vm1141_vm12 = vcmp.gt.f32.partialorder %v1109_v63, 0.0  ;;  %vm1143_vm13 = vcmp.gt.f32.partialorder %v1111_v48, 0.0 }
 0x30d   :  { %v11603_v55 = vpack.c.bf16 %v1199_v41, %v1197_v58  ;;  %v1201_v53 = vsel %vm1137_vm10, %v1105_v28, %v1169_v44  ;;  %v1203_v17 = vsel %vm1139_vm11, %v1107_v10, %v1171_v54  ;;  %v1173_v25 = vmul.f32 0.2, %v1109_v63 }
 0x30e   :  { %v11605_v29 = vpack.c.bf16 %v1203_v17, %v1201_v53  ;;  %v1175_v15 = vmul.f32 0.2, %v1111_v48  ;;  %v1076_v34 = vmul.f32 %v11568_v38, %v11518_v13  ;;  %v1078_v56 = vmul.f32 %v11568_v38, %v11522_v59  ;;  %v10255_v59 = vld [vmem:[#allocation9 + $0xb4] sm:$0xf0] }
 0x30f   :  { %1648 = vmatmul.bf16.vlgmr.msra.gmra.mxu0 %v11603_v55  ;;  %1746 = vmatmul.bf16.vlgmr.msra.gmra.mxu3 %v11603_v55  ;;  %v1205_v43 = vsel %vm1141_vm12, %v1109_v63, %v1173_v25  ;;  %v1080_v37 = vmul.f32 %v11568_v38, %v11411_v51  ;;  %v1082_v26 = vmul.f32 %v11568_v38, %v11414_v47  ;;  %v8873_v47 = vld [vmem:[#allocation9 + $0x1b8] sm:$0xf0]  ;;  %vm1150_vm14 = vcmp.gt.f32.partialorder %v11563_v23, 0.0 }
 0x310   :  { %v1207_v14 = vsel %vm1143_vm13, %v1111_v48, %v1175_v15  ;;  %v8748_v13 = vor.u32 %v10253_v57, %v8745_v50  ;;  %v1113_v52 = vadd.f32 %v11514_v30, %v1076_v34  ;;  %v1115_v3 = vadd.f32 %v11514_v30, %v1078_v56 }
 0x311   :  { %1702 = vmatmul.bf16.gmra.mxu2 %v11547_v46  ;;  %1800 = vmatmul.bf16.gmra.mxu1 %v11547_v46  ;;  %v11622_v32 = vpack.c.bf16 %v1207_v14, %v1205_v43  ;;  %v8872_v51 = vor.u32 %v10287_v19, %v8871_v31  ;;  %v8744_v8 = vor.u32 %v10255_v59, %v8743_v61  ;;  %vm1152_vm1 = vcmp.gt.f32.partialorder %v11566_v45, 0.0 }
 0x312   :  { %1936 = vmatpush.bf16.msrb.mxu3 %v8748_v13  ;;  %v8876_v36 = vor.u32 %v10285_v16, %v8873_v47  ;;  %vm1145_vm15 = vcmp.gt.f32.partialorder %v1113_v52, 0.0  ;;  %vm1147_vm0 = vcmp.gt.f32.partialorder %v1115_v3, 0.0  ;;  %v1177_v21 = vmul.f32 0.2, %v1113_v52  ;;  %v16288_v16 = vld [vmem:[#allocation21_spill] sm:$0xff] }
 0x313   :  { %1887 = vmatpush.bf16.msrb.mxu2 %v8872_v51  ;;  %1838 = vmatpush.bf16.msrb.mxu0 %v8744_v8  ;;  %v1179_v62 = vmul.f32 0.2, %v1115_v3  ;;  %v1182_v27 = vmul.f32 0.2, %v11563_v23  ;;  %v1117_v0 = vadd.f32 %v11514_v30, %v1080_v37  ;;  %v1184_v24 = vmul.f32 0.2, %v11566_v45 }
 0x314   :  { %1985 = vmatpush.bf16.msrb.mxu1 %v8876_v36  ;;  %v1209_v9 = vsel %vm1145_vm15, %v1113_v52, %v1177_v21  ;;  %v1119_v11 = vadd.f32 %v11514_v30, %v1082_v26  ;;  %v1087_v39 = vmul.f32 %v11512_v2, %v11333_v12  ;;  %v1122_v58 = vadd.f32 %v11498_v5, %v11575_v49  ;;  %v10249_v52 = vld [vmem:[#allocation9 + $0x8c] sm:$0xf]  ;;  %v8855_v51 = vld [vmem:[#allocation9 + $0x188] sm:$0xf]  ;;  %v16289_v36 = vld [vmem:[#allocation22_spill] sm:$0xff] }
 0x315   :  { %v1211_v28 = vsel %vm1147_vm0, %v1115_v3, %v1179_v62  ;;  %v1214_v10 = vsel %vm1150_vm14, %v11563_v23, %v1182_v27  ;;  %vm1149_vm2 = vcmp.gt.f32.partialorder %v1117_v0, 0.0  ;;  %v1181_v63 = vmul.f32 0.2, %v1117_v0  ;;  %v8729_v3 = vld [vmem:[#allocation9 + $0x98] sm:$0xf0] }
 0x316   :  { %v11635_v48 = vpack.c.bf16 %v1211_v28, %v1209_v9  ;;  %v1216_v1 = vsel %vm1152_vm1, %v11566_v45, %v1184_v24  ;;  %vm1151_vm3 = vcmp.gt.f32.partialorder %v1119_v11, 0.0  ;;  %v1183_v18 = vmul.f32 0.2, %v1119_v11  ;;  %v10283_v27 = vld [vmem:[#allocation9 + $0x194] sm:$0xf0] }
 0x317   :  { %v11638_v44 = vpack.c.bf16 %v1216_v1, %v1214_v10  ;;  %v1213_v54 = vsel %vm1149_vm2, %v1117_v0, %v1181_v63  ;;  %v1124_v12 = vadd.f32 %v11498_v5, %v1087_v39  ;;  %v1084_v23 = vmul.f32 %v11568_v38, %v11417_v7  ;;  %v8727_v0 = vld [vmem:[#allocation9 + $0x88] sm:$0xf]  ;;  %v10251_v9 = vld [vmem:[#allocation9 + $0x94] sm:$0xf0]  ;;  %v10281_v10 = vld [vmem:[#allocation9 + $0x18c] sm:$0xf] }
 0x318   :  { %v1215_v41 = vsel %vm1151_vm3, %v1119_v11, %v1183_v18  ;;  %v1086_v53 = vmul.f32 %v11568_v38, %v11421_v40  ;;  %v1089_v45 = vmul.f32 %v11512_v2, %v11339_v20  ;;  %vm1154_vm4 = vcmp.gt.f32.partialorder %v1122_v58, 0.0  ;;  %v16286_v40 = vld [vmem:[#allocation23_spill] sm:$0xff]  ;;  %v16287_v20 = vld [vmem:[#allocation24_spill] sm:$0xff] }
 0x319   :  { %v11649_v17 = vpack.c.bf16 %v1215_v41, %v1213_v54  ;;  %vm1156_vm5 = vcmp.gt.f32.partialorder %v1124_v12, 0.0  ;;  %v1186_v25 = vmul.f32 0.2, %v1122_v58  ;;  %v1188_v15 = vmul.f32 0.2, %v1124_v12 }
 0x31a   :  { %v1121_v49 = vadd.f32 %v11514_v30, %v1084_v23  ;;  %v1123_v34 = vadd.f32 %v11514_v30, %v1086_v53  ;;  %v1091_v56 = vmul.f32 %v11512_v2, %v11343_v4  ;;  %v1126_v43 = vadd.f32 %v11498_v5, %v1089_v45  ;;  %v8857_v63 = vld [vmem:[#allocation9 + $0x198] sm:$0xf0] }
 0x31b   :  { %v1218_v7 = vsel %vm1154_vm4, %v1122_v58, %v1186_v25  ;;  %v1088_v57 = vmul.f32 %v11568_v38, %v16286_v40  ;;  %v1090_v50 = vmul.f32 %v11568_v38, %v16287_v20  ;;  %v1220_v31 = vsel %vm1156_vm5, %v1124_v12, %v1188_v15  ;;  %v8713_v20 = vld [vmem:[#allocation9 + $0x78] sm:$0xf0] }
 0x31c   :  { %vm1153_vm6 = vcmp.gt.f32.partialorder %v1121_v49, 0.0  ;;  %vm1155_vm8 = vcmp.gt.f32.partialorder %v1123_v34, 0.0  ;;  %v1185_v37 = vmul.f32 0.2, %v1121_v49  ;;  %v11660_v26 = vpack.c.bf16 %v1220_v31, %v1218_v7  ;;  %v10279_v31 = vld [vmem:[#allocation9 + $0x174] sm:$0xf0] }
 0x31d   :  { %v1187_v14 = vmul.f32 0.2, %v1123_v34  ;;  %v1128_v13 = vadd.f32 %v11498_v5, %v1091_v56  ;;  %vm1158_vm9 = vcmp.gt.f32.partialorder %v1126_v43, 0.0  ;;  %v1190_v19 = vmul.f32 0.2, %v1126_v43 }
 0x31e   :  { %v1217_v4 = vsel %vm1153_vm6, %v1121_v49, %v1185_v37  ;;  %v1125_v61 = vadd.f32 %v11514_v30, %v1088_v57  ;;  %v1127_v59 = vadd.f32 %v11514_v30, %v1090_v50  ;;  %v1093_v47 = vmul.f32 %v11512_v2, %v16288_v16  ;;  %v10245_v57 = vld [vmem:[#allocation9 + $0x6c] sm:$0xf]  ;;  %v8839_v50 = vld [vmem:[#allocation9 + $0x168] sm:$0xf] }
 0x31f   :  { %1653 = vmatmul.bf16.gmra.mxu0 %v11605_v29  ;;  %1751 = vmatmul.bf16.gmra.mxu3 %v11605_v29  ;;  %v1219_v8 = vsel %vm1155_vm8, %v1123_v34, %v1187_v14  ;;  %v1092_v21 = vmul.f32 %v11568_v38, %v16289_v36  ;;  %v8732_v62 = vor.u32 %v10249_v52, %v8729_v3  ;;  %vm1160_vm7 = vcmp.gt.f32.partialorder %v1128_v13, 0.0  ;;  %v8711_v37 = vld [vmem:[#allocation9 + $0x68] sm:$0xf]  ;;  %v10247_v14 = vld [vmem:[#allocation9 + $0x74] sm:$0xf0] }
 0x320   :  { %v11671_v24 = vpack.c.bf16 %v1219_v8, %v1217_v4  ;;  %v1222_v11 = vsel %vm1158_vm9, %v1126_v43, %v1190_v19  ;;  %v8856_v39 = vor.u32 %v10283_v27, %v8855_v51  ;;  %v8728_v28 = vor.u32 %v10251_v9, %v8727_v0  ;;  %v8841_v19 = vld [vmem:[#allocation9 + $0x178] sm:$0xf0]  ;;  %v8823_v3 = vld [vmem:[#allocation9 + $0x148] sm:$0xf]  ;;  %v10275_v8 = vld [vmem:[#allocation9 + $0x154] sm:$0xf0] }
 0x321   :  { %1707 = vmatmul.bf16.gmra.mxu2 %v11570_v22  ;;  %1805 = vmatmul.bf16.gmra.mxu1 %v11570_v22  ;;  %vm1157_vm10 = vcmp.gt.f32.partialorder %v1125_v61, 0.0  ;;  %v8860_v2 = vor.u32 %v10281_v10, %v8857_v63  ;;  %v1192_v38 = vmul.f32 0.2, %v1128_v13  ;;  %vm1159_vm11 = vcmp.gt.f32.partialorder %v1127_v59, 0.0  ;;  %v8697_v52 = vld [vmem:[#allocation9 + $0x58] sm:$0xf0] }
 0x322   :  { %1937 = vmatpush.bf16.msrb.mxu3 %v8732_v62  ;;  %v1189_v1 = vmul.f32 0.2, %v1125_v61  ;;  %1888 = vmatpush.bf16.msrb.mxu2 %v8856_v39  ;;  %v1191_v18 = vmul.f32 0.2, %v1127_v59  ;;  %v1130_v54 = vadd.f32 %v11498_v5, %v1093_v47  ;;  %vm1164_vm12 = vcmp.gt.f32.partialorder %v11534_v6, 0.0 }
 0x323   :  { %1839 = vmatpush.bf16.msrb.mxu0 %v8728_v28  ;;  %v1196_v58 = vmul.f32 0.2, %v11534_v6  ;;  %1986 = vmatpush.bf16.msrb.mxu1 %v8860_v2  ;;  %v1224_v12 = vsel %vm1160_vm7, %v1128_v13, %v1192_v38  ;;  %v1129_v23 = vadd.f32 %v11514_v30, %v1092_v21  ;;  %vm1163_vm13 = vcmp.gt.f32.partialorder %v11593_v35, 0.0  ;;  %v8695_v16 = vld [vmem:[#allocation9 + $0x48] sm:$0xf] }
 0x324   :  { %v1221_v41 = vsel %vm1157_vm10, %v1125_v61, %v1189_v1  ;;  %v11681_v53 = vpack.c.bf16 %v1224_v12, %v1222_v11  ;;  %v1223_v45 = vsel %vm1159_vm11, %v1127_v59, %v1191_v18  ;;  %vm1162_vm14 = vcmp.gt.f32.partialorder %v1130_v54, 0.0  ;;  %v10241_v59 = vld [vmem:[#allocation9 + $0x4c] sm:$0xf]  ;;  %v10243_v47 = vld [vmem:[#allocation9 + $0x54] sm:$0xf0] }
 0x325   :  { %v1194_v25 = vmul.f32 0.2, %v1130_v54  ;;  %v11683_v15 = vpack.c.bf16 %v1223_v45, %v1221_v41  ;;  %v1228_v5 = vsel %vm1164_vm12, %v11534_v6, %v1196_v58  ;;  %vm1161_vm15 = vcmp.gt.f32.partialorder %v1129_v23, 0.0  ;;  %v10273_v62 = vld [vmem:[#allocation9 + $0x14c] sm:$0xf] }
 0x326   :  { %v1193_v49 = vmul.f32 0.2, %v1129_v23  ;;  %v1195_v56 = vmul.f32 0.2, %v11593_v35  ;;  %v8716_v6 = vor.u32 %v10245_v57, %v8713_v20  ;;  %v8840_v13 = vor.u32 %v10279_v31, %v8839_v50  ;;  %v8825_v27 = vld [vmem:[#allocation9 + $0x158] sm:$0xf0] }
 0x327   :  { %v1226_v34 = vsel %vm1162_vm14, %v1130_v54, %v1194_v25  ;;  %v8712_v4 = vor.u32 %v10247_v14, %v8711_v37  ;;  %v8700_v51 = vor.u32 %v10241_v59, %v8697_v52  ;;  %v8824_v36 = vor.u32 %v10275_v8, %v8823_v3  ;;  %v10237_v9 = vld [vmem:[#allocation9 + $0x2c] sm:$0xf]  ;;  %v8681_v11 = vld [vmem:[#allocation9 + $0x38] sm:$0xf0]  ;;  %v8807_v39 = vld [vmem:[#allocation9 + $0x128] sm:$0xf] }
 0x328   :  { %v11687_v7 = vpack.c.bf16 %v1228_v5, %v1226_v34  ;;  %v1225_v43 = vsel %vm1161_vm15, %v1129_v23, %v1193_v49  ;;  %v1227_v30 = vsel %vm1163_vm13, %v11593_v35, %v1195_v56  ;;  %v10277_v35 = vld [vmem:[#allocation9 + $0x16c] sm:$0xf]  ;;  %1938 = vmatpush.bf16.msrb.mxu3 %v8716_v6  ;;  %1889 = vmatpush.bf16.msrb.mxu2 %v8840_v13  ;;  %v10271_v10 = vld [vmem:[#allocation9 + $0x134] sm:$0xf0]  ;;  %v8679_v63 = vld [vmem:[#allocation9 + $0x28] sm:$0xf] }
 0x329   :  { %v11690_v40 = vpack.c.bf16 %v1227_v30, %v1225_v43  ;;  %v8844_v61 = vor.u32 %v10277_v35, %v8841_v19  ;;  %1840 = vmatpush.bf16.msrb.mxu0 %v8712_v4  ;;  %v8696_v21 = vor.u32 %v10243_v47, %v8695_v16  ;;  %v8828_v0 = vor.u32 %v10273_v62, %v8825_v27  ;;  %v10239_v2 = vld [vmem:[#allocation9 + $0x34] sm:$0xf0]  ;;  %v10269_v18 = vld [vmem:[#allocation9 + $0x12c] sm:$0xf]  ;;  %v8809_v54 = vld [vmem:[#allocation9 + $0x138] sm:$0xf0] }
 0x32a   :  { %v8684_v28 = vor.u32 %v10237_v9, %v8681_v11  ;;  %v8808_v38 = vor.u32 %v10271_v10, %v8807_v39  ;;  %v8680_v1 = vor.u32 %v10239_v2, %v8679_v63  ;;  %v8812_v58 = vor.u32 %v10269_v18, %v8809_v54  ;;  %v10233_v12 = vld [vmem:[#allocation9 + $0xc] sm:$0xf]  ;;  %v8665_v41 = vld [vmem:[#allocation9 + $0x18] sm:$0xf0]  ;;  %v8791_v23 = vld [vmem:[#allocation9 + $0x108] sm:$0xf] }
 0x32b   :  { %1987 = vmatpush.bf16.msrb.mxu1 %v8844_v61  ;;  %v8668_v45 = vor.u32 %v10233_v12, %v8665_v41  ;;  %v10267_v25 = vld [vmem:[#allocation9 + $0x114] sm:$0xf0]  ;;  %v8663_v5 = vld [vmem:[#allocation9 + $0x8] sm:$0xf]  ;;  %v10265_v43 = vld [vmem:[#allocation9 + $0x10c] sm:$0xf] }
 0x32c   :  { %1939 = vmatpush.bf16.msrb.mxu3 %v8700_v51  ;;  %1890 = vmatpush.bf16.msrb.mxu2 %v8824_v36  ;;  %v10235_v49 = vld [vmem:[#allocation9 + $0x14] sm:$0xf0]  ;;  %v8792_v34 = vor.u32 %v10267_v25, %v8791_v23  ;;  %v8793_v30 = vld [vmem:[#allocation9 + $0x118] sm:$0xf0] }
 0x32d   :  { %1841 = vmatpush.bf16.msrb.mxu0 %v8696_v21  ;;  %v8664_v56 = vor.u32 %v10235_v49, %v8663_v5  ;;  %v8796_v57 = vor.u32 %v10265_v43, %v8793_v30  ;;  %v11719_v6 = vld [vmem:[%s16158_s7 + $0x4] ss:$8 sm:$0xf] }
 0x32e   :  { %v11722_v37 = vperm.slane %v11719_v6, 0 }
 0x32f   :  { %1658 = vmatmul.bf16.gmra.mxu0 %v11622_v32  ;;  %1756 = vmatmul.bf16.gmra.mxu3 %v11622_v32 }
 0x330   :  { %1988 = vmatpush.bf16.msrb.mxu1 %v8828_v0  ;;  %1940 = vmatpush.bf16.msrb.mxu3 %v8684_v28 }
 0x331   :  { %1712 = vmatmul.bf16.gmra.mxu2 %v11601_v60  ;;  %1810 = vmatmul.bf16.gmra.mxu1 %v11601_v60 }
 0x332   :  { %1891 = vmatpush.bf16.msrb.mxu2 %v8808_v38  ;;  %1842 = vmatpush.bf16.msrb.mxu0 %v8680_v1 }
 0x334   :  { %1989 = vmatpush.bf16.msrb.mxu1 %v8812_v58  ;;  %1941 = vmatpush.bf16.msrb.mxu3 %v8668_v45 }
 0x336   :  { %1892 = vmatpush.bf16.msrb.mxu2 %v8792_v34  ;;  %1843 = vmatpush.bf16.msrb.mxu0 %v8664_v56 }
 0x338   :  { %1990 = vmatpush.bf16.msrb.mxu1 %v8796_v57 }
 0x33f   :  { %1663 = vmatmul.bf16.gmra.mxu0 %v11635_v48  ;;  %1761 = vmatmul.bf16.gmra.mxu3 %v11635_v48 }
 0x341   :  { %1717 = vmatmul.bf16.gmra.mxu2 %v11638_v44  ;;  %1815 = vmatmul.bf16.gmra.mxu1 %v11638_v44 }
 0x34f   :  { %1668 = vmatmul.bf16.gmra.mxu0 %v11649_v17  ;;  %1766 = vmatmul.bf16.gmra.mxu3 %v11649_v17 }
 0x351   :  { %1722 = vmatmul.bf16.gmra.mxu2 %v11660_v26  ;;  %1820 = vmatmul.bf16.gmra.mxu1 %v11660_v26 }
 0x35f   :  { %1673 = vmatmul.bf16.gmra.mxu0 %v11671_v24  ;;  %1771 = vmatmul.bf16.gmra.mxu3 %v11671_v24 }
 0x361   :  { %1727 = vmatmul.bf16.gmra.mxu2 %v11681_v53  ;;  %1825 = vmatmul.bf16.gmra.mxu1 %v11681_v53 }
 0x36f   :  { %1678 = vmatmul.bf16.gmra.mxu0 %v11683_v15  ;;  %1776 = vmatmul.bf16.gmra.mxu3 %v11683_v15 }
 0x371   :  { %1732 = vmatmul.bf16.gmra.mxu2 %v11687_v7  ;;  %1830 = vmatmul.bf16.gmra.mxu1 %v11687_v7 }
 0x37e   :  { %v1796_v20 = vpop.f32.mrf.mxu1 }
 0x37f   :  { %1683 = vmatmul.bf16.gmra.mxu0 %v11690_v40  ;;  %1781 = vmatmul.bf16.gmra.mxu3 %v11690_v40 }
 0x381   :  { %1893 = vmatmul.bf16.vlgmr.msrb.gmra.mxu2 %v11545_v42  ;;  %1991 = vmatmul.bf16.vlgmr.msrb.gmra.mxu1 %v11545_v42  ;;  %v11730_v42 = vperm.slane %v11719_v6, 1 }
 0x384   :  { %v1698_v50 = vpop.f32.mrf.mxu2 }
 0x386   :  { %v1798_v31 = vpop.f32.mrf.mxu1 }
 0x38c   :  { %v1649_v14 = vpop.f32.mrf.mxu0  ;;  %v1700_v13 = vpop.f32.mrf.mxu2 }
 0x38d   :  { %v1650_v4 = vadd.f32 %v1649_v14, %v11722_v37 }
 0x38e   :  { %v1801_v35 = vpop.f32.mrf.mxu1 }
 0x38f   :  { %v11725_v19 = vadd.f32 %v1698_v50, %v1650_v4  ;;  %1844 = vmatmul.bf16.vlgmr.msrb.gmra.mxu0 %v11603_v55  ;;  %1942 = vmatmul.bf16.vlgmr.msrb.gmra.mxu3 %v11603_v55 }
 0x391   :  { %1898 = vmatmul.bf16.gmra.mxu2 %v11547_v46  ;;  %1996 = vmatmul.bf16.gmra.mxu1 %v11547_v46 }
 0x392   :  { %v1747_v61 = vpop.f32.mrf.mxu3 }
 0x393   :  { %v1748_v59 = vadd.f32 %v1747_v61, %v11730_v42 }
 0x394   :  { %v1651_v52 = vpop.f32.mrf.mxu0  ;;  %v1703_v3 = vpop.f32.mrf.mxu2 }
 0x395   :  { %v11735_v51 = vadd.f32 %v1796_v20, %v1748_v59  ;;  %v1652_v8 = vadd.f32 %v1651_v52, %v11722_v37 }
 0x396   :  { %v1803_v16 = vpop.f32.mrf.mxu1 }
 0x397   :  { %v11738_v47 = vadd.f32 %v1700_v13, %v1652_v8 }
 0x399   :  { %v2036_v55 = vadd.f32 %v11738_v47, %v11725_v19 }
 0x39a   :  { %v1749_v36 = vpop.f32.mrf.mxu3 }
 0x39b   :  { %v1750_v21 = vadd.f32 %v1749_v36, %v11730_v42 }
 0x39c   :  { %v1654_v62 = vpop.f32.mrf.mxu0  ;;  %v1705_v46 = vpop.f32.mrf.mxu2 }
 0x39d   :  { %v11743_v27 = vadd.f32 %v1798_v31, %v1750_v21  ;;  %v1655_v0 = vadd.f32 %v1654_v62, %v11722_v37 }
 0x39e   :  { %v1806_v9 = vpop.f32.mrf.mxu1 }
 0x39f   :  { %v2057_v11 = vadd.f32 %v11743_v27, %v11735_v51  ;;  %v11748_v39 = vadd.f32 %v1703_v3, %v1655_v0  ;;  %1849 = vmatmul.bf16.gmra.mxu0 %v11605_v29  ;;  %1947 = vmatmul.bf16.gmra.mxu3 %v11605_v29 }
 0x3a1   :  { %v2037_v28 = vadd.f32 %v2036_v55, %v11748_v39  ;;  %1903 = vmatmul.bf16.gmra.mxu2 %v11570_v22  ;;  %2001 = vmatmul.bf16.gmra.mxu1 %v11570_v22 }
 0x3a2   :  { %v1752_v10 = vpop.f32.mrf.mxu3 }
 0x3a3   :  { %v1753_v63 = vadd.f32 %v1752_v10, %v11730_v42 }
 0x3a4   :  { %v1656_v2 = vpop.f32.mrf.mxu0  ;;  %v1708_v38 = vpop.f32.mrf.mxu2 }
 0x3a5   :  { %v11756_v1 = vadd.f32 %v1801_v35, %v1753_v63  ;;  %v1657_v18 = vadd.f32 %v1656_v2, %v11722_v37 }
 0x3a6   :  { %v1808_v54 = vpop.f32.mrf.mxu1 }
 0x3a7   :  { %v2058_v58 = vadd.f32 %v2057_v11, %v11756_v1  ;;  %v11760_v12 = vadd.f32 %v1705_v46, %v1657_v18 }
 0x3a9   :  { %v2038_v29 = vadd.f32 %v2037_v28, %v11760_v12 }
 0x3aa   :  { %v1754_v41 = vpop.f32.mrf.mxu3 }
 0x3ab   :  { %v1755_v23 = vadd.f32 %v1754_v41, %v11730_v42 }
 0x3ac   :  { %v1659_v22 = vpop.f32.mrf.mxu0  ;;  %v1710_v45 = vpop.f32.mrf.mxu2 }
 0x3ad   :  { %v11764_v25 = vadd.f32 %v1803_v16, %v1755_v23  ;;  %v1660_v5 = vadd.f32 %v1659_v22, %v11722_v37 }
 0x3ae   :  { %v1811_v49 = vpop.f32.mrf.mxu1 }
 0x3af   :  { %v2059_v34 = vadd.f32 %v2058_v58, %v11764_v25  ;;  %v11768_v56 = vadd.f32 %v1708_v38, %v1660_v5  ;;  %1854 = vmatmul.bf16.gmra.mxu0 %v11622_v32  ;;  %1952 = vmatmul.bf16.gmra.mxu3 %v11622_v32 }
 0x3b1   :  { %v2039_v43 = vadd.f32 %v2038_v29, %v11768_v56  ;;  %1908 = vmatmul.bf16.gmra.mxu2 %v11601_v60  ;;  %2006 = vmatmul.bf16.gmra.mxu1 %v11601_v60 }
 0x3b2   :  { %v1757_v30 = vpop.f32.mrf.mxu3 }
 0x3b3   :  { %v1758_v57 = vadd.f32 %v1757_v30, %v11730_v42 }
 0x3b4   :  { %v1661_v20 = vpop.f32.mrf.mxu0  ;;  %v1713_v50 = vpop.f32.mrf.mxu2 }
 0x3b5   :  { %v11776_v31 = vadd.f32 %v1806_v9, %v1758_v57  ;;  %v1662_v14 = vadd.f32 %v1661_v20, %v11722_v37 }
 0x3b6   :  { %v1813_v13 = vpop.f32.mrf.mxu1 }
 0x3b7   :  { %v2060_v4 = vadd.f32 %v2059_v34, %v11776_v31  ;;  %v11780_v35 = vadd.f32 %v1710_v45, %v1662_v14 }
 0x3b9   :  { %v2040_v32 = vadd.f32 %v2039_v43, %v11780_v35 }
 0x3ba   :  { %v1759_v61 = vpop.f32.mrf.mxu3 }
 0x3bb   :  { %v1760_v59 = vadd.f32 %v1759_v61, %v11730_v42 }
 0x3bc   :  { %v1664_v60 = vpop.f32.mrf.mxu0  ;;  %v1715_v52 = vpop.f32.mrf.mxu2 }
 0x3bd   :  { %v11784_v3 = vadd.f32 %v1808_v54, %v1760_v59  ;;  %v1665_v8 = vadd.f32 %v1664_v60, %v11722_v37 }
 0x3be   :  { %v1816_v36 = vpop.f32.mrf.mxu1 }
 0x3bf   :  { %v2061_v16 = vadd.f32 %v2060_v4, %v11784_v3  ;;  %v11788_v55 = vadd.f32 %v1713_v50, %v1665_v8  ;;  %1859 = vmatmul.bf16.gmra.mxu0 %v11635_v48  ;;  %1957 = vmatmul.bf16.gmra.mxu3 %v11635_v48 }
 0x3c1   :  { %v2041_v21 = vadd.f32 %v2040_v32, %v11788_v55  ;;  %1913 = vmatmul.bf16.gmra.mxu2 %v11638_v44  ;;  %2011 = vmatmul.bf16.gmra.mxu1 %v11638_v44 }
 0x3c2   :  { %v1762_v62 = vpop.f32.mrf.mxu3 }
 0x3c3   :  { %v1763_v46 = vadd.f32 %v1762_v62, %v11730_v42 }
 0x3c4   :  { %v1666_v0 = vpop.f32.mrf.mxu0  ;;  %v1718_v9 = vpop.f32.mrf.mxu2 }
 0x3c5   :  { %v11796_v11 = vadd.f32 %v1811_v49, %v1763_v46  ;;  %v1667_v28 = vadd.f32 %v1666_v0, %v11722_v37 }
 0x3c6   :  { %v1818_v2 = vpop.f32.mrf.mxu1 }
 0x3c7   :  { %v2062_v10 = vadd.f32 %v2061_v16, %v11796_v11  ;;  %v11800_v63 = vadd.f32 %v1715_v52, %v1667_v28 }
 0x3c9   :  { %v2042_v48 = vadd.f32 %v2041_v21, %v11800_v63 }
 0x3ca   :  { %v1764_v38 = vpop.f32.mrf.mxu3 }
 0x3cb   :  { %v1765_v18 = vadd.f32 %v1764_v38, %v11730_v42 }
 0x3cc   :  { %v1669_v44 = vpop.f32.mrf.mxu0  ;;  %v1720_v54 = vpop.f32.mrf.mxu2 }
 0x3cd   :  { %v11804_v58 = vadd.f32 %v1813_v13, %v1765_v18  ;;  %v1670_v29 = vadd.f32 %v1669_v44, %v11722_v37 }
 0x3ce   :  { %v1821_v49 = vpop.f32.mrf.mxu1 }
 0x3cf   :  { %v2063_v41 = vadd.f32 %v2062_v10, %v11804_v58  ;;  %v11808_v23 = vadd.f32 %v1718_v9, %v1670_v29  ;;  %1864 = vmatmul.bf16.gmra.mxu0 %v11649_v17  ;;  %1962 = vmatmul.bf16.gmra.mxu3 %v11649_v17 }
 0x3d1   :  { %v2043_v22 = vadd.f32 %v2042_v48, %v11808_v23  ;;  %1918 = vmatmul.bf16.gmra.mxu2 %v11660_v26  ;;  %2016 = vmatmul.bf16.gmra.mxu1 %v11660_v26 }
 0x3d2   :  { %v1767_v45 = vpop.f32.mrf.mxu3 }
 0x3d3   :  { %v1768_v5 = vadd.f32 %v1767_v45, %v11730_v42 }
 0x3d4   :  { %v1671_v34 = vpop.f32.mrf.mxu0  ;;  %v1723_v43 = vpop.f32.mrf.mxu2 }
 0x3d5   :  { %v11816_v30 = vadd.f32 %v1816_v36, %v1768_v5  ;;  %v1672_v57 = vadd.f32 %v1671_v34, %v11722_v37 }
 0x3d6   :  { %v1823_v61 = vpop.f32.mrf.mxu1 }
 0x3d7   :  { %v2064_v20 = vadd.f32 %v2063_v41, %v11816_v30  ;;  %v11820_v50 = vadd.f32 %v1720_v54, %v1672_v57 }
 0x3d9   :  { %v2044_v17 = vadd.f32 %v2043_v22, %v11820_v50 }
 0x3da   :  { %v1769_v14 = vpop.f32.mrf.mxu3 }
 0x3db   :  { %v1770_v13 = vadd.f32 %v1769_v14, %v11730_v42 }
 0x3dc   :  { %v1674_v26 = vpop.f32.mrf.mxu0  ;;  %v1725_v59 = vpop.f32.mrf.mxu2 }
 0x3dd   :  { %v11824_v4 = vadd.f32 %v1818_v2, %v1770_v13  ;;  %v1675_v32 = vadd.f32 %v1674_v26, %v11722_v37 }
 0x3de   :  { %v1826_v28 = vpop.f32.mrf.mxu1 }
 0x3df   :  { %v2065_v60 = vadd.f32 %v2064_v20, %v11824_v4  ;;  %v11828_v52 = vadd.f32 %v1723_v43, %v1675_v32  ;;  %1869 = vmatmul.bf16.gmra.mxu0 %v11671_v24  ;;  %1967 = vmatmul.bf16.gmra.mxu3 %v11671_v24 }
 0x3e1   :  { %v2045_v8 = vadd.f32 %v2044_v17, %v11828_v52  ;;  %1923 = vmatmul.bf16.gmra.mxu2 %v11681_v53  ;;  %2021 = vmatmul.bf16.gmra.mxu1 %v11681_v53 }
 0x3e2   :  { %v1772_v16 = vpop.f32.mrf.mxu3 }
 0x3e3   :  { %v1773_v36 = vadd.f32 %v1772_v16, %v11730_v42 }
 0x3e4   :  { %v1676_v21 = vpop.f32.mrf.mxu0  ;;  %v1728_v24 = vpop.f32.mrf.mxu2 }
 0x3e5   :  { %v11836_v62 = vadd.f32 %v1821_v49, %v1773_v36  ;;  %v1677_v46 = vadd.f32 %v1676_v21, %v11722_v37 }
 0x3e6   :  { %v1828_v41 = vpop.f32.mrf.mxu1 }
 0x3e7   :  { %v2066_v0 = vadd.f32 %v2065_v60, %v11836_v62  ;;  %v11840_v9 = vadd.f32 %v1725_v59, %v1677_v46 }
 0x3e9   :  { %v2046_v10 = vadd.f32 %v2045_v8, %v11840_v9 }
 0x3ea   :  { %v1774_v48 = vpop.f32.mrf.mxu3 }
 0x3eb   :  { %v1775_v2 = vadd.f32 %v1774_v48, %v11730_v42 }
 0x3ec   :  { %v1679_v53 = vpop.f32.mrf.mxu0  ;;  %v1730_v45 = vpop.f32.mrf.mxu2 }
 0x3ed   :  { %v11844_v38 = vadd.f32 %v1823_v61, %v1775_v2  ;;  %v1680_v18 = vadd.f32 %v1679_v53, %v11722_v37 }
 0x3ee   :  { %v1831_v14 = vpop.f32.mrf.mxu1 }
 0x3ef   :  { %v2067_v44 = vadd.f32 %v2066_v0, %v11844_v38  ;;  %v11848_v54 = vadd.f32 %v1728_v24, %v1680_v18  ;;  %1874 = vmatmul.bf16.gmra.mxu0 %v11683_v15  ;;  %1972 = vmatmul.bf16.gmra.mxu3 %v11683_v15 }
 0x3f1   :  { %v2047_v29 = vadd.f32 %v2046_v10, %v11848_v54  ;;  %1928 = vmatmul.bf16.gmra.mxu2 %v11687_v7  ;;  %2026 = vmatmul.bf16.gmra.mxu1 %v11687_v7 }
 0x3f2   :  { %v1777_v22 = vpop.f32.mrf.mxu3 }
 0x3f3   :  { %v1778_v5 = vadd.f32 %v1777_v22, %v11730_v42 }
 0x3f4   :  { %v1681_v49 = vpop.f32.mrf.mxu0  ;;  %v1733_v32 = vpop.f32.mrf.mxu2 }
 0x3f5   :  { %v11856_v34 = vadd.f32 %v1826_v28, %v1778_v5  ;;  %v1682_v43 = vadd.f32 %v1681_v49, %v11722_v37 }
 0x3f6   :  { %v1833_v46 = vpop.f32.mrf.mxu1 }
 0x3f7   :  { %v2068_v57 = vadd.f32 %v2067_v44, %v11856_v34  ;;  %v1731_v20 = vadd.f32 %v1730_v45, %v1682_v43 }
 0x3f9   :  { %v2048_v15 = vadd.f32 %v2047_v29, %v1731_v20 }
 0x3fa   :  { %v1779_v17 = vpop.f32.mrf.mxu3 }
 0x3fb   :  { %v1780_v13 = vadd.f32 %v1779_v17, %v11730_v42 }
 0x3fc   :  { %v1684_v26 = vpop.f32.mrf.mxu0  ;;  %v1735_v24 = vpop.f32.mrf.mxu2 }
 0x3fd   :  { %v11861_v7 = vadd.f32 %v1828_v41, %v1780_v13  ;;  %v1685_v61 = vadd.f32 %v1684_v26, %v11722_v37 }
 0x3fe   :  { %v11875_v22 = vpop.f32.mrf.mxu1 }
 0x3ff   :  { %v2069_v59 = vadd.f32 %v2068_v57, %v11861_v7  ;;  %v1734_v60 = vadd.f32 %v1733_v32, %v1685_v61  ;;  %1879 = vmatmul.bf16.gmra.mxu0 %v11690_v40  ;;  %1977 = vmatmul.bf16.gmra.mxu3 %v11690_v40 }
 0x401   :  { %v2049_v8 = vadd.f32 %v2048_v15, %v1734_v60 }
 0x402   :  { %v1782_v16 = vpop.f32.mrf.mxu3 }
 0x403   :  { %v1783_v36 = vadd.f32 %v1782_v16, %v11730_v42 }
 0x404   :  { %v1686_v21 = vpop.f32.mrf.mxu0 }
 0x405   :  { %v11868_v0 = vadd.f32 %v1831_v14, %v1783_v36  ;;  %v1687_v28 = vadd.f32 %v1686_v21, %v11722_v37  ;;  %v1894_v14 = vpop.f32.mrf.mxu2 }
 0x407   :  { %v2070_v10 = vadd.f32 %v2069_v59, %v11868_v0  ;;  %v1736_v48 = vadd.f32 %v1735_v24, %v1687_v28 }
 0x409   :  { %v2050_v2 = vadd.f32 %v2049_v8, %v1736_v48  ;;  %v1994_v8 = vpop.f32.mrf.mxu1 }
 0x40a   :  { %v1784_v18 = vpop.f32.mrf.mxu3 }
 0x40b   :  { %v2051_v53 = vrot.slane %v2050_v2, 4  ;;  %v1785_v44 = vadd.f32 %v1784_v18, %v11730_v42  ;;  %v11880_v42 = vperm.slane %v11719_v6, 2 }
 0x40c   :  { %v1845_v17 = vpop.f32.mrf.mxu0 }
 0x40d   :  { %v2052_v40 = vadd.f32 %v2051_v53, %v2050_v2  ;;  %v11873_v29 = vadd.f32 %v1833_v46, %v1785_v44  ;;  %v1846_v28 = vadd.f32 %v1845_v17, %v11880_v42  ;;  %v11941_v44 = vperm.slane %v11719_v6, 3 }
 0x40f   :  { %v2053_v41 = vrot.slane %v2052_v40, 2  ;;  %v2071_v45 = vadd.f32 %v2070_v10, %v11873_v29  ;;  %v1896_v10 = vpop.f32.mrf.mxu2 }
 0x411   :  { %v2054_v5 = vadd.f32 %v2053_v41, %v2052_v40  ;;  %v2072_v49 = vrot.slane %v2071_v45, 4 }
 0x413   :  { %v2055_v37 = vrot.slane %v2054_v5, 1  ;;  %v2073_v43 = vadd.f32 %v2072_v49, %v2071_v45 }
 0x414   :  { %v1847_v24 = vpop.f32.mrf.mxu0 }
 0x415   :  { %v2056_v57 = vadd.f32 %v2055_v37, %v2054_v5  ;;  %v2074_v13 = vrot.slane %v2073_v43, 2  ;;  %v1848_v40 = vadd.f32 %v1847_v24, %v11880_v42 }
 0x417   :  { %v2120_v15 = vmul.f32 %v2056_v57, %v11264_v33  ;;  %v1899_v17 = vpop.f32.mrf.mxu2 }
 0x419   :  { %v11883_v26 = vsub.f32 %v11725_v19, %v2120_v15  ;;  %v11886_v32 = vsub.f32 %v11738_v47, %v2120_v15  ;;  %v11889_v61 = vsub.f32 %v11748_v39, %v2120_v15  ;;  %v11892_v59 = vsub.f32 %v11760_v12, %v2120_v15 }
 0x41a   :  { %v11895_v16 = vsub.f32 %v11768_v56, %v2120_v15  ;;  %v11898_v36 = vsub.f32 %v11780_v35, %v2120_v15  ;;  %v11901_v21 = vsub.f32 %v11788_v55, %v2120_v15  ;;  %v11904_v19 = vsub.f32 %v11800_v63, %v2120_v15 }
 0x41b   :  { %v11907_v47 = vsub.f32 %v11808_v23, %v2120_v15  ;;  %v11910_v39 = vsub.f32 %v11820_v50, %v2120_v15  ;;  %v11913_v12 = vsub.f32 %v11828_v52, %v2120_v15  ;;  %v11916_v56 = vsub.f32 %v11840_v9, %v2120_v15  ;;  %v1943_v52 = vpop.f32.mrf.mxu3 }
 0x41c   :  { %v11919_v35 = vsub.f32 %v11848_v54, %v2120_v15  ;;  %v11921_v55 = vsub.f32 %v1731_v20, %v2120_v15  ;;  %v11923_v46 = vsub.f32 %v1734_v60, %v2120_v15  ;;  %v11925_v63 = vsub.f32 %v1736_v48, %v2120_v15  ;;  %v11934_v60 = vpop.f32.mrf.mxu1  ;;  %v1850_v15 = vpop.f32.mrf.mxu0 }
 0x41d   :  { %v2188_v23 = vmul.f32 %v11883_v26, %v11883_v26  ;;  %v2192_v50 = vmul.f32 %v11886_v32, %v11886_v32  ;;  %v2075_v9 = vadd.f32 %v2074_v13, %v2073_v43  ;;  %v2196_v54 = vmul.f32 %v11889_v61, %v11889_v61 }
 0x41e   :  { %v11936_v48 = vadd.f32 %v1894_v14, %v1846_v28  ;;  %v2200_v2 = vmul.f32 %v11892_v59, %v11892_v59  ;;  %v2204_v41 = vmul.f32 %v11895_v16, %v11895_v16  ;;  %v2208_v49 = vmul.f32 %v11898_v36, %v11898_v36 }
 0x41f   :  { %v2252_v20 = vadd.f32 %v2192_v50, %v2188_v23  ;;  %v2076_v18 = vrot.slane %v2075_v9, 1  ;;  %v2212_v37 = vmul.f32 %v11901_v21, %v11901_v21  ;;  %v1944_v6 = vadd.f32 %v1943_v52, %v11941_v44 }
 0x420   :  { %16290 = vst [vmem:[#allocation23_spill] sm:$0xff] %v11936_v48  ;;  %v11951_v14 = vadd.f32 %v1896_v10, %v1848_v40  ;;  %v1851_v23 = vadd.f32 %v1850_v15, %v11880_v42  ;;  %v2216_v50 = vmul.f32 %v11904_v19, %v11904_v19  ;;  %v2220_v28 = vmul.f32 %v11907_v47, %v11907_v47 }
 0x421   :  { %v2253_v53 = vadd.f32 %v2252_v20, %v2196_v54  ;;  %v2077_v57 = vadd.f32 %v2076_v18, %v2075_v9  ;;  %v11963_v20 = vadd.f32 %v11875_v22, %v1944_v6 }
 0x422   :  { %16291 = vst [vmem:[#allocation24_spill] sm:$0xff] %v11951_v14  ;;  %v2078_v52 = vadd.f32 %v11951_v14, %v11936_v48 }
 0x423   :  { %v2254_v45 = vadd.f32 %v2253_v53, %v2200_v2  ;;  %v1945_v5 = vpop.f32.mrf.mxu3  ;;  %v2121_v54 = vmul.f32 %v2077_v57, %v11264_v33  ;;  %16292 = vst [vmem:[#allocation21_spill] sm:$0xff] %v11963_v20  ;;  %v11969_v2 = vadd.f32 %v1899_v17, %v1851_v23  ;;  %v1901_v57 = vpop.f32.mrf.mxu2  ;;  %v2236_v23 = vmul.f32 %v11919_v35, %v11919_v35 }
 0x424   :  { %v1946_v13 = vadd.f32 %v1945_v5, %v11941_v44  ;;  %v11960_v9 = vpop.f32.mrf.mxu1 }
 0x425   :  { %v2255_v43 = vadd.f32 %v2254_v45, %v2204_v41  ;;  %16294 = vst [vmem:[#allocation25_spill] sm:$0xff] %v11969_v2  ;;  %v11972_v18 = vsub.f32 %v11735_v51, %v2121_v54  ;;  %v11975_v40 = vsub.f32 %v11743_v27, %v2121_v54  ;;  %v11978_v41 = vsub.f32 %v11756_v1, %v2121_v54 }
 0x426   :  { %v11967_v10 = vadd.f32 %v1994_v8, %v1946_v13  ;;  %v11981_v22 = vsub.f32 %v11764_v25, %v2121_v54  ;;  %v11984_v45 = vsub.f32 %v11776_v31, %v2121_v54  ;;  %v11987_v8 = vsub.f32 %v11784_v3, %v2121_v54 }
 0x427   :  { %v2256_v24 = vadd.f32 %v2255_v43, %v2208_v49  ;;  %v11990_v5 = vsub.f32 %v11796_v11, %v2121_v54  ;;  %v11993_v49 = vsub.f32 %v11804_v58, %v2121_v54  ;;  %v11996_v27 = vsub.f32 %v11816_v30, %v2121_v54 }
 0x428   :  { %16293 = vst [vmem:[#allocation22_spill] sm:$0xff] %v11967_v10  ;;  %v11999_v1 = vsub.f32 %v11824_v4, %v2121_v54  ;;  %v12002_v31 = vsub.f32 %v11836_v62, %v2121_v54  ;;  %v12005_v3 = vsub.f32 %v11844_v38, %v2121_v54  ;;  %v12008_v11 = vsub.f32 %v11856_v34, %v2121_v54  ;;  %v1852_v62 = vpop.f32.mrf.mxu0 }
 0x429   :  { %v2257_v53 = vadd.f32 %v2256_v24, %v2212_v37  ;;  %v12011_v37 = vsub.f32 %v11861_v7, %v2121_v54  ;;  %v2224_v58 = vmul.f32 %v11910_v39, %v11910_v39  ;;  %v12016_v4 = vsub.f32 %v11868_v0, %v2121_v54 }
 0x42a   :  { %v12019_v43 = vsub.f32 %v11873_v29, %v2121_v54  ;;  %v2189_v38 = vmul.f32 %v11972_v18, %v11972_v18  ;;  %v2193_v34 = vmul.f32 %v11975_v40, %v11975_v40  ;;  %v2228_v7 = vmul.f32 %v11913_v12, %v11913_v12 }
 0x42b   :  { %v2258_v51 = vadd.f32 %v2257_v53, %v2216_v50  ;;  %v1948_v25 = vpop.f32.mrf.mxu3  ;;  %16295 = vst [vmem:[#allocation26_spill] sm:$0xff] %v12011_v37  ;;  %v2232_v0 = vmul.f32 %v11916_v56, %v11916_v56  ;;  %v2197_v29 = vmul.f32 %v11978_v41, %v11978_v41  ;;  %v2201_v24 = vmul.f32 %v11981_v22, %v11981_v22 }
 0x42c   :  { %16296 = vst [vmem:[#allocation27_spill] sm:$0xff] %v12016_v4  ;;  %v2002_v17 = vpop.f32.mrf.mxu1  ;;  %v2273_v13 = vadd.f32 %v2193_v34, %v2189_v38  ;;  %v2240_v53 = vmul.f32 %v11921_v55, %v11921_v55  ;;  %v2244_v38 = vmul.f32 %v11923_v46, %v11923_v46  ;;  %v1853_v14 = vadd.f32 %v1852_v62, %v11880_v42 }
 0x42d   :  { %v2259_v30 = vadd.f32 %v2258_v51, %v2220_v28  ;;  %16297 = vst [vmem:[#allocation28_spill] sm:$0xff] %v12019_v43  ;;  %v2217_v62 = vmul.f32 %v11993_v49, %v11993_v49 }
 0x42e   :  { %v2274_v54 = vadd.f32 %v2273_v13, %v2197_v29 }
 0x42f   :  { %v2260_v15 = vadd.f32 %v2259_v30, %v2224_v58  ;;  %v1904_v30 = vpop.f32.mrf.mxu2 }
 0x430   :  { %v1855_v58 = vpop.f32.mrf.mxu0 }
 0x431   :  { %v2261_v6 = vadd.f32 %v2260_v15, %v2228_v7  ;;  %v2205_v7 = vmul.f32 %v11984_v45, %v11984_v45  ;;  %v2275_v15 = vadd.f32 %v2274_v54, %v2201_v24  ;;  %v2248_v24 = vmul.f32 %v11925_v63, %v11925_v63 }
 0x433   :  { %v2262_v50 = vadd.f32 %v2261_v6, %v2232_v0  ;;  %v1950_v28 = vpop.f32.mrf.mxu3  ;;  %v2209_v0 = vmul.f32 %v11987_v8, %v11987_v8  ;;  %v2099_v6 = vadd.f32 %v11967_v10, %v11963_v20  ;;  %v2276_v13 = vadd.f32 %v2275_v15, %v2205_v7 }
 0x434   :  { %v12045_v29 = vpop.f32.mrf.mxu1  ;;  %v2213_v10 = vmul.f32 %v11990_v5, %v11990_v5 }
 0x435   :  { %v2263_v51 = vadd.f32 %v2262_v50, %v2236_v23  ;;  %v2079_v23 = vadd.f32 %v2078_v52, %v11969_v2  ;;  %v1949_v50 = vadd.f32 %v1948_v25, %v11941_v44  ;;  %v2277_v20 = vadd.f32 %v2276_v13, %v2209_v0 }
 0x436   :  { %v12059_v52 = vadd.f32 %v1901_v57, %v1853_v14  ;;  %v2221_v14 = vmul.f32 %v11996_v27, %v11996_v27 }
 0x437   :  { %v2264_v34 = vadd.f32 %v2263_v51, %v2240_v53  ;;  %v1951_v53 = vadd.f32 %v1950_v28, %v11941_v44  ;;  %v1856_v51 = vadd.f32 %v1855_v58, %v11880_v42  ;;  %v12057_v7 = vadd.f32 %v11934_v60, %v1949_v50  ;;  %v12073_v50 = vpop.f32.mrf.mxu2 }
 0x438   :  { %16299 = vst [vmem:[#allocation30_spill] sm:$0xff] %v12059_v52  ;;  %v2278_v58 = vadd.f32 %v2277_v20, %v2213_v10  ;;  %v2080_v0 = vadd.f32 %v2079_v23, %v12059_v52  ;;  %v1857_v57 = vpop.f32.mrf.mxu0  ;;  %v2225_v23 = vmul.f32 %v11999_v1, %v11999_v1 }
 0x439   :  { %v2265_v54 = vadd.f32 %v2264_v34, %v2244_v38  ;;  %16298 = vst [vmem:[#allocation29_spill] sm:$0xff] %v12057_v7  ;;  %v12064_v15 = vadd.f32 %v11960_v9, %v1951_v53  ;;  %v12066_v38 = vadd.f32 %v1904_v30, %v1856_v51  ;;  %v2100_v34 = vadd.f32 %v2099_v6, %v12057_v7 }
 0x43b   :  { %v2266_v25 = vadd.f32 %v2265_v54, %v2248_v24  ;;  %16300 = vst [vmem:[#allocation31_spill] sm:$0xff] %v12064_v15  ;;  %v1953_v28 = vpop.f32.mrf.mxu3  ;;  %v2279_v24 = vadd.f32 %v2278_v58, %v2217_v62  ;;  %v2101_v9 = vadd.f32 %v2100_v34, %v12064_v15  ;;  %v12077_v30 = vadd.f32 %v2080_v0, %v12066_v38 }
 0x43c   :  { %16301 = vst [vmem:[#allocation32_spill] sm:$0xff] %v12066_v38  ;;  %v1954_v60 = vadd.f32 %v1953_v28, %v11941_v44  ;;  %v12081_v6 = vpop.f32.mrf.mxu1  ;;  %v2229_v62 = vmul.f32 %v12002_v31, %v12002_v31 }
 0x43d   :  { %v2267_v13 = vrot.slane %v2266_v25, 4  ;;  %v2280_v54 = vadd.f32 %v2279_v24, %v2221_v14  ;;  %v2237_v14 = vmul.f32 %v12008_v11, %v12008_v11 }
 0x43e   :  { %v12079_v20 = vadd.f32 %v2002_v17, %v1954_v60  ;;  %v2233_v17 = vmul.f32 %v12005_v3, %v12005_v3 }
 0x43f   :  { %v2268_v10 = vadd.f32 %v2267_v13, %v2266_v25  ;;  %v2281_v28 = vadd.f32 %v2280_v54, %v2225_v23  ;;  %v12092_v13 = vpop.f32.mrf.mxu2  ;;  %v2241_v23 = vmul.f32 %v12011_v37, %v12011_v37  ;;  %v12103_v54 = vld [vmem:[%s16158_s7 + $0x5] ss:$8 sm:$0xf] }
 0x440   :  { %16302 = vst [vmem:[#allocation33_spill] sm:$0xff] %v12079_v20  ;;  %v12086_v53 = vadd.f32 %v2101_v9, %v12079_v20  ;;  %v1860_v60 = vpop.f32.mrf.mxu0 }
 0x441   :  { %v2269_v51 = vrot.slane %v2268_v10, 2  ;;  %v2282_v25 = vadd.f32 %v2281_v28, %v2229_v62  ;;  %16303 = vst [vmem:[#allocation34_spill] sm:$0xff] %v12103_v54  ;;  %v2245_v62 = vmul.f32 %v12016_v4, %v12016_v4 }
 0x443   :  { %v2270_v58 = vadd.f32 %v2269_v51, %v2268_v10  ;;  %v1955_v34 = vpop.f32.mrf.mxu3  ;;  %v2283_v24 = vadd.f32 %v2282_v25, %v2233_v17  ;;  %v2341_v17 = vperm.slane %v12103_v54, 0  ;;  %v2249_v25 = vmul.f32 %v12019_v43, %v12019_v43 }
 0x444   :  { %v12096_v20 = vpop.f32.mrf.mxu1  ;;  %v1956_v2 = vadd.f32 %v1955_v34, %v11941_v44 }
 0x445   :  { %v2271_v0 = vrot.slane %v2270_v58, 1  ;;  %v2284_v10 = vadd.f32 %v2283_v24, %v2237_v14  ;;  %v12160_v48 = vmul.f32 %v2341_v17, %v11919_v35 }
 0x447   :  { %v2272_v9 = vadd.f32 %v2271_v0, %v2270_v58  ;;  %v2285_v28 = vadd.f32 %v2284_v10, %v2241_v23  ;;  %v12114_v24 = vpop.f32.mrf.mxu2  ;;  %v12120_v23 = vmul.f32 %v2341_v17, %v11883_v26  ;;  %v12123_v10 = vmul.f32 %v2341_v17, %v11886_v32 }
 0x448   :  { %v1862_v14 = vpop.f32.mrf.mxu0  ;;  %v12140_v26 = vmul.f32 %v2341_v17, %v11901_v21  ;;  %v12143_v32 = vmul.f32 %v2341_v17, %v11904_v19  ;;  %v1858_v21 = vadd.f32 %v1857_v57, %v11880_v42 }
 0x449   :  { %v2336_v51 = vmul.f32 %v2272_v9, %v11264_v33  ;;  %v2286_v0 = vadd.f32 %v2285_v28, %v2245_v62  ;;  %v12117_v9 = vperm.slane %v12103_v54, 1  ;;  %v12131_v28 = vmul.f32 %v2341_v17, %v11892_v59 }
 0x44a   :  { %v12149_v54 = vmul.f32 %v2341_v17, %v11910_v39 }
 0x44b   :  { %v12108_v15 = vadd.f32 0.8, %v2336_v51  ;;  %v1958_v58 = vpop.f32.mrf.mxu3  ;;  %v2287_v7 = vadd.f32 %v2286_v0, %v2249_v25  ;;  %v12126_v51 = vmul.f32 %v2341_v17, %v11889_v61  ;;  %v12134_v25 = vmul.f32 %v2341_v17, %v11895_v16 }
 0x44c   :  { %v12128_v62 = vpop.f32.mrf.mxu1  ;;  %v12137_v0 = vmul.f32 %v2341_v17, %v11898_v36  ;;  %v12146_v61 = vmul.f32 %v2341_v17, %v11907_v47  ;;  %v12152_v16 = vmul.f32 %v2341_v17, %v11913_v12  ;;  %v12155_v36 = vmul.f32 %v2341_v17, %v11916_v56 }
 0x44d   :  { %10647 = vrsqrt.f32 %v12108_v15  ;;  %v2288_v38 = vrot.slane %v2287_v7, 4  ;;  %v12163_v47 = vmul.f32 %v2341_v17, %v11921_v55  ;;  %v2405_v12 = vmul.f32 %v2341_v17, %v11923_v46 }
 0x44e   :  { %v1861_v56 = vadd.f32 %v1860_v60, %v11880_v42  ;;  %v1959_v57 = vadd.f32 %v1958_v58, %v11941_v44  ;;  %v12172_v35 = vmul.f32 %v12117_v9, %v11972_v18  ;;  %v12176_v55 = vmul.f32 %v12117_v9, %v11975_v40 }
 0x44f   :  { %v2289_v59 = vadd.f32 %v2288_v38, %v2287_v7  ;;  %v2409_v38 = vmul.f32 %v2341_v17, %v11925_v63  ;;  %v1914_v34 = vpop.f32.mrf.mxu2  ;;  %v12180_v46 = vmul.f32 %v12117_v9, %v11978_v41  ;;  %v12184_v63 = vmul.f32 %v12117_v9, %v11981_v22  ;;  %v12203_v22 = vld [vmem:[%s16158_s7 + $0x6] ss:$8 sm:$0xf] }
 0x450   :  { %v1865_v43 = vpop.f32.mrf.mxu0  ;;  %16304 = vst [vmem:[#allocation35_spill] sm:$0xff] %v12172_v35  ;;  %v12187_v60 = vadd.f32 %v12073_v50, %v1858_v21  ;;  %v12190_v58 = vadd.f32 %v12045_v29, %v1956_v2  ;;  %v12194_v40 = vmul.f32 %v12117_v9, %v11984_v45  ;;  %v12198_v41 = vmul.f32 %v12117_v9, %v11987_v8 }
 0x451   :  { %v2290_v7 = vrot.slane %v2289_v59, 2  ;;  %16305 = vst [vmem:[#allocation36_spill] sm:$0xff] %v12176_v55  ;;  %v12206_v50 = vadd.f32 %v12092_v13, %v1861_v56  ;;  %v12209_v2 = vadd.f32 %v12081_v6, %v1959_v57  ;;  %v1866_v8 = vadd.f32 %v1865_v43, %v11880_v42 }
 0x452   :  { %16306 = vst [vmem:[#allocation37_spill] sm:$0xff] %v12180_v46  ;;  %v12222_v13 = vmul.f32 %v12117_v9, %v11993_v49  ;;  %v2082_v6 = vadd.f32 %v12077_v30, %v12187_v60  ;;  %vm2423_vm1 = vweird.f32 %v12108_v15  ;;  %v2522_v43 = vperm.slane %v12203_v22, 0 }
 0x453   :  { %v10648_v52 = vpop.eup %10647  ;;  %v1960_v19 = vpop.f32.mrf.mxu3  ;;  %v2291_v37 = vadd.f32 %v2290_v7, %v2289_v59  ;;  %16307 = vst [vmem:[#allocation38_spill] sm:$0xff] %v12184_v63 }
 0x454   :  { %v2418_v39 = vmul.f32 %v10648_v52, %v12108_v15  ;;  %16308 = vst [vmem:[#allocation39_spill] sm:$0xff] %v12187_v60  ;;  %v1961_v45 = vadd.f32 %v1960_v19, %v11941_v44  ;;  %vm2424_vm0 = vweird.f32 %v10648_v52  ;;  %v12214_v21 = vpop.f32.mrf.mxu1 }
 0x455   :  { %16309 = vst [vmem:[#allocation40_spill] sm:$0xff] %v12190_v58  ;;  %v2292_v17 = vrot.slane %v2291_v37, 1  ;;  %vm2425_vm2 = vmor %vm2423_vm1, %vm2424_vm0 }
 0x456   :  { %v2419_v4 = vmul.f32 %v10648_v52, %v2418_v39  ;;  %16310 = vst [vmem:[#allocation41_spill] sm:$0xff] %v12194_v40  ;;  %v12218_v39 = vmul.f32 %v12117_v9, %v11990_v5  ;;  %v12232_v5 = vadd.f32 %v2082_v6, %v12206_v50 }
 0x457   :  { %16311 = vst [vmem:[#allocation42_spill] sm:$0xff] %v12198_v41  ;;  %v2293_v59 = vadd.f32 %v2292_v17, %v2291_v37  ;;  %v12245_v15 = vpop.f32.mrf.mxu2  ;;  %v12249_v17 = vadd.f32 %v1914_v34, %v1866_v8 }
 0x458   :  { %v2420_v18 = vmul.f32 0.5, %v2419_v4  ;;  %16312 = vst [vmem:[#allocation43_spill] sm:$0xff] %v12206_v50  ;;  %v1863_v4 = vadd.f32 %v1862_v14, %v11880_v42  ;;  %v2103_v14 = vadd.f32 %v12086_v53, %v12190_v58  ;;  %v12241_v53 = vadd.f32 %v12096_v20, %v1961_v45  ;;  %v12243_v56 = vpop.f32.mrf.mxu0 }
 0x459   :  { %16313 = vst [vmem:[#allocation44_spill] sm:$0xff] %v12209_v2  ;;  %v2337_v7 = vmul.f32 %v2293_v59, %v11264_v33 }
 0x45a   :  { %v2421_v29 = vsub.f32 1.5, %v2420_v18  ;;  %16314 = vst [vmem:[#allocation45_spill] sm:$0xff] %v12218_v39  ;;  %v12235_v49 = vadd.f32 %v2103_v14, %v12209_v2  ;;  %v12238_v30 = vadd.f32 %v12114_v24, %v1863_v4 }
 0x45b   :  { %16315 = vst [vmem:[#allocation46_spill] sm:$0xff] %v12222_v13  ;;  %v1963_v19 = vpop.f32.mrf.mxu3  ;;  %v12247_v18 = vadd.f32 0.8, %v2337_v7 }
 0x45c   :  { %v2422_v37 = vmul.f32 %v10648_v52, %v2421_v29  ;;  %v12252_v29 = vadd.f32 %v1963_v19, %v11941_v44  ;;  %v12270_v50 = vpop.f32.mrf.mxu1 }
 0x45d   :  { %10649 = vrsqrt.f32 %v12247_v18 }
 0x45e   :  { %v2426_v57 = vsel %vm2425_vm2, %v10648_v52, %v2422_v37 }
 0x45f   :  { %v2457_v59 = vmul.f32 %v2426_v57, %v12120_v23  ;;  %v2461_v24 = vmul.f32 %v2426_v57, %v12123_v10  ;;  %v2465_v4 = vmul.f32 %v2426_v57, %v12126_v51  ;;  %v2469_v20 = vmul.f32 %v2426_v57, %v12131_v28 }
 0x460   :  { %v2473_v45 = vmul.f32 %v2426_v57, %v12134_v25  ;;  %v2477_v6 = vmul.f32 %v2426_v57, %v12137_v0  ;;  %v2481_v52 = vmul.f32 %v2426_v57, %v12140_v26  ;;  %v2485_v34 = vmul.f32 %v2426_v57, %v12143_v32  ;;  %v12272_v33 = vpop.f32.mrf.mxu0 }
 0x461   :  { %v2489_v8 = vmul.f32 %v2426_v57, %v12146_v61  ;;  %v2493_v14 = vmul.f32 %v2426_v57, %v12149_v54  ;;  %v2497_v23 = vmul.f32 %v2426_v57, %v12152_v16  ;;  %v2501_v10 = vmul.f32 %v2426_v57, %v12155_v36 }
 0x462   :  { %v2505_v51 = vmul.f32 %v2426_v57, %v12160_v48  ;;  %v2509_v28 = vmul.f32 %v2426_v57, %v12163_v47  ;;  %v2513_v19 = vmul.f32 %v2426_v57, %v2405_v12  ;;  %v2517_v25 = vmul.f32 %v2426_v57, %v2409_v38  ;;  %v12274_v47 = vpop.f32.mrf.mxu2 }
 0x463   :  { %v2530_v37 = vadd.f32 %v2522_v43, %v2457_v59  ;;  %v2534_v0 = vadd.f32 %v2522_v43, %v2461_v24  ;;  %v2538_v7 = vadd.f32 %v2522_v43, %v2465_v4  ;;  %v2542_v26 = vadd.f32 %v2522_v43, %v2469_v20  ;;  %v12268_v2 = vpop.f32.mrf.mxu3 }
 0x464   :  { %v2546_v32 = vadd.f32 %v2522_v43, %v2473_v45  ;;  %v2550_v61 = vadd.f32 %v2522_v43, %v2477_v6  ;;  %v2554_v58 = vadd.f32 %v2522_v43, %v2481_v52  ;;  %v2558_v54 = vadd.f32 %v2522_v43, %v2485_v34  ;;  %v2019_v41 = vpop.f32.mrf.mxu1 }
 0x465   :  { %v2562_v16 = vadd.f32 %v2522_v43, %v2489_v8  ;;  %v2566_v36 = vadd.f32 %v2522_v43, %v2493_v14  ;;  %v2570_v60 = vadd.f32 %v2522_v43, %v2497_v23  ;;  %v2574_v48 = vadd.f32 %v2522_v43, %v2501_v10 }
 0x466   :  { %v2578_v12 = vadd.f32 %v2522_v43, %v2505_v51  ;;  %v2582_v38 = vadd.f32 %v2522_v43, %v2509_v28  ;;  %v2586_v57 = vadd.f32 %v2522_v43, %v2513_v19  ;;  %v2590_v59 = vadd.f32 %v2522_v43, %v2517_v25 }
 0x467   :  { %vm2594_vm3 = vcmp.gt.f32.partialorder %v2530_v37, 0.0  ;;  %vm2598_vm4 = vcmp.gt.f32.partialorder %v2534_v0, 0.0  ;;  %vm2602_vm5 = vcmp.gt.f32.partialorder %v2538_v7, 0.0  ;;  %vm2606_vm6 = vcmp.gt.f32.partialorder %v2542_v26, 0.0 }
 0x468   :  { %vm2610_vm8 = vcmp.gt.f32.partialorder %v2546_v32, 0.0  ;;  %vm2614_vm9 = vcmp.gt.f32.partialorder %v2550_v61, 0.0  ;;  %vm2618_vm7 = vcmp.gt.f32.partialorder %v2554_v58, 0.0  ;;  %vm2622_vm10 = vcmp.gt.f32.partialorder %v2558_v54, 0.0  ;;  %v1872_v51 = vpop.f32.mrf.mxu0 }
 0x469   :  { %vm2626_vm11 = vcmp.gt.f32.partialorder %v2562_v16, 0.0  ;;  %vm2630_vm12 = vcmp.gt.f32.partialorder %v2566_v36, 0.0  ;;  %vm2634_vm13 = vcmp.gt.f32.partialorder %v2570_v60, 0.0  ;;  %vm2638_vm14 = vcmp.gt.f32.partialorder %v2574_v48, 0.0 }
 0x46a   :  { %vm2642_vm15 = vcmp.gt.f32.partialorder %v2578_v12, 0.0  ;;  %vm2646_vm0 = vcmp.gt.f32.partialorder %v2582_v38, 0.0  ;;  %vm2650_vm1 = vcmp.gt.f32.partialorder %v2586_v57, 0.0  ;;  %vm2654_vm2 = vcmp.gt.f32.partialorder %v2590_v59, 0.0  ;;  %v1921_v28 = vpop.f32.mrf.mxu2 }
 0x46b   :  { %v2658_v24 = vmul.f32 0.2, %v2530_v37  ;;  %v2662_v4 = vmul.f32 0.2, %v2534_v0  ;;  %v2666_v20 = vmul.f32 0.2, %v2538_v7  ;;  %v1968_v43 = vpop.f32.mrf.mxu3  ;;  %v1868_v34 = vadd.f32 %v12243_v56, %v11880_v42 }
 0x46c   :  { %v2670_v45 = vmul.f32 0.2, %v2542_v26  ;;  %v2674_v6 = vmul.f32 0.2, %v2546_v32  ;;  %v2678_v52 = vmul.f32 0.2, %v2550_v61 }
 0x46d   :  { %v2682_v8 = vmul.f32 0.2, %v2554_v58  ;;  %v2686_v14 = vmul.f32 0.2, %v2558_v54  ;;  %v2690_v23 = vmul.f32 0.2, %v2562_v16  ;;  %v12280_v10 = vsel %vm2594_vm3, %v2530_v37, %v2658_v24 }
 0x46e   :  { %16316 = vst [vmem:[#allocation47_spill] sm:$0xff] %v12280_v10  ;;  %v2694_v19 = vmul.f32 0.2, %v2566_v36  ;;  %v2698_v25 = vmul.f32 0.2, %v2570_v60  ;;  %v12283_v39 = vsel %vm2598_vm4, %v2534_v0, %v2662_v4  ;;  %v12286_v56 = vsel %vm2602_vm5, %v2538_v7, %v2666_v20  ;;  %v10650_v10 = vpop.eup %10649 }
 0x46f   :  { %v2702_v13 = vmul.f32 0.2, %v2574_v48  ;;  %v2706_v40 = vmul.f32 0.2, %v2578_v12  ;;  %v2710_v63 = vmul.f32 0.2, %v2582_v38  ;;  %v12289_v35 = vsel %vm2606_vm6, %v2542_v26, %v2670_v45 }
 0x470   :  { %v2714_v46 = vmul.f32 0.2, %v2586_v57  ;;  %v2718_v55 = vmul.f32 0.2, %v2590_v59  ;;  %16317 = vst [vmem:[#allocation48_spill] sm:$0xff] %v12289_v35  ;;  %v12292_v37 = vsel %vm2610_vm8, %v2546_v32, %v2674_v6  ;;  %v12295_v24 = vsel %vm2614_vm9, %v2550_v61, %v2678_v52 }
 0x471   :  { %16318 = vst [vmem:[#allocation49_spill] sm:$0xff] %v12292_v37  ;;  %v12298_v0 = vsel %vm2618_vm7, %v2554_v58, %v2682_v8  ;;  %v12301_v4 = vsel %vm2622_vm10, %v2558_v54, %v2686_v14  ;;  %v12304_v7 = vsel %vm2626_vm11, %v2562_v16, %v2690_v23  ;;  %v12307_v20 = vsel %vm2630_vm12, %v2566_v36, %v2694_v19 }
 0x472   :  { %16319 = vst [vmem:[#allocation50_spill] sm:$0xff] %v12295_v24  ;;  %v12310_v26 = vsel %vm2634_vm13, %v2570_v60, %v2698_v25  ;;  %v12313_v32 = vsel %vm2638_vm14, %v2574_v48, %v2702_v13  ;;  %v12316_v61 = vsel %vm2642_vm15, %v2578_v12, %v2706_v40  ;;  %v12319_v58 = vsel %vm2646_vm0, %v2582_v38, %v2710_v63  ;;  %v1875_v38 = vpop.f32.mrf.mxu0 }
 0x473   :  { %16320 = vst [vmem:[#allocation51_spill] sm:$0xff] %v12298_v0  ;;  %v12322_v54 = vsel %vm2650_vm1, %v2586_v57, %v2714_v46  ;;  %v12325_v16 = vsel %vm2654_vm2, %v2590_v59, %v2718_v55  ;;  %v2428_v36 = vmul.f32 %v10650_v10, %v12247_v18  ;;  %v12330_v60 = vadd.f32 %v12128_v62, %v12252_v29  ;;  %v1970_v13 = vpop.f32.mrf.mxu3 }
 0x474   :  { %16321 = vst [vmem:[#allocation52_spill] sm:$0xff] %v12301_v4  ;;  %v2084_v40 = vadd.f32 %v12232_v5, %v12238_v30  ;;  %v2105_v63 = vadd.f32 %v12235_v49, %v12241_v53  ;;  %v12337_v48 = vadd.f32 %v12245_v15, %v1868_v34  ;;  %v1966_v55 = vadd.f32 %v12268_v2, %v11941_v44  ;;  %v1924_v2 = vpop.f32.mrf.mxu2 }
 0x475   :  { %16322 = vst [vmem:[#allocation53_spill] sm:$0xff] %v12304_v7  ;;  %v2429_v46 = vmul.f32 %v10650_v10, %v2428_v36  ;;  %v1871_v12 = vadd.f32 %v12272_v33, %v11880_v42  ;;  %v1969_v62 = vadd.f32 %v1968_v43, %v11941_v44  ;;  %v1873_v29 = vadd.f32 %v1872_v51, %v11880_v42  ;;  %v16330_v51 = vld [vmem:[#allocation26_spill] sm:$0xff] }
 0x476   :  { %16323 = vst [vmem:[#allocation54_spill] sm:$0xff] %v12307_v20  ;;  %v2382_v5 = vmul.f32 %v12117_v9, %v11996_v27  ;;  %v2085_v49 = vadd.f32 %v2084_v40, %v12249_v17  ;;  %v12349_v15 = vadd.f32 %v12214_v21, %v1966_v55  ;;  %v1971_v57 = vadd.f32 %v1970_v13, %v11941_v44  ;;  %v12362_v21 = vpop.f32.mrf.mxu1  ;;  %v16331_v13 = vld [vmem:[#allocation27_spill] sm:$0xff]  ;;  %v16332_v40 = vld [vmem:[#allocation28_spill] sm:$0xff] }
 0x477   :  { %16324 = vst [vmem:[#allocation55_spill] sm:$0xff] %v12310_v26  ;;  %v2430_v59 = vmul.f32 0.5, %v2429_v46  ;;  %v2106_v45 = vadd.f32 %v2105_v63, %v12330_v60  ;;  %v12354_v33 = vadd.f32 %v12274_v47, %v1871_v12  ;;  %v12357_v43 = vadd.f32 %v12270_v50, %v1969_v62 }
 0x478   :  { %16325 = vst [vmem:[#allocation56_spill] sm:$0xff] %v12313_v32  ;;  %v2386_v27 = vmul.f32 %v12117_v9, %v11999_v1  ;;  %vm2434_vm3 = vweird.f32 %v10650_v10  ;;  %v2086_v6 = vadd.f32 %v2085_v49, %v12337_v48  ;;  %v1876_v52 = vadd.f32 %v1875_v38, %v11880_v42  ;;  %v16334_v49 = vld [vmem:[#allocation36_spill] sm:$0xff] }
 0x479   :  { %16326 = vst [vmem:[#allocation57_spill] sm:$0xff] %v12316_v61  ;;  %v2431_v34 = vsub.f32 1.5, %v2430_v59  ;;  %v2107_v8 = vadd.f32 %v2106_v45, %v12349_v15  ;;  %v12366_v14 = vadd.f32 %v1921_v28, %v1873_v29  ;;  %v12368_v47 = vadd.f32 %v2019_v41, %v1971_v57  ;;  %v16333_v29 = vld [vmem:[#allocation35_spill] sm:$0xff]  ;;  %v16335_v57 = vld [vmem:[#allocation37_spill] sm:$0xff]  ;;  %v16336_v45 = vld [vmem:[#allocation38_spill] sm:$0xff] }
 0x47a   :  { %16327 = vst [vmem:[#allocation58_spill] sm:$0xff] %v12319_v58  ;;  %v2390_v50 = vmul.f32 %v12117_v9, %v12002_v31  ;;  %v2394_v1 = vmul.f32 %v12117_v9, %v12005_v3  ;;  %v2398_v23 = vmul.f32 %v12117_v9, %v12008_v11  ;;  %v2402_v19 = vmul.f32 %v12117_v9, %v16330_v51  ;;  %v1877_v62 = vpop.f32.mrf.mxu0 }
 0x47b   :  { %16328 = vst [vmem:[#allocation59_spill] sm:$0xff] %v12322_v54  ;;  %v2432_v25 = vmul.f32 %v10650_v10, %v2431_v34  ;;  %vm2433_vm4 = vweird.f32 %v12247_v18  ;;  %v2087_v28 = vadd.f32 %v2086_v6, %v12354_v33  ;;  %v2108_v41 = vadd.f32 %v2107_v8, %v12357_v43  ;;  %v1973_v36 = vpop.f32.mrf.mxu3  ;;  %v16339_v8 = vld [vmem:[#allocation45_spill] sm:$0xff] }
 0x47c   :  { %16329 = vst [vmem:[#allocation60_spill] sm:$0xff] %v12325_v16  ;;  %v2406_v31 = vmul.f32 %v12117_v9, %v16331_v13  ;;  %v2410_v3 = vmul.f32 %v12117_v9, %v16332_v40  ;;  %vm2435_vm5 = vmor %vm2433_vm4, %vm2434_vm3  ;;  %v2523_v11 = vperm.slane %v12203_v22, 1  ;;  %v12387_v63 = vadd.f32 %v1924_v2, %v1876_v52  ;;  %v16337_v2 = vld [vmem:[#allocation41_spill] sm:$0xff]  ;;  %v12404_v16 = vpop.f32.mrf.mxu2 }
 0x47d   :  { %v2436_v55 = vsel %vm2435_vm5, %v10650_v10, %v2432_v25  ;;  %v12390_v18 = vadd.f32 %v2087_v28, %v12366_v14  ;;  %v12393_v46 = vadd.f32 %v2108_v41, %v12368_v47  ;;  %v1974_v12 = vadd.f32 %v1973_v36, %v11941_v44  ;;  %v16338_v10 = vld [vmem:[#allocation42_spill] sm:$0xff] }
 0x47e   :  { %v2458_v38 = vmul.f32 %v2436_v55, %v16333_v29  ;;  %v2462_v9 = vmul.f32 %v2436_v55, %v16334_v49  ;;  %v2466_v59 = vmul.f32 %v2436_v55, %v16335_v57  ;;  %v2470_v6 = vmul.f32 %v2436_v55, %v16336_v45  ;;  %v16340_v25 = vld [vmem:[#allocation46_spill] sm:$0xff]  ;;  %v12406_v32 = vpop.f32.mrf.mxu1 }
 0x47f   :  { %v2474_v52 = vmul.f32 %v2436_v55, %v16337_v2  ;;  %v2478_v34 = vmul.f32 %v2436_v55, %v16338_v10  ;;  %v2482_v51 = vmul.f32 %v2436_v55, %v16339_v8  ;;  %v2486_v28 = vmul.f32 %v2436_v55, %v16340_v25 }
 0x480   :  { %v2490_v41 = vmul.f32 %v2436_v55, %v2382_v5  ;;  %v2494_v13 = vmul.f32 %v2436_v55, %v2386_v27  ;;  %v2498_v36 = vmul.f32 %v2436_v55, %v2390_v50  ;;  %v2502_v40 = vmul.f32 %v2436_v55, %v2394_v1 }
 0x481   :  { %v2506_v29 = vmul.f32 %v2436_v55, %v2398_v23  ;;  %v2510_v49 = vmul.f32 %v2436_v55, %v2402_v19  ;;  %v2514_v54 = vmul.f32 %v2436_v55, %v2406_v31  ;;  %v2518_v57 = vmul.f32 %v2436_v55, %v2410_v3 }
 0x482   :  { %v2531_v58 = vadd.f32 %v2523_v11, %v2458_v38  ;;  %v2535_v45 = vadd.f32 %v2523_v11, %v2462_v9  ;;  %v2539_v61 = vadd.f32 %v2523_v11, %v2466_v59  ;;  %v2543_v2 = vadd.f32 %v2523_v11, %v2470_v6  ;;  %v1880_v55 = vpop.f32.mrf.mxu0 }
 0x483   :  { %v2547_v10 = vadd.f32 %v2523_v11, %v2474_v52  ;;  %v2551_v8 = vadd.f32 %v2523_v11, %v2478_v34  ;;  %v2555_v26 = vadd.f32 %v2523_v11, %v2482_v51  ;;  %v2559_v25 = vadd.f32 %v2523_v11, %v2486_v28  ;;  %v12408_v5 = vpop.f32.mrf.mxu3 }
 0x484   :  { %v2563_v27 = vadd.f32 %v2523_v11, %v2490_v41  ;;  %v2567_v50 = vadd.f32 %v2523_v11, %v2494_v13  ;;  %v2571_v1 = vadd.f32 %v2523_v11, %v2498_v36  ;;  %v2575_v20 = vadd.f32 %v2523_v11, %v2502_v40  ;;  %v1929_v59 = vpop.f32.mrf.mxu2 }
 0x485   :  { %v2579_v23 = vadd.f32 %v2523_v11, %v2506_v29  ;;  %v2583_v19 = vadd.f32 %v2523_v11, %v2510_v49  ;;  %v2587_v31 = vadd.f32 %v2523_v11, %v2514_v54  ;;  %v2591_v3 = vadd.f32 %v2523_v11, %v2518_v57 }
 0x486   :  { %vm2595_vm6 = vcmp.gt.f32.partialorder %v2531_v58, 0.0  ;;  %vm2599_vm8 = vcmp.gt.f32.partialorder %v2535_v45, 0.0  ;;  %vm2603_vm9 = vcmp.gt.f32.partialorder %v2539_v61, 0.0  ;;  %vm2607_vm7 = vcmp.gt.f32.partialorder %v2543_v2, 0.0  ;;  %v2027_v29 = vpop.f32.mrf.mxu1 }
 0x487   :  { %vm2611_vm10 = vcmp.gt.f32.partialorder %v2547_v10, 0.0  ;;  %vm2615_vm11 = vcmp.gt.f32.partialorder %v2551_v8, 0.0  ;;  %vm2619_vm12 = vcmp.gt.f32.partialorder %v2555_v26, 0.0  ;;  %vm2623_vm13 = vcmp.gt.f32.partialorder %v2559_v25, 0.0 }
 0x488   :  { %vm2627_vm14 = vcmp.gt.f32.partialorder %v2563_v27, 0.0  ;;  %vm2631_vm15 = vcmp.gt.f32.partialorder %v2567_v50, 0.0  ;;  %vm2635_vm0 = vcmp.gt.f32.partialorder %v2571_v1, 0.0  ;;  %vm2639_vm1 = vcmp.gt.f32.partialorder %v2575_v20, 0.0 }
 0x489   :  { %vm2643_vm2 = vcmp.gt.f32.partialorder %v2579_v23, 0.0  ;;  %vm2647_vm3 = vcmp.gt.f32.partialorder %v2583_v19, 0.0  ;;  %vm2651_vm4 = vcmp.gt.f32.partialorder %v2587_v31, 0.0  ;;  %vm2655_vm5 = vcmp.gt.f32.partialorder %v2591_v3, 0.0 }
 0x48a   :  { %v2659_v38 = vmul.f32 0.2, %v2531_v58  ;;  %v2663_v54 = vmul.f32 0.2, %v2535_v45  ;;  %v2667_v11 = vmul.f32 0.2, %v2539_v61  ;;  %v12411_v9 = vadd.f32 %v12362_v21, %v1974_v12 }
 0x48b   :  { %v2671_v6 = vmul.f32 0.2, %v2543_v2  ;;  %v2675_v52 = vmul.f32 0.2, %v2547_v10  ;;  %v2679_v34 = vmul.f32 0.2, %v2551_v8  ;;  %v1878_v51 = vadd.f32 %v1877_v62, %v11880_v42  ;;  %v1978_v28 = vpop.f32.mrf.mxu3 }
 0x48c   :  { %v2683_v41 = vmul.f32 0.2, %v2555_v26  ;;  %v2687_v13 = vmul.f32 0.2, %v2559_v25  ;;  %v2691_v36 = vmul.f32 0.2, %v2563_v27  ;;  %v12415_v40 = vsel %vm2595_vm6, %v2531_v58, %v2659_v38 }
 0x48d   :  { %v2695_v49 = vmul.f32 0.2, %v2567_v50  ;;  %v2699_v57 = vmul.f32 0.2, %v2571_v1  ;;  %v2703_v7 = vmul.f32 0.2, %v2575_v20  ;;  %v12418_v21 = vsel %vm2599_vm8, %v2535_v45, %v2663_v54 }
 0x48e   :  { %v2707_v12 = vmul.f32 0.2, %v2579_v23  ;;  %v2711_v4 = vmul.f32 0.2, %v2583_v19  ;;  %v2715_v0 = vmul.f32 0.2, %v2587_v31  ;;  %v12421_v24 = vsel %vm2603_vm9, %v2539_v61, %v2667_v11 }
 0x48f   :  { %v2719_v62 = vmul.f32 0.2, %v2591_v3  ;;  %v12424_v37 = vsel %vm2607_vm7, %v2543_v2, %v2671_v6  ;;  %v12427_v58 = vsel %vm2611_vm10, %v2547_v10, %v2675_v52  ;;  %v12430_v38 = vsel %vm2615_vm11, %v2551_v8, %v2679_v34  ;;  %v1882_v2 = vpop.f32.mrf.mxu0  ;;  %v2029_v52 = vpop.f32.mrf.mxu1 }
 0x490   :  { %16341 = vst [vmem:[#allocation26_spill] sm:$0xff] %v12430_v38  ;;  %v12433_v35 = vsel %vm2619_vm12, %v2555_v26, %v2683_v41  ;;  %v12436_v45 = vsel %vm2623_vm13, %v2559_v25, %v2687_v13  ;;  %v12439_v54 = vsel %vm2627_vm14, %v2563_v27, %v2691_v36  ;;  %v12442_v61 = vsel %vm2631_vm15, %v2567_v50, %v2695_v49 }
 0x491   :  { %16342 = vst [vmem:[#allocation27_spill] sm:$0xff] %v12433_v35  ;;  %v12445_v11 = vsel %vm2635_vm0, %v2571_v1, %v2699_v57  ;;  %v12448_v10 = vsel %vm2639_vm1, %v2575_v20, %v2703_v7  ;;  %v12451_v8 = vsel %vm2643_vm2, %v2579_v23, %v2707_v12  ;;  %v12454_v26 = vsel %vm2647_vm3, %v2583_v19, %v2711_v4 }
 0x492   :  { %16343 = vst [vmem:[#allocation28_spill] sm:$0xff] %v12436_v45  ;;  %v12457_v25 = vsel %vm2651_vm4, %v2587_v31, %v2715_v0  ;;  %v12460_v27 = vsel %vm2655_vm5, %v2591_v3, %v2719_v62  ;;  %v2089_v50 = vadd.f32 %v12390_v18, %v12387_v63  ;;  %v12465_v1 = vadd.f32 %v12404_v16, %v1878_v51  ;;  %v1931_v3 = vpop.f32.mrf.mxu2  ;;  %v16352_v62 = vld [vmem:[#allocation20_spill] sm:$0xff] }
 0x493   :  { %16344 = vst [vmem:[#allocation35_spill] sm:$0xff] %v12439_v54  ;;  %v1976_v7 = vadd.f32 %v12408_v5, %v11941_v44  ;;  %v1881_v20 = vadd.f32 %v1880_v55, %v11880_v42  ;;  %v1979_v4 = vadd.f32 %v1978_v28, %v11941_v44  ;;  %v1883_v23 = vadd.f32 %v1882_v2, %v11880_v42  ;;  %v1980_v0 = vpop.f32.mrf.mxu3  ;;  %v16367_v54 = vld [vmem:[#allocation34_spill] sm:$0xff] }
 0x494   :  { %16345 = vst [vmem:[#allocation36_spill] sm:$0xff] %v12442_v61  ;;  %v2110_v19 = vadd.f32 %v12393_v46, %v12411_v9  ;;  %v2090_v31 = vadd.f32 %v2089_v50, %v12465_v1  ;;  %v1981_v18 = vadd.f32 %v1980_v0, %v11941_v44  ;;  %v16355_v0 = vld [vmem:[#allocation25_spill] sm:$0xff]  ;;  %v2343_v45 = vperm.slane %v16367_v54, 2 }
 0x495   :  { %16346 = vst [vmem:[#allocation37_spill] sm:$0xff] %v12445_v11  ;;  %v12477_v16 = vadd.f32 %v12406_v32, %v1976_v7  ;;  %v12479_v6 = vadd.f32 %v1929_v59, %v1881_v20  ;;  %v12481_v5 = vadd.f32 %v2027_v29, %v1979_v4  ;;  %v12483_v55 = vadd.f32 %v1931_v3, %v1883_v23  ;;  %v16353_v7 = vld [vmem:[#allocation23_spill] sm:$0xff]  ;;  %v16354_v4 = vld [vmem:[#allocation24_spill] sm:$0xff] }
 0x496   :  { %16347 = vst [vmem:[#allocation38_spill] sm:$0xff] %v12448_v10  ;;  %v12487_v46 = vadd.f32 %v2029_v52, %v1981_v18  ;;  %v16357_v18 = vld [vmem:[#allocation32_spill] sm:$0xff] }
 0x497   :  { %16348 = vst [vmem:[#allocation41_spill] sm:$0xff] %v12451_v8  ;;  %v2111_v42 = vadd.f32 %v2110_v19, %v12477_v16  ;;  %v2091_v34 = vadd.f32 %v2090_v31, %v12479_v6  ;;  %v16356_v31 = vld [vmem:[#allocation30_spill] sm:$0xff] }
 0x498   :  { %16349 = vst [vmem:[#allocation42_spill] sm:$0xff] %v12454_v26 }
 0x499   :  { %16350 = vst [vmem:[#allocation45_spill] sm:$0xff] %v12457_v25  ;;  %v2112_v51 = vadd.f32 %v2111_v42, %v12481_v5  ;;  %v2092_v44 = vadd.f32 %v2091_v34, %v12483_v55 }
 0x49a   :  { %16351 = vst [vmem:[#allocation46_spill] sm:$0xff] %v12460_v27 }
 0x49b   :  { %v2093_v28 = vrot.slane %v2092_v44, 4  ;;  %v2113_v32 = vadd.f32 %v2112_v51, %v12487_v46 }
 0x49d   :  { %v2094_v59 = vadd.f32 %v2093_v28, %v2092_v44  ;;  %v2114_v41 = vrot.slane %v2113_v32, 4 }
 0x49f   :  { %v2095_v13 = vrot.slane %v2094_v59, 2  ;;  %v2115_v36 = vadd.f32 %v2114_v41, %v2113_v32 }
 0x4a1   :  { %v2096_v29 = vadd.f32 %v2095_v13, %v2094_v59  ;;  %v2116_v57 = vrot.slane %v2115_v36, 2  ;;  %v16358_v59 = vld [vmem:[#allocation39_spill] sm:$0xff] }
 0x4a3   :  { %v2097_v49 = vrot.slane %v2096_v29, 1  ;;  %v2117_v50 = vadd.f32 %v2116_v57, %v2115_v36 }
 0x4a5   :  { %v2098_v12 = vadd.f32 %v2097_v49, %v2096_v29  ;;  %v2118_v51 = vrot.slane %v2117_v50, 1  ;;  %v16359_v29 = vld [vmem:[#allocation43_spill] sm:$0xff] }
 0x4a7   :  { %v2122_v2 = vmul.f32 %v2098_v12, %v16352_v62  ;;  %v2119_v32 = vadd.f32 %v2118_v51, %v2117_v50  ;;  %v16362_v51 = vld [vmem:[#allocation29_spill] sm:$0xff] }
 0x4a9   :  { %v12500_v20 = vsub.f32 %v16353_v7, %v2122_v2  ;;  %v12503_v23 = vsub.f32 %v16354_v4, %v2122_v2  ;;  %v12506_v19 = vsub.f32 %v16355_v0, %v2122_v2  ;;  %v12509_v3 = vsub.f32 %v16356_v31, %v2122_v2  ;;  %v16360_v31 = vld [vmem:[#allocation21_spill] sm:$0xff] }
 0x4aa   :  { %v12512_v52 = vsub.f32 %v16357_v18, %v2122_v2  ;;  %v12521_v41 = vsub.f32 %v16358_v59, %v2122_v2  ;;  %v12526_v49 = vsub.f32 %v16359_v29, %v2122_v2  ;;  %v12531_v7 = vmul.f32 %v2119_v32, %v16352_v62  ;;  %v16364_v32 = vld [vmem:[#allocation33_spill] sm:$0xff] }
 0x4ab   :  { %v2190_v42 = vmul.f32 %v12500_v20, %v12500_v20  ;;  %v2194_v34 = vmul.f32 %v12503_v23, %v12503_v23  ;;  %v2198_v44 = vmul.f32 %v12506_v19, %v12506_v19  ;;  %v2202_v13 = vmul.f32 %v12509_v3, %v12509_v3 }
 0x4ac   :  { %v2206_v57 = vmul.f32 %v12512_v52, %v12512_v52  ;;  %v12534_v4 = vsub.f32 %v12238_v30, %v2122_v2  ;;  %v2210_v50 = vmul.f32 %v12521_v41, %v12521_v41  ;;  %v12540_v18 = vsub.f32 %v16360_v31, %v12531_v7 }
 0x4ad   :  { %v2294_v28 = vadd.f32 %v2194_v34, %v2190_v42  ;;  %v16361_v42 = vld [vmem:[#allocation22_spill] sm:$0xff]  ;;  %v12556_v59 = vsub.f32 %v16364_v32, %v12531_v7  ;;  %v12585_v27 = vsub.f32 %v12387_v63, %v2122_v2 }
 0x4ae   :  { %v12544_v34 = vsub.f32 %v16361_v42, %v12531_v7  ;;  %v2191_v42 = vmul.f32 %v12540_v18, %v12540_v18 }
 0x4af   :  { %v2295_v36 = vadd.f32 %v2294_v28, %v2198_v44  ;;  %v12548_v44 = vsub.f32 %v16362_v51, %v12531_v7  ;;  %v16363_v28 = vld [vmem:[#allocation31_spill] sm:$0xff] }
 0x4b0   :  { %v12552_v30 = vsub.f32 %v16363_v28, %v12531_v7  ;;  %v2195_v51 = vmul.f32 %v12544_v34, %v12544_v34 }
 0x4b1   :  { %v2296_v12 = vadd.f32 %v2295_v36, %v2202_v13  ;;  %v12559_v13 = vsub.f32 %v12249_v17, %v2122_v2  ;;  %v2214_v36 = vmul.f32 %v12526_v49, %v12526_v49  ;;  %v12573_v17 = vsub.f32 %v12354_v33, %v2122_v2 }
 0x4b3   :  { %v2297_v0 = vadd.f32 %v2296_v12, %v2206_v57  ;;  %v12564_v57 = vsub.f32 %v12337_v48, %v2122_v2  ;;  %v2218_v12 = vmul.f32 %v12534_v4, %v12534_v4  ;;  %v2222_v28 = vmul.f32 %v12559_v13, %v12559_v13 }
 0x4b4   :  { %v12578_v48 = vsub.f32 %v12366_v14, %v2122_v2  ;;  %v2230_v33 = vmul.f32 %v12573_v17, %v12573_v17  ;;  %v2203_v14 = vmul.f32 %v12552_v30, %v12552_v30 }
 0x4b5   :  { %v2298_v29 = vadd.f32 %v2297_v0, %v2210_v50  ;;  %v2226_v0 = vmul.f32 %v12564_v57, %v12564_v57 }
 0x4b7   :  { %v2299_v31 = vadd.f32 %v2298_v29, %v2214_v36  ;;  %v2199_v36 = vmul.f32 %v12548_v44, %v12548_v44  ;;  %v2315_v29 = vadd.f32 %v2195_v51, %v2191_v42  ;;  %v2234_v42 = vmul.f32 %v12578_v48, %v12578_v48  ;;  %v16366_v51 = vld [vmem:[#allocation44_spill] sm:$0xff] }
 0x4b9   :  { %v2300_v50 = vadd.f32 %v2299_v31, %v2218_v12  ;;  %v16365_v12 = vld [vmem:[#allocation40_spill] sm:$0xff]  ;;  %v2316_v26 = vadd.f32 %v2315_v29, %v2199_v36  ;;  %v2238_v36 = vmul.f32 %v12585_v27, %v12585_v27  ;;  %v12613_v29 = vsub.f32 %v12241_v53, %v12531_v7 }
 0x4ba   :  { %v12591_v31 = vsub.f32 %v16365_v12, %v12531_v7  ;;  %v12607_v12 = vsub.f32 %v12479_v6, %v2122_v2 }
 0x4bb   :  { %v2301_v32 = vadd.f32 %v2300_v50, %v2222_v28  ;;  %v12596_v28 = vsub.f32 %v12465_v1, %v2122_v2  ;;  %v12602_v50 = vsub.f32 %v16366_v51, %v12531_v7  ;;  %v12618_v51 = vsub.f32 %v12483_v55, %v2122_v2 }
 0x4bc   :  { %v12632_v55 = vsub.f32 %v12349_v15, %v12531_v7  ;;  %v2219_v2 = vmul.f32 %v12613_v29, %v12613_v29  ;;  %v12646_v15 = vsub.f32 %v12368_v47, %v12531_v7 }
 0x4bd   :  { %v2302_v25 = vadd.f32 %v2301_v32, %v2226_v0  ;;  %v2207_v0 = vmul.f32 %v12556_v59, %v12556_v59  ;;  %v2317_v32 = vadd.f32 %v2316_v26, %v2203_v14  ;;  %v2242_v26 = vmul.f32 %v12596_v28, %v12596_v28 }
 0x4be   :  { %v12624_v14 = vsub.f32 %v12330_v60, %v12531_v7  ;;  %v2250_v60 = vmul.f32 %v12618_v51, %v12618_v51  ;;  %v2235_v47 = vmul.f32 %v12646_v15, %v12646_v15 }
 0x4bf   :  { %v2303_v63 = vadd.f32 %v2302_v25, %v2230_v33  ;;  %v2211_v25 = vmul.f32 %v12591_v31, %v12591_v31  ;;  %v2318_v33 = vadd.f32 %v2317_v32, %v2207_v0 }
 0x4c1   :  { %v2304_v1 = vadd.f32 %v2303_v63, %v2234_v42  ;;  %v2215_v42 = vmul.f32 %v12602_v50, %v12602_v50  ;;  %v2319_v53 = vadd.f32 %v2318_v33, %v2211_v25  ;;  %v2246_v63 = vmul.f32 %v12607_v12, %v12607_v12 }
 0x4c3   :  { %v2305_v6 = vadd.f32 %v2304_v1, %v2238_v36  ;;  %v2320_v0 = vadd.f32 %v2319_v53, %v2215_v42  ;;  %v12640_v36 = vsub.f32 %v12357_v43, %v12531_v7  ;;  %v2223_v1 = vmul.f32 %v12624_v14, %v12624_v14 }
 0x4c5   :  { %v2306_v8 = vadd.f32 %v2305_v6, %v2242_v26  ;;  %v2321_v25 = vadd.f32 %v2320_v0, %v2219_v2  ;;  %v2227_v26 = vmul.f32 %v12632_v55, %v12632_v55  ;;  %v2231_v43 = vmul.f32 %v12640_v36, %v12640_v36 }
 0x4c6   :  { %v12658_v2 = vsub.f32 %v12477_v16, %v12531_v7 }
 0x4c7   :  { %v2307_v32 = vadd.f32 %v2306_v8, %v2246_v63  ;;  %v2322_v6 = vadd.f32 %v2321_v25, %v2223_v1  ;;  %v12652_v8 = vsub.f32 %v12411_v9, %v12531_v7 }
 0x4c8   :  { %v2243_v16 = vmul.f32 %v12658_v2, %v12658_v2 }
 0x4c9   :  { %v2308_v33 = vadd.f32 %v2307_v32, %v2250_v60  ;;  %v2323_v53 = vadd.f32 %v2322_v6, %v2227_v26  ;;  %v12664_v32 = vsub.f32 %v12481_v5, %v12531_v7  ;;  %v2239_v9 = vmul.f32 %v12652_v8, %v12652_v8 }
 0x4cb   :  { %v2309_v42 = vrot.slane %v2308_v33, 4  ;;  %v2324_v0 = vadd.f32 %v2323_v53, %v2231_v43 }
 0x4cd   :  { %v2310_v63 = vadd.f32 %v2309_v42, %v2308_v33  ;;  %v2325_v1 = vadd.f32 %v2324_v0, %v2235_v47  ;;  %v12670_v33 = vsub.f32 %v12487_v46, %v12531_v7  ;;  %v2247_v42 = vmul.f32 %v12664_v32, %v12664_v32 }
 0x4cf   :  { %v2311_v60 = vrot.slane %v2310_v63, 2  ;;  %v2326_v26 = vadd.f32 %v2325_v1, %v2239_v9  ;;  %v2251_v53 = vmul.f32 %v12670_v33, %v12670_v33 }
 0x4d1   :  { %v2312_v25 = vadd.f32 %v2311_v60, %v2310_v63  ;;  %v2327_v43 = vadd.f32 %v2326_v26, %v2243_v16 }
 0x4d3   :  { %v2313_v6 = vrot.slane %v2312_v25, 1  ;;  %v2328_v10 = vadd.f32 %v2327_v43, %v2247_v42  ;;  %v12682_v42 = vperm.slane %v16367_v54, 3  ;;  %v2355_v43 = vmul.f32 %v2343_v45, %v12503_v23 }
 0x4d4   :  { %v2379_v54 = vmul.f32 %v2343_v45, %v12534_v4  ;;  %v2387_v23 = vmul.f32 %v2343_v45, %v12564_v57 }
 0x4d5   :  { %v2314_v5 = vadd.f32 %v2313_v6, %v2312_v25  ;;  %v2329_v47 = vadd.f32 %v2328_v10, %v2251_v53  ;;  %v2351_v10 = vmul.f32 %v2343_v45, %v12500_v20  ;;  %v2363_v53 = vmul.f32 %v2343_v45, %v12509_v3 }
 0x4d6   :  { %v2383_v20 = vmul.f32 %v2343_v45, %v12559_v13  ;;  %v2395_v3 = vmul.f32 %v2343_v45, %v12578_v48  ;;  %v2524_v13 = vperm.slane %v12203_v22, 2 }
 0x4d7   :  { %v2338_v63 = vmul.f32 %v2314_v5, %v16352_v62  ;;  %v2330_v46 = vrot.slane %v2329_v47, 4  ;;  %v2359_v5 = vmul.f32 %v2343_v45, %v12506_v19  ;;  %v2391_v19 = vmul.f32 %v2343_v45, %v12573_v17 }
 0x4d9   :  { %v2415_v0 = vadd.f32 0.8, %v2338_v63  ;;  %v2331_v7 = vadd.f32 %v2330_v46, %v2329_v47  ;;  %v2367_v63 = vmul.f32 %v2343_v45, %v12512_v52  ;;  %v2399_v52 = vmul.f32 %v2343_v45, %v12585_v27 }
 0x4db   :  { %10651 = vrsqrt.f32 %v2415_v0  ;;  %v2332_v60 = vrot.slane %v2331_v7, 2  ;;  %vm2443_vm8 = vweird.f32 %v2415_v0 }
 0x4dd   :  { %v2333_v11 = vadd.f32 %v2332_v60, %v2331_v7  ;;  %v2403_v60 = vmul.f32 %v2343_v45, %v12596_v28 }
 0x4df   :  { %v2334_v61 = vrot.slane %v2333_v11, 1 }
 0x4e1   :  { %v10652_v9 = vpop.eup %10651  ;;  %v2335_v25 = vadd.f32 %v2334_v61, %v2333_v11  ;;  %v2371_v61 = vmul.f32 %v2343_v45, %v12521_v41  ;;  %v2375_v11 = vmul.f32 %v2343_v45, %v12526_v49  ;;  %v2407_v41 = vmul.f32 %v2343_v45, %v12607_v12 }
 0x4e2   :  { %v2438_v1 = vmul.f32 %v10652_v9, %v2415_v0  ;;  %vm2444_vm6 = vweird.f32 %v10652_v9  ;;  %v2411_v49 = vmul.f32 %v2343_v45, %v12618_v51 }
 0x4e3   :  { %v2339_v6 = vmul.f32 %v2335_v25, %v16352_v62  ;;  %vm2445_vm9 = vmor %vm2443_vm8, %vm2444_vm6 }
 0x4e4   :  { %v2439_v16 = vmul.f32 %v10652_v9, %v2438_v1 }
 0x4e5   :  { %v12689_v46 = vadd.f32 0.8, %v2339_v6 }
 0x4e6   :  { %v2440_v26 = vmul.f32 0.5, %v2439_v16 }
 0x4e7   :  { %10653 = vrsqrt.f32 %v12689_v46 }
 0x4e8   :  { %v2441_v47 = vsub.f32 1.5, %v2440_v26 }
 0x4ea   :  { %v2442_v7 = vmul.f32 %v10652_v9, %v2441_v47 }
 0x4ec   :  { %v2446_v4 = vsel %vm2445_vm9, %v10652_v9, %v2442_v7 }
 0x4ed   :  { %v2459_v57 = vmul.f32 %v2446_v4, %v2351_v10  ;;  %v2463_v17 = vmul.f32 %v2446_v4, %v2355_v43  ;;  %v2467_v1 = vmul.f32 %v2446_v4, %v2359_v5  ;;  %v2471_v0 = vmul.f32 %v2446_v4, %v2363_v53  ;;  %v12704_v10 = vpop.eup %10653 }
 0x4ee   :  { %v2475_v16 = vmul.f32 %v2446_v4, %v2367_v63  ;;  %v2479_v48 = vmul.f32 %v2446_v4, %v2371_v61  ;;  %v2483_v25 = vmul.f32 %v2446_v4, %v2375_v11  ;;  %v2487_v27 = vmul.f32 %v2446_v4, %v2379_v54 }
 0x4ef   :  { %v2491_v26 = vmul.f32 %v2446_v4, %v2383_v20  ;;  %v2495_v28 = vmul.f32 %v2446_v4, %v2387_v23  ;;  %v2499_v6 = vmul.f32 %v2446_v4, %v2391_v19  ;;  %v2503_v12 = vmul.f32 %v2446_v4, %v2395_v3 }
 0x4f0   :  { %v2507_v47 = vmul.f32 %v2446_v4, %v2399_v52  ;;  %v2511_v62 = vmul.f32 %v2446_v4, %v2403_v60  ;;  %v2515_v45 = vmul.f32 %v2446_v4, %v2407_v41  ;;  %v2519_v51 = vmul.f32 %v2446_v4, %v2411_v49 }
 0x4f1   :  { %v2532_v9 = vadd.f32 %v2524_v13, %v2459_v57  ;;  %v2536_v22 = vadd.f32 %v2524_v13, %v2463_v17  ;;  %v2540_v7 = vadd.f32 %v2524_v13, %v2467_v1  ;;  %v2544_v35 = vadd.f32 %v2524_v13, %v2471_v0 }
 0x4f2   :  { %v2548_v43 = vadd.f32 %v2524_v13, %v2475_v16  ;;  %v2552_v5 = vadd.f32 %v2524_v13, %v2479_v48  ;;  %v2556_v53 = vadd.f32 %v2524_v13, %v2483_v25  ;;  %v2560_v63 = vadd.f32 %v2524_v13, %v2487_v27 }
 0x4f3   :  { %v2564_v61 = vadd.f32 %v2524_v13, %v2491_v26  ;;  %v2568_v11 = vadd.f32 %v2524_v13, %v2495_v28  ;;  %v2572_v54 = vadd.f32 %v2524_v13, %v2499_v6  ;;  %v2576_v20 = vadd.f32 %v2524_v13, %v2503_v12 }
 0x4f4   :  { %v2580_v23 = vadd.f32 %v2524_v13, %v2507_v47  ;;  %v2584_v19 = vadd.f32 %v2524_v13, %v2511_v62  ;;  %v2588_v3 = vadd.f32 %v2524_v13, %v2515_v45  ;;  %v2592_v52 = vadd.f32 %v2524_v13, %v2519_v51 }
 0x4f5   :  { %vm2596_vm7 = vcmp.gt.f32.partialorder %v2532_v9, 0.0  ;;  %vm2600_vm10 = vcmp.gt.f32.partialorder %v2536_v22, 0.0  ;;  %vm2604_vm11 = vcmp.gt.f32.partialorder %v2540_v7, 0.0  ;;  %vm2608_vm12 = vcmp.gt.f32.partialorder %v2544_v35, 0.0 }
 0x4f6   :  { %vm2612_vm13 = vcmp.gt.f32.partialorder %v2548_v43, 0.0  ;;  %vm2616_vm14 = vcmp.gt.f32.partialorder %v2552_v5, 0.0  ;;  %vm2620_vm15 = vcmp.gt.f32.partialorder %v2556_v53, 0.0  ;;  %vm2624_vm0 = vcmp.gt.f32.partialorder %v2560_v63, 0.0 }
 0x4f7   :  { %vm2628_vm1 = vcmp.gt.f32.partialorder %v2564_v61, 0.0  ;;  %vm2632_vm2 = vcmp.gt.f32.partialorder %v2568_v11, 0.0  ;;  %vm2636_vm3 = vcmp.gt.f32.partialorder %v2572_v54, 0.0  ;;  %vm2640_vm4 = vcmp.gt.f32.partialorder %v2576_v20, 0.0 }
 0x4f8   :  { %vm2644_vm5 = vcmp.gt.f32.partialorder %v2580_v23, 0.0  ;;  %vm2648_vm6 = vcmp.gt.f32.partialorder %v2584_v19, 0.0  ;;  %vm2652_vm8 = vcmp.gt.f32.partialorder %v2588_v3, 0.0  ;;  %vm2656_vm9 = vcmp.gt.f32.partialorder %v2592_v52, 0.0 }
 0x4f9   :  { %v2660_v60 = vmul.f32 0.2, %v2532_v9  ;;  %v2664_v62 = vmul.f32 0.2, %v2536_v22  ;;  %v2668_v41 = vmul.f32 0.2, %v2540_v7  ;;  %v2448_v57 = vmul.f32 %v12704_v10, %v12689_v46 }
 0x4fa   :  { %v2672_v49 = vmul.f32 0.2, %v2544_v35  ;;  %v2676_v4 = vmul.f32 0.2, %v2548_v43  ;;  %v2680_v13 = vmul.f32 0.2, %v2552_v5 }
 0x4fb   :  { %v2684_v17 = vmul.f32 0.2, %v2556_v53  ;;  %v2688_v1 = vmul.f32 0.2, %v2560_v63  ;;  %v2692_v0 = vmul.f32 0.2, %v2564_v61  ;;  %v12709_v16 = vsel %vm2596_vm7, %v2532_v9, %v2660_v60 }
 0x4fc   :  { %v2696_v48 = vmul.f32 0.2, %v2568_v11  ;;  %v2700_v25 = vmul.f32 0.2, %v2572_v54  ;;  %v2704_v27 = vmul.f32 0.2, %v2576_v20  ;;  %v12712_v26 = vsel %vm2600_vm10, %v2536_v22, %v2664_v62 }
 0x4fd   :  { %v2708_v28 = vmul.f32 0.2, %v2580_v23  ;;  %v2712_v6 = vmul.f32 0.2, %v2584_v19  ;;  %v2716_v12 = vmul.f32 0.2, %v2588_v3  ;;  %v12715_v47 = vsel %vm2604_vm11, %v2540_v7, %v2668_v41 }
 0x4fe   :  { %v2720_v45 = vmul.f32 0.2, %v2592_v52  ;;  %v12718_v51 = vsel %vm2608_vm12, %v2544_v35, %v2672_v49  ;;  %v12721_v38 = vsel %vm2612_vm13, %v2548_v43, %v2676_v4  ;;  %v12724_v9 = vsel %vm2616_vm14, %v2552_v5, %v2680_v13 }
 0x4ff   :  { %v12727_v60 = vsel %vm2620_vm15, %v2556_v53, %v2684_v17  ;;  %v12730_v22 = vsel %vm2624_vm0, %v2560_v63, %v2688_v1  ;;  %v12733_v62 = vsel %vm2628_vm1, %v2564_v61, %v2692_v0  ;;  %v12736_v7 = vsel %vm2632_vm2, %v2568_v11, %v2696_v48 }
 0x500   :  { %v12739_v35 = vsel %vm2636_vm3, %v2572_v54, %v2700_v25  ;;  %v12742_v43 = vsel %vm2640_vm4, %v2576_v20, %v2704_v27  ;;  %v12745_v5 = vsel %vm2644_vm5, %v2580_v23, %v2708_v28  ;;  %v12748_v53 = vsel %vm2648_vm6, %v2584_v19, %v2712_v6 }
 0x501   :  { %v12751_v63 = vsel %vm2652_vm8, %v2588_v3, %v2716_v12  ;;  %v12754_v61 = vsel %vm2656_vm9, %v2592_v52, %v2720_v45  ;;  %v2449_v11 = vmul.f32 %v12704_v10, %v2448_v57  ;;  %v2352_v54 = vmul.f32 %v12682_v42, %v12540_v18 }
 0x502   :  { %16368 = vst [vmem:[#allocation23_spill] sm:$0xff] %v12754_v61  ;;  %v2356_v20 = vmul.f32 %v12682_v42, %v12544_v34  ;;  %v2360_v23 = vmul.f32 %v12682_v42, %v12548_v44  ;;  %v2364_v19 = vmul.f32 %v12682_v42, %v12552_v30  ;;  %vm2454_vm7 = vweird.f32 %v12704_v10 }
 0x503   :  { %v2450_v41 = vmul.f32 0.5, %v2449_v11  ;;  %v2368_v52 = vmul.f32 %v12682_v42, %v12556_v59  ;;  %v2372_v49 = vmul.f32 %v12682_v42, %v12591_v31  ;;  %v2376_v18 = vmul.f32 %v12682_v42, %v12602_v50 }
 0x504   :  { %v2380_v34 = vmul.f32 %v12682_v42, %v12613_v29  ;;  %v2384_v44 = vmul.f32 %v12682_v42, %v12624_v14  ;;  %v2388_v30 = vmul.f32 %v12682_v42, %v12632_v55  ;;  %vm2453_vm10 = vweird.f32 %v12689_v46 }
 0x505   :  { %v2451_v3 = vsub.f32 1.5, %v2450_v41  ;;  %v2392_v59 = vmul.f32 %v12682_v42, %v12640_v36  ;;  %v2396_v31 = vmul.f32 %v12682_v42, %v12646_v15  ;;  %v2400_v50 = vmul.f32 %v12682_v42, %v12652_v8  ;;  %vm2455_vm11 = vmor %vm2453_vm10, %vm2454_vm7  ;;  %v10655_v36 = vld [vmem:[%s16158_s7 + $0x6] ss:$8 sm:$0xf] }
 0x506   :  { %v2404_v29 = vmul.f32 %v12682_v42, %v12658_v2  ;;  %v2408_v14 = vmul.f32 %v12682_v42, %v12664_v32  ;;  %v2412_v55 = vmul.f32 %v12682_v42, %v12670_v33  ;;  %v2525_v15 = vperm.slane %v10655_v36, 3 }
 0x507   :  { %v2452_v4 = vmul.f32 %v12704_v10, %v2451_v3 }
 0x509   :  { %v2456_v46 = vsel %vm2455_vm11, %v12704_v10, %v2452_v4 }
 0x50a   :  { %v2460_v13 = vmul.f32 %v2456_v46, %v2352_v54  ;;  %v2464_v57 = vmul.f32 %v2456_v46, %v2356_v20  ;;  %v2468_v8 = vmul.f32 %v2456_v46, %v2360_v23  ;;  %v2472_v17 = vmul.f32 %v2456_v46, %v2364_v19 }
 0x50b   :  { %v2476_v1 = vmul.f32 %v2456_v46, %v2368_v52  ;;  %v2480_v2 = vmul.f32 %v2456_v46, %v2372_v49  ;;  %v2484_v0 = vmul.f32 %v2456_v46, %v2376_v18  ;;  %v2488_v48 = vmul.f32 %v2456_v46, %v2380_v34 }
 0x50c   :  { %v2492_v25 = vmul.f32 %v2456_v46, %v2384_v44  ;;  %v2496_v32 = vmul.f32 %v2456_v46, %v2388_v30  ;;  %v2500_v27 = vmul.f32 %v2456_v46, %v2392_v59  ;;  %v2504_v28 = vmul.f32 %v2456_v46, %v2396_v31 }
 0x50d   :  { %v2508_v33 = vmul.f32 %v2456_v46, %v2400_v50  ;;  %v2512_v42 = vmul.f32 %v2456_v46, %v2404_v29  ;;  %v2516_v10 = vmul.f32 %v2456_v46, %v2408_v14  ;;  %v2520_v6 = vmul.f32 %v2456_v46, %v2412_v55 }
 0x50e   :  { %v2533_v12 = vadd.f32 %v2525_v15, %v2460_v13  ;;  %v2537_v45 = vadd.f32 %v2525_v15, %v2464_v57  ;;  %v2541_v11 = vadd.f32 %v2525_v15, %v2468_v8  ;;  %v2545_v41 = vadd.f32 %v2525_v15, %v2472_v17 }
 0x50f   :  { %v2549_v54 = vadd.f32 %v2525_v15, %v2476_v1  ;;  %v2553_v20 = vadd.f32 %v2525_v15, %v2480_v2  ;;  %v2557_v23 = vadd.f32 %v2525_v15, %v2484_v0  ;;  %v2561_v19 = vadd.f32 %v2525_v15, %v2488_v48 }
 0x510   :  { %v2565_v3 = vadd.f32 %v2525_v15, %v2492_v25  ;;  %v2569_v52 = vadd.f32 %v2525_v15, %v2496_v32  ;;  %v2573_v49 = vadd.f32 %v2525_v15, %v2500_v27  ;;  %v2577_v18 = vadd.f32 %v2525_v15, %v2504_v28 }
 0x511   :  { %v2581_v34 = vadd.f32 %v2525_v15, %v2508_v33  ;;  %v2585_v44 = vadd.f32 %v2525_v15, %v2512_v42  ;;  %v2589_v30 = vadd.f32 %v2525_v15, %v2516_v10  ;;  %v2593_v4 = vadd.f32 %v2525_v15, %v2520_v6 }
 0x512   :  { %vm2597_vm12 = vcmp.gt.f32.partialorder %v2533_v12, 0.0  ;;  %vm2601_vm13 = vcmp.gt.f32.partialorder %v2537_v45, 0.0  ;;  %vm2605_vm14 = vcmp.gt.f32.partialorder %v2541_v11, 0.0  ;;  %vm2609_vm15 = vcmp.gt.f32.partialorder %v2545_v41, 0.0 }
 0x513   :  { %vm2613_vm0 = vcmp.gt.f32.partialorder %v2549_v54, 0.0  ;;  %vm2617_vm1 = vcmp.gt.f32.partialorder %v2553_v20, 0.0  ;;  %vm2621_vm2 = vcmp.gt.f32.partialorder %v2557_v23, 0.0  ;;  %vm2625_vm3 = vcmp.gt.f32.partialorder %v2561_v19, 0.0 }
 0x514   :  { %vm2629_vm4 = vcmp.gt.f32.partialorder %v2565_v3, 0.0  ;;  %vm2633_vm5 = vcmp.gt.f32.partialorder %v2569_v52, 0.0  ;;  %vm2637_vm6 = vcmp.gt.f32.partialorder %v2573_v49, 0.0  ;;  %vm2641_vm8 = vcmp.gt.f32.partialorder %v2577_v18, 0.0 }
 0x515   :  { %vm2645_vm9 = vcmp.gt.f32.partialorder %v2581_v34, 0.0  ;;  %vm2649_vm7 = vcmp.gt.f32.partialorder %v2585_v44, 0.0  ;;  %vm2653_vm10 = vcmp.gt.f32.partialorder %v2589_v30, 0.0  ;;  %vm2657_vm11 = vcmp.gt.f32.partialorder %v2593_v4, 0.0 }
 0x516   :  { %v2661_v59 = vmul.f32 0.2, %v2533_v12  ;;  %v2665_v31 = vmul.f32 0.2, %v2537_v45  ;;  %v2669_v50 = vmul.f32 0.2, %v2541_v11 }
 0x517   :  { %v2673_v29 = vmul.f32 0.2, %v2545_v41  ;;  %v2677_v14 = vmul.f32 0.2, %v2549_v54  ;;  %v2681_v55 = vmul.f32 0.2, %v2553_v20 }
 0x518   :  { %v2685_v46 = vmul.f32 0.2, %v2557_v23  ;;  %v2689_v36 = vmul.f32 0.2, %v2561_v19  ;;  %v2693_v15 = vmul.f32 0.2, %v2565_v3  ;;  %v12797_v13 = vsel %vm2597_vm12, %v2533_v12, %v2661_v59 }
 0x519   :  { %v2697_v57 = vmul.f32 0.2, %v2569_v52  ;;  %v2701_v8 = vmul.f32 0.2, %v2573_v49  ;;  %v2705_v17 = vmul.f32 0.2, %v2577_v18  ;;  %v12800_v1 = vsel %vm2601_vm13, %v2537_v45, %v2665_v31 }
 0x51a   :  { %v2709_v2 = vmul.f32 0.2, %v2581_v34  ;;  %v2713_v0 = vmul.f32 0.2, %v2585_v44  ;;  %v2717_v48 = vmul.f32 0.2, %v2589_v30  ;;  %v12803_v25 = vsel %vm2605_vm14, %v2541_v11, %v2669_v50 }
 0x51b   :  { %v2721_v32 = vmul.f32 0.2, %v2593_v4  ;;  %v12806_v27 = vsel %vm2609_vm15, %v2545_v41, %v2673_v29  ;;  %v12809_v28 = vsel %vm2613_vm0, %v2549_v54, %v2677_v14  ;;  %v12812_v33 = vsel %vm2617_vm1, %v2553_v20, %v2681_v55 }
 0x51c   :  { %v12815_v42 = vsel %vm2621_vm2, %v2557_v23, %v2685_v46  ;;  %v12818_v10 = vsel %vm2625_vm3, %v2561_v19, %v2689_v36  ;;  %v12821_v6 = vsel %vm2629_vm4, %v2565_v3, %v2693_v15  ;;  %v12824_v12 = vsel %vm2633_vm5, %v2569_v52, %v2697_v57 }
 0x51d   :  { %v12827_v45 = vsel %vm2637_vm6, %v2573_v49, %v2701_v8  ;;  %v12830_v11 = vsel %vm2641_vm8, %v2577_v18, %v2705_v17  ;;  %v12833_v41 = vsel %vm2645_vm9, %v2581_v34, %v2709_v2  ;;  %v12836_v54 = vsel %vm2649_vm7, %v2585_v44, %v2713_v0 }
 0x51e   :  { %v12839_v20 = vsel %vm2653_vm10, %v2589_v30, %v2717_v48  ;;  %v12842_v23 = vsel %vm2657_vm11, %v2593_v4, %v2721_v32 }
 0x51f   :  { %16369 = vst [vmem:[#allocation24_spill] sm:$0xff] %v12839_v20 }
 0x520   :  { %16370 = vst [vmem:[#allocation25_spill] sm:$0xff] %v12842_v23 }
 0x521   :  { %10828 = dma.done.wait [#allocation4], 32768 }
 0x522   :  { %10829 = vsyncadd [#allocation4], 4294934528  ;;  %v9139_v19 = vld [vmem:[#allocation2 + $0x1c0] sm:$0xf]  ;;  %v9909_v61 = vld [vmem:[#allocation2 + $0x7e0] sm:$0xf0] }
 0x523   :  { %v10356_v3 = vld [vmem:[#allocation2 + $0x1dc] sm:$0xf0] }
 0x524   :  { %v9395_v52 = vld [vmem:[#allocation2 + $0x3c0] sm:$0xf]  ;;  %v9140_v49 = vor.u32 %v10356_v3, %v9139_v19 }
 0x525   :  { %v10420_v18 = vld [vmem:[#allocation2 + $0x3dc] sm:$0xf0] }
 0x526   :  { %v9651_v59 = vld [vmem:[#allocation2 + $0x5c0] sm:$0xf]  ;;  %v9396_v34 = vor.u32 %v10420_v18, %v9395_v52  ;;  %4379 = vmatpush.bf16.msra.mxu0 %v9140_v49 }
 0x527   :  { %v10484_v31 = vld [vmem:[#allocation2 + $0x5dc] sm:$0xf0] }
 0x528   :  { %v9652_v50 = vor.u32 %v10484_v31, %v9651_v59  ;;  %v9907_v29 = vld [vmem:[#allocation2 + $0x7c0] sm:$0xf]  ;;  %4428 = vmatpush.bf16.msra.mxu2 %v9396_v34 }
 0x529   :  { %v10548_v44 = vld [vmem:[#allocation2 + $0x7dc] sm:$0xf0] }
 0x52a   :  { %v9107_v14 = vld [vmem:[#allocation2 + $0x180] sm:$0xf]  ;;  %v9908_v30 = vor.u32 %v10548_v44, %v9907_v29  ;;  %4477 = vmatpush.bf16.msra.mxu3 %v9652_v50 }
 0x52b   :  { %v10348_v55 = vld [vmem:[#allocation2 + $0x19c] sm:$0xf0] }
 0x52c   :  { %v9363_v46 = vld [vmem:[#allocation2 + $0x380] sm:$0xf]  ;;  %v9108_v36 = vor.u32 %v10348_v55, %v9107_v14  ;;  %4526 = vmatpush.bf16.msra.mxu1 %v9908_v30 }
 0x52d   :  { %v10412_v4 = vld [vmem:[#allocation2 + $0x39c] sm:$0xf0] }
 0x52e   :  { %v9364_v15 = vor.u32 %v10412_v4, %v9363_v46  ;;  %v9619_v57 = vld [vmem:[#allocation2 + $0x580] sm:$0xf]  ;;  %4380 = vmatpush.bf16.msra.mxu0 %v9108_v36 }
 0x52f   :  { %v10476_v8 = vld [vmem:[#allocation2 + $0x59c] sm:$0xf0] }
 0x530   :  { %v9875_v17 = vld [vmem:[#allocation2 + $0x780] sm:$0xf]  ;;  %v9620_v2 = vor.u32 %v10476_v8, %v9619_v57  ;;  %4429 = vmatpush.bf16.msra.mxu2 %v9364_v15 }
 0x531   :  { %v10540_v0 = vld [vmem:[#allocation2 + $0x79c] sm:$0xf0] }
 0x532   :  { %v9075_v48 = vld [vmem:[#allocation2 + $0x140] sm:$0xf]  ;;  %v9876_v19 = vor.u32 %v10540_v0, %v9875_v17  ;;  %4478 = vmatpush.bf16.msra.mxu3 %v9620_v2 }
 0x533   :  { %v10340_v32 = vld [vmem:[#allocation2 + $0x15c] sm:$0xf0] }
 0x534   :  { %v9331_v3 = vld [vmem:[#allocation2 + $0x340] sm:$0xf]  ;;  %v9076_v18 = vor.u32 %v10340_v32, %v9075_v48  ;;  %4527 = vmatpush.bf16.msra.mxu1 %v9876_v19 }
 0x535   :  { %v10404_v52 = vld [vmem:[#allocation2 + $0x35c] sm:$0xf0] }
 0x536   :  { %v9587_v49 = vld [vmem:[#allocation2 + $0x540] sm:$0xf]  ;;  %v9332_v50 = vor.u32 %v10404_v52, %v9331_v3  ;;  %4381 = vmatpush.bf16.msra.mxu0 %v9076_v18 }
 0x537   :  { %v10468_v59 = vld [vmem:[#allocation2 + $0x55c] sm:$0xf0] }
 0x538   :  { %v9843_v31 = vld [vmem:[#allocation2 + $0x740] sm:$0xf]  ;;  %v9588_v29 = vor.u32 %v10468_v59, %v9587_v49  ;;  %4430 = vmatpush.bf16.msra.mxu2 %v9332_v50 }
 0x539   :  { %v10532_v34 = vld [vmem:[#allocation2 + $0x75c] sm:$0xf0] }
 0x53a   :  { %v9043_v44 = vld [vmem:[#allocation2 + $0x100] sm:$0xf]  ;;  %v9844_v55 = vor.u32 %v10532_v34, %v9843_v31  ;;  %4479 = vmatpush.bf16.msra.mxu3 %v9588_v29 }
 0x53b   :  { %v10332_v14 = vld [vmem:[#allocation2 + $0x11c] sm:$0xf0] }
 0x53c   :  { %v9299_v30 = vld [vmem:[#allocation2 + $0x300] sm:$0xf]  ;;  %v9044_v36 = vor.u32 %v10332_v14, %v9043_v44  ;;  %4528 = vmatpush.bf16.msra.mxu1 %v9844_v55 }
 0x53d   :  { %v10396_v46 = vld [vmem:[#allocation2 + $0x31c] sm:$0xf0] }
 0x53e   :  { %v9555_v4 = vld [vmem:[#allocation2 + $0x500] sm:$0xf]  ;;  %v9300_v0 = vor.u32 %v10396_v46, %v9299_v30  ;;  %4382 = vmatpush.bf16.msra.mxu0 %v9044_v36 }
 0x53f   :  { %v10460_v57 = vld [vmem:[#allocation2 + $0x51c] sm:$0xf0] }
 0x540   :  { %v9811_v8 = vld [vmem:[#allocation2 + $0x700] sm:$0xf]  ;;  %v9556_v48 = vor.u32 %v10460_v57, %v9555_v4  ;;  %4431 = vmatpush.bf16.msra.mxu2 %v9300_v0 }
 0x541   :  { %v10524_v17 = vld [vmem:[#allocation2 + $0x71c] sm:$0xf0] }
 0x542   :  { %v9011_v15 = vld [vmem:[#allocation2 + $0xc0] sm:$0xf]  ;;  %v9812_v3 = vor.u32 %v10524_v17, %v9811_v8  ;;  %4480 = vmatpush.bf16.msra.mxu3 %v9556_v48 }
 0x543   :  { %v10324_v2 = vld [vmem:[#allocation2 + $0xdc] sm:$0xf0] }
 0x544   :  { %v9267_v32 = vld [vmem:[#allocation2 + $0x2c0] sm:$0xf]  ;;  %v9012_v34 = vor.u32 %v10324_v2, %v9011_v15  ;;  %4529 = vmatpush.bf16.msra.mxu1 %v9812_v3 }
 0x545   :  { %v10388_v52 = vld [vmem:[#allocation2 + $0x2dc] sm:$0xf0] }
 0x546   :  { %v9523_v49 = vld [vmem:[#allocation2 + $0x4c0] sm:$0xf]  ;;  %v9268_v18 = vor.u32 %v10388_v52, %v9267_v32  ;;  %4383 = vmatpush.bf16.msra.mxu0 %v9012_v34 }
 0x547   :  { %v10452_v19 = vld [vmem:[#allocation2 + $0x4dc] sm:$0xf0] }
 0x548   :  { %v9779_v59 = vld [vmem:[#allocation2 + $0x6c0] sm:$0xf]  ;;  %v9524_v44 = vor.u32 %v10452_v19, %v9523_v49  ;;  %4432 = vmatpush.bf16.msra.mxu2 %v9268_v18 }
 0x549   :  { %v10516_v31 = vld [vmem:[#allocation2 + $0x6dc] sm:$0xf0] }
 0x54a   :  { %v8979_v50 = vld [vmem:[#allocation2 + $0x80] sm:$0xf]  ;;  %v9780_v30 = vor.u32 %v10516_v31, %v9779_v59  ;;  %4481 = vmatpush.bf16.msra.mxu3 %v9524_v44 }
 0x54b   :  { %v10316_v29 = vld [vmem:[#allocation2 + $0x9c] sm:$0xf0] }
 0x54c   :  { %v9235_v14 = vld [vmem:[#allocation2 + $0x280] sm:$0xf]  ;;  %v8980_v17 = vor.u32 %v10316_v29, %v8979_v50  ;;  %4530 = vmatpush.bf16.msra.mxu1 %v9780_v30 }
 0x54d   :  { %v10380_v46 = vld [vmem:[#allocation2 + $0x29c] sm:$0xf0] }
 0x54e   :  { %v9491_v4 = vld [vmem:[#allocation2 + $0x480] sm:$0xf]  ;;  %v9236_v36 = vor.u32 %v10380_v46, %v9235_v14  ;;  %4384 = vmatpush.bf16.msra.mxu0 %v8980_v17  ;;  %v10480_v17 = vld [vmem:[#allocation2 + $0x5c4] sm:$0xf] }
 0x54f   :  { %v10444_v55 = vld [vmem:[#allocation2 + $0x49c] sm:$0xf0] }
 0x550   :  { %v9747_v57 = vld [vmem:[#allocation2 + $0x680] sm:$0xf]  ;;  %v9492_v15 = vor.u32 %v10444_v55, %v9491_v4  ;;  %4433 = vmatpush.bf16.msra.mxu2 %v9236_v36 }
 0x551   :  { %v10508_v8 = vld [vmem:[#allocation2 + $0x69c] sm:$0xf0] }
 0x552   :  { %v8947_v0 = vld [vmem:[#allocation2 + $0x40] sm:$0xf]  ;;  %v9748_v32 = vor.u32 %v10508_v8, %v9747_v57  ;;  %4482 = vmatpush.bf16.msra.mxu3 %v9492_v15  ;;  %v10416_v57 = vld [vmem:[#allocation2 + $0x3c4] sm:$0xf] }
 0x553   :  { %v10308_v48 = vld [vmem:[#allocation2 + $0x5c] sm:$0xf0]  ;;  %v9397_v8 = vld [vmem:[#allocation2 + $0x3e0] sm:$0xf0] }
 0x554   :  { %v9203_v2 = vld [vmem:[#allocation2 + $0x240] sm:$0xf]  ;;  %v8948_v31 = vor.u32 %v10308_v48, %v8947_v0  ;;  %4531 = vmatpush.bf16.msra.mxu1 %v9748_v32  ;;  %v9653_v0 = vld [vmem:[#allocation2 + $0x5e0] sm:$0xf0] }
 0x555   :  { %v10372_v52 = vld [vmem:[#allocation2 + $0x25c] sm:$0xf0]  ;;  %v9141_v32 = vld [vmem:[#allocation2 + $0x1e0] sm:$0xf0] }
 0x556   :  { %v9459_v49 = vld [vmem:[#allocation2 + $0x440] sm:$0xf]  ;;  %v9204_v34 = vor.u32 %v10372_v52, %v9203_v2  ;;  %4385 = vmatpush.bf16.msra.mxu0 %v8948_v31  ;;  %v9400_v2 = vor.u32 %v10416_v57, %v9397_v8  ;;  %v10352_v52 = vld [vmem:[#allocation2 + $0x1c4] sm:$0xf] }
 0x557   :  { %v10436_v3 = vld [vmem:[#allocation2 + $0x45c] sm:$0xf0]  ;;  %v10408_v31 = vld [vmem:[#allocation2 + $0x384] sm:$0xf] }
 0x558   :  { %v9715_v19 = vld [vmem:[#allocation2 + $0x640] sm:$0xf]  ;;  %v9460_v18 = vor.u32 %v10436_v3, %v9459_v49  ;;  %4434 = vmatpush.bf16.msra.mxu2 %v9204_v34  ;;  %v10544_v49 = vld [vmem:[#allocation2 + $0x7c4] sm:$0xf]  ;;  %v16371_v3 = vld [vmem:[#allocation47_spill] sm:$0xff]  ;;  %v12850_v34 = vpack.c.bf16 %v12418_v21, %v12415_v40 }
 0x559   :  { %v10500_v59 = vld [vmem:[#allocation2 + $0x65c] sm:$0xf0]  ;;  %v9109_v40 = vld [vmem:[#allocation2 + $0x1a0] sm:$0xf0] }
 0x55a   :  { %v8915_v23 = vld [vmem:[#allocation2] sm:$0xf]  ;;  %v9716_v14 = vor.u32 %v10500_v59, %v9715_v19  ;;  %4483 = vmatpush.bf16.msra.mxu3 %v9460_v18  ;;  %v12846_v19 = vpack.c.bf16 %v12283_v39, %v16371_v3  ;;  %v9656_v59 = vor.u32 %v10480_v17, %v9653_v0  ;;  %16373 = vst [vmem:[#allocation32_spill] sm:$0xff] %v12850_v34  ;;  %v10336_v8 = vld [vmem:[#allocation2 + $0x144] sm:$0xf] }
 0x55b   :  { %v10300_v44 = vld [vmem:[#allocation2 + $0x1c] sm:$0xf0]  ;;  %v12854_v18 = vpack.c.bf16 %v12712_v26, %v12709_v16  ;;  %v12858_v39 = vpack.c.bf16 %v12800_v1, %v12797_v13  ;;  %v10536_v16 = vld [vmem:[#allocation2 + $0x784] sm:$0xf]  ;;  %v12874_v3 = vpack.c.bf16 %v12718_v51, %v12715_v47 }
 0x55c   :  { %v9171_v50 = vld [vmem:[#allocation2 + $0x200] sm:$0xf]  ;;  %v8916_v20 = vor.u32 %v10300_v44, %v8915_v23  ;;  %4532 = vmatpush.bf16.msra.mxu1 %v9716_v14  ;;  %16372 = vst [vmem:[#allocation30_spill] sm:$0xff] %v12846_v19  ;;  %v9365_v23 = vld [vmem:[#allocation2 + $0x3a0] sm:$0xf0] }
 0x55d   :  { %v10364_v29 = vld [vmem:[#allocation2 + $0x21c] sm:$0xf0]  ;;  %16374 = vst [vmem:[#allocation39_spill] sm:$0xff] %v12854_v18  ;;  %v10472_v44 = vld [vmem:[#allocation2 + $0x584] sm:$0xf]  ;;  %v9368_v14 = vor.u32 %v10408_v31, %v9365_v23 }
 0x55e   :  { %v9427_v46 = vld [vmem:[#allocation2 + $0x400] sm:$0xf]  ;;  %v9172_v36 = vor.u32 %v10364_v29, %v9171_v50  ;;  %4386 = vmatpush.bf16.msra.mxu0 %v8916_v20  ;;  %v9621_v50 = vld [vmem:[#allocation2 + $0x5a0] sm:$0xf0]  ;;  %16375 = vst [vmem:[#allocation43_spill] sm:$0xff] %v12858_v39  ;;  %v9144_v29 = vor.u32 %v10352_v52, %v9141_v32  ;;  %v9912_v20 = vor.u32 %v10544_v49, %v9909_v61 }
 0x55f   :  { %v10428_v30 = vld [vmem:[#allocation2 + $0x41c] sm:$0xf0]  ;;  %v9624_v21 = vor.u32 %v10472_v44, %v9621_v50  ;;  %v9877_v26 = vld [vmem:[#allocation2 + $0x7a0] sm:$0xf0]  ;;  %v12870_v49 = vpack.c.bf16 %v12424_v37, %v12421_v24  ;;  %16378 = vst [vmem:[#allocation22_spill] sm:$0xff] %v12874_v3 }
 0x560   :  { %v9683_v4 = vld [vmem:[#allocation2 + $0x600] sm:$0xf]  ;;  %v9428_v15 = vor.u32 %v10428_v30, %v9427_v46  ;;  %4435 = vmatpush.bf16.msra.mxu2 %v9172_v36  ;;  %v10344_v46 = vld [vmem:[#allocation2 + $0x184] sm:$0xf] }
 0x561   :  { %v10492_v55 = vld [vmem:[#allocation2 + $0x61c] sm:$0xf0]  ;;  %4387 = vmatmul.bf16.vlgmr.msra.gmra.mxu0 %v12846_v19  ;;  %v10400_v30 = vld [vmem:[#allocation2 + $0x344] sm:$0xf]  ;;  %v9112_v1 = vor.u32 %v10344_v46, %v9109_v40  ;;  %16377 = vst [vmem:[#allocation21_spill] sm:$0xff] %v12870_v49  ;;  %v16383_v40 = vld [vmem:[#allocation26_spill] sm:$0xff] }
 0x562   :  { %v9684_v48 = vor.u32 %v10492_v55, %v9683_v4  ;;  %4484 = vmatpush.bf16.msra.mxu3 %v9428_v15  ;;  %v9333_v13 = vld [vmem:[#allocation2 + $0x360] sm:$0xf0]  ;;  %4575 = vmatpush.bf16.msrb.mxu0 %v9144_v29  ;;  %v9880_v55 = vor.u32 %v10536_v16, %v9877_v26  ;;  %v12894_v16 = vpack.c.bf16 %v12724_v9, %v12721_v38 }
 0x563   :  { %4436 = vmatmul.bf16.vlgmr.msra.gmra.mxu2 %v12850_v34  ;;  %v10464_v61 = vld [vmem:[#allocation2 + $0x544] sm:$0xf]  ;;  %v9336_v57 = vor.u32 %v10400_v30, %v9333_v13  ;;  %v12898_v26 = vpack.c.bf16 %v12812_v33, %v12809_v28 }
 0x564   :  { %4533 = vmatpush.bf16.msra.mxu1 %v9684_v48  ;;  %4624 = vmatpush.bf16.msrb.mxu2 %v9400_v2  ;;  %v9589_v4 = vld [vmem:[#allocation2 + $0x560] sm:$0xf0]  ;;  %16385 = vst [vmem:[#allocation40_spill] sm:$0xff] %v12894_v16 }
 0x565   :  { %4485 = vmatmul.bf16.vlgmr.msra.gmra.mxu3 %v12854_v18  ;;  %v9077_v17 = vld [vmem:[#allocation2 + $0x160] sm:$0xf0]  ;;  %v9592_v0 = vor.u32 %v10464_v61, %v9589_v4  ;;  %16386 = vst [vmem:[#allocation44_spill] sm:$0xff] %v12898_v26 }
 0x566   :  { %4673 = vmatpush.bf16.msrb.mxu3 %v9656_v59  ;;  %v10528_v36 = vld [vmem:[#allocation2 + $0x744] sm:$0xf]  ;;  %4576 = vmatpush.bf16.msrb.mxu0 %v9112_v1  ;;  %v9080_v48 = vor.u32 %v10336_v8, %v9077_v17  ;;  %v12878_v59 = vpack.c.bf16 %v12806_v27, %v12803_v25  ;;  %v16387_v8 = vld [vmem:[#allocation51_spill] sm:$0xff] }
 0x567   :  { %4534 = vmatmul.bf16.vlgmr.msra.gmra.mxu1 %v12858_v39  ;;  %v9845_v15 = vld [vmem:[#allocation2 + $0x760] sm:$0xf0] }
 0x568   :  { %4722 = vmatpush.bf16.msrb.mxu1 %v9912_v20  ;;  %4625 = vmatpush.bf16.msrb.mxu2 %v9368_v14  ;;  %v9848_v2 = vor.u32 %v10528_v36, %v9845_v15  ;;  %v16376_v52 = vld [vmem:[#allocation48_spill] sm:$0xff]  ;;  %16379 = vst [vmem:[#allocation29_spill] sm:$0xff] %v12878_v59  ;;  %v16380_v20 = vld [vmem:[#allocation49_spill] sm:$0xff]  ;;  %v16381_v14 = vld [vmem:[#allocation50_spill] sm:$0xff] }
 0x569   :  { %v12866_v32 = vpack.c.bf16 %v16376_v52, %v12286_v56  ;;  %v10392_v56 = vld [vmem:[#allocation2 + $0x304] sm:$0xf]  ;;  %v12886_v46 = vpack.c.bf16 %v16381_v14, %v16380_v20  ;;  %v16390_v36 = vld [vmem:[#allocation27_spill] sm:$0xff]  ;;  %v12918_v52 = vpack.c.bf16 %v12818_v10, %v12815_v42 }
 0x56a   :  { %4674 = vmatpush.bf16.msrb.mxu3 %v9624_v21  ;;  %4577 = vmatpush.bf16.msrb.mxu0 %v9080_v48  ;;  %v9301_v31 = vld [vmem:[#allocation2 + $0x320] sm:$0xf0]  ;;  %v12890_v21 = vpack.c.bf16 %v16383_v40, %v12427_v58  ;;  %v12934_v40 = vpack.c.bf16 %v12736_v7, %v12733_v62 }
 0x56b   :  { %v9304_v37 = vor.u32 %v10392_v56, %v9301_v31  ;;  %v10456_v24 = vld [vmem:[#allocation2 + $0x504] sm:$0xf]  ;;  %16382 = vst [vmem:[#allocation31_spill] sm:$0xff] %v12886_v46 }
 0x56c   :  { %4723 = vmatpush.bf16.msrb.mxu1 %v9880_v55  ;;  %4626 = vmatpush.bf16.msrb.mxu2 %v9336_v57  ;;  %v9557_v23 = vld [vmem:[#allocation2 + $0x520] sm:$0xf0]  ;;  %16384 = vst [vmem:[#allocation33_spill] sm:$0xff] %v12890_v21 }
 0x56d   :  { %v10328_v44 = vld [vmem:[#allocation2 + $0x104] sm:$0xf]  ;;  %v9560_v47 = vor.u32 %v10456_v24, %v9557_v23  ;;  %16394 = vst [vmem:[#allocation49_spill] sm:$0xff] %v12918_v52 }
 0x56e   :  { %4675 = vmatpush.bf16.msrb.mxu3 %v9592_v0  ;;  %v9045_v51 = vld [vmem:[#allocation2 + $0x120] sm:$0xf0]  ;;  %16401 = vst [vmem:[#allocation51_spill] sm:$0xff] %v12934_v40 }
 0x56f   :  { %v10520_v50 = vld [vmem:[#allocation2 + $0x704] sm:$0xf]  ;;  %v9048_v25 = vor.u32 %v10328_v44, %v9045_v51 }
 0x570   :  { %4724 = vmatpush.bf16.msrb.mxu1 %v9848_v2  ;;  %v9813_v29 = vld [vmem:[#allocation2 + $0x720] sm:$0xf0]  ;;  %4627 = vmatpush.bf16.msrb.mxu2 %v9304_v37  ;;  %v12914_v2 = vpack.c.bf16 %v12730_v22, %v12727_v60 }
 0x571   :  { %4392 = vmatmul.bf16.gmra.mxu0 %v12866_v32  ;;  %v9816_v27 = vor.u32 %v10520_v50, %v9813_v29  ;;  %v10384_v30 = vld [vmem:[#allocation2 + $0x2c4] sm:$0xf]  ;;  %v16395_v50 = vld [vmem:[#allocation53_spill] sm:$0xff]  ;;  %v16396_v29 = vld [vmem:[#allocation54_spill] sm:$0xff] }
 0x572   :  { %4676 = vmatpush.bf16.msrb.mxu3 %v9560_v47  ;;  %4578 = vmatpush.bf16.msrb.mxu0 %v9048_v25  ;;  %v9269_v13 = vld [vmem:[#allocation2 + $0x2e0] sm:$0xf0]  ;;  %16393 = vst [vmem:[#allocation48_spill] sm:$0xff] %v12914_v2  ;;  %v12926_v25 = vpack.c.bf16 %v16396_v29, %v16395_v50  ;;  %v16414_v50 = vld [vmem:[#allocation41_spill] sm:$0xff]  ;;  %v16415_v29 = vld [vmem:[#allocation42_spill] sm:$0xff] }
 0x573   :  { %4441 = vmatmul.bf16.gmra.mxu2 %v12870_v49  ;;  %v9272_v58 = vor.u32 %v10384_v30, %v9269_v13  ;;  %v10448_v1 = vld [vmem:[#allocation2 + $0x4c4] sm:$0xf]  ;;  %v12938_v30 = vpack.c.bf16 %v12824_v12, %v12821_v6 }
 0x574   :  { %4725 = vmatpush.bf16.msrb.mxu1 %v9816_v27  ;;  %v9525_v61 = vld [vmem:[#allocation2 + $0x4e0] sm:$0xf0]  ;;  %16397 = vst [vmem:[#allocation50_spill] sm:$0xff] %v12926_v25  ;;  %v16398_v27 = vld [vmem:[#allocation35_spill] sm:$0xff] }
 0x575   :  { %4490 = vmatmul.bf16.gmra.mxu3 %v12874_v3  ;;  %v10320_v4 = vld [vmem:[#allocation2 + $0xc4] sm:$0xf]  ;;  %v9528_v38 = vor.u32 %v10448_v1, %v9525_v61  ;;  %4628 = vmatpush.bf16.msrb.mxu2 %v9272_v58 }
 0x576   :  { %v9013_v9 = vld [vmem:[#allocation2 + $0xe0] sm:$0xf0] }
 0x577   :  { %4539 = vmatmul.bf16.gmra.mxu1 %v12878_v59  ;;  %v10512_v55 = vld [vmem:[#allocation2 + $0x6c4] sm:$0xf]  ;;  %v9016_v28 = vor.u32 %v10320_v4, %v9013_v9  ;;  %4677 = vmatpush.bf16.msrb.mxu3 %v9528_v38 }
 0x578   :  { %v9781_v57 = vld [vmem:[#allocation2 + $0x6e0] sm:$0xf0] }
 0x579   :  { %v9784_v33 = vor.u32 %v10512_v55, %v9781_v57  ;;  %4579 = vmatpush.bf16.msrb.mxu0 %v9016_v28  ;;  %v16388_v17 = vld [vmem:[#allocation52_spill] sm:$0xff]  ;;  %v16403_v57 = vld [vmem:[#allocation55_spill] sm:$0xff] }
 0x57a   :  { %v12906_v0 = vpack.c.bf16 %v16388_v17, %v16387_v8  ;;  %v16391_v15 = vld [vmem:[#allocation28_spill] sm:$0xff]  ;;  %16402 = vst [vmem:[#allocation52_spill] sm:$0xff] %v12938_v30  ;;  %v16406_v8 = vld [vmem:[#allocation37_spill] sm:$0xff]  ;;  %v16407_v17 = vld [vmem:[#allocation38_spill] sm:$0xff] }
 0x57b   :  { %4726 = vmatpush.bf16.msrb.mxu1 %v9784_v33  ;;  %v12910_v48 = vpack.c.bf16 %v16391_v15, %v16390_v36  ;;  %v10376_v56 = vld [vmem:[#allocation2 + $0x284] sm:$0xf]  ;;  %v12950_v36 = vpack.c.bf16 %v16407_v17, %v16406_v8  ;;  %v12954_v15 = vpack.c.bf16 %v12742_v43, %v12739_v35  ;;  %v16423_v17 = vld [vmem:[#allocation23_spill] sm:$0xff] }
 0x57c   :  { %16389 = vst [vmem:[#allocation34_spill] sm:$0xff] %v12906_v0  ;;  %v9237_v31 = vld [vmem:[#allocation2 + $0x2a0] sm:$0xf0] }
 0x57d   :  { %16392 = vst [vmem:[#allocation47_spill] sm:$0xff] %v12910_v48  ;;  %v9240_v37 = vor.u32 %v10376_v56, %v9237_v31  ;;  %v10440_v24 = vld [vmem:[#allocation2 + $0x484] sm:$0xf]  ;;  %v12958_v56 = vpack.c.bf16 %v12830_v11, %v12827_v45 }
 0x57e   :  { %v9493_v23 = vld [vmem:[#allocation2 + $0x4a0] sm:$0xf0]  ;;  %16408 = vst [vmem:[#allocation28_spill] sm:$0xff] %v12950_v36 }
 0x57f   :  { %v10312_v44 = vld [vmem:[#allocation2 + $0x84] sm:$0xf]  ;;  %v9496_v60 = vor.u32 %v10440_v24, %v9493_v23  ;;  %4629 = vmatpush.bf16.msrb.mxu2 %v9240_v37  ;;  %16409 = vst [vmem:[#allocation53_spill] sm:$0xff] %v12954_v15 }
 0x580   :  { %v8981_v22 = vld [vmem:[#allocation2 + $0xa0] sm:$0xf0]  ;;  %16410 = vst [vmem:[#allocation54_spill] sm:$0xff] %v12958_v56 }
 0x581   :  { %4397 = vmatmul.bf16.gmra.mxu0 %v12886_v46  ;;  %v10504_v47 = vld [vmem:[#allocation2 + $0x684] sm:$0xf]  ;;  %v8984_v42 = vor.u32 %v10312_v44, %v8981_v22  ;;  %4678 = vmatpush.bf16.msrb.mxu3 %v9496_v60 }
 0x582   :  { %v9749_v51 = vld [vmem:[#allocation2 + $0x6a0] sm:$0xf0] }
 0x583   :  { %4446 = vmatmul.bf16.gmra.mxu2 %v12890_v21  ;;  %v9752_v10 = vor.u32 %v10504_v47, %v9749_v51  ;;  %4580 = vmatpush.bf16.msrb.mxu0 %v8984_v42  ;;  %v16399_v20 = vld [vmem:[#allocation36_spill] sm:$0xff]  ;;  %v16411_v51 = vld [vmem:[#allocation57_spill] sm:$0xff]  ;;  %v16412_v42 = vld [vmem:[#allocation58_spill] sm:$0xff] }
 0x584   :  { %v12930_v14 = vpack.c.bf16 %v16399_v20, %v16398_v27  ;;  %v10368_v13 = vld [vmem:[#allocation2 + $0x244] sm:$0xf]  ;;  %v12970_v27 = vpack.c.bf16 %v16415_v29, %v16414_v50  ;;  %v12974_v20 = vpack.c.bf16 %v12748_v53, %v12745_v5  ;;  %v9147_v5 = vld [vmem:[#allocation2 + $0x1c8] sm:$0xf] }
 0x585   :  { %4495 = vmatmul.bf16.gmra.mxu3 %v12894_v16  ;;  %4727 = vmatpush.bf16.msrb.mxu1 %v9752_v10  ;;  %v9205_v58 = vld [vmem:[#allocation2 + $0x260] sm:$0xf0]  ;;  %v12966_v10 = vpack.c.bf16 %v16412_v42, %v16411_v51  ;;  %v10357_v53 = vld [vmem:[#allocation2 + $0x1e4] sm:$0xf0] }
 0x586   :  { %16400 = vst [vmem:[#allocation26_spill] sm:$0xff] %v12930_v14  ;;  %v9208_v1 = vor.u32 %v10368_v13, %v9205_v58  ;;  %v10432_v61 = vld [vmem:[#allocation2 + $0x444] sm:$0xf]  ;;  %v12978_v13 = vpack.c.bf16 %v12836_v54, %v12833_v41  ;;  %v9403_v58 = vld [vmem:[#allocation2 + $0x3c8] sm:$0xf]  ;;  %v9148_v54 = vor.u32 %v10357_v53, %v9147_v5 }
 0x587   :  { %4544 = vmatmul.bf16.gmra.mxu1 %v12898_v26  ;;  %v9461_v4 = vld [vmem:[#allocation2 + $0x460] sm:$0xf0]  ;;  %16413 = vst [vmem:[#allocation35_spill] sm:$0xff] %v12966_v10  ;;  %v9915_v41 = vld [vmem:[#allocation2 + $0x7c8] sm:$0xf] }
 0x588   :  { %v10304_v38 = vld [vmem:[#allocation2 + $0x44] sm:$0xf]  ;;  %v9464_v62 = vor.u32 %v10432_v61, %v9461_v4  ;;  %4630 = vmatpush.bf16.msrb.mxu2 %v9208_v1  ;;  %16416 = vst [vmem:[#allocation36_spill] sm:$0xff] %v12970_v27  ;;  %v10421_v1 = vld [vmem:[#allocation2 + $0x3e4] sm:$0xf0] }
 0x589   :  { %v8949_v7 = vld [vmem:[#allocation2 + $0x60] sm:$0xf0]  ;;  %16417 = vst [vmem:[#allocation55_spill] sm:$0xff] %v12974_v20  ;;  %v9404_v61 = vor.u32 %v10421_v1, %v9403_v58  ;;  %v9659_v4 = vld [vmem:[#allocation2 + $0x5c8] sm:$0xf] }
 0x58a   :  { %v10496_v9 = vld [vmem:[#allocation2 + $0x644] sm:$0xf]  ;;  %v8952_v6 = vor.u32 %v10304_v38, %v8949_v7  ;;  %4679 = vmatpush.bf16.msrb.mxu3 %v9464_v62  ;;  %v10485_v38 = vld [vmem:[#allocation2 + $0x5e4] sm:$0xf0] }
 0x58b   :  { %v9717_v55 = vld [vmem:[#allocation2 + $0x660] sm:$0xf0]  ;;  %v9660_v62 = vor.u32 %v10485_v38, %v9659_v4  ;;  %v10549_v7 = vld [vmem:[#allocation2 + $0x7e4] sm:$0xf0] }
 0x58c   :  { %v9720_v12 = vor.u32 %v10496_v9, %v9717_v55  ;;  %4581 = vmatpush.bf16.msrb.mxu0 %v8952_v6  ;;  %v16404_v28 = vld [vmem:[#allocation56_spill] sm:$0xff]  ;;  %v9916_v9 = vor.u32 %v10549_v7, %v9915_v41  ;;  %v16419_v55 = vld [vmem:[#allocation59_spill] sm:$0xff]  ;;  %v9115_v51 = vld [vmem:[#allocation2 + $0x188] sm:$0xf] }
 0x58d   :  { %v12946_v33 = vpack.c.bf16 %v16404_v28, %v16403_v57  ;;  %v10360_v31 = vld [vmem:[#allocation2 + $0x204] sm:$0xf]  ;;  %16418 = vst [vmem:[#allocation56_spill] sm:$0xff] %v12978_v13  ;;  %v16421_v57 = vld [vmem:[#allocation45_spill] sm:$0xff]  ;;  %v16422_v28 = vld [vmem:[#allocation46_spill] sm:$0xff] }
 0x58e   :  { %4728 = vmatpush.bf16.msrb.mxu1 %v9720_v12  ;;  %v9173_v37 = vld [vmem:[#allocation2 + $0x220] sm:$0xf0]  ;;  %v12990_v8 = vpack.c.bf16 %v16422_v28, %v16421_v57  ;;  %v10349_v42 = vld [vmem:[#allocation2 + $0x1a4] sm:$0xf0] }
 0x58f   :  { %16405 = vst [vmem:[#allocation27_spill] sm:$0xff] %v12946_v33  ;;  %v9176_v24 = vor.u32 %v10360_v31, %v9173_v37  ;;  %v10424_v23 = vld [vmem:[#allocation2 + $0x404] sm:$0xf]  ;;  %v12994_v31 = vpack.c.bf16 %v16423_v17, %v12751_v63  ;;  %v9883_v50 = vld [vmem:[#allocation2 + $0x788] sm:$0xf]  ;;  %v9116_v29 = vor.u32 %v10349_v42, %v9115_v51 }
 0x590   :  { %v9429_v44 = vld [vmem:[#allocation2 + $0x420] sm:$0xf0]  ;;  %v10541_v58 = vld [vmem:[#allocation2 + $0x7a4] sm:$0xf0] }
 0x591   :  { %4402 = vmatmul.bf16.gmra.mxu0 %v12906_v0  ;;  %v10296_v60 = vld [vmem:[#allocation2 + $0x4] sm:$0xf]  ;;  %v9432_v35 = vor.u32 %v10424_v23, %v9429_v44  ;;  %4631 = vmatpush.bf16.msrb.mxu2 %v9176_v24  ;;  %v16425_v24 = vld [vmem:[#allocation25_spill] sm:$0xff]  ;;  %v9884_v4 = vor.u32 %v10541_v58, %v9883_v50 }
 0x592   :  { %v8917_v43 = vld [vmem:[#allocation2 + $0x20] sm:$0xf0]  ;;  %v9371_v44 = vld [vmem:[#allocation2 + $0x388] sm:$0xf] }
 0x593   :  { %4451 = vmatmul.bf16.gmra.mxu2 %v12910_v48  ;;  %v10488_v22 = vld [vmem:[#allocation2 + $0x604] sm:$0xf]  ;;  %v8920_v45 = vor.u32 %v10296_v60, %v8917_v43  ;;  %4680 = vmatpush.bf16.msrb.mxu3 %v9432_v35  ;;  %v10413_v60 = vld [vmem:[#allocation2 + $0x3a4] sm:$0xf0] }
 0x594   :  { %v9685_v47 = vld [vmem:[#allocation2 + $0x620] sm:$0xf0]  ;;  %v9627_v35 = vld [vmem:[#allocation2 + $0x588] sm:$0xf]  ;;  %v9372_v43 = vor.u32 %v10413_v60, %v9371_v44 }
 0x595   :  { %4500 = vmatmul.bf16.gmra.mxu3 %v12914_v2  ;;  %v9688_v11 = vor.u32 %v10488_v22, %v9685_v47  ;;  %4582 = vmatpush.bf16.msrb.mxu0 %v8920_v45  ;;  %v16420_v6 = vld [vmem:[#allocation60_spill] sm:$0xff]  ;;  %v10477_v22 = vld [vmem:[#allocation2 + $0x5a4] sm:$0xf0] }
 0x596   :  { %4820 = vmatpush.bf16.msra.mxu2 %v9404_v61  ;;  %v12986_v12 = vpack.c.bf16 %v16420_v6, %v16419_v55  ;;  %v16424_v37 = vld [vmem:[#allocation24_spill] sm:$0xff]  ;;  %v9628_v63 = vor.u32 %v10477_v22, %v9627_v35  ;;  %v9339_v5 = vld [vmem:[#allocation2 + $0x348] sm:$0xf] }
 0x597   :  { %4549 = vmatmul.bf16.gmra.mxu1 %v12918_v52  ;;  %4869 = vmatpush.bf16.msra.mxu3 %v9660_v62  ;;  %v12998_v23 = vpack.c.bf16 %v16425_v24, %v16424_v37  ;;  %v8911_v47 = vld [vmem:[%s16158_s7 + $0x7] ss:$8 sm:$0xf]  ;;  %v10405_v53 = vld [vmem:[#allocation2 + $0x364] sm:$0xf0] }
 0x598   :  { %4729 = vmatpush.bf16.msrb.mxu1 %v9688_v11  ;;  %v8912_v45 = vld [vmem:[%s16158_s7 + $0x7] ss:$8 sm:$0xf0]  ;;  %v9595_v41 = vld [vmem:[#allocation2 + $0x548] sm:$0xf] }
 0x599   :  { %4771 = vmatpush.bf16.msra.mxu0 %v9148_v54  ;;  %16426 = vst [vmem:[#allocation37_spill] sm:$0xff] %v12998_v23  ;;  %v13010_v11 = vor.u32 %v8912_v45, %v8911_v47  ;;  %v10469_v55 = vld [vmem:[#allocation2 + $0x564] sm:$0xf0] }
 0x59a   :  { %4821 = vmatpush.bf16.msra.mxu2 %v9372_v43  ;;  %v9596_v28 = vor.u32 %v10469_v55, %v9595_v41  ;;  %v9083_v60 = vld [vmem:[#allocation2 + $0x148] sm:$0xf] }
 0x59b   :  { %4870 = vmatpush.bf16.msra.mxu3 %v9628_v63  ;;  %16427 = vst [vmem:[#allocation38_spill] sm:$0xff] %v13010_v11  ;;  %v13013_v1 = vperm.slane %v13010_v11, 0  ;;  %v10341_v35 = vld [vmem:[#allocation2 + $0x164] sm:$0xf0] }
 0x59c   :  { %4918 = vmatpush.bf16.msra.mxu1 %v9916_v9  ;;  %v9340_v9 = vor.u32 %v10405_v53, %v9339_v5  ;;  %v9851_v43 = vld [vmem:[#allocation2 + $0x748] sm:$0xf]  ;;  %v9084_v47 = vor.u32 %v10341_v35, %v9083_v60 }
 0x59d   :  { %4772 = vmatpush.bf16.msra.mxu0 %v9116_v29  ;;  %v10533_v45 = vld [vmem:[#allocation2 + $0x764] sm:$0xf0] }
 0x59e   :  { %4822 = vmatpush.bf16.msra.mxu2 %v9340_v9  ;;  %v9852_v50 = vor.u32 %v10533_v45, %v9851_v43  ;;  %v10397_v5 = vld [vmem:[#allocation2 + $0x324] sm:$0xf0] }
 0x59f   :  { %4871 = vmatpush.bf16.msra.mxu3 %v9596_v28  ;;  %v9563_v53 = vld [vmem:[#allocation2 + $0x508] sm:$0xf] }
 0x5a0   :  { %4919 = vmatpush.bf16.msra.mxu1 %v9884_v4  ;;  %v10461_v9 = vld [vmem:[#allocation2 + $0x524] sm:$0xf0] }
 0x5a1   :  { %4407 = vmatmul.bf16.gmra.mxu0 %v12926_v25  ;;  %v9051_v35 = vld [vmem:[#allocation2 + $0x108] sm:$0xf] }
 0x5a2   :  { %4773 = vmatpush.bf16.msra.mxu0 %v9084_v47  ;;  %v10333_v43 = vld [vmem:[#allocation2 + $0x124] sm:$0xf0] }
 0x5a3   :  { %4456 = vmatmul.bf16.gmra.mxu2 %v12930_v14  ;;  %v9052_v45 = vor.u32 %v10333_v43, %v9051_v35 }
 0x5a4   :  { %4920 = vmatpush.bf16.msra.mxu1 %v9852_v50 }
 0x5a5   :  { %4505 = vmatmul.bf16.gmra.mxu3 %v12934_v40 }
 0x5a6   :  { %4774 = vmatpush.bf16.msra.mxu0 %v9052_v45  ;;  %v9787_v45 = vld [vmem:[#allocation2 + $0x6c8] sm:$0xf] }
 0x5a7   :  { %4554 = vmatmul.bf16.gmra.mxu1 %v12938_v30 }
 0x5b1   :  { %4412 = vmatmul.bf16.gmra.mxu0 %v12946_v33 }
 0x5b3   :  { %4461 = vmatmul.bf16.gmra.mxu2 %v12950_v36 }
 0x5b5   :  { %4510 = vmatmul.bf16.gmra.mxu3 %v12954_v15 }
 0x5b7   :  { %4559 = vmatmul.bf16.gmra.mxu1 %v12958_v56 }
 0x5c1   :  { %4417 = vmatmul.bf16.gmra.mxu0 %v12966_v10 }
 0x5c3   :  { %4466 = vmatmul.bf16.gmra.mxu2 %v12970_v27 }
 0x5c5   :  { %4515 = vmatmul.bf16.gmra.mxu3 %v12974_v20 }
 0x5c7   :  { %4564 = vmatmul.bf16.gmra.mxu1 %v12978_v13 }
 0x5d1   :  { %4422 = vmatmul.bf16.gmra.mxu0 %v12986_v12 }
 0x5d3   :  { %4471 = vmatmul.bf16.gmra.mxu2 %v12990_v8 }
 0x5d5   :  { %4520 = vmatmul.bf16.gmra.mxu3 %v12994_v31 }
 0x5d7   :  { %4569 = vmatmul.bf16.gmra.mxu1 %v12998_v23 }
 0x5de   :  { %v4388_v61 = vpop.f32.mrf.mxu0 }
 0x5df   :  { %v4389_v62 = vadd.f32 %v4388_v61, %v13013_v1 }
 0x5e1   :  { %4583 = vmatmul.bf16.vlgmr.msrb.gmra.mxu0 %v12846_v19 }
 0x5e3   :  { %4632 = vmatmul.bf16.vlgmr.msrb.gmra.mxu2 %v12850_v34 }
 0x5e4   :  { %v4535_v38 = vpop.f32.mrf.mxu1 }
 0x5e5   :  { %4681 = vmatmul.bf16.vlgmr.msrb.gmra.mxu3 %v12854_v18 }
 0x5e6   :  { %v4437_v54 = vpop.f32.mrf.mxu2  ;;  %v4390_v57 = vpop.f32.mrf.mxu0 }
 0x5e7   :  { %4730 = vmatmul.bf16.vlgmr.msrb.gmra.mxu1 %v12858_v39  ;;  %v4438_v6 = vadd.f32 %v4437_v54, %v4389_v62  ;;  %v4391_v44 = vadd.f32 %v4390_v57, %v13013_v1  ;;  %v9307_v62 = vld [vmem:[#allocation2 + $0x308] sm:$0xf]  ;;  %v9564_v57 = vor.u32 %v10461_v9, %v9563_v53 }
 0x5e8   :  { %v4486_v7 = vpop.f32.mrf.mxu3  ;;  %v9275_v53 = vld [vmem:[#allocation2 + $0x2c8] sm:$0xf] }
 0x5e9   :  { %v4487_v17 = vadd.f32 %v4486_v7, %v4438_v6  ;;  %v9308_v7 = vor.u32 %v10397_v5, %v9307_v62  ;;  %4872 = vmatpush.bf16.msra.mxu3 %v9564_v57 }
 0x5eb   :  { %v13020_v24 = vadd.f32 %v4535_v38, %v4487_v17  ;;  %4823 = vmatpush.bf16.msra.mxu2 %v9308_v7 }
 0x5ec   :  { %v4537_v37 = vpop.f32.mrf.mxu1 }
 0x5ee   :  { %v4439_v22 = vpop.f32.mrf.mxu2  ;;  %v4393_v42 = vpop.f32.mrf.mxu0 }
 0x5ef   :  { %v4440_v51 = vadd.f32 %v4439_v22, %v4391_v44  ;;  %v4394_v4 = vadd.f32 %v4393_v42, %v13013_v1  ;;  %v9819_v22 = vld [vmem:[#allocation2 + $0x708] sm:$0xf] }
 0x5f0   :  { %v4488_v63 = vpop.f32.mrf.mxu3 }
 0x5f1   :  { %v4489_v29 = vadd.f32 %v4488_v63, %v4440_v51  ;;  %4588 = vmatmul.bf16.gmra.mxu0 %v12866_v32  ;;  %v10525_v51 = vld [vmem:[#allocation2 + $0x724] sm:$0xf0] }
 0x5f3   :  { %v13024_v61 = vadd.f32 %v4537_v37, %v4489_v29  ;;  %4637 = vmatmul.bf16.gmra.mxu2 %v12870_v49  ;;  %v9820_v29 = vor.u32 %v10525_v51, %v9819_v22 }
 0x5f4   :  { %v4540_v58 = vpop.f32.mrf.mxu1 }
 0x5f5   :  { %4686 = vmatmul.bf16.gmra.mxu3 %v12874_v3  ;;  %v5955_v38 = vadd.f32 %v13024_v61, %v13020_v24  ;;  %4921 = vmatpush.bf16.msra.mxu1 %v9820_v29  ;;  %v10517_v29 = vld [vmem:[#allocation2 + $0x6e4] sm:$0xf0] }
 0x5f6   :  { %v4442_v41 = vpop.f32.mrf.mxu2  ;;  %v4395_v6 = vpop.f32.mrf.mxu0 }
 0x5f7   :  { %4735 = vmatmul.bf16.gmra.mxu1 %v12878_v59  ;;  %v4443_v55 = vadd.f32 %v4442_v41, %v4394_v4  ;;  %v4396_v60 = vadd.f32 %v4395_v6, %v13013_v1  ;;  %v10389_v41 = vld [vmem:[#allocation2 + $0x2e4] sm:$0xf0] }
 0x5f8   :  { %v4491_v54 = vpop.f32.mrf.mxu3  ;;  %v10453_v6 = vld [vmem:[#allocation2 + $0x4e4] sm:$0xf0] }
 0x5f9   :  { %v4492_v28 = vadd.f32 %v4491_v54, %v4443_v55  ;;  %v9531_v54 = vld [vmem:[#allocation2 + $0x4c8] sm:$0xf]  ;;  %v9276_v55 = vor.u32 %v10389_v41, %v9275_v53  ;;  %v9788_v53 = vor.u32 %v10517_v29, %v9787_v45 }
 0x5fa   :  { %v10317_v29 = vld [vmem:[#allocation2 + $0xa4] sm:$0xf0] }
 0x5fb   :  { %v13032_v37 = vadd.f32 %v4540_v58, %v4492_v28  ;;  %4824 = vmatpush.bf16.msra.mxu2 %v9276_v55  ;;  %4922 = vmatpush.bf16.msra.mxu1 %v9788_v53  ;;  %v10381_v55 = vld [vmem:[#allocation2 + $0x2a4] sm:$0xf0] }
 0x5fc   :  { %v4542_v17 = vpop.f32.mrf.mxu1 }
 0x5fd   :  { %v5956_v44 = vadd.f32 %v5955_v38, %v13032_v37 }
 0x5fe   :  { %v4444_v63 = vpop.f32.mrf.mxu2  ;;  %v4398_v50 = vpop.f32.mrf.mxu0 }
 0x5ff   :  { %v4445_v42 = vadd.f32 %v4444_v63, %v4396_v60  ;;  %v4399_v38 = vadd.f32 %v4398_v50, %v13013_v1  ;;  %v9019_v63 = vld [vmem:[#allocation2 + $0xc8] sm:$0xf] }
 0x600   :  { %v4493_v47 = vpop.f32.mrf.mxu3 }
 0x601   :  { %v4494_v4 = vadd.f32 %v4493_v47, %v4445_v42  ;;  %4593 = vmatmul.bf16.gmra.mxu0 %v12886_v46  ;;  %v10325_v47 = vld [vmem:[#allocation2 + $0xe4] sm:$0xf0] }
 0x602   :  { %v9020_v50 = vor.u32 %v10325_v47, %v9019_v63 }
 0x603   :  { %v13037_v58 = vadd.f32 %v4542_v17, %v4494_v4  ;;  %4642 = vmatmul.bf16.gmra.mxu2 %v12890_v21  ;;  %v9532_v17 = vor.u32 %v10453_v6, %v9531_v54  ;;  %v9499_v6 = vld [vmem:[#allocation2 + $0x488] sm:$0xf] }
 0x604   :  { %v4545_v62 = vpop.f32.mrf.mxu1  ;;  %4775 = vmatpush.bf16.msra.mxu0 %v9020_v50  ;;  %v8987_v50 = vld [vmem:[#allocation2 + $0x88] sm:$0xf] }
 0x605   :  { %4691 = vmatmul.bf16.gmra.mxu3 %v12894_v16  ;;  %v5957_v5 = vadd.f32 %v5956_v44, %v13037_v58 }
 0x606   :  { %v4447_v7 = vpop.f32.mrf.mxu2  ;;  %v4400_v28 = vpop.f32.mrf.mxu0  ;;  %4873 = vmatpush.bf16.msra.mxu3 %v9532_v17 }
 0x607   :  { %4740 = vmatmul.bf16.gmra.mxu1 %v12898_v26  ;;  %v4448_v57 = vadd.f32 %v4447_v7, %v4399_v38  ;;  %v4401_v44 = vadd.f32 %v4400_v28, %v13013_v1 }
 0x608   :  { %v4496_v9 = vpop.f32.mrf.mxu3 }
 0x609   :  { %v4497_v60 = vadd.f32 %v4496_v9, %v4448_v57  ;;  %v9243_v9 = vld [vmem:[#allocation2 + $0x288] sm:$0xf] }
 0x60a   :  { %v9244_v17 = vor.u32 %v10381_v55, %v9243_v9  ;;  %v10509_v9 = vld [vmem:[#allocation2 + $0x6a4] sm:$0xf0] }
 0x60b   :  { %v13044_v43 = vadd.f32 %v4545_v62, %v4497_v60  ;;  %v10445_v60 = vld [vmem:[#allocation2 + $0x4a4] sm:$0xf0] }
 0x60c   :  { %v4547_v35 = vpop.f32.mrf.mxu1  ;;  %v9500_v63 = vor.u32 %v10445_v60, %v9499_v6  ;;  %4825 = vmatpush.bf16.msra.mxu2 %v9244_v17  ;;  %v9211_v60 = vld [vmem:[#allocation2 + $0x248] sm:$0xf] }
 0x60d   :  { %v5958_v22 = vadd.f32 %v5957_v5, %v13044_v43 }
 0x60e   :  { %v4449_v51 = vpop.f32.mrf.mxu2  ;;  %v4403_v38 = vpop.f32.mrf.mxu0  ;;  %4874 = vmatpush.bf16.msra.mxu3 %v9500_v63 }
 0x60f   :  { %v4450_v4 = vadd.f32 %v4449_v51, %v4401_v44  ;;  %v4404_v5 = vadd.f32 %v4403_v38, %v13013_v1 }
 0x610   :  { %v4498_v42 = vpop.f32.mrf.mxu3 }
 0x611   :  { %v4499_v41 = vadd.f32 %v4498_v42, %v4450_v4  ;;  %4598 = vmatmul.bf16.gmra.mxu0 %v12906_v0  ;;  %v9755_v4 = vld [vmem:[#allocation2 + $0x688] sm:$0xf] }
 0x612   :  { %v9756_v6 = vor.u32 %v10509_v9, %v9755_v4 }
 0x613   :  { %v13049_v62 = vadd.f32 %v4547_v35, %v4499_v41  ;;  %4647 = vmatmul.bf16.gmra.mxu2 %v12910_v48  ;;  %v8988_v41 = vor.u32 %v10317_v29, %v8987_v50  ;;  %v10437_v50 = vld [vmem:[#allocation2 + $0x464] sm:$0xf0] }
 0x614   :  { %v4550_v54 = vpop.f32.mrf.mxu1  ;;  %4923 = vmatpush.bf16.msra.mxu1 %v9756_v6  ;;  %v9723_v6 = vld [vmem:[#allocation2 + $0x648] sm:$0xf] }
 0x615   :  { %4696 = vmatmul.bf16.gmra.mxu3 %v12914_v2  ;;  %v5959_v7 = vadd.f32 %v5958_v22, %v13049_v62  ;;  %4776 = vmatpush.bf16.msra.mxu0 %v8988_v41 }
 0x616   :  { %v4452_v57 = vpop.f32.mrf.mxu2  ;;  %v4405_v35 = vpop.f32.mrf.mxu0 }
 0x617   :  { %4745 = vmatmul.bf16.gmra.mxu1 %v12918_v52  ;;  %v4453_v44 = vadd.f32 %v4452_v57, %v4404_v5  ;;  %v4406_v22 = vadd.f32 %v4405_v35, %v13013_v1  ;;  %v9467_v35 = vld [vmem:[#allocation2 + $0x448] sm:$0xf] }
 0x618   :  { %v4501_v28 = vpop.f32.mrf.mxu3  ;;  %v9468_v4 = vor.u32 %v10437_v50, %v9467_v35 }
 0x619   :  { %v4502_v47 = vadd.f32 %v4501_v28, %v4453_v44  ;;  %v10373_v44 = vld [vmem:[#allocation2 + $0x264] sm:$0xf0] }
 0x61a   :  { %4875 = vmatpush.bf16.msra.mxu3 %v9468_v4  ;;  %v9435_v4 = vld [vmem:[#allocation2 + $0x408] sm:$0xf] }
 0x61b   :  { %v13056_v51 = vadd.f32 %v4550_v54, %v4502_v47 }
 0x61c   :  { %v4552_v45 = vpop.f32.mrf.mxu1 }
 0x61d   :  { %v5960_v42 = vadd.f32 %v5959_v7, %v13056_v51 }
 0x61e   :  { %v4454_v38 = vpop.f32.mrf.mxu2  ;;  %v4408_v55 = vpop.f32.mrf.mxu0 }
 0x61f   :  { %v4455_v5 = vadd.f32 %v4454_v38, %v4406_v22  ;;  %v4409_v7 = vadd.f32 %v4408_v55, %v13013_v1  ;;  %v9212_v22 = vor.u32 %v10373_v44, %v9211_v60  ;;  %v10309_v55 = vld [vmem:[#allocation2 + $0x64] sm:$0xf0] }
 0x620   :  { %v4503_v53 = vpop.f32.mrf.mxu3  ;;  %v10501_v44 = vld [vmem:[#allocation2 + $0x664] sm:$0xf0] }
 0x621   :  { %v4504_v57 = vadd.f32 %v4503_v53, %v4455_v5  ;;  %4603 = vmatmul.bf16.gmra.mxu0 %v12926_v25  ;;  %4826 = vmatpush.bf16.msra.mxu2 %v9212_v22  ;;  %v8955_v5 = vld [vmem:[#allocation2 + $0x48] sm:$0xf]  ;;  %v9724_v35 = vor.u32 %v10501_v44, %v9723_v6 }
 0x622   :  { %v8956_v60 = vor.u32 %v10309_v55, %v8955_v5  ;;  %v10429_v5 = vld [vmem:[#allocation2 + $0x424] sm:$0xf0] }
 0x623   :  { %v13061_v54 = vadd.f32 %v4552_v45, %v4504_v57  ;;  %4652 = vmatmul.bf16.gmra.mxu2 %v12930_v14  ;;  %4924 = vmatpush.bf16.msra.mxu1 %v9724_v35  ;;  %v9436_v6 = vor.u32 %v10429_v5, %v9435_v4  ;;  %v10301_v35 = vld [vmem:[#allocation2 + $0x24] sm:$0xf0] }
 0x624   :  { %v4555_v28 = vpop.f32.mrf.mxu1  ;;  %4777 = vmatpush.bf16.msra.mxu0 %v8956_v60 }
 0x625   :  { %4701 = vmatmul.bf16.gmra.mxu3 %v12934_v40  ;;  %v5961_v17 = vadd.f32 %v5960_v42, %v13061_v54 }
 0x626   :  { %v4457_v63 = vpop.f32.mrf.mxu2  ;;  %v4410_v45 = vpop.f32.mrf.mxu0  ;;  %4876 = vmatpush.bf16.msra.mxu3 %v9436_v6 }
 0x627   :  { %4750 = vmatmul.bf16.gmra.mxu1 %v12938_v30  ;;  %v4458_v29 = vadd.f32 %v4457_v63, %v4409_v7  ;;  %v4411_v42 = vadd.f32 %v4410_v45, %v13013_v1  ;;  %v10365_v45 = vld [vmem:[#allocation2 + $0x224] sm:$0xf0] }
 0x628   :  { %v4506_v47 = vpop.f32.mrf.mxu3 }
 0x629   :  { %v4507_v38 = vadd.f32 %v4506_v47, %v4458_v29  ;;  %v9179_v29 = vld [vmem:[#allocation2 + $0x208] sm:$0xf] }
 0x62b   :  { %v13068_v41 = vadd.f32 %v4555_v28, %v4507_v38 }
 0x62c   :  { %v4557_v53 = vpop.f32.mrf.mxu1 }
 0x62d   :  { %v5962_v9 = vadd.f32 %v5961_v17, %v13068_v41 }
 0x62e   :  { %v4459_v57 = vpop.f32.mrf.mxu2  ;;  %v4413_v63 = vpop.f32.mrf.mxu0 }
 0x62f   :  { %v4460_v7 = vadd.f32 %v4459_v57, %v4411_v42  ;;  %v4414_v17 = vadd.f32 %v4413_v63, %v13013_v1  ;;  %v9180_v42 = vor.u32 %v10365_v45, %v9179_v29  ;;  %v8923_v63 = vld [vmem:[#allocation2 + $0x8] sm:$0xf] }
 0x630   :  { %v4508_v30 = vpop.f32.mrf.mxu3  ;;  %v8924_v29 = vor.u32 %v10301_v35, %v8923_v63  ;;  %v10493_v45 = vld [vmem:[#allocation2 + $0x624] sm:$0xf0] }
 0x631   :  { %v4509_v47 = vadd.f32 %v4508_v30, %v4460_v7  ;;  %4608 = vmatmul.bf16.gmra.mxu0 %v12946_v33  ;;  %4827 = vmatpush.bf16.msra.mxu2 %v9180_v42 }
 0x632   :  { %4778 = vmatpush.bf16.msra.mxu0 %v8924_v29 }
 0x633   :  { %v13073_v28 = vadd.f32 %v4557_v53, %v4509_v47  ;;  %4657 = vmatmul.bf16.gmra.mxu2 %v12950_v36  ;;  %v9691_v47 = vld [vmem:[#allocation2 + $0x608] sm:$0xf] }
 0x634   :  { %v4560_v22 = vpop.f32.mrf.mxu1  ;;  %v9692_v4 = vor.u32 %v10493_v45, %v9691_v47 }
 0x635   :  { %4706 = vmatmul.bf16.gmra.mxu3 %v12954_v15  ;;  %v5963_v50 = vadd.f32 %v5962_v9, %v13073_v28 }
 0x636   :  { %v4462_v30 = vpop.f32.mrf.mxu2  ;;  %v4415_v53 = vpop.f32.mrf.mxu0  ;;  %4925 = vmatpush.bf16.msra.mxu1 %v9692_v4 }
 0x637   :  { %4755 = vmatmul.bf16.gmra.mxu1 %v12958_v56  ;;  %v4463_v55 = vadd.f32 %v4462_v30, %v4414_v17  ;;  %v4416_v9 = vadd.f32 %v4415_v53, %v13013_v1 }
 0x638   :  { %v4511_v38 = vpop.f32.mrf.mxu3 }
 0x639   :  { %v4512_v57 = vadd.f32 %v4511_v38, %v4463_v55 }
 0x63b   :  { %v13080_v44 = vadd.f32 %v4560_v22, %v4512_v57 }
 0x63c   :  { %v4562_v60 = vpop.f32.mrf.mxu1 }
 0x63d   :  { %v5964_v7 = vadd.f32 %v5963_v50, %v13080_v44 }
 0x63e   :  { %v4464_v56 = vpop.f32.mrf.mxu2  ;;  %v4418_v30 = vpop.f32.mrf.mxu0 }
 0x63f   :  { %v4465_v17 = vadd.f32 %v4464_v56, %v4416_v9  ;;  %v4419_v50 = vadd.f32 %v4418_v30, %v13013_v1 }
 0x640   :  { %v4513_v15 = vpop.f32.mrf.mxu3 }
 0x641   :  { %v4514_v38 = vadd.f32 %v4513_v15, %v4465_v17  ;;  %4613 = vmatmul.bf16.gmra.mxu0 %v12966_v10 }
 0x643   :  { %v13085_v22 = vadd.f32 %v4562_v60, %v4514_v38  ;;  %4662 = vmatmul.bf16.gmra.mxu2 %v12970_v27 }
 0x644   :  { %v4565_v42 = vpop.f32.mrf.mxu1 }
 0x645   :  { %4711 = vmatmul.bf16.gmra.mxu3 %v12974_v20  ;;  %v5965_v56 = vadd.f32 %v5964_v7, %v13085_v22 }
 0x646   :  { %v4467_v5 = vpop.f32.mrf.mxu2  ;;  %v4420_v15 = vpop.f32.mrf.mxu0 }
 0x647   :  { %4760 = vmatmul.bf16.gmra.mxu1 %v12978_v13  ;;  %v4468_v53 = vadd.f32 %v4467_v5, %v4419_v50  ;;  %v4421_v63 = vadd.f32 %v4420_v15, %v13013_v1 }
 0x648   :  { %v4516_v55 = vpop.f32.mrf.mxu3 }
 0x649   :  { %v4517_v6 = vadd.f32 %v4516_v55, %v4468_v53 }
 0x64b   :  { %v13092_v9 = vadd.f32 %v4565_v42, %v4517_v6 }
 0x64c   :  { %v4567_v57 = vpop.f32.mrf.mxu1 }
 0x64d   :  { %v5966_v60 = vadd.f32 %v5965_v56, %v13092_v9 }
 0x64e   :  { %v4469_v35 = vpop.f32.mrf.mxu2  ;;  %v4423_v45 = vpop.f32.mrf.mxu0 }
 0x64f   :  { %v4470_v29 = vadd.f32 %v4469_v35, %v4421_v63  ;;  %v4424_v4 = vadd.f32 %v4423_v45, %v13013_v1 }
 0x650   :  { %v4518_v47 = vpop.f32.mrf.mxu3 }
 0x651   :  { %v4519_v17 = vadd.f32 %v4518_v47, %v4470_v29  ;;  %4618 = vmatmul.bf16.gmra.mxu0 %v12986_v12  ;;  %v13106_v29 = vperm.slane %v13010_v11, 1 }
 0x653   :  { %v13097_v7 = vadd.f32 %v4567_v57, %v4519_v17  ;;  %4667 = vmatmul.bf16.gmra.mxu2 %v12990_v8 }
 0x654   :  { %v4570_v30 = vpop.f32.mrf.mxu1 }
 0x655   :  { %4716 = vmatmul.bf16.gmra.mxu3 %v12994_v31  ;;  %v5967_v38 = vadd.f32 %v5966_v60, %v13097_v7 }
 0x656   :  { %v4472_v42 = vpop.f32.mrf.mxu2  ;;  %v4425_v5 = vpop.f32.mrf.mxu0 }
 0x657   :  { %4765 = vmatmul.bf16.gmra.mxu1 %v12998_v23  ;;  %v4473_v56 = vadd.f32 %v4472_v42, %v4424_v4  ;;  %v4426_v57 = vadd.f32 %v4425_v5, %v13013_v1 }
 0x658   :  { %v4521_v50 = vpop.f32.mrf.mxu3 }
 0x659   :  { %v4522_v55 = vadd.f32 %v4521_v50, %v4473_v56 }
 0x65b   :  { %v4571_v15 = vadd.f32 %v4570_v30, %v4522_v55 }
 0x65c   :  { %v4572_v53 = vpop.f32.mrf.mxu1 }
 0x65d   :  { %v5968_v6 = vadd.f32 %v5967_v38, %v4571_v15 }
 0x65e   :  { %v4474_v63 = vpop.f32.mrf.mxu2  ;;  %v4584_v45 = vpop.f32.mrf.mxu0 }
 0x65f   :  { %v4475_v47 = vadd.f32 %v4474_v63, %v4426_v57  ;;  %v4585_v4 = vadd.f32 %v4584_v45, %v13106_v29 }
 0x660   :  { %v4523_v35 = vpop.f32.mrf.mxu3 }
 0x661   :  { %v4524_v17 = vadd.f32 %v4523_v35, %v4475_v47  ;;  %4779 = vmatmul.bf16.vlgmr.msra.gmra.mxu0 %v12846_v19 }
 0x663   :  { %v4573_v60 = vadd.f32 %v4572_v53, %v4524_v17  ;;  %4828 = vmatmul.bf16.vlgmr.msra.gmra.mxu2 %v12850_v34 }
 0x664   :  { %v4731_v23 = vpop.f32.mrf.mxu1 }
 0x665   :  { %4877 = vmatmul.bf16.vlgmr.msra.gmra.mxu3 %v12854_v18  ;;  %v5969_v1 = vadd.f32 %v5968_v6, %v4573_v60 }
 0x666   :  { %v4633_v30 = vpop.f32.mrf.mxu2  ;;  %v4586_v56 = vpop.f32.mrf.mxu0 }
 0x667   :  { %4926 = vmatmul.bf16.vlgmr.msra.gmra.mxu1 %v12858_v39  ;;  %v5970_v42 = vrot.slane %v5969_v1, 4  ;;  %v4634_v50 = vadd.f32 %v4633_v30, %v4585_v4  ;;  %v4587_v47 = vadd.f32 %v4586_v56, %v13106_v29  ;;  %v16428_v4 = vld [vmem:[#allocation20_spill] sm:$0xff] }
 0x668   :  { %v4682_v38 = vpop.f32.mrf.mxu3 }
 0x669   :  { %v5971_v5 = vadd.f32 %v5970_v42, %v5969_v1  ;;  %v4683_v55 = vadd.f32 %v4682_v38, %v4634_v50 }
 0x66b   :  { %v5972_v63 = vrot.slane %v5971_v5, 2  ;;  %v13113_v35 = vadd.f32 %v4731_v23, %v4683_v55 }
 0x66c   :  { %v4733_v57 = vpop.f32.mrf.mxu1 }
 0x66d   :  { %v5973_v53 = vadd.f32 %v5972_v63, %v5971_v5 }
 0x66e   :  { %v4635_v45 = vpop.f32.mrf.mxu2  ;;  %v4589_v39 = vpop.f32.mrf.mxu0 }
 0x66f   :  { %v5974_v18 = vrot.slane %v5973_v53, 1  ;;  %v4636_v34 = vadd.f32 %v4635_v45, %v4587_v47 }
 0x670   :  { %v4684_v17 = vpop.f32.mrf.mxu3 }
 0x671   :  { %v5975_v6 = vadd.f32 %v5974_v18, %v5973_v53  ;;  %v4685_v19 = vadd.f32 %v4684_v17, %v4636_v34  ;;  %4784 = vmatmul.bf16.gmra.mxu0 %v12866_v32 }
 0x673   :  { %v6123_v1 = vmul.f32 %v5975_v6, %v16428_v4  ;;  %v13118_v30 = vadd.f32 %v4733_v57, %v4685_v19  ;;  %4833 = vmatmul.bf16.gmra.mxu2 %v12870_v49 }
 0x674   :  { %v4736_v11 = vpop.f32.mrf.mxu1 }
 0x675   :  { %4882 = vmatmul.bf16.gmra.mxu3 %v12874_v3  ;;  %v13124_v23 = vsub.f32 %v13020_v24, %v6123_v1  ;;  %v13127_v38 = vsub.f32 %v13024_v61, %v6123_v1  ;;  %v13130_v34 = vsub.f32 %v13032_v37, %v6123_v1  ;;  %v13133_v18 = vsub.f32 %v13037_v58, %v6123_v1 }
 0x676   :  { %v13136_v19 = vsub.f32 %v13044_v43, %v6123_v1  ;;  %v13139_v42 = vsub.f32 %v13049_v62, %v6123_v1  ;;  %v13142_v50 = vsub.f32 %v13056_v51, %v6123_v1  ;;  %v13145_v24 = vsub.f32 %v13061_v54, %v6123_v1  ;;  %v4638_v61 = vpop.f32.mrf.mxu2  ;;  %v4591_v5 = vpop.f32.mrf.mxu0 }
 0x677   :  { %4931 = vmatmul.bf16.gmra.mxu1 %v12878_v59  ;;  %v13148_v37 = vsub.f32 %v13068_v41, %v6123_v1  ;;  %v13151_v58 = vsub.f32 %v13073_v28, %v6123_v1  ;;  %v13154_v43 = vsub.f32 %v13080_v44, %v6123_v1  ;;  %v13157_v62 = vsub.f32 %v13085_v22, %v6123_v1 }
 0x678   :  { %v4687_v56 = vpop.f32.mrf.mxu3  ;;  %v13160_v51 = vsub.f32 %v13092_v9, %v6123_v1  ;;  %v13163_v54 = vsub.f32 %v13097_v7, %v6123_v1  ;;  %v13165_v55 = vsub.f32 %v4571_v15, %v6123_v1  ;;  %v13167_v41 = vsub.f32 %v4573_v60, %v6123_v1 }
 0x679   :  { %v6259_v28 = vmul.f32 %v13124_v23, %v13124_v23  ;;  %v6267_v44 = vmul.f32 %v13127_v38, %v13127_v38  ;;  %v6275_v22 = vmul.f32 %v13130_v34, %v13130_v34  ;;  %v4590_v9 = vadd.f32 %v4589_v39, %v13106_v29 }
 0x67a   :  { %v6283_v15 = vmul.f32 %v13133_v18, %v13133_v18  ;;  %v6291_v45 = vmul.f32 %v13136_v19, %v13136_v19  ;;  %v5976_v6 = vadd.f32 %v13118_v30, %v13113_v35  ;;  %v6299_v39 = vmul.f32 %v13139_v42, %v13139_v42 }
 0x67b   :  { %v6387_v63 = vadd.f32 %v6267_v44, %v6259_v28  ;;  %v4639_v59 = vadd.f32 %v4638_v61, %v4590_v9  ;;  %v4592_v28 = vadd.f32 %v4591_v5, %v13106_v29  ;;  %v6307_v61 = vmul.f32 %v13142_v50, %v13142_v50 }
 0x67c   :  { %v4738_v57 = vpop.f32.mrf.mxu1 }
 0x67d   :  { %v6388_v60 = vadd.f32 %v6387_v63, %v6275_v22  ;;  %v4688_v63 = vadd.f32 %v4687_v56, %v4639_v59 }
 0x67e   :  { %v4640_v53 = vpop.f32.mrf.mxu2  ;;  %v4594_v47 = vpop.f32.mrf.mxu0 }
 0x67f   :  { %v6389_v17 = vadd.f32 %v6388_v60, %v6283_v15  ;;  %v4595_v22 = vadd.f32 %v4594_v47, %v13106_v29  ;;  %v4641_v15 = vadd.f32 %v4640_v53, %v4592_v28  ;;  %v13192_v9 = vadd.f32 %v4736_v11, %v4688_v63 }
 0x680   :  { %v4689_v7 = vpop.f32.mrf.mxu3  ;;  %v6315_v47 = vmul.f32 %v13145_v24, %v13145_v24  ;;  %v6323_v53 = vmul.f32 %v13148_v37, %v13148_v37 }
 0x681   :  { %4789 = vmatmul.bf16.gmra.mxu0 %v12886_v46  ;;  %v6390_v44 = vadd.f32 %v6389_v17, %v6291_v45  ;;  %v4690_v60 = vadd.f32 %v4689_v7, %v4641_v15  ;;  %v5977_v59 = vadd.f32 %v5976_v6, %v13192_v9 }
 0x683   :  { %4838 = vmatmul.bf16.gmra.mxu2 %v12890_v21  ;;  %v6391_v5 = vadd.f32 %v6390_v44, %v6299_v39  ;;  %v13197_v56 = vadd.f32 %v4738_v57, %v4690_v60  ;;  %v6331_v44 = vmul.f32 %v13151_v58, %v13151_v58 }
 0x684   :  { %v4741_v1 = vpop.f32.mrf.mxu1 }
 0x685   :  { %4887 = vmatmul.bf16.gmra.mxu3 %v12894_v16  ;;  %v6392_v45 = vadd.f32 %v6391_v5, %v6307_v61  ;;  %v5978_v7 = vadd.f32 %v5977_v59, %v13197_v56  ;;  %v10465_v16 = vld [vmem:[#allocation2 + $0x54c] sm:$0xf] }
 0x686   :  { %v4643_v46 = vpop.f32.mrf.mxu2  ;;  %v4596_v21 = vpop.f32.mrf.mxu0 }
 0x687   :  { %4936 = vmatmul.bf16.gmra.mxu1 %v12898_v26  ;;  %v4644_v17 = vadd.f32 %v4643_v46, %v4595_v22  ;;  %v6393_v28 = vadd.f32 %v6392_v45, %v6315_v47  ;;  %v6339_v46 = vmul.f32 %v13154_v43, %v13154_v43  ;;  %v4597_v22 = vadd.f32 %v4596_v21, %v13106_v29 }
 0x688   :  { %v4692_v3 = vpop.f32.mrf.mxu3 }
 0x689   :  { %v4693_v39 = vadd.f32 %v4692_v3, %v4644_v17  ;;  %v6394_v63 = vadd.f32 %v6393_v28, %v6323_v53  ;;  %v6347_v3 = vmul.f32 %v13157_v62, %v13157_v62  ;;  %v6363_v28 = vmul.f32 %v13163_v54, %v13163_v54 }
 0x68b   :  { %v13204_v15 = vadd.f32 %v4741_v1, %v4693_v39  ;;  %v6395_v6 = vadd.f32 %v6394_v63, %v6331_v44  ;;  %v6355_v1 = vmul.f32 %v13160_v51, %v13160_v51  ;;  %v6371_v44 = vmul.f32 %v13165_v55, %v13165_v55 }
 0x68c   :  { %v4743_v11 = vpop.f32.mrf.mxu1 }
 0x68d   :  { %v5979_v57 = vadd.f32 %v5978_v7, %v13204_v15  ;;  %v6396_v60 = vadd.f32 %v6395_v6, %v6339_v46 }
 0x68e   :  { %v4645_v61 = vpop.f32.mrf.mxu2  ;;  %v4599_v45 = vpop.f32.mrf.mxu0 }
 0x68f   :  { %v4646_v47 = vadd.f32 %v4645_v61, %v4597_v22  ;;  %v6397_v17 = vadd.f32 %v6396_v60, %v6347_v3  ;;  %v4600_v7 = vadd.f32 %v4599_v45, %v13106_v29 }
 0x690   :  { %v4694_v5 = vpop.f32.mrf.mxu3 }
 0x691   :  { %v4695_v59 = vadd.f32 %v4694_v5, %v4646_v47  ;;  %4794 = vmatmul.bf16.gmra.mxu0 %v12906_v0  ;;  %v6398_v21 = vadd.f32 %v6397_v17, %v6355_v1 }
 0x693   :  { %v13217_v39 = vadd.f32 %v4743_v11, %v4695_v59  ;;  %4843 = vmatmul.bf16.gmra.mxu2 %v12910_v48  ;;  %v6399_v63 = vadd.f32 %v6398_v21, %v6363_v28  ;;  %v6379_v11 = vmul.f32 %v13167_v41, %v13167_v41 }
 0x694   :  { %v4746_v53 = vpop.f32.mrf.mxu1 }
 0x695   :  { %4892 = vmatmul.bf16.gmra.mxu3 %v12914_v2  ;;  %v5980_v46 = vadd.f32 %v5979_v57, %v13217_v39  ;;  %v6400_v61 = vadd.f32 %v6399_v63, %v6371_v44 }
 0x696   :  { %v4648_v6 = vpop.f32.mrf.mxu2  ;;  %v4601_v3 = vpop.f32.mrf.mxu0 }
 0x697   :  { %4941 = vmatmul.bf16.gmra.mxu1 %v12918_v52  ;;  %v4649_v5 = vadd.f32 %v4648_v6, %v4600_v7  ;;  %v6401_v60 = vadd.f32 %v6400_v61, %v6379_v11  ;;  %v4602_v28 = vadd.f32 %v4601_v3, %v13106_v29 }
 0x698   :  { %v4697_v22 = vpop.f32.mrf.mxu3 }
 0x699   :  { %v4698_v47 = vadd.f32 %v4697_v22, %v4649_v5  ;;  %v6402_v1 = vrot.slane %v6401_v60, 4  ;;  %v9937_v22 = vld [vmem:[%s16158_s7 + $0x40] ss:$8 sm:$0xf] }
 0x69b   :  { %v13228_v17 = vadd.f32 %v4746_v53, %v4698_v47  ;;  %v6403_v59 = vadd.f32 %v6402_v1, %v6401_v60 }
 0x69c   :  { %v4748_v45 = vpop.f32.mrf.mxu1 }
 0x69d   :  { %v5981_v52 = vadd.f32 %v5980_v46, %v13228_v17  ;;  %v6404_v2 = vrot.slane %v6403_v59, 2  ;;  %v16429_v46 = vld [vmem:[#allocation52_spill] sm:$0xff] }
 0x69e   :  { %v4650_v57 = vpop.f32.mrf.mxu2  ;;  %v4604_v0 = vpop.f32.mrf.mxu0 }
 0x69f   :  { %v4651_v48 = vadd.f32 %v4650_v57, %v4602_v28  ;;  %v6405_v26 = vadd.f32 %v6404_v2, %v6403_v59  ;;  %v4605_v53 = vadd.f32 %v4604_v0, %v13106_v29  ;;  %v9940_v57 = vld [vmem:[%s16158_s7 + $0x41] ss:$8 sm:$0xf0] }
 0x6a0   :  { %v4699_v21 = vpop.f32.mrf.mxu3 }
 0x6a1   :  { %v4700_v44 = vadd.f32 %v4699_v21, %v4651_v48  ;;  %4799 = vmatmul.bf16.gmra.mxu0 %v12926_v25  ;;  %v6406_v63 = vrot.slane %v6405_v26, 1  ;;  %v9938_v48 = vld [vmem:[%s16158_s7 + $0x40] ss:$8 sm:$0xf0]  ;;  %v10409_v25 = vld [vmem:[#allocation2 + $0x38c] sm:$0xf] }
 0x6a2   :  { %v13247_v47 = vor.u32 %v9938_v48, %v9937_v22 }
 0x6a3   :  { %v13233_v6 = vadd.f32 %v4748_v45, %v4700_v44  ;;  %4848 = vmatmul.bf16.gmra.mxu2 %v12930_v14  ;;  %v6407_v2 = vadd.f32 %v6406_v63, %v6405_v26 }
 0x6a4   :  { %v4751_v7 = vpop.f32.mrf.mxu1  ;;  %16430 = vst [vmem:[#allocation57_spill] sm:$0xff] %v13247_v47  ;;  %v13255_v26 = vperm.slane %v13247_v47, 0  ;;  %v9149_v47 = vld [vmem:[#allocation2 + $0x1e8] sm:$0xf0] }
 0x6a5   :  { %4897 = vmatmul.bf16.gmra.mxu3 %v12934_v40  ;;  %v5982_v11 = vadd.f32 %v5981_v52, %v13233_v6  ;;  %v6555_v0 = vmul.f32 %v6407_v2, %v16428_v4  ;;  %v9939_v52 = vld [vmem:[%s16158_s7 + $0x41] ss:$8 sm:$0xf] }
 0x6a6   :  { %v4653_v61 = vpop.f32.mrf.mxu2  ;;  %v4606_v60 = vpop.f32.mrf.mxu0  ;;  %v13265_v48 = vor.u32 %v9940_v57, %v9939_v52  ;;  %v13269_v2 = vmul.f32 %v13255_v26, %v13124_v23  ;;  %v13291_v23 = vmul.f32 %v13255_v26, %v13139_v42  ;;  %v13297_v57 = vmul.f32 %v13255_v26, %v13142_v50  ;;  %v16434_v50 = vld [vmem:[#allocation53_spill] sm:$0xff] }
 0x6a7   :  { %4946 = vmatmul.bf16.gmra.mxu1 %v16429_v46  ;;  %v4654_v3 = vadd.f32 %v4653_v61, %v4605_v53  ;;  %v13249_v45 = vadd.f32 0.8, %v6555_v0  ;;  %v4607_v44 = vadd.f32 %v4606_v60, %v13106_v29  ;;  %v13273_v61 = vmul.f32 %v13255_v26, %v13127_v38  ;;  %v10417_v38 = vld [vmem:[#allocation2 + $0x3cc] sm:$0xf] }
 0x6a8   :  { %v4702_v5 = vpop.f32.mrf.mxu3  ;;  %16432 = vst [vmem:[#allocation41_spill] sm:$0xff] %v13265_v48  ;;  %v13283_v0 = vmul.f32 %v13255_v26, %v13133_v18  ;;  %v9405_v60 = vld [vmem:[#allocation2 + $0x3e8] sm:$0xf0] }
 0x6a9   :  { %v4703_v1 = vadd.f32 %v4702_v5, %v4654_v3  ;;  %10656 = vrsqrt.f32 %v13249_v45  ;;  %v13277_v5 = vmul.f32 %v13255_v26, %v13130_v34  ;;  %v13287_v3 = vmul.f32 %v13255_v26, %v13136_v19  ;;  %v9661_v19 = vld [vmem:[#allocation2 + $0x5e8] sm:$0xf0] }
 0x6aa   :  { %vm6722_vm13 = vweird.f32 %v13249_v45 }
 0x6ab   :  { %v13252_v28 = vadd.f32 %v4751_v7, %v4703_v1  ;;  %v10481_v1 = vld [vmem:[#allocation2 + $0x5cc] sm:$0xf] }
 0x6ac   :  { %v4753_v59 = vpop.f32.mrf.mxu1  ;;  %v9664_v46 = vor.u32 %v10481_v1, %v9661_v19  ;;  %v10473_v1 = vld [vmem:[#allocation2 + $0x58c] sm:$0xf] }
 0x6ad   :  { %16431 = vst [vmem:[#allocation58_spill] sm:$0xff] %v13252_v28  ;;  %v5983_v21 = vadd.f32 %v5982_v11, %v13252_v28  ;;  %v10345_v19 = vld [vmem:[#allocation2 + $0x18c] sm:$0xf] }
 0x6ae   :  { %v4655_v63 = vpop.f32.mrf.mxu2  ;;  %v4609_v7 = vpop.f32.mrf.mxu0  ;;  %5065 = vmatpush.bf16.msrb.mxu3 %v9664_v46  ;;  %v9053_v28 = vld [vmem:[#allocation2 + $0x128] sm:$0xf0] }
 0x6af   :  { %v4656_v22 = vadd.f32 %v4655_v63, %v4607_v44  ;;  %v13279_v11 = vpop.eup %10656  ;;  %v9408_v44 = vor.u32 %v10417_v38, %v9405_v60  ;;  %v10353_v63 = vld [vmem:[#allocation2 + $0x1cc] sm:$0xf]  ;;  %v4610_v42 = vadd.f32 %v4609_v7, %v13106_v29  ;;  %v13309_v38 = vmul.f32 %v13255_v26, %v13145_v24 }
 0x6b0   :  { %v4704_v53 = vpop.f32.mrf.mxu3  ;;  %v6717_v18 = vmul.f32 %v13279_v11, %v13249_v45  ;;  %v9152_v40 = vor.u32 %v10353_v63, %v9149_v47  ;;  %v16435_v47 = vld [vmem:[#allocation54_spill] sm:$0xff]  ;;  %vm6723_vm12 = vweird.f32 %v13279_v11  ;;  %v9629_v24 = vld [vmem:[#allocation2 + $0x5a8] sm:$0xf0] }
 0x6b1   :  { %v4705_v52 = vadd.f32 %v4704_v53, %v4656_v22  ;;  %4804 = vmatmul.bf16.gmra.mxu0 %v12946_v33  ;;  %v10545_v53 = vld [vmem:[#allocation2 + $0x7cc] sm:$0xf]  ;;  %5016 = vmatpush.bf16.msrb.mxu2 %v9408_v44  ;;  %v13323_v44 = vmul.f32 %v13255_v26, %v13151_v58  ;;  %vm13332_vm14 = vmor %vm6722_vm13, %vm6723_vm12 }
 0x6b2   :  { %v9917_v22 = vld [vmem:[#allocation2 + $0x7e8] sm:$0xf0]  ;;  %v6718_v60 = vmul.f32 %v13279_v11, %v6717_v18  ;;  %4967 = vmatpush.bf16.msrb.mxu0 %v9152_v40 }
 0x6b3   :  { %v13303_v14 = vadd.f32 %v4753_v59, %v4705_v52  ;;  %4853 = vmatmul.bf16.gmra.mxu2 %v12950_v36  ;;  %v9920_v7 = vor.u32 %v10545_v53, %v9917_v22  ;;  %v9373_v33 = vld [vmem:[#allocation2 + $0x3a8] sm:$0xf0]  ;;  %v13315_v59 = vmul.f32 %v13255_v26, %v13148_v37  ;;  %v9632_v22 = vor.u32 %v10473_v1, %v9629_v24 }
 0x6b4   :  { %v13293_v34 = vpop.f32.mrf.mxu1  ;;  %v9376_v52 = vor.u32 %v10409_v25, %v9373_v33  ;;  %v9117_v63 = vld [vmem:[#allocation2 + $0x1a8] sm:$0xf0]  ;;  %v6719_v53 = vmul.f32 0.5, %v6718_v60  ;;  %v6660_v25 = vmul.f32 %v13255_v26, %v13154_v43  ;;  %v6668_v60 = vmul.f32 %v13255_v26, %v13157_v62 }
 0x6b5   :  { %16433 = vst [vmem:[#allocation42_spill] sm:$0xff] %v13303_v14  ;;  %4902 = vmatmul.bf16.gmra.mxu3 %v16434_v50  ;;  %v13319_v18 = vadd.f32 %v5983_v21, %v13303_v14  ;;  %5114 = vmatpush.bf16.msrb.mxu1 %v9920_v7  ;;  %v9120_v37 = vor.u32 %v10345_v19, %v9117_v63  ;;  %v9885_v50 = vld [vmem:[#allocation2 + $0x7a8] sm:$0xf0]  ;;  %v13337_v43 = vperm.slane %v13265_v48, 0 }
 0x6b6   :  { %v4658_v36 = vpop.f32.mrf.mxu2  ;;  %v10401_v33 = vld [vmem:[#allocation2 + $0x34c] sm:$0xf]  ;;  %v4611_v58 = vpop.f32.mrf.mxu0  ;;  %v6720_v7 = vsub.f32 1.5, %v6719_v53  ;;  %5017 = vmatpush.bf16.msrb.mxu2 %v9376_v52  ;;  %5066 = vmatpush.bf16.msrb.mxu3 %v9632_v22  ;;  %v6684_v48 = vmul.f32 %v13255_v26, %v13163_v54  ;;  %v6692_v52 = vmul.f32 %v13255_v26, %v13165_v55 }
 0x6b7   :  { %4951 = vmatmul.bf16.gmra.mxu1 %v16435_v47  ;;  %v10537_v47 = vld [vmem:[#allocation2 + $0x78c] sm:$0xf]  ;;  %v4659_v14 = vadd.f32 %v4658_v36, %v4610_v42  ;;  %v6676_v36 = vmul.f32 %v13255_v26, %v13160_v51  ;;  %4968 = vmatpush.bf16.msrb.mxu0 %v9120_v37  ;;  %v13354_v54 = vadd.f32 %v4611_v58, %v13106_v29 }
 0x6b8   :  { %v4707_v46 = vpop.f32.mrf.mxu3  ;;  %v9888_v40 = vor.u32 %v10537_v47, %v9885_v50  ;;  %v9341_v21 = vld [vmem:[#allocation2 + $0x368] sm:$0xf0] }
 0x6b9   :  { %v9344_v45 = vor.u32 %v10401_v33, %v9341_v21  ;;  %v9597_v50 = vld [vmem:[#allocation2 + $0x568] sm:$0xf0]  ;;  %v4708_v63 = vadd.f32 %v4707_v46, %v4659_v14  ;;  %v6721_v33 = vmul.f32 %v13279_v11, %v6720_v7 }
 0x6ba   :  { %v10337_v47 = vld [vmem:[#allocation2 + $0x14c] sm:$0xf]  ;;  %v9600_v62 = vor.u32 %v10465_v16, %v9597_v50  ;;  %5115 = vmatpush.bf16.msrb.mxu1 %v9888_v40  ;;  %v6700_v16 = vmul.f32 %v13255_v26, %v13167_v41 }
 0x6bb   :  { %v9085_v42 = vld [vmem:[#allocation2 + $0x168] sm:$0xf0]  ;;  %v13351_v49 = vadd.f32 %v13293_v34, %v4708_v63  ;;  %v6725_v55 = vsel %vm13332_vm14, %v13279_v11, %v6721_v33  ;;  %5018 = vmatpush.bf16.msrb.mxu2 %v9344_v45 }
 0x6bc   :  { %v10529_v24 = vld [vmem:[#allocation2 + $0x74c] sm:$0xf]  ;;  %v13341_v53 = vpop.f32.mrf.mxu1  ;;  %v9088_v21 = vor.u32 %v10337_v47, %v9085_v42  ;;  %v6796_v41 = vmul.f32 %v6725_v55, %v13269_v2  ;;  %v6804_v26 = vmul.f32 %v6725_v55, %v13273_v61  ;;  %v6812_v42 = vmul.f32 %v6725_v55, %v13277_v5  ;;  %5067 = vmatpush.bf16.msrb.mxu3 %v9600_v62 }
 0x6bd   :  { %v9853_v19 = vld [vmem:[#allocation2 + $0x768] sm:$0xf0]  ;;  %v6820_v34 = vmul.f32 %v6725_v55, %v13283_v0  ;;  %v6828_v58 = vmul.f32 %v6725_v55, %v13287_v3  ;;  %v6844_v1 = vmul.f32 %v6725_v55, %v13297_v57  ;;  %v6852_v11 = vmul.f32 %v6725_v55, %v13309_v38 }
 0x6be   :  { %v10393_v51 = vld [vmem:[#allocation2 + $0x30c] sm:$0xf]  ;;  %v9856_v50 = vor.u32 %v10529_v24, %v9853_v19  ;;  %v6836_v24 = vmul.f32 %v6725_v55, %v13291_v23  ;;  %4969 = vmatpush.bf16.msrb.mxu0 %v9088_v21  ;;  %v13367_v45 = vpop.f32.mrf.mxu2  ;;  %v6860_v2 = vmul.f32 %v6725_v55, %v13315_v59  ;;  %v6868_v61 = vmul.f32 %v6725_v55, %v13323_v44  ;;  %v13373_v62 = vpop.f32.mrf.mxu0 }
 0x6bf   :  { %v9309_v22 = vld [vmem:[#allocation2 + $0x328] sm:$0xf0]  ;;  %v6876_v5 = vmul.f32 %v6725_v55, %v6660_v25  ;;  %v6884_v0 = vmul.f32 %v6725_v55, %v6668_v60  ;;  %v6892_v3 = vmul.f32 %v6725_v55, %v6676_v36  ;;  %v6900_v23 = vmul.f32 %v6725_v55, %v6684_v48 }
 0x6c0   :  { %v10457_v37 = vld [vmem:[#allocation2 + $0x50c] sm:$0xf]  ;;  %v9312_v40 = vor.u32 %v10393_v51, %v9309_v22  ;;  %5116 = vmatpush.bf16.msrb.mxu1 %v9856_v50  ;;  %v6908_v19 = vmul.f32 %v6725_v55, %v6692_v52  ;;  %v6916_v57 = vmul.f32 %v6725_v55, %v6700_v16  ;;  %v6941_v38 = vadd.f32 %v13337_v43, %v6796_v41 }
 0x6c1   :  { %v9565_v14 = vld [vmem:[#allocation2 + $0x528] sm:$0xf0]  ;;  %v13377_v63 = vadd.f32 %v13337_v43, %v6804_v26  ;;  %v13380_v33 = vadd.f32 %v13337_v43, %v6812_v42  ;;  %v13383_v59 = vadd.f32 %v13337_v43, %v6820_v34  ;;  %v13388_v25 = vadd.f32 %v13337_v43, %v6828_v58  ;;  %4809 = vmatmul.bf16.gmra.mxu0 %v12966_v10 }
 0x6c2   :  { %v10329_v46 = vld [vmem:[#allocation2 + $0x10c] sm:$0xf]  ;;  %v9568_v7 = vor.u32 %v10457_v37, %v9565_v14  ;;  %5019 = vmatpush.bf16.msrb.mxu2 %v9312_v40  ;;  %v13391_v48 = vadd.f32 %v13337_v43, %v6836_v24  ;;  %v13394_v60 = vadd.f32 %v13337_v43, %v6844_v1  ;;  %v13397_v36 = vadd.f32 %v13337_v43, %v6852_v11 }
 0x6c3   :  { %v9056_v47 = vor.u32 %v10329_v46, %v9053_v28  ;;  %v13369_v28 = vpop.f32.mrf.mxu3  ;;  %v13400_v52 = vadd.f32 %v13337_v43, %v6860_v2  ;;  %v13403_v21 = vadd.f32 %v13337_v43, %v6868_v61  ;;  %v13406_v51 = vadd.f32 %v13337_v43, %v6876_v5  ;;  %v10521_v46 = vld [vmem:[#allocation2 + $0x70c] sm:$0xf]  ;;  %4858 = vmatmul.bf16.gmra.mxu2 %v12970_v27 }
 0x6c4   :  { %5068 = vmatpush.bf16.msrb.mxu3 %v9568_v7  ;;  %v13385_v44 = vpop.f32.mrf.mxu1  ;;  %v13409_v22 = vadd.f32 %v13337_v43, %v6884_v0  ;;  %v13413_v37 = vadd.f32 %v13337_v43, %v6892_v3  ;;  %v13416_v16 = vadd.f32 %v13337_v43, %v6900_v23  ;;  %v13419_v50 = vadd.f32 %v13337_v43, %v6908_v19  ;;  %v9821_v55 = vld [vmem:[#allocation2 + $0x728] sm:$0xf0] }
 0x6c5   :  { %4970 = vmatpush.bf16.msrb.mxu0 %v9056_v47  ;;  %v13422_v14 = vadd.f32 %v13337_v43, %v6916_v57  ;;  %vm7069_vm15 = vcmp.gt.f32.partialorder %v6941_v38, 0.0  ;;  %vm7077_vm0 = vcmp.gt.f32.partialorder %v13377_v63, 0.0  ;;  %vm7085_vm1 = vcmp.gt.f32.partialorder %v13380_v33, 0.0  ;;  %4907 = vmatmul.bf16.gmra.mxu3 %v12974_v20  ;;  %v10385_v43 = vld [vmem:[#allocation2 + $0x2cc] sm:$0xf] }
 0x6c6   :  { %vm7093_vm2 = vcmp.gt.f32.partialorder %v13383_v59, 0.0  ;;  %vm7101_vm3 = vcmp.gt.f32.partialorder %v13388_v25, 0.0  ;;  %vm7109_vm4 = vcmp.gt.f32.partialorder %v13391_v48, 0.0  ;;  %vm7117_vm5 = vcmp.gt.f32.partialorder %v13394_v60, 0.0  ;;  %v13434_v40 = vpop.f32.mrf.mxu2  ;;  %v9277_v47 = vld [vmem:[#allocation2 + $0x2e8] sm:$0xf0]  ;;  %v13442_v41 = vpop.f32.mrf.mxu0 }
 0x6c7   :  { %4956 = vmatmul.bf16.gmra.mxu1 %v12978_v13  ;;  %vm7125_vm6 = vcmp.gt.f32.partialorder %v13397_v36, 0.0  ;;  %vm7133_vm8 = vcmp.gt.f32.partialorder %v13400_v52, 0.0  ;;  %vm7141_vm9 = vcmp.gt.f32.partialorder %v13403_v21, 0.0  ;;  %vm7149_vm7 = vcmp.gt.f32.partialorder %v13406_v51, 0.0  ;;  %v10321_v13 = vld [vmem:[#allocation2 + $0xcc] sm:$0xf] }
 0x6c8   :  { %vm7157_vm10 = vcmp.gt.f32.partialorder %v13409_v22, 0.0  ;;  %vm7165_vm11 = vcmp.gt.f32.partialorder %v13413_v37, 0.0  ;;  %vm7173_vm12 = vcmp.gt.f32.partialorder %v13416_v16, 0.0  ;;  %vm7181_vm13 = vcmp.gt.f32.partialorder %v13419_v50, 0.0  ;;  %v9021_v20 = vld [vmem:[#allocation2 + $0xe8] sm:$0xf0] }
 0x6c9   :  { %vm7189_vm14 = vcmp.gt.f32.partialorder %v13422_v14, 0.0  ;;  %v7197_v26 = vmul.f32 0.2, %v6941_v38  ;;  %v7205_v42 = vmul.f32 0.2, %v13377_v63  ;;  %v9824_v58 = vor.u32 %v10521_v46, %v9821_v55 }
 0x6ca   :  { %v7213_v34 = vmul.f32 0.2, %v13380_v33  ;;  %v7221_v1 = vmul.f32 0.2, %v13383_v59  ;;  %v7229_v11 = vmul.f32 0.2, %v13388_v25  ;;  %v9280_v61 = vor.u32 %v10385_v43, %v9277_v47 }
 0x6cb   :  { %v13436_v7 = vpop.f32.mrf.mxu3  ;;  %v7237_v2 = vmul.f32 0.2, %v13391_v48  ;;  %v7245_v5 = vmul.f32 0.2, %v13394_v60  ;;  %v7253_v0 = vmul.f32 0.2, %v13397_v36  ;;  %v13459_v23 = vsel %vm7069_vm15, %v6941_v38, %v7197_v26  ;;  %5117 = vmatpush.bf16.msrb.mxu1 %v9824_v58 }
 0x6cc   :  { %v13450_v24 = vpop.f32.mrf.mxu1  ;;  %v7261_v3 = vmul.f32 0.2, %v13400_v52  ;;  %16438 = vst [vmem:[#allocation59_spill] sm:$0xff] %v13459_v23  ;;  %v7269_v19 = vmul.f32 0.2, %v13403_v21  ;;  %v13467_v55 = vsel %vm7077_vm0, %v13377_v63, %v7205_v42  ;;  %5020 = vmatpush.bf16.msrb.mxu2 %v9280_v61  ;;  %v13475_v23 = vsel %vm7085_vm1, %v13380_v33, %v7213_v34 }
 0x6cd   :  { %v7277_v57 = vmul.f32 0.2, %v13406_v51  ;;  %v7285_v46 = vmul.f32 0.2, %v13409_v22  ;;  %16439 = vst [vmem:[#allocation60_spill] sm:$0xff] %v13467_v55  ;;  %v13481_v42 = vsel %vm7093_vm2, %v13383_v59, %v7221_v1  ;;  %v13486_v61 = vsel %vm7101_vm3, %v13388_v25, %v7229_v11 }
 0x6ce   :  { %v10449_v43 = vld [vmem:[#allocation2 + $0x4cc] sm:$0xf]  ;;  %v7293_v38 = vmul.f32 0.2, %v13413_v37  ;;  %v7301_v26 = vmul.f32 0.2, %v13416_v16  ;;  %v13491_v55 = vsel %vm7109_vm4, %v13391_v48, %v7237_v2  ;;  %v13498_v59 = vsel %vm7117_vm5, %v13394_v60, %v7245_v5  ;;  %v4619_v60 = vpop.f32.mrf.mxu0 }
 0x6cf   :  { %v9533_v47 = vld [vmem:[#allocation2 + $0x4e8] sm:$0xf0]  ;;  %v7309_v58 = vmul.f32 0.2, %v13419_v50  ;;  %16440 = vst [vmem:[#allocation45_spill] sm:$0xff] %v13475_v23  ;;  %v4665_v23 = vpop.f32.mrf.mxu2  ;;  %v13503_v25 = vsel %vm7125_vm6, %v13397_v36, %v7253_v0  ;;  %v13508_v48 = vsel %vm7133_vm8, %v13400_v52, %v7261_v3  ;;  %v13513_v1 = vsel %vm7141_vm9, %v13403_v21, %v7269_v19 }
 0x6d0   :  { %v10513_v27 = vld [vmem:[#allocation2 + $0x6cc] sm:$0xf]  ;;  %v7317_v63 = vmul.f32 0.2, %v13422_v14  ;;  %16441 = vst [vmem:[#allocation46_spill] sm:$0xff] %v13481_v42  ;;  %v13518_v5 = vsel %vm7149_vm7, %v13406_v51, %v7277_v57  ;;  %v13523_v36 = vsel %vm7157_vm10, %v13409_v22, %v7285_v46  ;;  %v13528_v52 = vsel %vm7165_vm11, %v13413_v37, %v7293_v38 }
 0x6d1   :  { %16442 = vst [vmem:[#allocation23_spill] sm:$0xff] %v13486_v61  ;;  %v9789_v33 = vld [vmem:[#allocation2 + $0x6e8] sm:$0xf0]  ;;  %v13533_v21 = vsel %vm7173_vm12, %v13416_v16, %v7301_v26  ;;  %v13538_v51 = vsel %vm7181_vm13, %v13419_v50, %v7309_v58  ;;  %v9536_v37 = vor.u32 %v10449_v43, %v9533_v47  ;;  %v9024_v57 = vor.u32 %v10321_v13, %v9021_v20 }
 0x6d2   :  { %16443 = vst [vmem:[#allocation24_spill] sm:$0xff] %v13491_v55  ;;  %v10377_v34 = vld [vmem:[#allocation2 + $0x28c] sm:$0xf]  ;;  %v13543_v22 = vsel %vm7189_vm14, %v13422_v14, %v7317_v63  ;;  %v9792_v26 = vor.u32 %v10513_v27, %v9789_v33  ;;  %v4661_v14 = vadd.f32 %v13367_v45, %v13354_v54  ;;  %v4615_v27 = vadd.f32 %v13373_v62, %v13106_v29 }
 0x6d3   :  { %v13493_v10 = vpop.f32.mrf.mxu3  ;;  %16444 = vst [vmem:[#allocation25_spill] sm:$0xff] %v13498_v59  ;;  %v9245_v11 = vld [vmem:[#allocation2 + $0x2a8] sm:$0xf0]  ;;  %5069 = vmatpush.bf16.msrb.mxu3 %v9536_v37  ;;  %4971 = vmatpush.bf16.msrb.mxu0 %v9024_v57 }
 0x6d4   :  { %16445 = vst [vmem:[#allocation20_spill] sm:$0xff] %v13503_v25  ;;  %v10441_v2 = vld [vmem:[#allocation2 + $0x48c] sm:$0xf]  ;;  %v13545_v16 = vpop.f32.mrf.mxu1  ;;  %5118 = vmatpush.bf16.msrb.mxu1 %v9792_v26  ;;  %v4710_v33 = vadd.f32 %v13369_v28, %v4661_v14  ;;  %4814 = vmatmul.bf16.gmra.mxu0 %v12986_v12 }
 0x6d5   :  { %16446 = vst [vmem:[#allocation61_spill] sm:$0xff] %v13508_v48  ;;  %v9501_v55 = vld [vmem:[#allocation2 + $0x4a8] sm:$0xf0]  ;;  %4863 = vmatmul.bf16.gmra.mxu2 %v12990_v8  ;;  %4912 = vmatmul.bf16.gmra.mxu3 %v12994_v31 }
 0x6d6   :  { %16447 = vst [vmem:[#allocation62_spill] sm:$0xff] %v13513_v1  ;;  %v10313_v0 = vld [vmem:[#allocation2 + $0x8c] sm:$0xf]  ;;  %v9504_v58 = vor.u32 %v10441_v2, %v9501_v55  ;;  %v4617_v55 = vadd.f32 %v13442_v41, %v13106_v29  ;;  %v13562_v28 = vadd.f32 %v13341_v53, %v4710_v33 }
 0x6d7   :  { %16448 = vst [vmem:[#allocation63_spill] sm:$0xff] %v13518_v5  ;;  %v8989_v3 = vld [vmem:[#allocation2 + $0xa8] sm:$0xf0]  ;;  %v4668_v62 = vpop.f32.mrf.mxu2 }
 0x6d8   :  { %16449 = vst [vmem:[#allocation64_spill] sm:$0xff] %v13523_v36  ;;  %v10505_v19 = vld [vmem:[#allocation2 + $0x68c] sm:$0xf]  ;;  %v5985_v36 = vadd.f32 %v13319_v18, %v13351_v49  ;;  %5070 = vmatpush.bf16.msrb.mxu3 %v9504_v58 }
 0x6d9   :  { %16450 = vst [vmem:[#allocation65_spill] sm:$0xff] %v13528_v52  ;;  %v9757_v46 = vld [vmem:[#allocation2 + $0x6a8] sm:$0xf0] }
 0x6da   :  { %16451 = vst [vmem:[#allocation66_spill] sm:$0xff] %v13533_v21  ;;  %v10369_v38 = vld [vmem:[#allocation2 + $0x24c] sm:$0xf]  ;;  %v9248_v21 = vor.u32 %v10377_v34, %v9245_v11  ;;  %v9760_v43 = vor.u32 %v10505_v19, %v9757_v46  ;;  %v4664_v11 = vadd.f32 %v13434_v40, %v4615_v27 }
 0x6db   :  { %16452 = vst [vmem:[#allocation67_spill] sm:$0xff] %v13538_v51  ;;  %v9213_v52 = vld [vmem:[#allocation2 + $0x268] sm:$0xf0]  ;;  %v8992_v51 = vor.u32 %v10313_v0, %v8989_v3  ;;  %v4621_v3 = vpop.f32.mrf.mxu0 }
 0x6dc   :  { %16453 = vst [vmem:[#allocation68_spill] sm:$0xff] %v13543_v22  ;;  %v10433_v5 = vld [vmem:[#allocation2 + $0x44c] sm:$0xf]  ;;  %5021 = vmatpush.bf16.msrb.mxu2 %v9248_v21  ;;  %v9216_v47 = vor.u32 %v10369_v38, %v9213_v52  ;;  %v4620_v21 = vadd.f32 %v4619_v60, %v13106_v29  ;;  %v4717_v52 = vpop.f32.mrf.mxu3  ;;  %5119 = vmatpush.bf16.msrb.mxu1 %v9760_v43  ;;  %v4768_v53 = vpop.f32.mrf.mxu1 }
 0x6dd   :  { %v9469_v50 = vld [vmem:[#allocation2 + $0x468] sm:$0xf0]  ;;  %4972 = vmatpush.bf16.msrb.mxu0 %v8992_v51  ;;  %v4713_v40 = vadd.f32 %v13436_v7, %v4664_v11  ;;  %v5986_v38 = vadd.f32 %v5985_v36, %v13562_v28  ;;  %v4622_v27 = vadd.f32 %v4621_v3, %v13106_v29 }
 0x6de   :  { %v10305_v20 = vld [vmem:[#allocation2 + $0x4c] sm:$0xf]  ;;  %v9472_v34 = vor.u32 %v10433_v5, %v9469_v50  ;;  %v4666_v5 = vadd.f32 %v4665_v23, %v4617_v55  ;;  %v4669_v37 = vadd.f32 %v4668_v62, %v4620_v21  ;;  %v16457_v21 = vld [vmem:[#allocation32_spill] sm:$0xff]  ;;  %v16458_v62 = vld [vmem:[#allocation39_spill] sm:$0xff] }
 0x6df   :  { %v8957_v13 = vld [vmem:[#allocation2 + $0x68] sm:$0xf0]  ;;  %v13569_v58 = vadd.f32 %v13385_v44, %v4713_v40 }
 0x6e0   :  { %v10497_v63 = vld [vmem:[#allocation2 + $0x64c] sm:$0xf]  ;;  %v8960_v2 = vor.u32 %v10305_v20, %v8957_v13  ;;  %5022 = vmatpush.bf16.msrb.mxu2 %v9216_v47  ;;  %v4715_v51 = vadd.f32 %v13493_v10, %v4666_v5  ;;  %v4718_v14 = vadd.f32 %v4717_v52, %v4669_v37  ;;  %5071 = vmatpush.bf16.msrb.mxu3 %v9472_v34  ;;  %v4670_v47 = vpop.f32.mrf.mxu2 }
 0x6e1   :  { %v9725_v18 = vld [vmem:[#allocation2 + $0x668] sm:$0xf0]  ;;  %v5987_v36 = vadd.f32 %v5986_v38, %v13569_v58 }
 0x6e2   :  { %v10361_v54 = vld [vmem:[#allocation2 + $0x20c] sm:$0xf]  ;;  %v9728_v41 = vor.u32 %v10497_v63, %v9725_v18  ;;  %4973 = vmatpush.bf16.msrb.mxu0 %v8960_v2  ;;  %v13572_v7 = vadd.f32 %v13450_v24, %v4715_v51  ;;  %v13576_v10 = vadd.f32 %v13545_v16, %v4718_v14  ;;  %v4671_v24 = vadd.f32 %v4670_v47, %v4622_v27  ;;  %v16455_v18 = vld [vmem:[#allocation38_spill] sm:$0xff] }
 0x6e3   :  { %v9181_v45 = vld [vmem:[#allocation2 + $0x228] sm:$0xf0]  ;;  %v13581_v33 = vperm.slane %v16455_v18, 2  ;;  %v4780_v34 = vpop.f32.mrf.mxu0  ;;  %v16456_v2 = vld [vmem:[#allocation30_spill] sm:$0xff] }
 0x6e4   :  { %v10425_v0 = vld [vmem:[#allocation2 + $0x40c] sm:$0xf]  ;;  %v9184_v60 = vor.u32 %v10361_v54, %v9181_v45  ;;  %5120 = vmatpush.bf16.msrb.mxu1 %v9728_v41  ;;  %v5988_v44 = vadd.f32 %v5987_v36, %v13572_v7  ;;  %v4719_v63 = vpop.f32.mrf.mxu3  ;;  %v4927_v16 = vpop.f32.mrf.mxu1 }
 0x6e5   :  { %v9437_v19 = vld [vmem:[#allocation2 + $0x428] sm:$0xf0]  ;;  %v4720_v54 = vadd.f32 %v4719_v63, %v4671_v24  ;;  %v4781_v11 = vadd.f32 %v4780_v34, %v13581_v33 }
 0x6e6   :  { %v10297_v57 = vld [vmem:[#allocation2 + $0xc] sm:$0xf]  ;;  %v9440_v20 = vor.u32 %v10425_v0, %v9437_v19  ;;  %5023 = vmatpush.bf16.msrb.mxu2 %v9184_v60  ;;  %v5989_v55 = vadd.f32 %v5988_v44, %v13576_v10  ;;  %v16459_v60 = vld [vmem:[#allocation43_spill] sm:$0xff] }
 0x6e7   :  { %v8925_v46 = vld [vmem:[#allocation2 + $0x28] sm:$0xf0]  ;;  %v4769_v45 = vadd.f32 %v4768_v53, %v4720_v54 }
 0x6e8   :  { %v16454_v26 = vld [vmem:[#allocation37_spill] sm:$0xff]  ;;  %v8928_v13 = vor.u32 %v10297_v57, %v8925_v46  ;;  %5072 = vmatpush.bf16.msrb.mxu3 %v9440_v20  ;;  %v4829_v52 = vpop.f32.mrf.mxu2 }
 0x6e9   :  { %4961 = vmatmul.bf16.gmra.mxu1 %v16454_v26  ;;  %v10489_v50 = vld [vmem:[#allocation2 + $0x60c] sm:$0xf]  ;;  %v5990_v29 = vadd.f32 %v5989_v55, %v4769_v45  ;;  %5024 = vmatmul.bf16.vlgmr.msrb.gmra.mxu2 %v16457_v21  ;;  %v4830_v0 = vadd.f32 %v4829_v52, %v4781_v11  ;;  %v16462_v52 = vld [vmem:[#allocation42_spill] sm:$0xff] }
 0x6ea   :  { %v9693_v23 = vld [vmem:[#allocation2 + $0x628] sm:$0xf0]  ;;  %4974 = vmatpush.bf16.msrb.mxu0 %v8928_v13 }
 0x6eb   :  { %v9696_v43 = vor.u32 %v10489_v50, %v9693_v23  ;;  %5073 = vmatmul.bf16.vlgmr.msrb.gmra.mxu3 %v16458_v62  ;;  %v5991_v5 = vrot.slane %v5990_v29, 4  ;;  %v4782_v3 = vpop.f32.mrf.mxu0 }
 0x6ec   :  { %v4878_v41 = vpop.f32.mrf.mxu3  ;;  %v4929_v37 = vpop.f32.mrf.mxu1  ;;  %v4783_v51 = vadd.f32 %v4782_v3, %v13581_v33 }
 0x6ed   :  { %5121 = vmatpush.bf16.msrb.mxu1 %v9696_v43  ;;  %4975 = vmatmul.bf16.vlgmr.msrb.gmra.mxu0 %v16456_v2  ;;  %v5992_v40 = vadd.f32 %v5991_v5, %v5990_v29  ;;  %v4879_v19 = vadd.f32 %v4878_v41, %v4830_v0 }
 0x6ef   :  { %v5993_v57 = vrot.slane %v5992_v40, 2  ;;  %v13589_v46 = vadd.f32 %v4927_v16, %v4879_v19  ;;  %v16460_v16 = vld [vmem:[#allocation21_spill] sm:$0xff] }
 0x6f0   :  { %v4831_v53 = vpop.f32.mrf.mxu2  ;;  %v16464_v19 = vld [vmem:[#allocation29_spill] sm:$0xff] }
 0x6f1   :  { %v5994_v38 = vadd.f32 %v5993_v57, %v5992_v40  ;;  %v4832_v14 = vadd.f32 %v4831_v53, %v4783_v51 }
 0x6f3   :  { %v5995_v23 = vrot.slane %v5994_v38, 1  ;;  %v4785_v20 = vpop.f32.mrf.mxu0 }
 0x6f4   :  { %v4880_v50 = vpop.f32.mrf.mxu3  ;;  %v4932_v43 = vpop.f32.mrf.mxu1 }
 0x6f5   :  { %v5996_v13 = vadd.f32 %v5995_v23, %v5994_v38  ;;  %v4881_v36 = vadd.f32 %v4880_v50, %v4832_v14 }
 0x6f7   :  { %v6124_v27 = vmul.f32 %v5996_v13, %v16428_v4  ;;  %v13593_v44 = vadd.f32 %v4929_v37, %v4881_v36 }
 0x6f9   :  { %5122 = vmatmul.bf16.vlgmr.msrb.gmra.mxu1 %v16459_v60  ;;  %v13596_v47 = vsub.f32 %v13113_v35, %v6124_v27  ;;  %v13599_v63 = vsub.f32 %v13118_v30, %v6124_v27  ;;  %v13602_v24 = vsub.f32 %v13192_v9, %v6124_v27  ;;  %v13605_v34 = vsub.f32 %v13197_v56, %v6124_v27  ;;  %v4834_v9 = vpop.f32.mrf.mxu2  ;;  %v16461_v56 = vld [vmem:[#allocation58_spill] sm:$0xff] }
 0x6fa   :  { %v13609_v55 = vsub.f32 %v13204_v15, %v6124_v27  ;;  %v13612_v54 = vsub.f32 %v13217_v39, %v6124_v27  ;;  %v13615_v35 = vsub.f32 %v13228_v17, %v6124_v27  ;;  %v13618_v30 = vsub.f32 %v13233_v6, %v6124_v27  ;;  %5029 = vmatmul.bf16.gmra.mxu2 %v16460_v16  ;;  %v16463_v17 = vld [vmem:[#allocation22_spill] sm:$0xff] }
 0x6fb   :  { %v13622_v29 = vsub.f32 %v16461_v56, %v6124_v27  ;;  %v13625_v41 = vsub.f32 %v16462_v52, %v6124_v27  ;;  %v13628_v15 = vsub.f32 %v13351_v49, %v6124_v27  ;;  %v13631_v39 = vsub.f32 %v13562_v28, %v6124_v27  ;;  %5078 = vmatmul.bf16.gmra.mxu3 %v16463_v17  ;;  %v4787_v6 = vpop.f32.mrf.mxu0  ;;  %v16485_v17 = vld [vmem:[#allocation27_spill] sm:$0xff] }
 0x6fc   :  { %v4883_v11 = vpop.f32.mrf.mxu3  ;;  %v13635_v5 = vsub.f32 %v13569_v58, %v6124_v27  ;;  %v13638_v0 = vsub.f32 %v13572_v7, %v6124_v27  ;;  %v13641_v3 = vsub.f32 %v13576_v10, %v6124_v27  ;;  %v13643_v40 = vsub.f32 %v4769_v45, %v6124_v27  ;;  %v4934_v37 = vpop.f32.mrf.mxu1 }
 0x6fd   :  { %4980 = vmatmul.bf16.gmra.mxu0 %v12866_v32  ;;  %v6260_v49 = vmul.f32 %v13596_v47, %v13596_v47  ;;  %v6268_v28 = vmul.f32 %v13599_v63, %v13599_v63  ;;  %v6276_v58 = vmul.f32 %v13602_v24, %v13602_v24  ;;  %v4786_v7 = vadd.f32 %v4785_v20, %v13581_v33 }
 0x6fe   :  { %v6284_v45 = vmul.f32 %v13605_v34, %v13605_v34  ;;  %v6292_v50 = vmul.f32 %v13609_v55, %v13609_v55  ;;  %v5997_v14 = vadd.f32 %v13593_v44, %v13589_v46  ;;  %v4788_v27 = vadd.f32 %v4787_v6, %v13581_v33 }
 0x6ff   :  { %v6408_v57 = vadd.f32 %v6268_v28, %v6260_v49  ;;  %v4835_v36 = vadd.f32 %v4834_v9, %v4786_v7  ;;  %v6300_v20 = vmul.f32 %v13612_v54, %v13612_v54  ;;  %v16466_v9 = vld [vmem:[#allocation33_spill] sm:$0xff]  ;;  %v6372_v48 = vmul.f32 %v13641_v3, %v13641_v3 }
 0x701   :  { %v4836_v38 = vpop.f32.mrf.mxu2  ;;  %v6409_v51 = vadd.f32 %v6408_v57, %v6276_v58  ;;  %v4884_v49 = vadd.f32 %v4883_v11, %v4835_v36  ;;  %v6308_v58 = vmul.f32 %v13615_v35, %v13615_v35 }
 0x702   :  { %v4837_v28 = vadd.f32 %v4836_v38, %v4788_v27 }
 0x703   :  { %v4790_v53 = vpop.f32.mrf.mxu0  ;;  %v6410_v23 = vadd.f32 %v6409_v51, %v6284_v45  ;;  %v16465_v45 = vld [vmem:[#allocation31_spill] sm:$0xff]  ;;  %v13666_v51 = vadd.f32 %v4932_v43, %v4884_v49  ;;  %v6324_v43 = vmul.f32 %v13622_v29, %v13622_v29 }
 0x704   :  { %v4885_v10 = vpop.f32.mrf.mxu3  ;;  %v4937_v13 = vpop.f32.mrf.mxu1  ;;  %v4791_v52 = vadd.f32 %v4790_v53, %v13581_v33  ;;  %v16467_v53 = vld [vmem:[#allocation40_spill] sm:$0xff] }
 0x705   :  { %v6411_v56 = vadd.f32 %v6410_v23, %v6292_v50  ;;  %v4886_v22 = vadd.f32 %v4885_v10, %v4837_v28  ;;  %v6316_v50 = vmul.f32 %v13618_v30, %v13618_v30  ;;  %v5998_v36 = vadd.f32 %v5997_v14, %v13666_v51 }
 0x707   :  { %v6412_v57 = vadd.f32 %v6411_v56, %v6300_v20  ;;  %v13673_v27 = vadd.f32 %v4934_v37, %v4886_v22  ;;  %v16469_v20 = vld [vmem:[#allocation44_spill] sm:$0xff]  ;;  %v6340_v22 = vmul.f32 %v13628_v15, %v13628_v15 }
 0x709   :  { %5127 = vmatmul.bf16.gmra.mxu1 %v16464_v19  ;;  %v4839_v6 = vpop.f32.mrf.mxu2  ;;  %v6413_v23 = vadd.f32 %v6412_v57, %v6308_v58  ;;  %16468 = vst [vmem:[#allocation37_spill] sm:$0xff] %v13673_v27  ;;  %v5999_v28 = vadd.f32 %v5998_v36, %v13673_v27  ;;  %v6332_v58 = vmul.f32 %v13625_v41, %v13625_v41  ;;  %v10542_v19 = vld [vmem:[#allocation2 + $0x7ac] sm:$0xf0] }
 0x70a   :  { %5034 = vmatmul.bf16.gmra.mxu2 %v16466_v9  ;;  %v4840_v11 = vadd.f32 %v4839_v6, %v4791_v52 }
 0x70b   :  { %5083 = vmatmul.bf16.gmra.mxu3 %v16467_v53  ;;  %v4792_v38 = vpop.f32.mrf.mxu0  ;;  %v6414_v10 = vadd.f32 %v6413_v23, %v6316_v50 }
 0x70c   :  { %v4888_v7 = vpop.f32.mrf.mxu3  ;;  %v4939_v49 = vpop.f32.mrf.mxu1  ;;  %v4793_v6 = vadd.f32 %v4792_v38, %v13581_v33 }
 0x70d   :  { %4985 = vmatmul.bf16.gmra.mxu0 %v16465_v45  ;;  %v4889_v56 = vadd.f32 %v4888_v7, %v4840_v11  ;;  %v6415_v57 = vadd.f32 %v6414_v10, %v6324_v43  ;;  %v6348_v7 = vmul.f32 %v13631_v39, %v13631_v39 }
 0x70f   :  { %v13681_v52 = vadd.f32 %v4937_v13, %v4889_v56  ;;  %v6416_v37 = vadd.f32 %v6415_v57, %v6332_v58  ;;  %v6356_v13 = vmul.f32 %v13635_v5, %v13635_v5  ;;  %v6364_v58 = vmul.f32 %v13638_v0, %v13638_v0 }
 0x711   :  { %16470 = vst [vmem:[#allocation38_spill] sm:$0xff] %v13681_v52  ;;  %v6000_v14 = vadd.f32 %v5999_v28, %v13681_v52  ;;  %v4841_v50 = vpop.f32.mrf.mxu2  ;;  %v6417_v11 = vadd.f32 %v6416_v37, %v6340_v22  ;;  %v16497_v52 = vld [vmem:[#allocation56_spill] sm:$0xff] }
 0x712   :  { %v4842_v36 = vadd.f32 %v4841_v50, %v4793_v6  ;;  %v16472_v6 = vld [vmem:[#allocation34_spill] sm:$0xff]  ;;  %v16473_v50 = vld [vmem:[#allocation47_spill] sm:$0xff] }
 0x713   :  { %v4795_v1 = vpop.f32.mrf.mxu0  ;;  %v6418_v43 = vadd.f32 %v6417_v11, %v6348_v7  ;;  %v6380_v11 = vmul.f32 %v13643_v40, %v13643_v40 }
 0x714   :  { %v4890_v23 = vpop.f32.mrf.mxu3  ;;  %v4942_v56 = vpop.f32.mrf.mxu1  ;;  %v4796_v38 = vadd.f32 %v4795_v1, %v13581_v33 }
 0x715   :  { %v4891_v10 = vadd.f32 %v4890_v23, %v4842_v36  ;;  %v6419_v28 = vadd.f32 %v6418_v43, %v6356_v13 }
 0x717   :  { %v13693_v57 = vadd.f32 %v4939_v49, %v4891_v10  ;;  %v6420_v22 = vadd.f32 %v6419_v28, %v6364_v58  ;;  %v16474_v49 = vld [vmem:[#allocation48_spill] sm:$0xff]  ;;  %v16475_v10 = vld [vmem:[#allocation49_spill] sm:$0xff] }
 0x719   :  { %5132 = vmatmul.bf16.gmra.mxu1 %v16469_v20  ;;  %16471 = vst [vmem:[#allocation30_spill] sm:$0xff] %v13693_v57  ;;  %v6001_v37 = vadd.f32 %v6000_v14, %v13693_v57  ;;  %v4844_v23 = vpop.f32.mrf.mxu2  ;;  %v6421_v36 = vadd.f32 %v6420_v22, %v6372_v48  ;;  %v10326_v57 = vld [vmem:[#allocation2 + $0xec] sm:$0xf0] }
 0x71a   :  { %5039 = vmatmul.bf16.gmra.mxu2 %v16473_v50  ;;  %v4845_v13 = vadd.f32 %v4844_v23, %v4796_v38 }
 0x71b   :  { %5088 = vmatmul.bf16.gmra.mxu3 %v16474_v49  ;;  %v4797_v1 = vpop.f32.mrf.mxu0  ;;  %v6422_v43 = vadd.f32 %v6421_v36, %v6380_v11 }
 0x71c   :  { %v4893_v7 = vpop.f32.mrf.mxu3  ;;  %v4944_v28 = vpop.f32.mrf.mxu1  ;;  %v4798_v42 = vadd.f32 %v4797_v1, %v13581_v33 }
 0x71d   :  { %4990 = vmatmul.bf16.gmra.mxu0 %v16472_v6  ;;  %v4894_v58 = vadd.f32 %v4893_v7, %v4845_v13  ;;  %v6423_v14 = vrot.slane %v6422_v43, 4 }
 0x71f   :  { %v13705_v25 = vadd.f32 %v4942_v56, %v4894_v58  ;;  %v6424_v59 = vadd.f32 %v6423_v14, %v6422_v43  ;;  %v16478_v43 = vld [vmem:[#allocation50_spill] sm:$0xff] }
 0x721   :  { %16476 = vst [vmem:[#allocation32_spill] sm:$0xff] %v13705_v25  ;;  %v6002_v61 = vadd.f32 %v6001_v37, %v13705_v25  ;;  %v4846_v50 = vpop.f32.mrf.mxu2  ;;  %v6425_v48 = vrot.slane %v6424_v59, 2  ;;  %v16479_v37 = vld [vmem:[#allocation26_spill] sm:$0xff] }
 0x722   :  { %v4847_v22 = vadd.f32 %v4846_v50, %v4798_v42  ;;  %v16480_v50 = vld [vmem:[#allocation51_spill] sm:$0xff]  ;;  %v16491_v25 = vld [vmem:[#allocation54_spill] sm:$0xff] }
 0x723   :  { %v4800_v49 = vpop.f32.mrf.mxu0  ;;  %v6426_v38 = vadd.f32 %v6425_v48, %v6424_v59 }
 0x724   :  { %v4895_v6 = vpop.f32.mrf.mxu3  ;;  %v4947_v11 = vpop.f32.mrf.mxu1  ;;  %v4801_v7 = vadd.f32 %v4800_v49, %v13581_v33 }
 0x725   :  { %v4896_v23 = vadd.f32 %v4895_v6, %v4847_v22  ;;  %v6427_v36 = vrot.slane %v6426_v38, 1  ;;  %v16483_v22 = vld [vmem:[#allocation57_spill] sm:$0xff] }
 0x727   :  { %v6428_v56 = vadd.f32 %v6427_v36, %v6426_v38  ;;  %v13724_v38 = vperm.slane %v16483_v22, 1 }
 0x729   :  { %5137 = vmatmul.bf16.gmra.mxu1 %v16475_v10  ;;  %v13709_v10 = vadd.f32 %v4944_v28, %v4896_v23  ;;  %v4849_v1 = vpop.f32.mrf.mxu2  ;;  %v6556_v42 = vmul.f32 %v6428_v56, %v16428_v4  ;;  %v16481_v28 = vld [vmem:[#allocation52_spill] sm:$0xff]  ;;  %v13750_v22 = vmul.f32 %v13724_v38, %v13609_v55  ;;  %v13763_v45 = vmul.f32 %v13724_v38, %v13615_v35 }
 0x72a   :  { %5044 = vmatmul.bf16.gmra.mxu2 %v16479_v37  ;;  %v4850_v59 = vadd.f32 %v4849_v1, %v4801_v7  ;;  %v9155_v37 = vld [vmem:[#allocation2 + $0x1d0] sm:$0xf] }
 0x72b   :  { %16477 = vst [vmem:[#allocation39_spill] sm:$0xff] %v13709_v10  ;;  %v6003_v13 = vadd.f32 %v6002_v61, %v13709_v10  ;;  %5093 = vmatmul.bf16.gmra.mxu3 %v16480_v50  ;;  %v4802_v6 = vpop.f32.mrf.mxu0  ;;  %v13717_v14 = vadd.f32 0.8, %v6556_v42  ;;  %v10334_v10 = vld [vmem:[#allocation2 + $0x12c] sm:$0xf0] }
 0x72c   :  { %v4898_v58 = vpop.f32.mrf.mxu3  ;;  %v4949_v48 = vpop.f32.mrf.mxu1  ;;  %v4803_v36 = vadd.f32 %v4802_v6, %v13581_v33  ;;  %v9411_v6 = vld [vmem:[#allocation2 + $0x3d0] sm:$0xf] }
 0x72d   :  { %4995 = vmatmul.bf16.gmra.mxu0 %v16478_v43  ;;  %v4899_v49 = vadd.f32 %v4898_v58, %v4850_v59  ;;  %10658 = vrsqrt.f32 %v13717_v14  ;;  %v13740_v59 = vmul.f32 %v13724_v38, %v13602_v24  ;;  %v10358_v43 = vld [vmem:[#allocation2 + $0x1ec] sm:$0xf0]  ;;  %vm6732_vm0 = vweird.f32 %v13717_v14 }
 0x72e   :  { %v9156_v53 = vor.u32 %v10358_v43, %v9155_v37  ;;  %v10414_v43 = vld [vmem:[#allocation2 + $0x3ac] sm:$0xf0] }
 0x72f   :  { %v13721_v61 = vadd.f32 %v4947_v11, %v4899_v49  ;;  %v13736_v11 = vmul.f32 %v13724_v38, %v13599_v63  ;;  %v10422_v49 = vld [vmem:[#allocation2 + $0x3ec] sm:$0xf0]  ;;  %v13754_v63 = vmul.f32 %v13724_v38, %v13612_v54  ;;  %v13767_v54 = vmul.f32 %v13724_v38, %v13618_v30 }
 0x730   :  { %v9412_v50 = vor.u32 %v10422_v49, %v9411_v6  ;;  %v9635_v37 = vld [vmem:[#allocation2 + $0x590] sm:$0xf]  ;;  %5163 = vmatpush.bf16.msra.mxu0 %v9156_v53 }
 0x731   :  { %16482 = vst [vmem:[#allocation43_spill] sm:$0xff] %v13721_v61  ;;  %v6004_v23 = vadd.f32 %v6003_v13, %v13721_v61  ;;  %v4851_v56 = vpop.f32.mrf.mxu2  ;;  %v13744_v13 = vmul.f32 %v13724_v38, %v13605_v34  ;;  %v10486_v34 = vld [vmem:[#allocation2 + $0x5ec] sm:$0xf0]  ;;  %v16486_v61 = vld [vmem:[#allocation28_spill] sm:$0xff] }
 0x732   :  { %v4852_v1 = vadd.f32 %v4851_v56, %v4803_v36  ;;  %v9667_v36 = vld [vmem:[#allocation2 + $0x5d0] sm:$0xf]  ;;  %5212 = vmatpush.bf16.msra.mxu2 %v9412_v50  ;;  %v13780_v50 = vmul.f32 %v13724_v38, %v13625_v41 }
 0x733   :  { %v4805_v42 = vpop.f32.mrf.mxu0  ;;  %v13732_v58 = vpop.eup %10658  ;;  %v9668_v20 = vor.u32 %v10486_v34, %v9667_v36  ;;  %v9379_v36 = vld [vmem:[#allocation2 + $0x390] sm:$0xf] }
 0x734   :  { %v4900_v7 = vpop.f32.mrf.mxu3  ;;  %v6727_v24 = vmul.f32 %v13732_v58, %v13717_v14  ;;  %v4806_v55 = vadd.f32 %v4805_v42, %v13581_v33  ;;  %vm6733_vm15 = vweird.f32 %v13732_v58  ;;  %v9380_v35 = vor.u32 %v10414_v43, %v9379_v36  ;;  %v10478_v42 = vld [vmem:[#allocation2 + $0x5ac] sm:$0xf0] }
 0x735   :  { %v4901_v56 = vadd.f32 %v4900_v7, %v4852_v1  ;;  %v9923_v7 = vld [vmem:[#allocation2 + $0x7d0] sm:$0xf]  ;;  %5261 = vmatpush.bf16.msra.mxu3 %v9668_v20  ;;  %v6661_v36 = vmul.f32 %v13724_v38, %v13628_v15  ;;  %vm13792_vm1 = vmor %vm6732_vm0, %vm6733_vm15 }
 0x736   :  { %v10550_v1 = vld [vmem:[#allocation2 + $0x7ec] sm:$0xf0]  ;;  %v6728_v6 = vmul.f32 %v13732_v58, %v6727_v24  ;;  %5213 = vmatpush.bf16.msra.mxu2 %v9380_v35 }
 0x737   :  { %v13758_v9 = vadd.f32 %v4949_v48, %v4901_v56  ;;  %v9924_v49 = vor.u32 %v10550_v1, %v9923_v7  ;;  %v13772_v48 = vmul.f32 %v13724_v38, %v13622_v29  ;;  %v9123_v56 = vld [vmem:[#allocation2 + $0x190] sm:$0xf]  ;;  %v9636_v7 = vor.u32 %v10478_v42, %v9635_v37 }
 0x738   :  { %v10350_v30 = vld [vmem:[#allocation2 + $0x1ac] sm:$0xf0]  ;;  %v6729_v24 = vmul.f32 0.5, %v6728_v6  ;;  %v16487_v6 = vld [vmem:[#allocation53_spill] sm:$0xff]  ;;  %v6669_v42 = vmul.f32 %v13724_v38, %v13631_v39 }
 0x739   :  { %5142 = vmatmul.bf16.gmra.mxu1 %v16481_v28  ;;  %v13730_v28 = vmul.f32 %v13724_v38, %v13596_v47  ;;  %v13746_v47 = vpop.f32.mrf.mxu1  ;;  %16484 = vst [vmem:[#allocation58_spill] sm:$0xff] %v13758_v9  ;;  %v13776_v34 = vadd.f32 %v6004_v23, %v13758_v9  ;;  %v9124_v29 = vor.u32 %v10350_v30, %v9123_v56  ;;  %v9891_v1 = vld [vmem:[#allocation2 + $0x790] sm:$0xf]  ;;  %v4854_v53 = vpop.f32.mrf.mxu2 }
 0x73a   :  { %5310 = vmatpush.bf16.msra.mxu1 %v9924_v49  ;;  %v9892_v23 = vor.u32 %v10542_v19, %v9891_v1  ;;  %v9347_v43 = vld [vmem:[#allocation2 + $0x350] sm:$0xf]  ;;  %5049 = vmatmul.bf16.gmra.mxu2 %v16486_v61  ;;  %v4855_v49 = vadd.f32 %v4854_v53, %v4806_v55  ;;  %v6730_v56 = vsub.f32 1.5, %v6729_v24  ;;  %v16490_v19 = vld [vmem:[#allocation41_spill] sm:$0xff]  ;;  %v6677_v55 = vmul.f32 %v13724_v38, %v13635_v5 }
 0x73b   :  { %v10406_v9 = vld [vmem:[#allocation2 + $0x36c] sm:$0xf0]  ;;  %5098 = vmatmul.bf16.gmra.mxu3 %v16487_v6  ;;  %v4807_v37 = vpop.f32.mrf.mxu0  ;;  %v13797_v14 = vperm.slane %v16490_v19, 1  ;;  %5164 = vmatpush.bf16.msra.mxu0 %v9124_v29  ;;  %v6685_v19 = vmul.f32 %v13724_v38, %v13638_v0 }
 0x73c   :  { %v4903_v20 = vpop.f32.mrf.mxu3  ;;  %v9603_v41 = vld [vmem:[#allocation2 + $0x550] sm:$0xf]  ;;  %v9348_v30 = vor.u32 %v10406_v9, %v9347_v43  ;;  %5262 = vmatpush.bf16.msra.mxu3 %v9636_v7  ;;  %v6693_v9 = vmul.f32 %v13724_v38, %v13641_v3  ;;  %v6731_v35 = vmul.f32 %v13732_v58, %v6730_v56  ;;  %v13815_v3 = vadd.f32 %v4807_v37, %v13581_v33 }
 0x73d   :  { %5000 = vmatmul.bf16.gmra.mxu0 %v16485_v17  ;;  %v10470_v1 = vld [vmem:[#allocation2 + $0x56c] sm:$0xf0]  ;;  %v4904_v17 = vadd.f32 %v4903_v20, %v4855_v49 }
 0x73e   :  { %v9091_v61 = vld [vmem:[#allocation2 + $0x150] sm:$0xf]  ;;  %v9604_v39 = vor.u32 %v10470_v1, %v9603_v41  ;;  %5311 = vmatpush.bf16.msra.mxu1 %v9892_v23  ;;  %v6701_v41 = vmul.f32 %v13724_v38, %v13643_v40  ;;  %5214 = vmatpush.bf16.msra.mxu2 %v9348_v30 }
 0x73f   :  { %v10342_v24 = vld [vmem:[#allocation2 + $0x16c] sm:$0xf0]  ;;  %v13812_v0 = vadd.f32 %v13746_v47, %v4904_v17 }
 0x740   :  { %v9859_v53 = vld [vmem:[#allocation2 + $0x750] sm:$0xf]  ;;  %v9092_v43 = vor.u32 %v10342_v24, %v9091_v61  ;;  %v6735_v61 = vsel %vm13792_vm1, %v13732_v58, %v6731_v35  ;;  %5263 = vmatpush.bf16.msra.mxu3 %v9604_v39 }
 0x741   :  { %v10534_v6 = vld [vmem:[#allocation2 + $0x76c] sm:$0xf0]  ;;  %v13801_v16 = vpop.f32.mrf.mxu1  ;;  %v6797_v38 = vmul.f32 %v6735_v61, %v13730_v28  ;;  %v6813_v24 = vmul.f32 %v6735_v61, %v13740_v59  ;;  %v6821_v17 = vmul.f32 %v6735_v61, %v13744_v13  ;;  %v6829_v47 = vmul.f32 %v6735_v61, %v13750_v22  ;;  %v13828_v30 = vpop.f32.mrf.mxu2 }
 0x742   :  { %v9315_v5 = vld [vmem:[#allocation2 + $0x310] sm:$0xf]  ;;  %v9860_v1 = vor.u32 %v10534_v6, %v9859_v53  ;;  %v6805_v6 = vmul.f32 %v6735_v61, %v13736_v11  ;;  %v6837_v37 = vmul.f32 %v6735_v61, %v13754_v63  ;;  %v6845_v15 = vmul.f32 %v6735_v61, %v13763_v45  ;;  %5165 = vmatpush.bf16.msra.mxu0 %v9092_v43 }
 0x743   :  { %v10398_v7 = vld [vmem:[#allocation2 + $0x32c] sm:$0xf0]  ;;  %v6853_v58 = vmul.f32 %v6735_v61, %v13767_v54  ;;  %v6861_v28 = vmul.f32 %v6735_v61, %v13772_v48  ;;  %v6869_v11 = vmul.f32 %v6735_v61, %v13780_v50  ;;  %v6877_v59 = vmul.f32 %v6735_v61, %v6661_v36  ;;  %v13834_v45 = vpop.f32.mrf.mxu0 }
 0x744   :  { %v9571_v29 = vld [vmem:[#allocation2 + $0x510] sm:$0xf]  ;;  %v9316_v23 = vor.u32 %v10398_v7, %v9315_v5  ;;  %v6885_v13 = vmul.f32 %v6735_v61, %v6669_v42  ;;  %5312 = vmatpush.bf16.msra.mxu1 %v9860_v1  ;;  %v6893_v39 = vmul.f32 %v6735_v61, %v6677_v55  ;;  %v6901_v22 = vmul.f32 %v6735_v61, %v6685_v19 }
 0x745   :  { %v10462_v20 = vld [vmem:[#allocation2 + $0x52c] sm:$0xf0]  ;;  %v6909_v53 = vmul.f32 %v6735_v61, %v6693_v9  ;;  %v6917_v63 = vmul.f32 %v6735_v61, %v6701_v41  ;;  %v6942_v54 = vadd.f32 %v13797_v14, %v6797_v38  ;;  %v6950_v35 = vadd.f32 %v13797_v14, %v6805_v6  ;;  %v16493_v38 = vld [vmem:[#allocation36_spill] sm:$0xff]  ;;  %v16494_v6 = vld [vmem:[#allocation55_spill] sm:$0xff] }
 0x746   :  { %v9059_v49 = vld [vmem:[#allocation2 + $0x110] sm:$0xf]  ;;  %v9572_v56 = vor.u32 %v10462_v20, %v9571_v29  ;;  %5215 = vmatpush.bf16.msra.mxu2 %v9316_v23  ;;  %v13839_v43 = vadd.f32 %v13797_v14, %v6813_v24  ;;  %v13842_v48 = vadd.f32 %v13797_v14, %v6821_v17  ;;  %v13845_v50 = vadd.f32 %v13797_v14, %v6829_v47 }
 0x747   :  { %v9060_v40 = vor.u32 %v10334_v10, %v9059_v49  ;;  %v13830_v10 = vpop.f32.mrf.mxu3  ;;  %v13848_v36 = vadd.f32 %v13797_v14, %v6837_v37  ;;  %v13851_v42 = vadd.f32 %v13797_v14, %v6845_v15  ;;  %v13854_v19 = vadd.f32 %v13797_v14, %v6853_v58  ;;  %v9827_v61 = vld [vmem:[#allocation2 + $0x710] sm:$0xf] }
 0x748   :  { %5264 = vmatpush.bf16.msra.mxu3 %v9572_v56  ;;  %v13859_v9 = vadd.f32 %v13797_v14, %v6861_v28  ;;  %v13862_v5 = vadd.f32 %v13797_v14, %v6869_v11  ;;  %v13865_v7 = vadd.f32 %v13797_v14, %v6877_v59  ;;  %v13868_v29 = vadd.f32 %v13797_v14, %v6885_v13  ;;  %v10526_v23 = vld [vmem:[#allocation2 + $0x72c] sm:$0xf0] }
 0x749   :  { %5147 = vmatmul.bf16.gmra.mxu1 %v16491_v25  ;;  %5166 = vmatpush.bf16.msra.mxu0 %v9060_v40  ;;  %v13856_v55 = vpop.f32.mrf.mxu1  ;;  %v13871_v41 = vadd.f32 %v13797_v14, %v6893_v39  ;;  %v13874_v1 = vadd.f32 %v13797_v14, %v6901_v22  ;;  %v13877_v20 = vadd.f32 %v13797_v14, %v6909_v53  ;;  %vm7070_vm2 = vcmp.gt.f32.partialorder %v6942_v54, 0.0  ;;  %v9283_v56 = vld [vmem:[#allocation2 + $0x2d0] sm:$0xf]  ;;  %v16492_v40 = vld [vmem:[#allocation35_spill] sm:$0xff]  ;;  %v13895_v24 = vpop.f32.mrf.mxu2 }
 0x74a   :  { %v13880_v49 = vadd.f32 %v13797_v14, %v6917_v63  ;;  %vm7078_vm3 = vcmp.gt.f32.partialorder %v6950_v35, 0.0  ;;  %vm7086_vm4 = vcmp.gt.f32.partialorder %v13839_v43, 0.0  ;;  %vm7094_vm5 = vcmp.gt.f32.partialorder %v13842_v48, 0.0  ;;  %v10390_v14 = vld [vmem:[#allocation2 + $0x2ec] sm:$0xf0]  ;;  %5054 = vmatmul.bf16.gmra.mxu2 %v16493_v38 }
 0x74b   :  { %vm7102_vm6 = vcmp.gt.f32.partialorder %v13845_v50, 0.0  ;;  %vm7110_vm8 = vcmp.gt.f32.partialorder %v13848_v36, 0.0  ;;  %vm7118_vm9 = vcmp.gt.f32.partialorder %v13851_v42, 0.0  ;;  %vm7126_vm7 = vcmp.gt.f32.partialorder %v13854_v19, 0.0  ;;  %5103 = vmatmul.bf16.gmra.mxu3 %v16494_v6  ;;  %v13903_v47 = vpop.f32.mrf.mxu0  ;;  %v9027_v25 = vld [vmem:[#allocation2 + $0xd0] sm:$0xf] }
 0x74c   :  { %vm7134_vm10 = vcmp.gt.f32.partialorder %v13859_v9, 0.0  ;;  %vm7142_vm11 = vcmp.gt.f32.partialorder %v13862_v5, 0.0  ;;  %vm7150_vm12 = vcmp.gt.f32.partialorder %v13865_v7, 0.0  ;;  %vm7158_vm13 = vcmp.gt.f32.partialorder %v13868_v29, 0.0 }
 0x74d   :  { %5005 = vmatmul.bf16.gmra.mxu0 %v16492_v40  ;;  %vm7166_vm14 = vcmp.gt.f32.partialorder %v13871_v41, 0.0  ;;  %vm7174_vm15 = vcmp.gt.f32.partialorder %v13874_v1, 0.0  ;;  %vm7182_vm0 = vcmp.gt.f32.partialorder %v13877_v20, 0.0  ;;  %vm7190_vm1 = vcmp.gt.f32.partialorder %v13880_v49, 0.0 }
 0x74e   :  { %v7198_v37 = vmul.f32 0.2, %v6942_v54  ;;  %v7206_v15 = vmul.f32 0.2, %v6950_v35  ;;  %v7214_v58 = vmul.f32 0.2, %v13839_v43  ;;  %v9828_v28 = vor.u32 %v10526_v23, %v9827_v61 }
 0x74f   :  { %v13901_v17 = vpop.f32.mrf.mxu3  ;;  %v7222_v11 = vmul.f32 0.2, %v13842_v48  ;;  %v7230_v59 = vmul.f32 0.2, %v13845_v50  ;;  %v7238_v13 = vmul.f32 0.2, %v13848_v36  ;;  %v9284_v39 = vor.u32 %v10390_v14, %v9283_v56 }
 0x750   :  { %v7246_v22 = vmul.f32 0.2, %v13851_v42  ;;  %v7254_v53 = vmul.f32 0.2, %v13854_v19  ;;  %v7262_v63 = vmul.f32 0.2, %v13859_v9  ;;  %v13913_v6 = vsel %vm7070_vm2, %v6942_v54, %v7198_v37  ;;  %5313 = vmatpush.bf16.msra.mxu1 %v9828_v28 }
 0x751   :  { %16495 = vst [vmem:[#allocation42_spill] sm:$0xff] %v13913_v6  ;;  %v7270_v38 = vmul.f32 0.2, %v13862_v5  ;;  %v7278_v61 = vmul.f32 0.2, %v13865_v7  ;;  %v13919_v40 = vsel %vm7078_vm3, %v6950_v35, %v7206_v15  ;;  %5216 = vmatpush.bf16.msra.mxu2 %v9284_v39  ;;  %v13922_v27 = vpop.f32.mrf.mxu1  ;;  %v13930_v35 = vsel %vm7086_vm4, %v13839_v43, %v7214_v58 }
 0x752   :  { %v7286_v23 = vmul.f32 0.2, %v13868_v29  ;;  %16496 = vst [vmem:[#allocation69_spill] sm:$0xff] %v13919_v40  ;;  %v9539_v56 = vld [vmem:[#allocation2 + $0x4d0] sm:$0xf]  ;;  %v13936_v40 = vsel %vm7094_vm5, %v13842_v48, %v7222_v11  ;;  %v13941_v6 = vsel %vm7102_vm6, %v13845_v50, %v7230_v59  ;;  %v13956_v48 = vsel %vm7126_vm7, %v13854_v19, %v7254_v53 }
 0x753   :  { %v10454_v14 = vld [vmem:[#allocation2 + $0x4ec] sm:$0xf0]  ;;  %v7294_v54 = vmul.f32 0.2, %v13871_v41  ;;  %v7302_v37 = vmul.f32 0.2, %v13874_v1  ;;  %v13961_v50 = vsel %vm7134_vm10, %v13859_v9, %v7262_v63 }
 0x754   :  { %v7310_v28 = vmul.f32 0.2, %v13877_v20  ;;  %16498 = vst [vmem:[#allocation70_spill] sm:$0xff] %v13930_v35  ;;  %v9795_v15 = vld [vmem:[#allocation2 + $0x6d0] sm:$0xf]  ;;  %v13951_v35 = vsel %vm7118_vm9, %v13851_v42, %v7246_v22  ;;  %v4861_v42 = vpop.f32.mrf.mxu2  ;;  %v13971_v22 = vsel %vm7150_vm12, %v13865_v7, %v7278_v61  ;;  %v13976_v19 = vsel %vm7158_vm13, %v13868_v29, %v7286_v23 }
 0x755   :  { %v7318_v39 = vmul.f32 0.2, %v13880_v49  ;;  %16499 = vst [vmem:[#allocation71_spill] sm:$0xff] %v13936_v40  ;;  %v10518_v43 = vld [vmem:[#allocation2 + $0x6ec] sm:$0xf0]  ;;  %v13981_v9 = vsel %vm7166_vm14, %v13871_v41, %v7294_v54  ;;  %v9540_v41 = vor.u32 %v10454_v14, %v9539_v56  ;;  %v9028_v23 = vor.u32 %v10326_v57, %v9027_v25 }
 0x756   :  { %16500 = vst [vmem:[#allocation72_spill] sm:$0xff] %v13941_v6  ;;  %v9251_v58 = vld [vmem:[#allocation2 + $0x290] sm:$0xf]  ;;  %v13991_v61 = vsel %vm7182_vm0, %v13877_v20, %v7310_v28  ;;  %v4811_v57 = vadd.f32 %v13834_v45, %v13581_v33 }
 0x757   :  { %16502 = vst [vmem:[#allocation74_spill] sm:$0xff] %v13951_v35  ;;  %v10382_v11 = vld [vmem:[#allocation2 + $0x2ac] sm:$0xf0]  ;;  %v4910_v7 = vpop.f32.mrf.mxu3  ;;  %v13996_v29 = vsel %vm7190_vm1, %v13880_v49, %v7318_v39  ;;  %5265 = vmatpush.bf16.msra.mxu3 %v9540_v41  ;;  %5167 = vmatpush.bf16.msra.mxu0 %v9028_v23  ;;  %v16533_v35 = vld [vmem:[#allocation49_spill] sm:$0xff] }
 0x758   :  { %16503 = vst [vmem:[#allocation75_spill] sm:$0xff] %v13956_v48  ;;  %v9507_v59 = vld [vmem:[#allocation2 + $0x490] sm:$0xf] }
 0x759   :  { %5152 = vmatmul.bf16.gmra.mxu1 %v16497_v52  ;;  %v13946_v52 = vsel %vm7110_vm8, %v13848_v36, %v7238_v13  ;;  %16504 = vst [vmem:[#allocation76_spill] sm:$0xff] %v13961_v50  ;;  %v13966_v36 = vsel %vm7142_vm11, %v13862_v5, %v7270_v38  ;;  %v10446_v13 = vld [vmem:[#allocation2 + $0x4ac] sm:$0xf0]  ;;  %v13986_v5 = vsel %vm7174_vm15, %v13874_v1, %v7302_v37 }
 0x75a   :  { %16501 = vst [vmem:[#allocation73_spill] sm:$0xff] %v13946_v52  ;;  %v8995_v38 = vld [vmem:[#allocation2 + $0x90] sm:$0xf]  ;;  %v9796_v37 = vor.u32 %v10518_v43, %v9795_v15  ;;  %v9508_v20 = vor.u32 %v10446_v13, %v9507_v59  ;;  %v4860_v13 = vadd.f32 %v13895_v24, %v4811_v57  ;;  %5059 = vmatmul.bf16.gmra.mxu2 %v12990_v8 }
 0x75b   :  { %16505 = vst [vmem:[#allocation77_spill] sm:$0xff] %v13966_v36  ;;  %v10318_v53 = vld [vmem:[#allocation2 + $0xac] sm:$0xf0]  ;;  %5108 = vmatmul.bf16.gmra.mxu3 %v12994_v31 }
 0x75c   :  { %16506 = vst [vmem:[#allocation78_spill] sm:$0xff] %v13971_v22  ;;  %v9763_v63 = vld [vmem:[#allocation2 + $0x690] sm:$0xf]  ;;  %v4815_v22 = vpop.f32.mrf.mxu0  ;;  %v8996_v28 = vor.u32 %v10318_v53, %v8995_v38  ;;  %5314 = vmatpush.bf16.msra.mxu1 %v9796_v37  ;;  %5266 = vmatpush.bf16.msra.mxu3 %v9508_v20 }
 0x75d   :  { %16507 = vst [vmem:[#allocation79_spill] sm:$0xff] %v13976_v19  ;;  %v10510_v54 = vld [vmem:[#allocation2 + $0x6ac] sm:$0xf0]  ;;  %v6006_v19 = vadd.f32 %v13776_v34, %v13812_v0  ;;  %5010 = vmatmul.bf16.gmra.mxu0 %v12986_v12 }
 0x75e   :  { %16508 = vst [vmem:[#allocation80_spill] sm:$0xff] %v13981_v9  ;;  %v9219_v9 = vld [vmem:[#allocation2 + $0x250] sm:$0xf]  ;;  %v9764_v25 = vor.u32 %v10510_v54, %v9763_v63  ;;  %5168 = vmatpush.bf16.msra.mxu0 %v8996_v28 }
 0x75f   :  { %16509 = vst [vmem:[#allocation81_spill] sm:$0xff] %v13986_v5  ;;  %v10374_v1 = vld [vmem:[#allocation2 + $0x26c] sm:$0xf0]  ;;  %v9252_v5 = vor.u32 %v10382_v11, %v9251_v58  ;;  %v4813_v58 = vadd.f32 %v13903_v47, %v13581_v33  ;;  %v4909_v47 = vadd.f32 %v13901_v17, %v4860_v13 }
 0x760   :  { %16510 = vst [vmem:[#allocation82_spill] sm:$0xff] %v13991_v61  ;;  %v4857_v61 = vadd.f32 %v13828_v30, %v13815_v3  ;;  %v9475_v49 = vld [vmem:[#allocation2 + $0x450] sm:$0xf]  ;;  %v9220_v56 = vor.u32 %v10374_v1, %v9219_v9  ;;  %5315 = vmatpush.bf16.msra.mxu1 %v9764_v25  ;;  %v4913_v1 = vpop.f32.mrf.mxu3 }
 0x761   :  { %16511 = vst [vmem:[#allocation83_spill] sm:$0xff] %v13996_v29  ;;  %v10438_v39 = vld [vmem:[#allocation2 + $0x46c] sm:$0xf0]  ;;  %5217 = vmatpush.bf16.msra.mxu2 %v9252_v5  ;;  %v4816_v5 = vadd.f32 %v4815_v22, %v13581_v33  ;;  %v4862_v9 = vadd.f32 %v4861_v42, %v4813_v58  ;;  %v14018_v20 = vadd.f32 %v13856_v55, %v4909_v47 }
 0x762   :  { %v8963_v14 = vld [vmem:[#allocation2 + $0x50] sm:$0xf]  ;;  %v4906_v43 = vadd.f32 %v13830_v10, %v4857_v61  ;;  %v9476_v30 = vor.u32 %v10438_v39, %v9475_v49 }
 0x763   :  { %v10310_v15 = vld [vmem:[#allocation2 + $0x6c] sm:$0xf0]  ;;  %v4911_v54 = vadd.f32 %v4910_v7, %v4862_v9 }
 0x764   :  { %v9731_v34 = vld [vmem:[#allocation2 + $0x650] sm:$0xf]  ;;  %v14011_v45 = vadd.f32 %v13801_v16, %v4906_v43  ;;  %v8964_v10 = vor.u32 %v10310_v15, %v8963_v14  ;;  %v4864_v16 = vpop.f32.mrf.mxu2  ;;  %v4817_v28 = vpop.f32.mrf.mxu0  ;;  %5267 = vmatpush.bf16.msra.mxu3 %v9476_v30 }
 0x765   :  { %v10502_v11 = vld [vmem:[#allocation2 + $0x66c] sm:$0xf0]  ;;  %5218 = vmatpush.bf16.msra.mxu2 %v9220_v56  ;;  %v4865_v17 = vadd.f32 %v4864_v16, %v4816_v5  ;;  %v14021_v49 = vadd.f32 %v13922_v27, %v4911_v54  ;;  %v4818_v15 = vadd.f32 %v4817_v28, %v13581_v33 }
 0x766   :  { %v9187_v59 = vld [vmem:[#allocation2 + $0x210] sm:$0xf]  ;;  %v4962_v38 = vpop.f32.mrf.mxu1  ;;  %v9732_v63 = vor.u32 %v10502_v11, %v9731_v34  ;;  %v6007_v23 = vadd.f32 %v6006_v19, %v14011_v45  ;;  %5169 = vmatpush.bf16.msra.mxu0 %v8964_v10  ;;  %v14031_v11 = vperm.slane %v16455_v18, 3 }
 0x767   :  { %v10366_v3 = vld [vmem:[#allocation2 + $0x22c] sm:$0xf0]  ;;  %v4914_v25 = vadd.f32 %v4913_v1, %v4865_v17 }
 0x768   :  { %v9443_v53 = vld [vmem:[#allocation2 + $0x410] sm:$0xf]  ;;  %v9188_v61 = vor.u32 %v10366_v3, %v9187_v59  ;;  %v6008_v39 = vadd.f32 %v6007_v23, %v14018_v20  ;;  %5316 = vmatpush.bf16.msra.mxu1 %v9732_v63  ;;  %v4915_v43 = vpop.f32.mrf.mxu3 }
 0x769   :  { %v10430_v24 = vld [vmem:[#allocation2 + $0x42c] sm:$0xf0]  ;;  %5157 = vmatmul.bf16.gmra.mxu1 %v16454_v26  ;;  %v14026_v56 = vadd.f32 %v4962_v38, %v4914_v25 }
 0x76a   :  { %v8931_v41 = vld [vmem:[#allocation2 + $0x10] sm:$0xf]  ;;  %v9444_v19 = vor.u32 %v10430_v24, %v9443_v53  ;;  %5219 = vmatpush.bf16.msra.mxu2 %v9188_v61  ;;  %v6009_v55 = vadd.f32 %v6008_v39, %v14021_v49 }
 0x76b   :  { %v10302_v22 = vld [vmem:[#allocation2 + $0x2c] sm:$0xf0] }
 0x76c   :  { %v9699_v42 = vld [vmem:[#allocation2 + $0x610] sm:$0xf]  ;;  %v8932_v7 = vor.u32 %v10302_v22, %v8931_v41  ;;  %5268 = vmatpush.bf16.msra.mxu3 %v9444_v19  ;;  %v6010_v27 = vadd.f32 %v6009_v55, %v14026_v56  ;;  %v4866_v34 = vpop.f32.mrf.mxu2  ;;  %v4976_v59 = vpop.f32.mrf.mxu0 }
 0x76d   :  { %v10494_v37 = vld [vmem:[#allocation2 + $0x62c] sm:$0xf0]  ;;  %v4867_v58 = vadd.f32 %v4866_v34, %v4818_v15  ;;  %v4977_v13 = vadd.f32 %v4976_v59, %v14031_v11  ;;  %5220 = vmatmul.bf16.vlgmr.msra.gmra.mxu2 %v16457_v21 }
 0x76e   :  { %v9700_v57 = vor.u32 %v10494_v37, %v9699_v42  ;;  %v4964_v14 = vpop.f32.mrf.mxu1  ;;  %5170 = vmatpush.bf16.msra.mxu0 %v8932_v7  ;;  %v16513_v34 = vld [vmem:[#allocation38_spill] sm:$0xff] }
 0x76f   :  { %v4916_v3 = vadd.f32 %v4915_v43, %v4867_v58  ;;  %5269 = vmatmul.bf16.vlgmr.msra.gmra.mxu3 %v16458_v62  ;;  %v16514_v58 = vld [vmem:[#allocation30_spill] sm:$0xff] }
 0x770   :  { %5317 = vmatpush.bf16.msra.mxu1 %v9700_v57  ;;  %v5074_v10 = vpop.f32.mrf.mxu3  ;;  %v16530_v48 = vld [vmem:[#allocation34_spill] sm:$0xff] }
 0x771   :  { %v4965_v30 = vadd.f32 %v4964_v14, %v4916_v3  ;;  %5171 = vmatmul.bf16.vlgmr.msra.gmra.mxu0 %v16456_v2  ;;  %v16515_v3 = vld [vmem:[#allocation32_spill] sm:$0xff] }
 0x773   :  { %v6011_v38 = vadd.f32 %v6010_v27, %v4965_v30  ;;  %v16512_v27 = vld [vmem:[#allocation37_spill] sm:$0xff] }
 0x774   :  { %v5025_v33 = vpop.f32.mrf.mxu2  ;;  %v4978_v47 = vpop.f32.mrf.mxu0 }
 0x775   :  { %v6012_v9 = vrot.slane %v6011_v38, 4  ;;  %v5026_v53 = vadd.f32 %v5025_v33, %v4977_v13  ;;  %v4979_v54 = vadd.f32 %v4978_v47, %v14031_v11 }
 0x776   :  { %v5123_v5 = vpop.f32.mrf.mxu1 }
 0x777   :  { %v6013_v63 = vadd.f32 %v6012_v9, %v6011_v38  ;;  %v5075_v61 = vadd.f32 %v5074_v10, %v5026_v53  ;;  %v16519_v10 = vld [vmem:[#allocation58_spill] sm:$0xff] }
 0x778   :  { %v5076_v1 = vpop.f32.mrf.mxu3 }
 0x779   :  { %5318 = vmatmul.bf16.vlgmr.msra.gmra.mxu1 %v16459_v60  ;;  %v6014_v24 = vrot.slane %v6013_v63, 2  ;;  %v14038_v41 = vadd.f32 %v5123_v5, %v5075_v61 }
 0x77b   :  { %v6015_v23 = vadd.f32 %v6014_v24, %v6013_v63  ;;  %v16520_v63 = vld [vmem:[#allocation22_spill] sm:$0xff] }
 0x77c   :  { %v5027_v16 = vpop.f32.mrf.mxu2  ;;  %v4981_v17 = vpop.f32.mrf.mxu0 }
 0x77d   :  { %v6016_v42 = vrot.slane %v6015_v23, 1  ;;  %v5028_v37 = vadd.f32 %v5027_v16, %v4979_v54 }
 0x77e   :  { %v5125_v22 = vpop.f32.mrf.mxu1 }
 0x77f   :  { %v6017_v28 = vadd.f32 %v6016_v42, %v6015_v23  ;;  %v5077_v19 = vadd.f32 %v5076_v1, %v5028_v37  ;;  %5274 = vmatmul.bf16.gmra.mxu3 %v16520_v63  ;;  %v16521_v1 = vld [vmem:[#allocation29_spill] sm:$0xff]  ;;  %v9093_v63 = vld [vmem:[#allocation2 + $0x170] sm:$0xf0] }
 0x780   :  { %v5079_v61 = vpop.f32.mrf.mxu3 }
 0x781   :  { %v6125_v7 = vmul.f32 %v6017_v28, %v16428_v4  ;;  %v14042_v39 = vadd.f32 %v5125_v22, %v5077_v19  ;;  %5176 = vmatmul.bf16.gmra.mxu0 %v12866_v32 }
 0x783   :  { %v14046_v57 = vsub.f32 %v13589_v46, %v6125_v7  ;;  %v14049_v55 = vsub.f32 %v13593_v44, %v6125_v7  ;;  %v14052_v14 = vsub.f32 %v13666_v51, %v6125_v7  ;;  %v14055_v15 = vsub.f32 %v16512_v27, %v6125_v7  ;;  %v16516_v46 = vld [vmem:[#allocation39_spill] sm:$0xff]  ;;  %v16517_v44 = vld [vmem:[#allocation21_spill] sm:$0xff] }
 0x784   :  { %v14058_v43 = vsub.f32 %v16513_v34, %v6125_v7  ;;  %v14061_v59 = vsub.f32 %v16514_v58, %v6125_v7  ;;  %v14064_v13 = vsub.f32 %v16515_v3, %v6125_v7  ;;  %v14067_v5 = vsub.f32 %v16516_v46, %v6125_v7  ;;  %5225 = vmatmul.bf16.gmra.mxu2 %v16517_v44  ;;  %v5030_v38 = vpop.f32.mrf.mxu2  ;;  %v16518_v51 = vld [vmem:[#allocation43_spill] sm:$0xff]  ;;  %v4983_v24 = vpop.f32.mrf.mxu0 }
 0x785   :  { %v14071_v33 = vsub.f32 %v16518_v51, %v6125_v7  ;;  %v14074_v9 = vsub.f32 %v16519_v10, %v6125_v7  ;;  %v14077_v53 = vsub.f32 %v13812_v0, %v6125_v7  ;;  %v14080_v47 = vsub.f32 %v14011_v45, %v6125_v7 }
 0x786   :  { %v5128_v25 = vpop.f32.mrf.mxu1  ;;  %v14084_v22 = vsub.f32 %v14018_v20, %v6125_v7  ;;  %v14087_v23 = vsub.f32 %v14021_v49, %v6125_v7  ;;  %v14090_v54 = vsub.f32 %v14026_v56, %v6125_v7  ;;  %v14092_v16 = vsub.f32 %v4965_v30, %v6125_v7 }
 0x787   :  { %v6261_v0 = vmul.f32 %v14046_v57, %v14046_v57  ;;  %v6269_v45 = vmul.f32 %v14049_v55, %v14049_v55  ;;  %v6277_v20 = vmul.f32 %v14052_v14, %v14052_v14  ;;  %v4982_v49 = vadd.f32 %v4981_v17, %v14031_v11 }
 0x788   :  { %v6285_v56 = vmul.f32 %v14055_v15, %v14055_v15  ;;  %v5081_v19 = vpop.f32.mrf.mxu3  ;;  %v6293_v27 = vmul.f32 %v14058_v43, %v14058_v43  ;;  %v6018_v58 = vadd.f32 %v14042_v39, %v14038_v41  ;;  %v4984_v46 = vadd.f32 %v4983_v24, %v14031_v11 }
 0x789   :  { %5323 = vmatmul.bf16.gmra.mxu1 %v16521_v1  ;;  %v6429_v37 = vadd.f32 %v6269_v45, %v6261_v0  ;;  %v5031_v3 = vadd.f32 %v5030_v38, %v4982_v49  ;;  %v6301_v17 = vmul.f32 %v14061_v59, %v14061_v59  ;;  %v16522_v45 = vld [vmem:[#allocation31_spill] sm:$0xff]  ;;  %v16524_v49 = vld [vmem:[#allocation33_spill] sm:$0xff]  ;;  %v9381_v1 = vld [vmem:[#allocation2 + $0x3b0] sm:$0xf0] }
 0x78b   :  { %v6430_v30 = vadd.f32 %v6429_v37, %v6277_v20  ;;  %v5080_v20 = vadd.f32 %v5079_v61, %v5031_v3 }
 0x78c   :  { %v5032_v28 = vpop.f32.mrf.mxu2  ;;  %v4986_v7 = vpop.f32.mrf.mxu0 }
 0x78d   :  { %v6431_v34 = vadd.f32 %v6430_v30, %v6285_v56  ;;  %v4987_v10 = vadd.f32 %v4986_v7, %v14031_v11  ;;  %v5033_v37 = vadd.f32 %v5032_v28, %v4984_v46  ;;  %v6309_v56 = vmul.f32 %v14064_v13, %v14064_v13  ;;  %v16525_v7 = vld [vmem:[#allocation40_spill] sm:$0xff] }
 0x78e   :  { %v5130_v42 = vpop.f32.mrf.mxu1  ;;  %v14115_v29 = vadd.f32 %v5128_v25, %v5080_v20  ;;  %v6325_v25 = vmul.f32 %v14071_v33, %v14071_v33  ;;  %v6333_v20 = vmul.f32 %v14074_v9, %v14074_v9 }
 0x78f   :  { %v6432_v51 = vadd.f32 %v6431_v34, %v6293_v27  ;;  %v5082_v38 = vadd.f32 %v5081_v19, %v5033_v37  ;;  %v6317_v27 = vmul.f32 %v14067_v5, %v14067_v5  ;;  %5279 = vmatmul.bf16.gmra.mxu3 %v16525_v7 }
 0x790   :  { %16523 = vst [vmem:[#allocation37_spill] sm:$0xff] %v14115_v29  ;;  %v5084_v50 = vpop.f32.mrf.mxu3  ;;  %v6019_v28 = vadd.f32 %v6018_v58, %v14115_v29 }
 0x791   :  { %5181 = vmatmul.bf16.gmra.mxu0 %v16522_v45  ;;  %v6433_v30 = vadd.f32 %v6432_v51, %v6301_v17  ;;  %v14122_v3 = vadd.f32 %v5130_v42, %v5082_v38  ;;  %v16527_v51 = vld [vmem:[#allocation44_spill] sm:$0xff]  ;;  %v6341_v42 = vmul.f32 %v14077_v53, %v14077_v53  ;;  %v10410_v45 = vld [vmem:[#allocation2 + $0x394] sm:$0xf] }
 0x793   :  { %v6434_v34 = vadd.f32 %v6433_v30, %v6309_v56  ;;  %16526 = vst [vmem:[#allocation38_spill] sm:$0xff] %v14122_v3  ;;  %v6020_v17 = vadd.f32 %v6019_v28, %v14122_v3  ;;  %v16555_v3 = vld [vmem:[#allocation56_spill] sm:$0xff] }
 0x794   :  { %5230 = vmatmul.bf16.gmra.mxu2 %v16524_v49  ;;  %v5035_v24 = vpop.f32.mrf.mxu2  ;;  %v4988_v61 = vpop.f32.mrf.mxu0  ;;  %v16543_v49 = vld [vmem:[#allocation27_spill] sm:$0xff] }
 0x795   :  { %v5036_v36 = vadd.f32 %v5035_v24, %v4987_v10  ;;  %v6435_v19 = vadd.f32 %v6434_v34, %v6317_v27  ;;  %v4989_v38 = vadd.f32 %v4988_v61, %v14031_v11 }
 0x796   :  { %v5133_v0 = vpop.f32.mrf.mxu1 }
 0x797   :  { %v5085_v46 = vadd.f32 %v5084_v50, %v5036_v36  ;;  %v6436_v37 = vadd.f32 %v6435_v19, %v6325_v25  ;;  %v6349_v36 = vmul.f32 %v14080_v47, %v14080_v47 }
 0x798   :  { %v5086_v34 = vpop.f32.mrf.mxu3 }
 0x799   :  { %5328 = vmatmul.bf16.gmra.mxu1 %v16527_v51  ;;  %v14130_v10 = vadd.f32 %v5133_v0, %v5085_v46  ;;  %v6437_v58 = vadd.f32 %v6436_v37, %v6333_v20  ;;  %v6357_v0 = vmul.f32 %v14084_v22, %v14084_v22  ;;  %v6365_v46 = vmul.f32 %v14087_v23, %v14087_v23  ;;  %v10546_v51 = vld [vmem:[#allocation2 + $0x7d4] sm:$0xf] }
 0x79b   :  { %16528 = vst [vmem:[#allocation30_spill] sm:$0xff] %v14130_v10  ;;  %v6021_v30 = vadd.f32 %v6020_v17, %v14130_v10  ;;  %v6438_v24 = vadd.f32 %v6437_v58, %v6341_v42  ;;  %v6373_v42 = vmul.f32 %v14090_v54, %v14090_v54  ;;  %v16549_v10 = vld [vmem:[#allocation54_spill] sm:$0xff] }
 0x79c   :  { %v5037_v50 = vpop.f32.mrf.mxu2  ;;  %v4991_v28 = vpop.f32.mrf.mxu0 }
 0x79d   :  { %v5038_v27 = vadd.f32 %v5037_v50, %v4989_v38  ;;  %v6439_v25 = vadd.f32 %v6438_v24, %v6349_v36  ;;  %v4992_v61 = vadd.f32 %v4991_v28, %v14031_v11  ;;  %v16531_v50 = vld [vmem:[#allocation47_spill] sm:$0xff]  ;;  %v6381_v24 = vmul.f32 %v14092_v16, %v14092_v16 }
 0x79e   :  { %v5135_v56 = vpop.f32.mrf.mxu1 }
 0x79f   :  { %v5087_v19 = vadd.f32 %v5086_v34, %v5038_v27  ;;  %v6440_v20 = vadd.f32 %v6439_v25, %v6357_v0 }
 0x7a0   :  { %v5089_v28 = vpop.f32.mrf.mxu3 }
 0x7a1   :  { %v14142_v17 = vadd.f32 %v5135_v56, %v5087_v19  ;;  %5186 = vmatmul.bf16.gmra.mxu0 %v16530_v48  ;;  %v6441_v58 = vadd.f32 %v6440_v20, %v6365_v46  ;;  %v16532_v56 = vld [vmem:[#allocation48_spill] sm:$0xff] }
 0x7a2   :  { %5284 = vmatmul.bf16.gmra.mxu3 %v16532_v56 }
 0x7a3   :  { %16529 = vst [vmem:[#allocation32_spill] sm:$0xff] %v14142_v17  ;;  %v6022_v38 = vadd.f32 %v6021_v30, %v14142_v17  ;;  %v6442_v27 = vadd.f32 %v6441_v58, %v6373_v42  ;;  %v9061_v17 = vld [vmem:[#allocation2 + $0x130] sm:$0xf0] }
 0x7a4   :  { %5235 = vmatmul.bf16.gmra.mxu2 %v16531_v50  ;;  %v5040_v36 = vpop.f32.mrf.mxu2  ;;  %v4993_v0 = vpop.f32.mrf.mxu0 }
 0x7a5   :  { %v5041_v34 = vadd.f32 %v5040_v36, %v4992_v61  ;;  %v6443_v25 = vadd.f32 %v6442_v27, %v6381_v24  ;;  %v4994_v40 = vadd.f32 %v4993_v0, %v14031_v11 }
 0x7a6   :  { %v5138_v37 = vpop.f32.mrf.mxu1 }
 0x7a7   :  { %v5090_v19 = vadd.f32 %v5089_v28, %v5041_v34  ;;  %v6444_v52 = vrot.slane %v6443_v25, 4  ;;  %v16536_v28 = vld [vmem:[#allocation50_spill] sm:$0xff] }
 0x7a8   :  { %v5091_v56 = vpop.f32.mrf.mxu3 }
 0x7a9   :  { %5333 = vmatmul.bf16.gmra.mxu1 %v16533_v35  ;;  %v14154_v46 = vadd.f32 %v5138_v37, %v5090_v19  ;;  %v6445_v20 = vadd.f32 %v6444_v52, %v6443_v25  ;;  %v16537_v25 = vld [vmem:[#allocation26_spill] sm:$0xff] }
 0x7ab   :  { %16534 = vst [vmem:[#allocation39_spill] sm:$0xff] %v14154_v46  ;;  %v6023_v6 = vadd.f32 %v6022_v38, %v14154_v46  ;;  %v6446_v42 = vrot.slane %v6445_v20, 2  ;;  %v9861_v46 = vld [vmem:[#allocation2 + $0x770] sm:$0xf0] }
 0x7ac   :  { %v5042_v50 = vpop.f32.mrf.mxu2  ;;  %v4996_v61 = vpop.f32.mrf.mxu0 }
 0x7ad   :  { %v5043_v58 = vadd.f32 %v5042_v50, %v4994_v40  ;;  %v6447_v36 = vadd.f32 %v6446_v42, %v6445_v20  ;;  %v4997_v34 = vadd.f32 %v4996_v61, %v14031_v11  ;;  %v16538_v50 = vld [vmem:[#allocation51_spill] sm:$0xff]  ;;  %v16539_v42 = vld [vmem:[#allocation52_spill] sm:$0xff]  ;;  %v16541_v61 = vld [vmem:[#allocation57_spill] sm:$0xff] }
 0x7ae   :  { %v5140_v30 = vpop.f32.mrf.mxu1 }
 0x7af   :  { %v5092_v48 = vadd.f32 %v5091_v56, %v5043_v58  ;;  %v6448_v24 = vrot.slane %v6447_v36, 1 }
 0x7b0   :  { %v5094_v56 = vpop.f32.mrf.mxu3 }
 0x7b1   :  { %v14158_v27 = vadd.f32 %v5140_v30, %v5092_v48  ;;  %5191 = vmatmul.bf16.gmra.mxu0 %v16536_v28  ;;  %v6449_v52 = vadd.f32 %v6448_v24, %v6447_v36  ;;  %v14173_v36 = vperm.slane %v16541_v61, 2  ;;  %v10354_v28 = vld [vmem:[#allocation2 + $0x1d4] sm:$0xf] }
 0x7b2   :  { %5289 = vmatmul.bf16.gmra.mxu3 %v16538_v50 }
 0x7b3   :  { %16535 = vst [vmem:[#allocation43_spill] sm:$0xff] %v14158_v27  ;;  %v6024_v38 = vadd.f32 %v6023_v6, %v14158_v27  ;;  %v6557_v40 = vmul.f32 %v6449_v52, %v16428_v4  ;;  %v14197_v61 = vmul.f32 %v14173_v36, %v14058_v43  ;;  %v14207_v35 = vmul.f32 %v14173_v36, %v14064_v13  ;;  %v9925_v43 = vld [vmem:[#allocation2 + $0x7f0] sm:$0xf0] }
 0x7b4   :  { %5240 = vmatmul.bf16.gmra.mxu2 %v16537_v25  ;;  %v5045_v0 = vpop.f32.mrf.mxu2  ;;  %v4998_v20 = vpop.f32.mrf.mxu0  ;;  %v9669_v25 = vld [vmem:[#allocation2 + $0x5f0] sm:$0xf0] }
 0x7b5   :  { %v5046_v19 = vadd.f32 %v5045_v0, %v4997_v34  ;;  %v14166_v48 = vadd.f32 0.8, %v6557_v40  ;;  %v4999_v52 = vadd.f32 %v4998_v20, %v14031_v11  ;;  %v14179_v40 = vmul.f32 %v14173_v36, %v14046_v57  ;;  %v10418_v20 = vld [vmem:[#allocation2 + $0x3d4] sm:$0xf] }
 0x7b6   :  { %v5143_v37 = vpop.f32.mrf.mxu1  ;;  %v10474_v13 = vld [vmem:[#allocation2 + $0x594] sm:$0xf] }
 0x7b7   :  { %v5095_v30 = vadd.f32 %v5094_v56, %v5046_v19  ;;  %10660 = vrsqrt.f32 %v14166_v48  ;;  %vm6742_vm3 = vweird.f32 %v14166_v48  ;;  %v10530_v27 = vld [vmem:[#allocation2 + $0x754] sm:$0xf] }
 0x7b8   :  { %v5096_v50 = vpop.f32.mrf.mxu3 }
 0x7b9   :  { %5338 = vmatmul.bf16.gmra.mxu1 %v16539_v42  ;;  %v14170_v58 = vadd.f32 %v5143_v37, %v5095_v30  ;;  %v14185_v37 = vmul.f32 %v14173_v36, %v14049_v55  ;;  %v14189_v30 = vmul.f32 %v14173_v36, %v14052_v14  ;;  %v14201_v55 = vmul.f32 %v14173_v36, %v14061_v59 }
 0x7ba   :  { %v14214_v59 = vmul.f32 %v14173_v36, %v14067_v5  ;;  %v9637_v5 = vld [vmem:[#allocation2 + $0x5b0] sm:$0xf0] }
 0x7bb   :  { %16540 = vst [vmem:[#allocation58_spill] sm:$0xff] %v14170_v58  ;;  %v6025_v24 = vadd.f32 %v6024_v38, %v14170_v58  ;;  %v14193_v38 = vmul.f32 %v14173_v36, %v14055_v15  ;;  %v9157_v15 = vld [vmem:[#allocation2 + $0x1f0] sm:$0xf0] }
 0x7bc   :  { %v5047_v34 = vpop.f32.mrf.mxu2  ;;  %v5001_v19 = vpop.f32.mrf.mxu0 }
 0x7bd   :  { %v5048_v0 = vadd.f32 %v5047_v34, %v4999_v52  ;;  %v14181_v56 = vpop.eup %10660  ;;  %v9413_v52 = vld [vmem:[#allocation2 + $0x3f0] sm:$0xf0] }
 0x7be   :  { %v5145_v6 = vpop.f32.mrf.mxu1  ;;  %v10482_v34 = vld [vmem:[#allocation2 + $0x5d4] sm:$0xf]  ;;  %v6737_v14 = vmul.f32 %v14181_v56, %v14166_v48  ;;  %v9416_v42 = vor.u32 %v10418_v20, %v9413_v52  ;;  %v9928_v52 = vor.u32 %v10546_v51, %v9925_v43  ;;  %vm6743_vm2 = vweird.f32 %v14181_v56 }
 0x7bf   :  { %v5097_v57 = vadd.f32 %v5096_v50, %v5048_v0  ;;  %v9672_v50 = vor.u32 %v10482_v34, %v9669_v25  ;;  %v9160_v0 = vor.u32 %v10354_v28, %v9157_v15  ;;  %v5002_v25 = vadd.f32 %v5001_v19, %v14031_v11  ;;  %v10346_v34 = vld [vmem:[#allocation2 + $0x194] sm:$0xf]  ;;  %vm14239_vm4 = vmor %vm6742_vm3, %vm6743_vm2 }
 0x7c0   :  { %v6738_v20 = vmul.f32 %v14181_v56, %v6737_v14  ;;  %5408 = vmatpush.bf16.msrb.mxu2 %v9416_v42  ;;  %v14220_v28 = vmul.f32 %v14173_v36, %v14071_v33  ;;  %v14228_v14 = vmul.f32 %v14173_v36, %v14074_v9  ;;  %5506 = vmatpush.bf16.msrb.mxu1 %v9928_v52  ;;  %v10538_v43 = vld [vmem:[#allocation2 + $0x794] sm:$0xf] }
 0x7c1   :  { %v14209_v7 = vadd.f32 %v5145_v6, %v5097_v57  ;;  %5196 = vmatmul.bf16.gmra.mxu0 %v16543_v49  ;;  %5457 = vmatpush.bf16.msrb.mxu3 %v9672_v50  ;;  %v9384_v6 = vor.u32 %v10410_v45, %v9381_v1  ;;  %v9125_v57 = vld [vmem:[#allocation2 + $0x1b0] sm:$0xf0]  ;;  %v9640_v33 = vor.u32 %v10474_v13, %v9637_v5  ;;  %v16544_v50 = vld [vmem:[#allocation28_spill] sm:$0xff]  ;;  %v5099_v13 = vpop.f32.mrf.mxu3 }
 0x7c2   :  { %5359 = vmatpush.bf16.msrb.mxu0 %v9160_v0  ;;  %v6739_v19 = vmul.f32 0.5, %v6738_v20  ;;  %v9128_v15 = vor.u32 %v10346_v34, %v9125_v57  ;;  %v9893_v49 = vld [vmem:[#allocation2 + $0x7b0] sm:$0xf0]  ;;  %v6662_v1 = vmul.f32 %v14173_v36, %v14077_v53  ;;  %v6670_v45 = vmul.f32 %v14173_v36, %v14080_v47  ;;  %v16545_v20 = vld [vmem:[#allocation53_spill] sm:$0xff] }
 0x7c3   :  { %16542 = vst [vmem:[#allocation84_spill] sm:$0xff] %v14209_v7  ;;  %v14224_v42 = vadd.f32 %v6025_v24, %v14209_v7  ;;  %v9896_v24 = vor.u32 %v10538_v43, %v9893_v49  ;;  %v10402_v0 = vld [vmem:[#allocation2 + $0x354] sm:$0xf]  ;;  %5294 = vmatmul.bf16.gmra.mxu3 %v16545_v20  ;;  %v16548_v53 = vld [vmem:[#allocation41_spill] sm:$0xff]  ;;  %v6678_v20 = vmul.f32 %v14173_v36, %v14084_v22 }
 0x7c4   :  { %5245 = vmatmul.bf16.gmra.mxu2 %v16544_v50  ;;  %v9349_v9 = vld [vmem:[#allocation2 + $0x370] sm:$0xf0]  ;;  %v5050_v52 = vpop.f32.mrf.mxu2  ;;  %v6740_v5 = vsub.f32 1.5, %v6739_v19  ;;  %v14244_v57 = vperm.slane %v16548_v53, 2  ;;  %v5003_v50 = vpop.f32.mrf.mxu0  ;;  %v6686_v19 = vmul.f32 %v14173_v36, %v14087_v23  ;;  %v6702_v23 = vmul.f32 %v14173_v36, %v14092_v16 }
 0x7c5   :  { %v10466_v7 = vld [vmem:[#allocation2 + $0x554] sm:$0xf]  ;;  %5409 = vmatpush.bf16.msrb.mxu2 %v9384_v6  ;;  %v9352_v47 = vor.u32 %v10402_v0, %v9349_v9  ;;  %v5051_v43 = vadd.f32 %v5050_v52, %v5002_v25  ;;  %5458 = vmatpush.bf16.msrb.mxu3 %v9640_v33  ;;  %v6694_v6 = vmul.f32 %v14173_v36, %v14090_v54 }
 0x7c6   :  { %v5148_v51 = vpop.f32.mrf.mxu1  ;;  %v9605_v49 = vld [vmem:[#allocation2 + $0x570] sm:$0xf0]  ;;  %5360 = vmatpush.bf16.msrb.mxu0 %v9128_v15  ;;  %v6741_v0 = vmul.f32 %v14181_v56, %v6740_v5  ;;  %5507 = vmatpush.bf16.msrb.mxu1 %v9896_v24  ;;  %v9864_v33 = vor.u32 %v10530_v27, %v9861_v46  ;;  %v14257_v54 = vadd.f32 %v5003_v50, %v14031_v11 }
 0x7c7   :  { %v10338_v48 = vld [vmem:[#allocation2 + $0x154] sm:$0xf]  ;;  %v9608_v58 = vor.u32 %v10466_v7, %v9605_v49  ;;  %v5100_v22 = vadd.f32 %v5099_v13, %v5051_v43 }
 0x7c8   :  { %v9096_v25 = vor.u32 %v10338_v48, %v9093_v63  ;;  %v10394_v9 = vld [vmem:[#allocation2 + $0x314] sm:$0xf]  ;;  %v6745_v63 = vsel %vm14239_vm4, %v14181_v56, %v6741_v0 }
 0x7c9   :  { %v9317_v52 = vld [vmem:[#allocation2 + $0x330] sm:$0xf0]  ;;  %5343 = vmatmul.bf16.gmra.mxu1 %v16549_v10  ;;  %5410 = vmatpush.bf16.msrb.mxu2 %v9352_v47  ;;  %v14262_v5 = vadd.f32 %v5148_v51, %v5100_v22  ;;  %v6798_v16 = vmul.f32 %v6745_v63, %v14179_v40  ;;  %v6806_v46 = vmul.f32 %v6745_v63, %v14185_v37 }
 0x7ca   :  { %v10458_v53 = vld [vmem:[#allocation2 + $0x514] sm:$0xf]  ;;  %v9320_v15 = vor.u32 %v10394_v9, %v9317_v52  ;;  %v6814_v27 = vmul.f32 %v6745_v63, %v14189_v30  ;;  %v6822_v36 = vmul.f32 %v6745_v63, %v14193_v38  ;;  %5459 = vmatpush.bf16.msrb.mxu3 %v9608_v58  ;;  %v6830_v48 = vmul.f32 %v6745_v63, %v14197_v61  ;;  %v14278_v58 = vpop.f32.mrf.mxu3  ;;  %v16550_v52 = vld [vmem:[#allocation35_spill] sm:$0xff] }
 0x7cb   :  { %v9573_v7 = vld [vmem:[#allocation2 + $0x530] sm:$0xf0]  ;;  %v6838_v56 = vmul.f32 %v6745_v63, %v14201_v55  ;;  %v6846_v34 = vmul.f32 %v6745_v63, %v14207_v35  ;;  %5361 = vmatpush.bf16.msrb.mxu0 %v9096_v25  ;;  %v6862_v40 = vmul.f32 %v6745_v63, %v14220_v28  ;;  %v6870_v37 = vmul.f32 %v6745_v63, %v14228_v14 }
 0x7cc   :  { %v10330_v49 = vld [vmem:[#allocation2 + $0x114] sm:$0xf]  ;;  %v9576_v24 = vor.u32 %v10458_v53, %v9573_v7  ;;  %v6878_v51 = vmul.f32 %v6745_v63, %v6662_v1  ;;  %v6886_v30 = vmul.f32 %v6745_v63, %v6670_v45  ;;  %5508 = vmatpush.bf16.msrb.mxu1 %v9864_v33  ;;  %v14276_v38 = vpop.f32.mrf.mxu2  ;;  %v6894_v53 = vmul.f32 %v6745_v63, %v6678_v20  ;;  %v14280_v35 = vpop.f32.mrf.mxu0 }
 0x7cd   :  { %v9064_v13 = vor.u32 %v10330_v49, %v9061_v17  ;;  %v6854_v17 = vmul.f32 %v6745_v63, %v14214_v59  ;;  %v6902_v61 = vmul.f32 %v6745_v63, %v6686_v19  ;;  %v6910_v47 = vmul.f32 %v6745_v63, %v6694_v6  ;;  %5411 = vmatpush.bf16.msrb.mxu2 %v9320_v15  ;;  %v10522_v7 = vld [vmem:[#allocation2 + $0x714] sm:$0xf] }
 0x7ce   :  { %v14268_v50 = vpop.f32.mrf.mxu1  ;;  %v6918_v55 = vmul.f32 %v6745_v63, %v6702_v23  ;;  %v6943_v59 = vadd.f32 %v14244_v57, %v6798_v16  ;;  %v6951_v28 = vadd.f32 %v14244_v57, %v6806_v46  ;;  %v14285_v14 = vadd.f32 %v14244_v57, %v6814_v27  ;;  %5460 = vmatpush.bf16.msrb.mxu3 %v9576_v24  ;;  %v9829_v49 = vld [vmem:[#allocation2 + $0x730] sm:$0xf0]  ;;  %v16552_v16 = vld [vmem:[#allocation55_spill] sm:$0xff] }
 0x7cf   :  { %v14288_v1 = vadd.f32 %v14244_v57, %v6822_v36  ;;  %v14291_v45 = vadd.f32 %v14244_v57, %v6830_v48  ;;  %v14294_v20 = vadd.f32 %v14244_v57, %v6838_v56  ;;  %v14297_v43 = vadd.f32 %v14244_v57, %v6846_v34  ;;  %5362 = vmatpush.bf16.msrb.mxu0 %v9064_v13  ;;  %v10386_v63 = vld [vmem:[#allocation2 + $0x2d4] sm:$0xf] }
 0x7d0   :  { %v14300_v19 = vadd.f32 %v14244_v57, %v6854_v17  ;;  %v14303_v6 = vadd.f32 %v14244_v57, %v6862_v40  ;;  %v14306_v0 = vadd.f32 %v14244_v57, %v6870_v37  ;;  %v14309_v25 = vadd.f32 %v14244_v57, %v6878_v51  ;;  %v9285_v13 = vld [vmem:[#allocation2 + $0x2f0] sm:$0xf0] }
 0x7d1   :  { %v14312_v9 = vadd.f32 %v14244_v57, %v6886_v30  ;;  %5201 = vmatmul.bf16.gmra.mxu0 %v16550_v52  ;;  %v14316_v22 = vadd.f32 %v14244_v57, %v6894_v53  ;;  %v14319_v23 = vadd.f32 %v14244_v57, %v6902_v61  ;;  %v14322_v33 = vadd.f32 %v14244_v57, %v6910_v47  ;;  %v10322_v52 = vld [vmem:[#allocation2 + $0xd4] sm:$0xf] }
 0x7d2   :  { %v14325_v15 = vadd.f32 %v14244_v57, %v6918_v55  ;;  %vm7071_vm5 = vcmp.gt.f32.partialorder %v6943_v59, 0.0  ;;  %vm7079_vm6 = vcmp.gt.f32.partialorder %v6951_v28, 0.0  ;;  %vm7087_vm8 = vcmp.gt.f32.partialorder %v14285_v14, 0.0  ;;  %v16551_v57 = vld [vmem:[#allocation36_spill] sm:$0xff]  ;;  %v14343_v27 = vpop.f32.mrf.mxu3  ;;  %v9029_v10 = vld [vmem:[#allocation2 + $0xf0] sm:$0xf0] }
 0x7d3   :  { %vm7095_vm9 = vcmp.gt.f32.partialorder %v14288_v1, 0.0  ;;  %vm7103_vm7 = vcmp.gt.f32.partialorder %v14291_v45, 0.0  ;;  %vm7111_vm10 = vcmp.gt.f32.partialorder %v14294_v20, 0.0  ;;  %vm7119_vm11 = vcmp.gt.f32.partialorder %v14297_v43, 0.0  ;;  %5299 = vmatmul.bf16.gmra.mxu3 %v16552_v16 }
 0x7d4   :  { %vm7127_vm12 = vcmp.gt.f32.partialorder %v14300_v19, 0.0  ;;  %5250 = vmatmul.bf16.gmra.mxu2 %v16551_v57  ;;  %vm7135_vm13 = vcmp.gt.f32.partialorder %v14303_v6, 0.0  ;;  %vm7143_vm14 = vcmp.gt.f32.partialorder %v14306_v0, 0.0  ;;  %vm7151_vm15 = vcmp.gt.f32.partialorder %v14309_v25, 0.0  ;;  %v14341_v46 = vpop.f32.mrf.mxu2  ;;  %v14349_v36 = vpop.f32.mrf.mxu0 }
 0x7d5   :  { %vm7159_vm0 = vcmp.gt.f32.partialorder %v14312_v9, 0.0  ;;  %vm7167_vm1 = vcmp.gt.f32.partialorder %v14316_v22, 0.0  ;;  %vm7175_vm2 = vcmp.gt.f32.partialorder %v14319_v23, 0.0  ;;  %vm7183_vm3 = vcmp.gt.f32.partialorder %v14322_v33, 0.0 }
 0x7d6   :  { %v14333_v24 = vpop.f32.mrf.mxu1  ;;  %vm7191_vm4 = vcmp.gt.f32.partialorder %v14325_v15, 0.0  ;;  %v7199_v48 = vmul.f32 0.2, %v6943_v59  ;;  %v7207_v56 = vmul.f32 0.2, %v6951_v28  ;;  %v9832_v17 = vor.u32 %v10522_v7, %v9829_v49 }
 0x7d7   :  { %v7215_v34 = vmul.f32 0.2, %v14285_v14  ;;  %v7223_v40 = vmul.f32 0.2, %v14288_v1  ;;  %v7231_v37 = vmul.f32 0.2, %v14291_v45  ;;  %v9288_v30 = vor.u32 %v10386_v63, %v9285_v13 }
 0x7d8   :  { %v7239_v51 = vmul.f32 0.2, %v14294_v20  ;;  %v7247_v53 = vmul.f32 0.2, %v14297_v43  ;;  %v7255_v61 = vmul.f32 0.2, %v14300_v19  ;;  %v14359_v55 = vsel %vm7071_vm5, %v6943_v59, %v7199_v48  ;;  %5509 = vmatpush.bf16.msrb.mxu1 %v9832_v17 }
 0x7d9   :  { %v7263_v47 = vmul.f32 0.2, %v14303_v6  ;;  %16553 = vst [vmem:[#allocation85_spill] sm:$0xff] %v14359_v55  ;;  %v7271_v16 = vmul.f32 0.2, %v14306_v0  ;;  %v14365_v57 = vsel %vm7079_vm6, %v6951_v28, %v7207_v56  ;;  %5412 = vmatpush.bf16.msrb.mxu2 %v9288_v30  ;;  %5348 = vmatmul.bf16.gmra.mxu1 %v16555_v3  ;;  %v14374_v55 = vsel %vm7087_vm8, %v14285_v14, %v7215_v34 }
 0x7da   :  { %v7279_v7 = vmul.f32 0.2, %v14309_v25  ;;  %v7287_v49 = vmul.f32 0.2, %v14312_v9  ;;  %16554 = vst [vmem:[#allocation86_spill] sm:$0xff] %v14365_v57  ;;  %v14380_v30 = vsel %vm7095_vm9, %v14288_v1, %v7223_v40  ;;  %v14385_v57 = vsel %vm7103_vm7, %v14291_v45, %v7231_v37 }
 0x7db   :  { %v10450_v63 = vld [vmem:[#allocation2 + $0x4d4] sm:$0xf]  ;;  %v7295_v59 = vmul.f32 0.2, %v14316_v22  ;;  %v7303_v48 = vmul.f32 0.2, %v14319_v23  ;;  %v14390_v3 = vsel %vm7111_vm10, %v14294_v20, %v7239_v51  ;;  %v14397_v29 = vsel %vm7119_vm11, %v14297_v43, %v7247_v53  ;;  %v5106_v53 = vpop.f32.mrf.mxu3 }
 0x7dc   :  { %v9541_v13 = vld [vmem:[#allocation2 + $0x4f0] sm:$0xf0]  ;;  %v7311_v17 = vmul.f32 0.2, %v14322_v33  ;;  %16556 = vst [vmem:[#allocation87_spill] sm:$0xff] %v14374_v55  ;;  %v14402_v1 = vsel %vm7127_vm12, %v14300_v19, %v7255_v61  ;;  %v14407_v45 = vsel %vm7135_vm13, %v14303_v6, %v7263_v47  ;;  %v14412_v20 = vsel %vm7143_vm14, %v14306_v0, %v7271_v16  ;;  %v5057_v43 = vpop.f32.mrf.mxu2 }
 0x7dd   :  { %v10514_v28 = vld [vmem:[#allocation2 + $0x6d4] sm:$0xf]  ;;  %v7319_v56 = vmul.f32 0.2, %v14325_v15  ;;  %16557 = vst [vmem:[#allocation88_spill] sm:$0xff] %v14380_v30  ;;  %v14417_v19 = vsel %vm7151_vm15, %v14309_v25, %v7279_v7  ;;  %v14422_v6 = vsel %vm7159_vm0, %v14312_v9, %v7287_v49  ;;  %v14427_v0 = vsel %vm7167_vm1, %v14316_v22, %v7295_v59  ;;  %v5011_v25 = vpop.f32.mrf.mxu0 }
 0x7de   :  { %16558 = vst [vmem:[#allocation89_spill] sm:$0xff] %v14385_v57  ;;  %v9797_v14 = vld [vmem:[#allocation2 + $0x6f0] sm:$0xf0]  ;;  %v14392_v55 = vpop.f32.mrf.mxu1  ;;  %v14432_v16 = vsel %vm7175_vm2, %v14319_v23, %v7303_v48  ;;  %v14437_v7 = vsel %vm7183_vm3, %v14322_v33, %v7311_v17  ;;  %v9544_v22 = vor.u32 %v10450_v63, %v9541_v13  ;;  %v9032_v49 = vor.u32 %v10322_v52, %v9029_v10 }
 0x7df   :  { %16559 = vst [vmem:[#allocation90_spill] sm:$0xff] %v14390_v3  ;;  %v10378_v34 = vld [vmem:[#allocation2 + $0x294] sm:$0xf]  ;;  %v14442_v9 = vsel %vm7191_vm4, %v14325_v15, %v7319_v56  ;;  %v9800_v48 = vor.u32 %v10514_v28, %v9797_v14  ;;  %v5053_v17 = vadd.f32 %v14276_v38, %v14257_v54  ;;  %v5007_v52 = vadd.f32 %v14280_v35, %v14031_v11 }
 0x7e0   :  { %16560 = vst [vmem:[#allocation91_spill] sm:$0xff] %v14397_v29  ;;  %v9253_v40 = vld [vmem:[#allocation2 + $0x2b0] sm:$0xf0]  ;;  %5461 = vmatpush.bf16.msrb.mxu3 %v9544_v22  ;;  %5363 = vmatpush.bf16.msrb.mxu0 %v9032_v49  ;;  %v5009_v14 = vadd.f32 %v14349_v36, %v14031_v11  ;;  %v16590_v29 = vld [vmem:[#allocation49_spill] sm:$0xff] }
 0x7e1   :  { %16561 = vst [vmem:[#allocation92_spill] sm:$0xff] %v14402_v1  ;;  %v10442_v37 = vld [vmem:[#allocation2 + $0x494] sm:$0xf]  ;;  %5510 = vmatpush.bf16.msrb.mxu1 %v9800_v48  ;;  %5206 = vmatmul.bf16.gmra.mxu0 %v12986_v12 }
 0x7e2   :  { %16562 = vst [vmem:[#allocation93_spill] sm:$0xff] %v14407_v45  ;;  %v9509_v51 = vld [vmem:[#allocation2 + $0x4b0] sm:$0xf0] }
 0x7e3   :  { %16563 = vst [vmem:[#allocation94_spill] sm:$0xff] %v14412_v20  ;;  %v10314_v61 = vld [vmem:[#allocation2 + $0x94] sm:$0xf]  ;;  %5304 = vmatmul.bf16.gmra.mxu3 %v12994_v31 }
 0x7e4   :  { %16564 = vst [vmem:[#allocation95_spill] sm:$0xff] %v14417_v19  ;;  %v8997_v47 = vld [vmem:[#allocation2 + $0xb0] sm:$0xf0]  ;;  %v9512_v19 = vor.u32 %v10442_v37, %v9509_v51  ;;  %v5012_v37 = vadd.f32 %v5011_v25, %v14031_v11  ;;  %5255 = vmatmul.bf16.gmra.mxu2 %v12990_v8  ;;  %v5058_v51 = vadd.f32 %v5057_v43, %v5009_v14 }
 0x7e5   :  { %16565 = vst [vmem:[#allocation96_spill] sm:$0xff] %v14422_v6  ;;  %v10506_v20 = vld [vmem:[#allocation2 + $0x694] sm:$0xf]  ;;  %v6027_v6 = vadd.f32 %v14224_v42, %v14262_v5  ;;  %v9000_v33 = vor.u32 %v10314_v61, %v8997_v47  ;;  %v5102_v42 = vadd.f32 %v14278_v58, %v5053_v17  ;;  %v5013_v22 = vpop.f32.mrf.mxu0 }
 0x7e6   :  { %16566 = vst [vmem:[#allocation97_spill] sm:$0xff] %v14427_v0  ;;  %v9765_v59 = vld [vmem:[#allocation2 + $0x6b0] sm:$0xf0]  ;;  %5462 = vmatpush.bf16.msrb.mxu3 %v9512_v19  ;;  %v5158_v36 = vpop.f32.mrf.mxu1  ;;  %v5107_v49 = vadd.f32 %v5106_v53, %v5058_v51 }
 0x7e7   :  { %16567 = vst [vmem:[#allocation98_spill] sm:$0xff] %v14432_v16  ;;  %v10370_v0 = vld [vmem:[#allocation2 + $0x254] sm:$0xf]  ;;  %v9256_v16 = vor.u32 %v10378_v34, %v9253_v40  ;;  %v9768_v10 = vor.u32 %v10506_v20, %v9765_v59  ;;  %v5056_v20 = vadd.f32 %v14341_v46, %v5007_v52  ;;  %5364 = vmatpush.bf16.msrb.mxu0 %v9000_v33  ;;  %v5109_v59 = vpop.f32.mrf.mxu3 }
 0x7e8   :  { %16568 = vst [vmem:[#allocation99_spill] sm:$0xff] %v14437_v7  ;;  %v9221_v23 = vld [vmem:[#allocation2 + $0x270] sm:$0xf0]  ;;  %v14458_v35 = vadd.f32 %v14268_v50, %v5102_v42  ;;  %v5060_v50 = vpop.f32.mrf.mxu2 }
 0x7e9   :  { %16569 = vst [vmem:[#allocation100_spill] sm:$0xff] %v14442_v9  ;;  %v10434_v7 = vld [vmem:[#allocation2 + $0x454] sm:$0xf]  ;;  %5413 = vmatpush.bf16.msrb.mxu2 %v9256_v16  ;;  %v9224_v63 = vor.u32 %v10370_v0, %v9221_v23  ;;  %5511 = vmatpush.bf16.msrb.mxu1 %v9768_v10  ;;  %v5105_v16 = vadd.f32 %v14343_v27, %v5056_v20  ;;  %v16582_v9 = vld [vmem:[#allocation40_spill] sm:$0xff] }
 0x7ea   :  { %v9477_v15 = vld [vmem:[#allocation2 + $0x470] sm:$0xf0]  ;;  %v6028_v19 = vadd.f32 %v6027_v6, %v14458_v35  ;;  %v5061_v33 = vadd.f32 %v5060_v50, %v5012_v37  ;;  %v14467_v27 = vadd.f32 %v14392_v55, %v5107_v49  ;;  %5353 = vmatmul.bf16.gmra.mxu1 %v16454_v26 }
 0x7eb   :  { %v10306_v13 = vld [vmem:[#allocation2 + $0x54] sm:$0xf]  ;;  %v9480_v40 = vor.u32 %v10434_v7, %v9477_v15  ;;  %v14464_v48 = vadd.f32 %v14333_v24, %v5105_v16 }
 0x7ec   :  { %v8965_v28 = vld [vmem:[#allocation2 + $0x70] sm:$0xf0]  ;;  %v5110_v53 = vadd.f32 %v5109_v59, %v5061_v33 }
 0x7ed   :  { %v10498_v56 = vld [vmem:[#allocation2 + $0x654] sm:$0xf]  ;;  %v8968_v58 = vor.u32 %v10306_v13, %v8965_v28  ;;  %5414 = vmatpush.bf16.msrb.mxu2 %v9224_v63  ;;  %5463 = vmatpush.bf16.msrb.mxu3 %v9480_v40  ;;  %v6029_v6 = vadd.f32 %v6028_v19, %v14464_v48  ;;  %v5014_v13 = vadd.f32 %v5013_v22, %v14031_v11 }
 0x7ee   :  { %v9733_v34 = vld [vmem:[#allocation2 + $0x670] sm:$0xf0]  ;;  %v14472_v24 = vadd.f32 %v5158_v36, %v5110_v53  ;;  %v5160_v63 = vpop.f32.mrf.mxu1  ;;  %v5172_v28 = vpop.f32.mrf.mxu0 }
 0x7ef   :  { %v10362_v54 = vld [vmem:[#allocation2 + $0x214] sm:$0xf]  ;;  %v9736_v61 = vor.u32 %v10498_v56, %v9733_v34  ;;  %5365 = vmatpush.bf16.msrb.mxu0 %v8968_v58  ;;  %v6030_v52 = vadd.f32 %v6029_v6, %v14467_v27  ;;  %v5111_v42 = vpop.f32.mrf.mxu3  ;;  %v14477_v34 = vperm.slane %v16455_v18, 4 }
 0x7f0   :  { %v9189_v38 = vld [vmem:[#allocation2 + $0x230] sm:$0xf0]  ;;  %v5062_v56 = vpop.f32.mrf.mxu2 }
 0x7f1   :  { %v10426_v0 = vld [vmem:[#allocation2 + $0x414] sm:$0xf]  ;;  %v9192_v47 = vor.u32 %v10362_v54, %v9189_v38  ;;  %5512 = vmatpush.bf16.msrb.mxu1 %v9736_v61  ;;  %v6031_v55 = vadd.f32 %v6030_v52, %v14472_v24  ;;  %v5063_v14 = vadd.f32 %v5062_v56, %v5014_v13  ;;  %v5173_v40 = vadd.f32 %v5172_v28, %v14477_v34  ;;  %v16570_v52 = vld [vmem:[#allocation37_spill] sm:$0xff] }
 0x7f2   :  { %v9445_v46 = vld [vmem:[#allocation2 + $0x430] sm:$0xf0] }
 0x7f3   :  { %v10298_v7 = vld [vmem:[#allocation2 + $0x14] sm:$0xf]  ;;  %v9448_v17 = vor.u32 %v10426_v0, %v9445_v46  ;;  %5415 = vmatpush.bf16.msrb.mxu2 %v9192_v47  ;;  %v5112_v54 = vadd.f32 %v5111_v42, %v5063_v14  ;;  %v16573_v14 = vld [vmem:[#allocation32_spill] sm:$0xff] }
 0x7f4   :  { %v8933_v25 = vld [vmem:[#allocation2 + $0x30] sm:$0xf0] }
 0x7f5   :  { %v10490_v43 = vld [vmem:[#allocation2 + $0x614] sm:$0xf]  ;;  %v8936_v15 = vor.u32 %v10298_v7, %v8933_v25  ;;  %5464 = vmatpush.bf16.msrb.mxu3 %v9448_v17  ;;  %v5161_v38 = vadd.f32 %v5160_v63, %v5112_v54 }
 0x7f6   :  { %v9701_v23 = vld [vmem:[#allocation2 + $0x630] sm:$0xf0]  ;;  %5416 = vmatmul.bf16.vlgmr.msrb.gmra.mxu2 %v16457_v21  ;;  %v5319_v20 = vpop.f32.mrf.mxu1  ;;  %v5174_v58 = vpop.f32.mrf.mxu0 }
 0x7f7   :  { %v9704_v10 = vor.u32 %v10490_v43, %v9701_v23  ;;  %5366 = vmatpush.bf16.msrb.mxu0 %v8936_v15  ;;  %v6032_v37 = vadd.f32 %v6031_v55, %v5161_v38  ;;  %v5270_v51 = vpop.f32.mrf.mxu3  ;;  %v5175_v22 = vadd.f32 %v5174_v58, %v14477_v34  ;;  %v16571_v55 = vld [vmem:[#allocation38_spill] sm:$0xff] }
 0x7f8   :  { %5465 = vmatmul.bf16.vlgmr.msrb.gmra.mxu3 %v16458_v62  ;;  %v5221_v11 = vpop.f32.mrf.mxu2  ;;  %v16572_v56 = vld [vmem:[#allocation30_spill] sm:$0xff] }
 0x7f9   :  { %5513 = vmatpush.bf16.msrb.mxu1 %v9704_v10  ;;  %v6033_v36 = vrot.slane %v6032_v37, 4  ;;  %v5222_v0 = vadd.f32 %v5221_v11, %v5173_v40  ;;  %v16574_v40 = vld [vmem:[#allocation39_spill] sm:$0xff]  ;;  %v16577_v11 = vld [vmem:[#allocation58_spill] sm:$0xff] }
 0x7fa   :  { %5367 = vmatmul.bf16.vlgmr.msrb.gmra.mxu0 %v16456_v2 }
 0x7fb   :  { %v6034_v16 = vadd.f32 %v6033_v36, %v6032_v37  ;;  %v5271_v61 = vadd.f32 %v5270_v51, %v5222_v0  ;;  %v16578_v36 = vld [vmem:[#allocation84_spill] sm:$0xff] }
 0x7fc   :  { %5514 = vmatmul.bf16.vlgmr.msrb.gmra.mxu1 %v16459_v60 }
 0x7fd   :  { %v6035_v47 = vrot.slane %v6034_v16, 2  ;;  %v14484_v46 = vadd.f32 %v5319_v20, %v5271_v61 }
 0x7fe   :  { %v5321_v7 = vpop.f32.mrf.mxu1  ;;  %v5177_v19 = vpop.f32.mrf.mxu0 }
 0x7ff   :  { %v6036_v25 = vadd.f32 %v6035_v47, %v6034_v16  ;;  %v5272_v50 = vpop.f32.mrf.mxu3 }
 0x800   :  { %v5223_v49 = vpop.f32.mrf.mxu2 }
 0x801   :  { %v6037_v59 = vrot.slane %v6036_v25, 1  ;;  %v5224_v43 = vadd.f32 %v5223_v49, %v5175_v22 }
 0x803   :  { %v6038_v23 = vadd.f32 %v6037_v59, %v6036_v25  ;;  %v5273_v33 = vadd.f32 %v5272_v50, %v5224_v43 }
 0x805   :  { %v6126_v17 = vmul.f32 %v6038_v23, %v16428_v4  ;;  %v14489_v15 = vadd.f32 %v5321_v7, %v5273_v33  ;;  %v5178_v23 = vadd.f32 %v5177_v19, %v14477_v34 }
 0x806   :  { %5421 = vmatmul.bf16.gmra.mxu2 %v16517_v44  ;;  %v5324_v6 = vpop.f32.mrf.mxu1  ;;  %v5179_v28 = vpop.f32.mrf.mxu0  ;;  %v16612_v44 = vld [vmem:[#allocation56_spill] sm:$0xff] }
 0x807   :  { %v14493_v53 = vsub.f32 %v14038_v41, %v6126_v17  ;;  %v14496_v10 = vsub.f32 %v14042_v39, %v6126_v17  ;;  %v14499_v63 = vsub.f32 %v16570_v52, %v6126_v17  ;;  %v14502_v13 = vsub.f32 %v16571_v55, %v6126_v17  ;;  %v16575_v41 = vld [vmem:[#allocation43_spill] sm:$0xff]  ;;  %v16576_v39 = vld [vmem:[#allocation22_spill] sm:$0xff]  ;;  %v5275_v47 = vpop.f32.mrf.mxu3 }
 0x808   :  { %v14505_v42 = vsub.f32 %v16572_v56, %v6126_v17  ;;  %v14508_v54 = vsub.f32 %v16573_v14, %v6126_v17  ;;  %v14511_v20 = vsub.f32 %v16574_v40, %v6126_v17  ;;  %v14514_v37 = vsub.f32 %v16575_v41, %v6126_v17  ;;  %5470 = vmatmul.bf16.gmra.mxu3 %v16576_v39  ;;  %v5226_v58 = vpop.f32.mrf.mxu2  ;;  %v16580_v41 = vld [vmem:[#allocation31_spill] sm:$0xff] }
 0x809   :  { %v14518_v51 = vsub.f32 %v16577_v11, %v6126_v17  ;;  %v14521_v0 = vsub.f32 %v16578_v36, %v6126_v17  ;;  %v14524_v16 = vsub.f32 %v14262_v5, %v6126_v17  ;;  %v14527_v61 = vsub.f32 %v14458_v35, %v6126_v17  ;;  %v16579_v35 = vld [vmem:[#allocation29_spill] sm:$0xff]  ;;  %v9611_v39 = vld [vmem:[#allocation2 + $0x558] sm:$0xf] }
 0x80a   :  { %5372 = vmatmul.bf16.gmra.mxu0 %v12866_v32  ;;  %v14530_v7 = vsub.f32 %v14464_v48, %v6126_v17  ;;  %v14533_v25 = vsub.f32 %v14467_v27, %v6126_v17  ;;  %v14536_v22 = vsub.f32 %v14472_v24, %v6126_v17  ;;  %v14538_v49 = vsub.f32 %v5161_v38, %v6126_v17 }
 0x80b   :  { %v6262_v50 = vmul.f32 %v14493_v53, %v14493_v53  ;;  %v6270_v5 = vmul.f32 %v14496_v10, %v14496_v10  ;;  %v6278_v48 = vmul.f32 %v14499_v63, %v14499_v63  ;;  %v6286_v38 = vmul.f32 %v14502_v13, %v14502_v13 }
 0x80c   :  { %5519 = vmatmul.bf16.gmra.mxu1 %v16579_v35  ;;  %v6294_v52 = vmul.f32 %v14505_v42, %v14505_v42  ;;  %v6039_v56 = vadd.f32 %v14489_v15, %v14484_v46  ;;  %v5227_v14 = vadd.f32 %v5226_v58, %v5178_v23  ;;  %v5180_v40 = vadd.f32 %v5179_v28, %v14477_v34  ;;  %v9899_v35 = vld [vmem:[#allocation2 + $0x798] sm:$0xf] }
 0x80d   :  { %v6450_v43 = vadd.f32 %v6270_v5, %v6262_v50  ;;  %v6302_v19 = vmul.f32 %v14508_v54, %v14508_v54  ;;  %v16581_v50 = vld [vmem:[#allocation33_spill] sm:$0xff] }
 0x80e   :  { %v5326_v59 = vpop.f32.mrf.mxu1  ;;  %v5182_v27 = vpop.f32.mrf.mxu0  ;;  %v5276_v5 = vadd.f32 %v5275_v47, %v5227_v14  ;;  %v6326_v14 = vmul.f32 %v14518_v51, %v14518_v51 }
 0x80f   :  { %v6451_v33 = vadd.f32 %v6450_v43, %v6278_v48  ;;  %v5277_v17 = vpop.f32.mrf.mxu3  ;;  %v5183_v36 = vadd.f32 %v5182_v27, %v14477_v34 }
 0x810   :  { %v5228_v24 = vpop.f32.mrf.mxu2  ;;  %v14562_v23 = vadd.f32 %v5324_v6, %v5276_v5 }
 0x811   :  { %v6452_v55 = vadd.f32 %v6451_v33, %v6286_v38  ;;  %v5229_v48 = vadd.f32 %v5228_v24, %v5180_v40  ;;  %v6310_v38 = vmul.f32 %v14511_v20, %v14511_v20 }
 0x812   :  { %v6040_v47 = vadd.f32 %v6039_v56, %v14562_v23 }
 0x813   :  { %v6453_v11 = vadd.f32 %v6452_v55, %v6294_v52  ;;  %v5278_v28 = vadd.f32 %v5277_v17, %v5229_v48  ;;  %v6318_v52 = vmul.f32 %v14514_v37, %v14514_v37 }
 0x815   :  { %v6454_v33 = vadd.f32 %v6453_v11, %v6302_v19  ;;  %v14568_v24 = vadd.f32 %v5326_v59, %v5278_v28  ;;  %v16584_v19 = vld [vmem:[#allocation44_spill] sm:$0xff]  ;;  %v6334_v11 = vmul.f32 %v14521_v0, %v14521_v0  ;;  %v6342_v59 = vmul.f32 %v14524_v16, %v14524_v16 }
 0x816   :  { %5426 = vmatmul.bf16.gmra.mxu2 %v16581_v50  ;;  %v5329_v43 = vpop.f32.mrf.mxu1  ;;  %v5184_v58 = vpop.f32.mrf.mxu0  ;;  %v6350_v28 = vmul.f32 %v14527_v61, %v14527_v61 }
 0x817   :  { %v6455_v27 = vadd.f32 %v6454_v33, %v6310_v38  ;;  %v5280_v1 = vpop.f32.mrf.mxu3  ;;  %16583 = vst [vmem:[#allocation37_spill] sm:$0xff] %v14568_v24  ;;  %v6041_v17 = vadd.f32 %v6040_v47, %v14568_v24  ;;  %v5185_v38 = vadd.f32 %v5184_v58, %v14477_v34 }
 0x818   :  { %5475 = vmatmul.bf16.gmra.mxu3 %v16582_v9  ;;  %v5231_v45 = vpop.f32.mrf.mxu2 }
 0x819   :  { %v5232_v55 = vadd.f32 %v5231_v45, %v5183_v36  ;;  %v6456_v40 = vadd.f32 %v6455_v27, %v6318_v52 }
 0x81a   :  { %5377 = vmatmul.bf16.gmra.mxu0 %v16580_v41  ;;  %v16601_v41 = vld [vmem:[#allocation28_spill] sm:$0xff] }
 0x81b   :  { %v5281_v6 = vadd.f32 %v5280_v1, %v5232_v55  ;;  %v6457_v5 = vadd.f32 %v6456_v40, %v6326_v14  ;;  %v16586_v40 = vld [vmem:[#allocation34_spill] sm:$0xff] }
 0x81c   :  { %5524 = vmatmul.bf16.gmra.mxu1 %v16584_v19 }
 0x81d   :  { %v14576_v48 = vadd.f32 %v5329_v43, %v5281_v6  ;;  %v6458_v56 = vadd.f32 %v6457_v5, %v6334_v11  ;;  %v6358_v43 = vmul.f32 %v14530_v7, %v14530_v7  ;;  %v6366_v6 = vmul.f32 %v14533_v25, %v14533_v25  ;;  %v16588_v5 = vld [vmem:[#allocation47_spill] sm:$0xff] }
 0x81e   :  { %v5331_v45 = vpop.f32.mrf.mxu1  ;;  %v5187_v1 = vpop.f32.mrf.mxu0 }
 0x81f   :  { %16585 = vst [vmem:[#allocation38_spill] sm:$0xff] %v14576_v48  ;;  %v6042_v36 = vadd.f32 %v6041_v17, %v14576_v48  ;;  %v6459_v52 = vadd.f32 %v6458_v56, %v6342_v59  ;;  %v5282_v55 = vpop.f32.mrf.mxu3  ;;  %v5188_v11 = vadd.f32 %v5187_v1, %v14477_v34  ;;  %v6374_v56 = vmul.f32 %v14536_v22, %v14536_v22  ;;  %v10327_v48 = vld [vmem:[#allocation2 + $0xf4] sm:$0xf0] }
 0x820   :  { %v5233_v33 = vpop.f32.mrf.mxu2 }
 0x821   :  { %v5234_v27 = vadd.f32 %v5233_v33, %v5185_v38  ;;  %v6460_v47 = vadd.f32 %v6459_v52, %v6350_v28  ;;  %v16589_v52 = vld [vmem:[#allocation48_spill] sm:$0xff] }
 0x823   :  { %v5283_v14 = vadd.f32 %v5282_v55, %v5234_v27  ;;  %v6461_v17 = vadd.f32 %v6460_v47, %v6358_v43  ;;  %v6382_v55 = vmul.f32 %v14538_v49, %v14538_v49 }
 0x825   :  { %v14589_v58 = vadd.f32 %v5331_v45, %v5283_v14  ;;  %v6462_v38 = vadd.f32 %v6461_v17, %v6366_v6 }
 0x826   :  { %5431 = vmatmul.bf16.gmra.mxu2 %v16588_v5  ;;  %v5334_v59 = vpop.f32.mrf.mxu1  ;;  %v5189_v28 = vpop.f32.mrf.mxu0 }
 0x827   :  { %16587 = vst [vmem:[#allocation30_spill] sm:$0xff] %v14589_v58  ;;  %v6043_v33 = vadd.f32 %v6042_v36, %v14589_v58  ;;  %v6463_v45 = vadd.f32 %v6462_v38, %v6374_v56  ;;  %v5285_v47 = vpop.f32.mrf.mxu3  ;;  %v5190_v30 = vadd.f32 %v5189_v28, %v14477_v34  ;;  %v9035_v58 = vld [vmem:[#allocation2 + $0xd8] sm:$0xf] }
 0x828   :  { %5480 = vmatmul.bf16.gmra.mxu3 %v16589_v52  ;;  %v5236_v27 = vpop.f32.mrf.mxu2 }
 0x829   :  { %v5237_v43 = vadd.f32 %v5236_v27, %v5188_v11  ;;  %v6464_v1 = vadd.f32 %v6463_v45, %v6382_v55  ;;  %v16592_v27 = vld [vmem:[#allocation50_spill] sm:$0xff] }
 0x82a   :  { %5382 = vmatmul.bf16.gmra.mxu0 %v16586_v40 }
 0x82b   :  { %v5286_v14 = vadd.f32 %v5285_v47, %v5237_v43  ;;  %v6465_v3 = vrot.slane %v6464_v1, 4  ;;  %v16594_v43 = vld [vmem:[#allocation26_spill] sm:$0xff] }
 0x82c   :  { %5529 = vmatmul.bf16.gmra.mxu1 %v16590_v29 }
 0x82d   :  { %v14600_v57 = vadd.f32 %v5334_v59, %v5286_v14  ;;  %v6466_v17 = vadd.f32 %v6465_v3, %v6464_v1  ;;  %v16595_v1 = vld [vmem:[#allocation51_spill] sm:$0xff] }
 0x82e   :  { %v5336_v6 = vpop.f32.mrf.mxu1  ;;  %v5192_v52 = vpop.f32.mrf.mxu0 }
 0x82f   :  { %16591 = vst [vmem:[#allocation32_spill] sm:$0xff] %v14600_v57  ;;  %v6044_v36 = vadd.f32 %v6043_v33, %v14600_v57  ;;  %v6467_v40 = vrot.slane %v6466_v17, 2  ;;  %v5287_v56 = vpop.f32.mrf.mxu3  ;;  %v5193_v59 = vadd.f32 %v5192_v52, %v14477_v34  ;;  %v10399_v57 = vld [vmem:[#allocation2 + $0x334] sm:$0xf0] }
 0x830   :  { %v5238_v5 = vpop.f32.mrf.mxu2 }
 0x831   :  { %v5239_v19 = vadd.f32 %v5238_v5, %v5190_v30  ;;  %v6468_v11 = vadd.f32 %v6467_v40, %v6466_v17  ;;  %v16596_v17 = vld [vmem:[#allocation52_spill] sm:$0xff] }
 0x833   :  { %v5288_v38 = vadd.f32 %v5287_v56, %v5239_v19  ;;  %v6469_v55 = vrot.slane %v6468_v11, 1  ;;  %v16598_v56 = vld [vmem:[#allocation57_spill] sm:$0xff] }
 0x835   :  { %v14605_v45 = vadd.f32 %v5336_v6, %v5288_v38  ;;  %v6470_v33 = vadd.f32 %v6469_v55, %v6468_v11  ;;  %v14619_v11 = vperm.slane %v16598_v56, 3 }
 0x836   :  { %5436 = vmatmul.bf16.gmra.mxu2 %v16594_v43  ;;  %v5339_v3 = vpop.f32.mrf.mxu1  ;;  %v5194_v47 = vpop.f32.mrf.mxu0  ;;  %v9163_v43 = vld [vmem:[#allocation2 + $0x1d8] sm:$0xf] }
 0x837   :  { %16593 = vst [vmem:[#allocation39_spill] sm:$0xff] %v14605_v45  ;;  %v6045_v28 = vadd.f32 %v6044_v36, %v14605_v45  ;;  %v6558_v40 = vmul.f32 %v6470_v33, %v16428_v4  ;;  %v5290_v5 = vpop.f32.mrf.mxu3  ;;  %v5195_v55 = vadd.f32 %v5194_v47, %v14477_v34  ;;  %v9419_v47 = vld [vmem:[#allocation2 + $0x3d8] sm:$0xf] }
 0x838   :  { %5485 = vmatmul.bf16.gmra.mxu3 %v16595_v1  ;;  %v5241_v30 = vpop.f32.mrf.mxu2  ;;  %v10487_v1 = vld [vmem:[#allocation2 + $0x5f4] sm:$0xf0] }
 0x839   :  { %v5242_v19 = vadd.f32 %v5241_v30, %v5193_v59  ;;  %v14612_v14 = vadd.f32 0.8, %v6558_v40 }
 0x83a   :  { %5387 = vmatmul.bf16.gmra.mxu0 %v16592_v27  ;;  %v16599_v27 = vld [vmem:[#allocation27_spill] sm:$0xff] }
 0x83b   :  { %v5291_v6 = vadd.f32 %v5290_v5, %v5242_v19  ;;  %10662 = vrsqrt.f32 %v14612_v14  ;;  %v14625_v19 = vmul.f32 %v14619_v11, %v14493_v53  ;;  %v14643_v53 = vmul.f32 %v14619_v11, %v14505_v42 }
 0x83c   :  { %5534 = vmatmul.bf16.gmra.mxu1 %v16596_v17  ;;  %vm6752_vm6 = vweird.f32 %v14612_v14 }
 0x83d   :  { %v14616_v52 = vadd.f32 %v5339_v3, %v5291_v6  ;;  %v14631_v3 = vmul.f32 %v14619_v11, %v14496_v10  ;;  %v14635_v6 = vmul.f32 %v14619_v11, %v14499_v63  ;;  %v14647_v10 = vmul.f32 %v14619_v11, %v14508_v54 }
 0x83e   :  { %v5341_v36 = vpop.f32.mrf.mxu1  ;;  %v5197_v33 = vpop.f32.mrf.mxu0  ;;  %v14658_v54 = vmul.f32 %v14619_v11, %v14511_v20 }
 0x83f   :  { %16597 = vst [vmem:[#allocation43_spill] sm:$0xff] %v14616_v52  ;;  %v6046_v38 = vadd.f32 %v6045_v28, %v14616_v52  ;;  %v5292_v40 = vpop.f32.mrf.mxu3  ;;  %v14639_v28 = vmul.f32 %v14619_v11, %v14502_v13  ;;  %v10359_v13 = vld [vmem:[#allocation2 + $0x1f4] sm:$0xf0]  ;;  %v5198_v42 = vadd.f32 %v5197_v33, %v14477_v34 }
 0x840   :  { %v5243_v59 = vpop.f32.mrf.mxu2  ;;  %v9164_v9 = vor.u32 %v10359_v13, %v9163_v43  ;;  %v10479_v33 = vld [vmem:[#allocation2 + $0x5b4] sm:$0xf0] }
 0x841   :  { %v5244_v30 = vadd.f32 %v5243_v59, %v5195_v55  ;;  %v14627_v5 = vpop.eup %10662  ;;  %v10423_v55 = vld [vmem:[#allocation2 + $0x3f4] sm:$0xf0] }
 0x842   :  { %v9675_v59 = vld [vmem:[#allocation2 + $0x5d8] sm:$0xf]  ;;  %v6747_v63 = vmul.f32 %v14627_v5, %v14612_v14  ;;  %v9420_v56 = vor.u32 %v10423_v55, %v9419_v47  ;;  %v14662_v47 = vmul.f32 %v14619_v11, %v14514_v37  ;;  %vm6753_vm5 = vweird.f32 %v14627_v5  ;;  %5555 = vmatpush.bf16.msra.mxu0 %v9164_v9  ;;  %v16602_v9 = vld [vmem:[#allocation53_spill] sm:$0xff] }
 0x843   :  { %v5293_v17 = vadd.f32 %v5292_v40, %v5244_v30  ;;  %v9676_v29 = vor.u32 %v10487_v1, %v9675_v59  ;;  %v9931_v30 = vld [vmem:[#allocation2 + $0x7d8] sm:$0xf]  ;;  %vm14685_vm8 = vmor %vm6752_vm6, %vm6753_vm5 }
 0x844   :  { %v10551_v40 = vld [vmem:[#allocation2 + $0x7f4] sm:$0xf0]  ;;  %v6748_v55 = vmul.f32 %v14627_v5, %v6747_v63  ;;  %5604 = vmatpush.bf16.msra.mxu2 %v9420_v56 }
 0x845   :  { %v14652_v50 = vadd.f32 %v5341_v36, %v5293_v17  ;;  %v9932_v43 = vor.u32 %v10551_v40, %v9931_v30  ;;  %v9387_v1 = vld [vmem:[#allocation2 + $0x398] sm:$0xf]  ;;  %v14667_v36 = vmul.f32 %v14619_v11, %v14518_v51  ;;  %5653 = vmatpush.bf16.msra.mxu3 %v9676_v29  ;;  %v14675_v30 = vmul.f32 %v14619_v11, %v14521_v0 }
 0x846   :  { %5441 = vmatmul.bf16.gmra.mxu2 %v16601_v41  ;;  %v10415_v59 = vld [vmem:[#allocation2 + $0x3b4] sm:$0xf0]  ;;  %v5344_v56 = vpop.f32.mrf.mxu1  ;;  %v5199_v63 = vpop.f32.mrf.mxu0  ;;  %v6749_v40 = vmul.f32 0.5, %v6748_v55  ;;  %v6671_v55 = vmul.f32 %v14619_v11, %v14527_v61 }
 0x847   :  { %16600 = vst [vmem:[#allocation58_spill] sm:$0xff] %v14652_v50  ;;  %v9643_v17 = vld [vmem:[#allocation2 + $0x598] sm:$0xf]  ;;  %v9388_v20 = vor.u32 %v10415_v59, %v9387_v1  ;;  %v14671_v41 = vadd.f32 %v6046_v38, %v14652_v50  ;;  %5702 = vmatpush.bf16.msra.mxu1 %v9932_v43  ;;  %v6663_v59 = vmul.f32 %v14619_v11, %v14524_v16  ;;  %v5295_v45 = vpop.f32.mrf.mxu3 }
 0x848   :  { %v9131_v13 = vld [vmem:[#allocation2 + $0x198] sm:$0xf]  ;;  %v9644_v51 = vor.u32 %v10479_v33, %v9643_v17  ;;  %5490 = vmatmul.bf16.gmra.mxu3 %v16602_v9  ;;  %v5246_v1 = vpop.f32.mrf.mxu2  ;;  %v6750_v43 = vsub.f32 1.5, %v6749_v40  ;;  %v16605_v33 = vld [vmem:[#allocation41_spill] sm:$0xff]  ;;  %v6687_v9 = vmul.f32 %v14619_v11, %v14533_v25 }
 0x849   :  { %v10351_v37 = vld [vmem:[#allocation2 + $0x1b4] sm:$0xf0]  ;;  %v5247_v0 = vadd.f32 %v5246_v1, %v5198_v42  ;;  %v14690_v16 = vperm.slane %v16605_v33, 3  ;;  %5605 = vmatpush.bf16.msra.mxu2 %v9388_v20  ;;  %v6679_v42 = vmul.f32 %v14619_v11, %v14530_v7  ;;  %v6695_v33 = vmul.f32 %v14619_v11, %v14536_v22 }
 0x84a   :  { %5392 = vmatmul.bf16.gmra.mxu0 %v16599_v27  ;;  %v9132_v27 = vor.u32 %v10351_v37, %v9131_v13  ;;  %v10543_v29 = vld [vmem:[#allocation2 + $0x7b4] sm:$0xf0]  ;;  %5654 = vmatpush.bf16.msra.mxu3 %v9644_v51  ;;  %v14705_v22 = vadd.f32 %v5199_v63, %v14477_v34 }
 0x84b   :  { %v9900_v38 = vor.u32 %v10543_v29, %v9899_v35  ;;  %v9355_v50 = vld [vmem:[#allocation2 + $0x358] sm:$0xf]  ;;  %v5296_v1 = vadd.f32 %v5295_v45, %v5247_v0  ;;  %v16606_v0 = vld [vmem:[#allocation54_spill] sm:$0xff] }
 0x84c   :  { %v10407_v52 = vld [vmem:[#allocation2 + $0x374] sm:$0xf0]  ;;  %5556 = vmatpush.bf16.msra.mxu0 %v9132_v27  ;;  %5539 = vmatmul.bf16.gmra.mxu1 %v16606_v0 }
 0x84d   :  { %v9356_v35 = vor.u32 %v10407_v52, %v9355_v50  ;;  %v10471_v14 = vld [vmem:[#allocation2 + $0x574] sm:$0xf0]  ;;  %v6751_v50 = vmul.f32 %v14627_v5, %v6750_v43  ;;  %5703 = vmatpush.bf16.msra.mxu1 %v9900_v38  ;;  %v14702_v25 = vadd.f32 %v5344_v56, %v5296_v1 }
 0x84e   :  { %v9099_v13 = vld [vmem:[#allocation2 + $0x158] sm:$0xf]  ;;  %v9612_v61 = vor.u32 %v10471_v14, %v9611_v39  ;;  %v6703_v39 = vmul.f32 %v14619_v11, %v14538_v49  ;;  %v14716_v63 = vpop.f32.mrf.mxu0 }
 0x84f   :  { %v10343_v37 = vld [vmem:[#allocation2 + $0x174] sm:$0xf0]  ;;  %v6755_v38 = vsel %vm14685_vm8, %v14627_v5, %v6751_v50  ;;  %5606 = vmatpush.bf16.msra.mxu2 %v9356_v35  ;;  %v14726_v1 = vpop.f32.mrf.mxu3 }
 0x850   :  { %v9867_v40 = vld [vmem:[#allocation2 + $0x758] sm:$0xf]  ;;  %v9100_v52 = vor.u32 %v10343_v37, %v9099_v13  ;;  %v6799_v49 = vmul.f32 %v6755_v38, %v14625_v19  ;;  %v6807_v11 = vmul.f32 %v6755_v38, %v14631_v3  ;;  %v6823_v56 = vmul.f32 %v6755_v38, %v14639_v28  ;;  %5655 = vmatpush.bf16.msra.mxu3 %v9612_v61  ;;  %v14722_v19 = vpop.f32.mrf.mxu2 }
 0x851   :  { %v10535_v29 = vld [vmem:[#allocation2 + $0x774] sm:$0xf0]  ;;  %v6831_v17 = vmul.f32 %v6755_v38, %v14643_v53  ;;  %v6839_v5 = vmul.f32 %v6755_v38, %v14647_v10  ;;  %v6855_v35 = vmul.f32 %v6755_v38, %v14662_v47  ;;  %v6863_v3 = vmul.f32 %v6755_v38, %v14667_v36 }
 0x852   :  { %v9323_v20 = vld [vmem:[#allocation2 + $0x318] sm:$0xf]  ;;  %v9868_v27 = vor.u32 %v10535_v29, %v9867_v40  ;;  %v6815_v40 = vmul.f32 %v6755_v38, %v14635_v6  ;;  %v14714_v29 = vpop.f32.mrf.mxu1  ;;  %5557 = vmatpush.bf16.msra.mxu0 %v9100_v52  ;;  %v6871_v6 = vmul.f32 %v6755_v38, %v14675_v30  ;;  %v6879_v28 = vmul.f32 %v6755_v38, %v6663_v59 }
 0x853   :  { %v9579_v7 = vld [vmem:[#allocation2 + $0x518] sm:$0xf]  ;;  %v9324_v43 = vor.u32 %v10399_v57, %v9323_v20  ;;  %v6847_v57 = vmul.f32 %v6755_v38, %v14658_v54  ;;  %v6887_v61 = vmul.f32 %v6755_v38, %v6671_v55  ;;  %v6895_v50 = vmul.f32 %v6755_v38, %v6679_v42 }
 0x854   :  { %v10463_v51 = vld [vmem:[#allocation2 + $0x534] sm:$0xf0]  ;;  %5704 = vmatpush.bf16.msra.mxu1 %v9868_v27  ;;  %v6903_v53 = vmul.f32 %v6755_v38, %v6687_v9  ;;  %v6911_v20 = vmul.f32 %v6755_v38, %v6695_v33  ;;  %v6919_v10 = vmul.f32 %v6755_v38, %v6703_v39  ;;  %v6944_v54 = vadd.f32 %v14690_v16, %v6799_v49 }
 0x855   :  { %v9067_v14 = vld [vmem:[#allocation2 + $0x118] sm:$0xf]  ;;  %v9580_v13 = vor.u32 %v10463_v51, %v9579_v7  ;;  %5607 = vmatpush.bf16.msra.mxu2 %v9324_v43  ;;  %v6952_v47 = vadd.f32 %v14690_v16, %v6807_v11  ;;  %v14731_v52 = vadd.f32 %v14690_v16, %v6815_v40  ;;  %v14734_v36 = vadd.f32 %v14690_v16, %v6823_v56 }
 0x856   :  { %v10335_v45 = vld [vmem:[#allocation2 + $0x134] sm:$0xf0]  ;;  %v14737_v30 = vadd.f32 %v14690_v16, %v6831_v17  ;;  %v14740_v59 = vadd.f32 %v14690_v16, %v6839_v5  ;;  %v14743_v9 = vadd.f32 %v14690_v16, %v6847_v57  ;;  %v14746_v55 = vadd.f32 %v14690_v16, %v6855_v35  ;;  %v14776_v49 = vpop.f32.mrf.mxu0 }
 0x857   :  { %v9068_v37 = vor.u32 %v10335_v45, %v9067_v14  ;;  %5656 = vmatpush.bf16.msra.mxu3 %v9580_v13  ;;  %v14749_v33 = vadd.f32 %v14690_v16, %v6863_v3  ;;  %v14752_v42 = vadd.f32 %v14690_v16, %v6871_v6  ;;  %v14755_v7 = vadd.f32 %v14690_v16, %v6879_v28  ;;  %v16607_v27 = vld [vmem:[#allocation35_spill] sm:$0xff]  ;;  %v16608_v13 = vld [vmem:[#allocation36_spill] sm:$0xff]  ;;  %v14791_v5 = vpop.f32.mrf.mxu3 }
 0x858   :  { %v14758_v39 = vadd.f32 %v14690_v16, %v6887_v61  ;;  %v14762_v51 = vadd.f32 %v14690_v16, %v6895_v50  ;;  %v14765_v14 = vadd.f32 %v14690_v16, %v6903_v53  ;;  %v14768_v45 = vadd.f32 %v14690_v16, %v6911_v20  ;;  %v9835_v43 = vld [vmem:[#allocation2 + $0x718] sm:$0xf]  ;;  %5446 = vmatmul.bf16.gmra.mxu2 %v16608_v13  ;;  %v14785_v56 = vpop.f32.mrf.mxu2 }
 0x859   :  { %5558 = vmatpush.bf16.msra.mxu0 %v9068_v37  ;;  %v14771_v38 = vadd.f32 %v14690_v16, %v6919_v10  ;;  %vm7072_vm9 = vcmp.gt.f32.partialorder %v6944_v54, 0.0  ;;  %vm7080_vm7 = vcmp.gt.f32.partialorder %v6952_v47, 0.0  ;;  %vm7088_vm10 = vcmp.gt.f32.partialorder %v14731_v52, 0.0  ;;  %v10527_v37 = vld [vmem:[#allocation2 + $0x734] sm:$0xf0] }
 0x85a   :  { %5397 = vmatmul.bf16.gmra.mxu0 %v16607_v27  ;;  %vm7096_vm11 = vcmp.gt.f32.partialorder %v14734_v36, 0.0  ;;  %vm7104_vm12 = vcmp.gt.f32.partialorder %v14737_v30, 0.0  ;;  %vm7112_vm13 = vcmp.gt.f32.partialorder %v14740_v59, 0.0  ;;  %vm7120_vm14 = vcmp.gt.f32.partialorder %v14743_v9, 0.0  ;;  %v9291_v16 = vld [vmem:[#allocation2 + $0x2d8] sm:$0xf]  ;;  %v14782_v11 = vpop.f32.mrf.mxu1 }
 0x85b   :  { %vm7128_vm15 = vcmp.gt.f32.partialorder %v14746_v55, 0.0  ;;  %v16609_v40 = vld [vmem:[#allocation55_spill] sm:$0xff]  ;;  %vm7136_vm0 = vcmp.gt.f32.partialorder %v14749_v33, 0.0  ;;  %vm7144_vm1 = vcmp.gt.f32.partialorder %v14752_v42, 0.0  ;;  %vm7152_vm2 = vcmp.gt.f32.partialorder %v14755_v7, 0.0 }
 0x85c   :  { %5495 = vmatmul.bf16.gmra.mxu3 %v16609_v40  ;;  %vm7160_vm3 = vcmp.gt.f32.partialorder %v14758_v39, 0.0  ;;  %v10391_v17 = vld [vmem:[#allocation2 + $0x2f4] sm:$0xf0]  ;;  %vm7168_vm4 = vcmp.gt.f32.partialorder %v14762_v51, 0.0  ;;  %vm7176_vm5 = vcmp.gt.f32.partialorder %v14765_v14, 0.0  ;;  %vm7184_vm6 = vcmp.gt.f32.partialorder %v14768_v45, 0.0  ;;  %5544 = vmatmul.bf16.gmra.mxu1 %v16612_v44 }
 0x85d   :  { %vm7192_vm8 = vcmp.gt.f32.partialorder %v14771_v38, 0.0  ;;  %v7200_v57 = vmul.f32 0.2, %v6944_v54  ;;  %v7208_v35 = vmul.f32 0.2, %v6952_v47  ;;  %v9836_v6 = vor.u32 %v10527_v37, %v9835_v43 }
 0x85e   :  { %v7216_v3 = vmul.f32 0.2, %v14731_v52  ;;  %v7224_v28 = vmul.f32 0.2, %v14734_v36  ;;  %v7232_v61 = vmul.f32 0.2, %v14737_v30  ;;  %v9292_v53 = vor.u32 %v10391_v17, %v9291_v16 }
 0x85f   :  { %v7240_v50 = vmul.f32 0.2, %v14740_v59  ;;  %v7248_v20 = vmul.f32 0.2, %v14743_v9  ;;  %v7256_v10 = vmul.f32 0.2, %v14746_v55  ;;  %v14805_v13 = vsel %vm7072_vm9, %v6944_v54, %v7200_v57  ;;  %5705 = vmatpush.bf16.msra.mxu1 %v9836_v6 }
 0x860   :  { %v7264_v40 = vmul.f32 0.2, %v14749_v33  ;;  %16610 = vst [vmem:[#allocation84_spill] sm:$0xff] %v14805_v13  ;;  %v7272_v27 = vmul.f32 0.2, %v14752_v42  ;;  %v14811_v0 = vsel %vm7080_vm7, %v6952_v47, %v7208_v35  ;;  %5608 = vmatpush.bf16.msra.mxu2 %v9292_v53  ;;  %v14820_v13 = vsel %vm7088_vm10, %v14731_v52, %v7216_v3  ;;  %v5253_v24 = vpop.f32.mrf.mxu2 }
 0x861   :  { %v7280_v43 = vmul.f32 0.2, %v14755_v7  ;;  %v7288_v37 = vmul.f32 0.2, %v14758_v39  ;;  %16611 = vst [vmem:[#allocation101_spill] sm:$0xff] %v14811_v0  ;;  %v14826_v53 = vsel %vm7096_vm11, %v14734_v36, %v7224_v28  ;;  %v14831_v0 = vsel %vm7104_vm12, %v14737_v30, %v7232_v61 }
 0x862   :  { %v9547_v16 = vld [vmem:[#allocation2 + $0x4d8] sm:$0xf]  ;;  %v7296_v54 = vmul.f32 0.2, %v14762_v51  ;;  %v7304_v57 = vmul.f32 0.2, %v14765_v14  ;;  %v14836_v44 = vsel %vm7112_vm13, %v14740_v59, %v7240_v50  ;;  %v14843_v36 = vsel %vm7120_vm14, %v14743_v9, %v7248_v20  ;;  %v14860_v9 = vpop.f32.mrf.mxu3  ;;  %v5207_v20 = vpop.f32.mrf.mxu0 }
 0x863   :  { %v10455_v17 = vld [vmem:[#allocation2 + $0x4f4] sm:$0xf0]  ;;  %v7312_v6 = vmul.f32 0.2, %v14768_v45  ;;  %16613 = vst [vmem:[#allocation102_spill] sm:$0xff] %v14820_v13  ;;  %v14838_v13 = vpop.f32.mrf.mxu1  ;;  %v14848_v30 = vsel %vm7128_vm15, %v14746_v55, %v7256_v10  ;;  %v14853_v59 = vsel %vm7136_vm0, %v14749_v33, %v7264_v40  ;;  %v14858_v28 = vsel %vm7144_vm1, %v14752_v42, %v7272_v27 }
 0x864   :  { %v9803_v47 = vld [vmem:[#allocation2 + $0x6d8] sm:$0xf]  ;;  %v7320_v35 = vmul.f32 0.2, %v14771_v38  ;;  %16614 = vst [vmem:[#allocation103_spill] sm:$0xff] %v14826_v53  ;;  %v14865_v55 = vsel %vm7152_vm2, %v14755_v7, %v7280_v43  ;;  %v14870_v33 = vsel %vm7160_vm3, %v14758_v39, %v7288_v37  ;;  %v14875_v42 = vsel %vm7168_vm4, %v14762_v51, %v7296_v54 }
 0x865   :  { %16615 = vst [vmem:[#allocation104_spill] sm:$0xff] %v14831_v0  ;;  %v10519_v52 = vld [vmem:[#allocation2 + $0x6f4] sm:$0xf0]  ;;  %v14880_v27 = vsel %vm7176_vm5, %v14765_v14, %v7304_v57  ;;  %v14885_v7 = vsel %vm7184_vm6, %v14768_v45, %v7312_v6  ;;  %v9548_v51 = vor.u32 %v10455_v17, %v9547_v16  ;;  %v9036_v43 = vor.u32 %v10327_v48, %v9035_v58 }
 0x866   :  { %16616 = vst [vmem:[#allocation105_spill] sm:$0xff] %v14836_v44  ;;  %v9259_v3 = vld [vmem:[#allocation2 + $0x298] sm:$0xf]  ;;  %v14890_v39 = vsel %vm7192_vm8, %v14771_v38, %v7320_v35  ;;  %v9804_v14 = vor.u32 %v10519_v52, %v9803_v47  ;;  %v5249_v38 = vadd.f32 %v14722_v19, %v14705_v22  ;;  %v5203_v58 = vadd.f32 %v14716_v63, %v14477_v34 }
 0x867   :  { %16617 = vst [vmem:[#allocation106_spill] sm:$0xff] %v14843_v36  ;;  %v10383_v61 = vld [vmem:[#allocation2 + $0x2b4] sm:$0xf0]  ;;  %5657 = vmatpush.bf16.msra.mxu3 %v9548_v51  ;;  %5559 = vmatpush.bf16.msra.mxu0 %v9036_v43 }
 0x868   :  { %16618 = vst [vmem:[#allocation107_spill] sm:$0xff] %v14848_v30  ;;  %v9515_v50 = vld [vmem:[#allocation2 + $0x498] sm:$0xf]  ;;  %v9260_v57 = vor.u32 %v10383_v61, %v9259_v3  ;;  %5706 = vmatpush.bf16.msra.mxu1 %v9804_v14  ;;  %v5298_v52 = vadd.f32 %v14726_v1, %v5249_v38  ;;  %v5252_v61 = vadd.f32 %v14785_v56, %v5203_v58  ;;  %v5256_v63 = vpop.f32.mrf.mxu2 }
 0x869   :  { %16619 = vst [vmem:[#allocation108_spill] sm:$0xff] %v14853_v59  ;;  %v10447_v44 = vld [vmem:[#allocation2 + $0x4b4] sm:$0xf0]  ;;  %5451 = vmatmul.bf16.gmra.mxu2 %v12990_v8 }
 0x86a   :  { %16620 = vst [vmem:[#allocation109_spill] sm:$0xff] %v14858_v28  ;;  %v9003_v40 = vld [vmem:[#allocation2 + $0x98] sm:$0xf]  ;;  %v9516_v45 = vor.u32 %v10447_v44, %v9515_v50  ;;  %5609 = vmatpush.bf16.msra.mxu2 %v9260_v57  ;;  %v5205_v44 = vadd.f32 %v14776_v49, %v14477_v34  ;;  %5402 = vmatmul.bf16.gmra.mxu0 %v12986_v12 }
 0x86b   :  { %16621 = vst [vmem:[#allocation110_spill] sm:$0xff] %v14865_v55  ;;  %v10319_v10 = vld [vmem:[#allocation2 + $0xb4] sm:$0xf0]  ;;  %v14907_v1 = vadd.f32 %v14714_v29, %v5298_v52  ;;  %v5301_v56 = vadd.f32 %v14791_v5, %v5252_v61  ;;  %v5305_v29 = vpop.f32.mrf.mxu3 }
 0x86c   :  { %16622 = vst [vmem:[#allocation111_spill] sm:$0xff] %v14870_v33  ;;  %v9771_v28 = vld [vmem:[#allocation2 + $0x698] sm:$0xf]  ;;  %v9004_v6 = vor.u32 %v10319_v10, %v9003_v40  ;;  %5500 = vmatmul.bf16.gmra.mxu3 %v12994_v31  ;;  %v5209_v40 = vpop.f32.mrf.mxu0  ;;  %5549 = vmatmul.bf16.gmra.mxu1 %v16454_v26 }
 0x86d   :  { %16623 = vst [vmem:[#allocation112_spill] sm:$0xff] %v14875_v42  ;;  %v10511_v37 = vld [vmem:[#allocation2 + $0x6b4] sm:$0xf0]  ;;  %5658 = vmatpush.bf16.msra.mxu3 %v9516_v45 }
 0x86e   :  { %16624 = vst [vmem:[#allocation113_spill] sm:$0xff] %v14880_v27  ;;  %v9227_v54 = vld [vmem:[#allocation2 + $0x258] sm:$0xf]  ;;  %v6048_v27 = vadd.f32 %v14671_v41, %v14702_v25  ;;  %v9772_v48 = vor.u32 %v10511_v37, %v9771_v28  ;;  %v5208_v28 = vadd.f32 %v5207_v20, %v14477_v34  ;;  %5560 = vmatpush.bf16.msra.mxu0 %v9004_v6 }
 0x86f   :  { %16625 = vst [vmem:[#allocation114_spill] sm:$0xff] %v14885_v7  ;;  %v10375_v42 = vld [vmem:[#allocation2 + $0x274] sm:$0xf0] }
 0x870   :  { %16626 = vst [vmem:[#allocation115_spill] sm:$0xff] %v14890_v39  ;;  %v9483_v33 = vld [vmem:[#allocation2 + $0x458] sm:$0xf]  ;;  %v9228_v17 = vor.u32 %v10375_v42, %v9227_v54  ;;  %5707 = vmatpush.bf16.msra.mxu1 %v9772_v48  ;;  %v5257_v51 = vadd.f32 %v5256_v63, %v5208_v28  ;;  %v6049_v54 = vadd.f32 %v6048_v27, %v14907_v1  ;;  %v5258_v58 = vpop.f32.mrf.mxu2 }
 0x871   :  { %v10439_v55 = vld [vmem:[#allocation2 + $0x474] sm:$0xf0] }
 0x872   :  { %v8971_v35 = vld [vmem:[#allocation2 + $0x58] sm:$0xf]  ;;  %v9484_v3 = vor.u32 %v10439_v55, %v9483_v33  ;;  %v5254_v55 = vadd.f32 %v5253_v24, %v5205_v44  ;;  %v5354_v33 = vpop.f32.mrf.mxu1  ;;  %5610 = vmatpush.bf16.msra.mxu2 %v9228_v17  ;;  %v14913_v24 = vadd.f32 %v14782_v11, %v5301_v56  ;;  %v5306_v6 = vadd.f32 %v5305_v29, %v5257_v51 }
 0x873   :  { %v10311_v16 = vld [vmem:[#allocation2 + $0x74] sm:$0xf0]  ;;  %v5210_v11 = vadd.f32 %v5209_v40, %v14477_v34 }
 0x874   :  { %v9739_v47 = vld [vmem:[#allocation2 + $0x658] sm:$0xf]  ;;  %v8972_v50 = vor.u32 %v10311_v16, %v8971_v35  ;;  %v5303_v14 = vadd.f32 %v14860_v9, %v5254_v55  ;;  %5659 = vmatpush.bf16.msra.mxu3 %v9484_v3  ;;  %v6050_v16 = vadd.f32 %v6049_v54, %v14913_v24  ;;  %v14919_v27 = vadd.f32 %v5354_v33, %v5306_v6  ;;  %v5307_v3 = vpop.f32.mrf.mxu3 }
 0x875   :  { %v10503_v41 = vld [vmem:[#allocation2 + $0x674] sm:$0xf0]  ;;  %v5259_v17 = vadd.f32 %v5258_v58, %v5210_v11  ;;  %v16627_v11 = vld [vmem:[#allocation37_spill] sm:$0xff] }
 0x876   :  { %v9195_v22 = vld [vmem:[#allocation2 + $0x218] sm:$0xf]  ;;  %v9740_v49 = vor.u32 %v10503_v41, %v9739_v47  ;;  %5561 = vmatpush.bf16.msra.mxu0 %v8972_v50  ;;  %v14916_v5 = vadd.f32 %v14838_v13, %v5303_v14  ;;  %v14925_v47 = vperm.slane %v16455_v18, 5  ;;  %v16628_v58 = vld [vmem:[#allocation21_spill] sm:$0xff] }
 0x877   :  { %v10367_v19 = vld [vmem:[#allocation2 + $0x234] sm:$0xf0]  ;;  %v5368_v41 = vpop.f32.mrf.mxu0  ;;  %v5308_v44 = vadd.f32 %v5307_v3, %v5259_v17  ;;  %v16629_v17 = vld [vmem:[#allocation38_spill] sm:$0xff] }
 0x878   :  { %v9451_v42 = vld [vmem:[#allocation2 + $0x418] sm:$0xf]  ;;  %v9196_v20 = vor.u32 %v10367_v19, %v9195_v22  ;;  %5708 = vmatpush.bf16.msra.mxu1 %v9740_v49  ;;  %v6051_v48 = vadd.f32 %v6050_v16, %v14916_v5  ;;  %v5369_v22 = vadd.f32 %v5368_v41, %v14925_v47 }
 0x879   :  { %v10431_v10 = vld [vmem:[#allocation2 + $0x434] sm:$0xf0]  ;;  %v5417_v61 = vpop.f32.mrf.mxu2 }
 0x87a   :  { %v8939_v43 = vld [vmem:[#allocation2 + $0x18] sm:$0xf]  ;;  %v9452_v38 = vor.u32 %v10431_v10, %v9451_v42  ;;  %5611 = vmatpush.bf16.msra.mxu2 %v9196_v20  ;;  %v5356_v13 = vpop.f32.mrf.mxu1  ;;  %v6052_v52 = vadd.f32 %v6051_v48, %v14919_v27  ;;  %v5418_v28 = vadd.f32 %v5417_v61, %v5369_v22 }
 0x87b   :  { %v10303_v37 = vld [vmem:[#allocation2 + $0x34] sm:$0xf0]  ;;  %v5357_v19 = vadd.f32 %v5356_v13, %v5308_v44 }
 0x87c   :  { %v9707_v57 = vld [vmem:[#allocation2 + $0x618] sm:$0xf]  ;;  %v8940_v35 = vor.u32 %v10303_v37, %v8939_v43  ;;  %5660 = vmatpush.bf16.msra.mxu3 %v9452_v38  ;;  %v5466_v55 = vpop.f32.mrf.mxu3 }
 0x87d   :  { %v10495_v45 = vld [vmem:[#allocation2 + $0x634] sm:$0xf0]  ;;  %v6053_v34 = vadd.f32 %v6052_v52, %v5357_v19  ;;  %5612 = vmatmul.bf16.vlgmr.msra.gmra.mxu2 %v16457_v21  ;;  %v5467_v42 = vadd.f32 %v5466_v55, %v5418_v28  ;;  %v16630_v52 = vld [vmem:[#allocation30_spill] sm:$0xff] }
 0x87e   :  { %v9708_v9 = vor.u32 %v10495_v45, %v9707_v57  ;;  %5562 = vmatpush.bf16.msra.mxu0 %v8940_v35 }
 0x87f   :  { %5661 = vmatmul.bf16.vlgmr.msra.gmra.mxu3 %v16458_v62  ;;  %v5370_v63 = vpop.f32.mrf.mxu0  ;;  %v6054_v49 = vrot.slane %v6053_v34, 4 }
 0x880   :  { %5709 = vmatpush.bf16.msra.mxu1 %v9708_v9  ;;  %v5371_v20 = vadd.f32 %v5370_v63, %v14925_v47  ;;  %v16635_v63 = vld [vmem:[#allocation58_spill] sm:$0xff] }
 0x881   :  { %5563 = vmatmul.bf16.vlgmr.msra.gmra.mxu0 %v16456_v2  ;;  %v6055_v33 = vadd.f32 %v6054_v49, %v6053_v34  ;;  %v5419_v51 = vpop.f32.mrf.mxu2  ;;  %v16633_v34 = vld [vmem:[#allocation22_spill] sm:$0xff] }
 0x882   :  { %v5515_v50 = vpop.f32.mrf.mxu1  ;;  %v5420_v37 = vadd.f32 %v5419_v51, %v5371_v20 }
 0x883   :  { %v6056_v40 = vrot.slane %v6055_v33, 2  ;;  %v14932_v56 = vadd.f32 %v5515_v50, %v5467_v42  ;;  %5710 = vmatmul.bf16.vlgmr.msra.gmra.mxu1 %v16459_v60  ;;  %v16634_v50 = vld [vmem:[#allocation43_spill] sm:$0xff] }
 0x884   :  { %v5468_v29 = vpop.f32.mrf.mxu3 }
 0x885   :  { %v6057_v10 = vadd.f32 %v6056_v40, %v6055_v33  ;;  %v5469_v45 = vadd.f32 %v5468_v29, %v5420_v37 }
 0x887   :  { %v5373_v54 = vpop.f32.mrf.mxu0  ;;  %v6058_v14 = vrot.slane %v6057_v10, 1 }
 0x889   :  { %v6059_v57 = vadd.f32 %v6058_v14, %v6057_v10  ;;  %v5422_v13 = vpop.f32.mrf.mxu2  ;;  %v5374_v14 = vadd.f32 %v5373_v54, %v14925_v47 }
 0x88a   :  { %v5517_v43 = vpop.f32.mrf.mxu1 }
 0x88b   :  { %v6127_v6 = vmul.f32 %v6059_v57, %v16428_v4  ;;  %v14937_v38 = vadd.f32 %v5517_v43, %v5469_v45 }
 0x88c   :  { %v5471_v51 = vpop.f32.mrf.mxu3 }
 0x88d   :  { %v14941_v35 = vsub.f32 %v14484_v46, %v6127_v6  ;;  %v14944_v16 = vsub.f32 %v14489_v15, %v6127_v6  ;;  %v14947_v9 = vsub.f32 %v14562_v23, %v6127_v6  ;;  %v14950_v48 = vsub.f32 %v16627_v11, %v6127_v6  ;;  %5617 = vmatmul.bf16.gmra.mxu2 %v16628_v58  ;;  %v16631_v46 = vld [vmem:[#allocation32_spill] sm:$0xff]  ;;  %v16632_v15 = vld [vmem:[#allocation39_spill] sm:$0xff] }
 0x88e   :  { %v14954_v41 = vsub.f32 %v16629_v17, %v6127_v6  ;;  %v14957_v3 = vsub.f32 %v16630_v52, %v6127_v6  ;;  %v14960_v44 = vsub.f32 %v16631_v46, %v6127_v6  ;;  %v14963_v22 = vsub.f32 %v16632_v15, %v6127_v6 }
 0x88f   :  { %5666 = vmatmul.bf16.gmra.mxu3 %v16633_v34  ;;  %v5375_v61 = vpop.f32.mrf.mxu0  ;;  %v14967_v28 = vsub.f32 %v16634_v50, %v6127_v6  ;;  %v14970_v49 = vsub.f32 %v16635_v63, %v6127_v6  ;;  %v14973_v55 = vsub.f32 %v14702_v25, %v6127_v6  ;;  %v14976_v33 = vsub.f32 %v14907_v1, %v6127_v6  ;;  %v16636_v1 = vld [vmem:[#allocation29_spill] sm:$0xff]  ;;  %v16658_v34 = vld [vmem:[#allocation27_spill] sm:$0xff] }
 0x890   :  { %v14979_v42 = vsub.f32 %v14913_v24, %v6127_v6  ;;  %v14982_v40 = vsub.f32 %v14916_v5, %v6127_v6  ;;  %v14985_v20 = vsub.f32 %v14919_v27, %v6127_v6  ;;  %v14987_v10 = vsub.f32 %v5357_v19, %v6127_v6 }
 0x891   :  { %5568 = vmatmul.bf16.gmra.mxu0 %v12866_v32  ;;  %v6263_v43 = vmul.f32 %v14941_v35, %v14941_v35  ;;  %v6271_v25 = vmul.f32 %v14944_v16, %v14944_v16  ;;  %v6279_v24 = vmul.f32 %v14947_v9, %v14947_v9  ;;  %v5424_v5 = vpop.f32.mrf.mxu2  ;;  %v6287_v19 = vmul.f32 %v14950_v48, %v14950_v48 }
 0x892   :  { %v5520_v23 = vpop.f32.mrf.mxu1  ;;  %v6295_v6 = vmul.f32 %v14954_v41, %v14954_v41  ;;  %v6060_v17 = vadd.f32 %v14937_v38, %v14932_v56  ;;  %v5423_v52 = vadd.f32 %v5422_v13, %v5374_v14  ;;  %v5376_v46 = vadd.f32 %v5375_v61, %v14925_v47 }
 0x893   :  { %5715 = vmatmul.bf16.gmra.mxu1 %v16636_v1  ;;  %v6471_v37 = vadd.f32 %v6271_v25, %v6263_v43  ;;  %v6303_v54 = vmul.f32 %v14957_v3, %v14957_v3  ;;  %v16637_v25 = vld [vmem:[#allocation31_spill] sm:$0xff] }
 0x894   :  { %v5473_v45 = vpop.f32.mrf.mxu3  ;;  %v5472_v63 = vadd.f32 %v5471_v51, %v5423_v52  ;;  %v5425_v43 = vadd.f32 %v5424_v5, %v5376_v46  ;;  %v6319_v51 = vmul.f32 %v14963_v22, %v14963_v22  ;;  %v6327_v46 = vmul.f32 %v14967_v28, %v14967_v28  ;;  %v10475_v1 = vld [vmem:[#allocation2 + $0x59c] sm:$0xf] }
 0x895   :  { %v6472_v57 = vadd.f32 %v6471_v37, %v6279_v24  ;;  %v6311_v24 = vmul.f32 %v14960_v44, %v14960_v44 }
 0x896   :  { %v15011_v13 = vadd.f32 %v5520_v23, %v5472_v63  ;;  %v5474_v61 = vadd.f32 %v5473_v45, %v5425_v43  ;;  %v16643_v43 = vld [vmem:[#allocation44_spill] sm:$0xff] }
 0x897   :  { %v5378_v29 = vpop.f32.mrf.mxu0  ;;  %v6473_v11 = vadd.f32 %v6472_v57, %v6287_v19  ;;  %v16638_v19 = vld [vmem:[#allocation33_spill] sm:$0xff] }
 0x898   :  { %v5379_v15 = vadd.f32 %v5378_v29, %v14925_v47  ;;  %16639 = vst [vmem:[#allocation37_spill] sm:$0xff] %v15011_v13  ;;  %v16640_v29 = vld [vmem:[#allocation40_spill] sm:$0xff] }
 0x899   :  { %v6474_v50 = vadd.f32 %v6473_v11, %v6295_v6  ;;  %v5427_v57 = vpop.f32.mrf.mxu2  ;;  %v6061_v6 = vadd.f32 %v6060_v17, %v15011_v13 }
 0x89a   :  { %v5522_v27 = vpop.f32.mrf.mxu1  ;;  %v5428_v39 = vadd.f32 %v5427_v57, %v5379_v15  ;;  %v6335_v15 = vmul.f32 %v14970_v49, %v14970_v49 }
 0x89b   :  { %v6475_v37 = vadd.f32 %v6474_v50, %v6303_v54  ;;  %v15017_v11 = vadd.f32 %v5522_v27, %v5474_v61  ;;  %v6343_v27 = vmul.f32 %v14973_v55, %v14973_v55 }
 0x89c   :  { %v5476_v52 = vpop.f32.mrf.mxu3 }
 0x89d   :  { %5622 = vmatmul.bf16.gmra.mxu2 %v16638_v19  ;;  %v6476_v5 = vadd.f32 %v6475_v37, %v6311_v24  ;;  %16641 = vst [vmem:[#allocation21_spill] sm:$0xff] %v15017_v11  ;;  %v5477_v54 = vadd.f32 %v5476_v52, %v5428_v39  ;;  %v6062_v45 = vadd.f32 %v6061_v6, %v15017_v11  ;;  %v16670_v11 = vld [vmem:[#allocation56_spill] sm:$0xff] }
 0x89e   :  { %v6359_v52 = vmul.f32 %v14979_v42, %v14979_v42 }
 0x89f   :  { %5671 = vmatmul.bf16.gmra.mxu3 %v16640_v29  ;;  %v5380_v7 = vpop.f32.mrf.mxu0  ;;  %v6477_v23 = vadd.f32 %v6476_v5, %v6319_v51  ;;  %v6351_v5 = vmul.f32 %v14976_v33, %v14976_v33 }
 0x8a0   :  { %v5381_v17 = vadd.f32 %v5380_v7, %v14925_v47 }
 0x8a1   :  { %5573 = vmatmul.bf16.gmra.mxu0 %v16637_v25  ;;  %v6478_v50 = vadd.f32 %v6477_v23, %v6327_v46  ;;  %v5429_v57 = vpop.f32.mrf.mxu2  ;;  %v10411_v25 = vld [vmem:[#allocation2 + $0x39c] sm:$0xf] }
 0x8a2   :  { %v5525_v14 = vpop.f32.mrf.mxu1  ;;  %v5430_v61 = vadd.f32 %v5429_v57, %v5381_v17  ;;  %v6375_v17 = vmul.f32 %v14985_v20, %v14985_v20  ;;  %v16646_v57 = vld [vmem:[#allocation47_spill] sm:$0xff] }
 0x8a3   :  { %v15024_v63 = vadd.f32 %v5525_v14, %v5477_v54  ;;  %5720 = vmatmul.bf16.gmra.mxu1 %v16643_v43  ;;  %v6479_v24 = vadd.f32 %v6478_v50, %v6335_v15  ;;  %v6367_v54 = vmul.f32 %v14982_v40, %v14982_v40  ;;  %v16645_v50 = vld [vmem:[#allocation34_spill] sm:$0xff] }
 0x8a4   :  { %v5478_v14 = vpop.f32.mrf.mxu3 }
 0x8a5   :  { %16642 = vst [vmem:[#allocation38_spill] sm:$0xff] %v15024_v63  ;;  %v6063_v37 = vadd.f32 %v6062_v45, %v15024_v63  ;;  %v6480_v6 = vadd.f32 %v6479_v24, %v6343_v27  ;;  %v5479_v7 = vadd.f32 %v5478_v14, %v5430_v61  ;;  %v9037_v63 = vld [vmem:[#allocation2 + $0xf8] sm:$0xf0] }
 0x8a7   :  { %v5383_v51 = vpop.f32.mrf.mxu0  ;;  %v6481_v46 = vadd.f32 %v6480_v6, %v6351_v5  ;;  %v16647_v6 = vld [vmem:[#allocation48_spill] sm:$0xff] }
 0x8a8   :  { %v5384_v23 = vadd.f32 %v5383_v51, %v14925_v47 }
 0x8a9   :  { %v6482_v45 = vadd.f32 %v6481_v46, %v6359_v52  ;;  %v5432_v5 = vpop.f32.mrf.mxu2 }
 0x8aa   :  { %v5527_v39 = vpop.f32.mrf.mxu1  ;;  %v5433_v51 = vadd.f32 %v5432_v5, %v5384_v23 }
 0x8ab   :  { %v15038_v15 = vadd.f32 %v5527_v39, %v5479_v7  ;;  %v6483_v27 = vadd.f32 %v6482_v45, %v6367_v54  ;;  %v6383_v39 = vmul.f32 %v14987_v10, %v14987_v10  ;;  %v16649_v54 = vld [vmem:[#allocation49_spill] sm:$0xff] }
 0x8ac   :  { %v5481_v46 = vpop.f32.mrf.mxu3 }
 0x8ad   :  { %16644 = vst [vmem:[#allocation30_spill] sm:$0xff] %v15038_v15  ;;  %v6064_v24 = vadd.f32 %v6063_v37, %v15038_v15  ;;  %5627 = vmatmul.bf16.gmra.mxu2 %v16646_v57  ;;  %v6484_v52 = vadd.f32 %v6483_v27, %v6375_v17  ;;  %v5482_v59 = vadd.f32 %v5481_v46, %v5433_v51 }
 0x8af   :  { %5676 = vmatmul.bf16.gmra.mxu3 %v16647_v6  ;;  %v5385_v14 = vpop.f32.mrf.mxu0  ;;  %v6485_v7 = vadd.f32 %v6484_v52, %v6383_v39 }
 0x8b0   :  { %v5386_v37 = vadd.f32 %v5385_v14, %v14925_v47  ;;  %v16652_v14 = vld [vmem:[#allocation26_spill] sm:$0xff] }
 0x8b1   :  { %5578 = vmatmul.bf16.gmra.mxu0 %v16645_v50  ;;  %v6486_v30 = vrot.slane %v6485_v7, 4  ;;  %v5434_v53 = vpop.f32.mrf.mxu2 }
 0x8b2   :  { %v5530_v61 = vpop.f32.mrf.mxu1  ;;  %v5435_v5 = vadd.f32 %v5434_v53, %v5386_v37  ;;  %v16653_v53 = vld [vmem:[#allocation51_spill] sm:$0xff] }
 0x8b3   :  { %v15048_v36 = vadd.f32 %v5530_v61, %v5482_v59  ;;  %5725 = vmatmul.bf16.gmra.mxu1 %v16649_v54  ;;  %v6487_v45 = vadd.f32 %v6486_v30, %v6485_v7  ;;  %v16651_v61 = vld [vmem:[#allocation50_spill] sm:$0xff] }
 0x8b4   :  { %v5483_v50 = vpop.f32.mrf.mxu3 }
 0x8b5   :  { %16648 = vst [vmem:[#allocation32_spill] sm:$0xff] %v15048_v36  ;;  %v6065_v0 = vadd.f32 %v6064_v24, %v15048_v36  ;;  %v6488_v57 = vrot.slane %v6487_v45, 2  ;;  %v5484_v27 = vadd.f32 %v5483_v50, %v5435_v5  ;;  %v16655_v5 = vld [vmem:[#allocation57_spill] sm:$0xff]  ;;  %v9069_v36 = vld [vmem:[#allocation2 + $0x138] sm:$0xf0] }
 0x8b7   :  { %v5388_v6 = vpop.f32.mrf.mxu0  ;;  %v6489_v17 = vadd.f32 %v6488_v57, %v6487_v45 }
 0x8b8   :  { %v5389_v51 = vadd.f32 %v5388_v6, %v14925_v47 }
 0x8b9   :  { %v6490_v39 = vrot.slane %v6489_v17, 1  ;;  %v5437_v24 = vpop.f32.mrf.mxu2 }
 0x8ba   :  { %v5532_v23 = vpop.f32.mrf.mxu1  ;;  %v5438_v7 = vadd.f32 %v5437_v24, %v5389_v51 }
 0x8bb   :  { %v15054_v59 = vadd.f32 %v5532_v23, %v5484_v27  ;;  %v6491_v52 = vadd.f32 %v6490_v39, %v6489_v17  ;;  %v16656_v17 = vld [vmem:[#allocation52_spill] sm:$0xff] }
 0x8bc   :  { %v5486_v57 = vpop.f32.mrf.mxu3 }
 0x8bd   :  { %16650 = vst [vmem:[#allocation39_spill] sm:$0xff] %v15054_v59  ;;  %v6066_v30 = vadd.f32 %v6065_v0, %v15054_v59  ;;  %5632 = vmatmul.bf16.gmra.mxu2 %v16652_v14  ;;  %v6559_v50 = vmul.f32 %v6491_v52, %v16428_v4  ;;  %v5487_v45 = vadd.f32 %v5486_v57, %v5438_v7  ;;  %v15067_v0 = vperm.slane %v16655_v5, 4  ;;  %v9677_v14 = vld [vmem:[#allocation2 + $0x5f8] sm:$0xf0] }
 0x8be   :  { %v9325_v59 = vld [vmem:[#allocation2 + $0x338] sm:$0xf0] }
 0x8bf   :  { %5681 = vmatmul.bf16.gmra.mxu3 %v16653_v53  ;;  %v5390_v37 = vpop.f32.mrf.mxu0  ;;  %v15061_v6 = vadd.f32 0.8, %v6559_v50  ;;  %v15074_v7 = vmul.f32 %v15067_v0, %v14941_v35  ;;  %v10419_v35 = vld [vmem:[#allocation2 + $0x3dc] sm:$0xf]  ;;  %v15096_v5 = vmul.f32 %v15067_v0, %v14957_v3  ;;  %v15109_v3 = vmul.f32 %v15067_v0, %v14963_v22 }
 0x8c0   :  { %v5391_v27 = vadd.f32 %v5390_v37, %v14925_v47  ;;  %v15084_v37 = vmul.f32 %v15067_v0, %v14947_v9  ;;  %v9645_v22 = vld [vmem:[#allocation2 + $0x5b8] sm:$0xf0] }
 0x8c1   :  { %5583 = vmatmul.bf16.gmra.mxu0 %v16651_v61  ;;  %10664 = vrsqrt.f32 %v15061_v6  ;;  %v5439_v39 = vpop.f32.mrf.mxu2  ;;  %v10355_v61 = vld [vmem:[#allocation2 + $0x1dc] sm:$0xf]  ;;  %vm6762_vm7 = vweird.f32 %v15061_v6 }
 0x8c2   :  { %v5535_v46 = vpop.f32.mrf.mxu1  ;;  %v5440_v52 = vadd.f32 %v5439_v39, %v5391_v27  ;;  %v9421_v27 = vld [vmem:[#allocation2 + $0x3f8] sm:$0xf0] }
 0x8c3   :  { %v15064_v23 = vadd.f32 %v5535_v46, %v5487_v45  ;;  %5730 = vmatmul.bf16.gmra.mxu1 %v16656_v17  ;;  %v15078_v46 = vmul.f32 %v15067_v0, %v14944_v16  ;;  %v15092_v45 = vmul.f32 %v15067_v0, %v14954_v41  ;;  %v10483_v39 = vld [vmem:[#allocation2 + $0x5dc] sm:$0xf]  ;;  %v9424_v17 = vor.u32 %v10419_v35, %v9421_v27 }
 0x8c4   :  { %v5488_v50 = vpop.f32.mrf.mxu3  ;;  %v15103_v41 = vmul.f32 %v15067_v0, %v14960_v44  ;;  %v9680_v43 = vor.u32 %v10483_v39, %v9677_v14  ;;  %v15115_v44 = vmul.f32 %v15067_v0, %v14967_v28  ;;  %v10347_v14 = vld [vmem:[#allocation2 + $0x19c] sm:$0xf]  ;;  %v16659_v28 = vld [vmem:[#allocation28_spill] sm:$0xff] }
 0x8c5   :  { %16654 = vst [vmem:[#allocation43_spill] sm:$0xff] %v15064_v23  ;;  %v6067_v51 = vadd.f32 %v6066_v30, %v15064_v23  ;;  %v15088_v30 = vmul.f32 %v15067_v0, %v14950_v48  ;;  %v5489_v16 = vadd.f32 %v5488_v50, %v5440_v52  ;;  %v9165_v48 = vld [vmem:[#allocation2 + $0x1f8] sm:$0xf0]  ;;  %5800 = vmatpush.bf16.msrb.mxu2 %v9424_v17 }
 0x8c6   :  { %v9168_v29 = vor.u32 %v10355_v61, %v9165_v48  ;;  %v10547_v52 = vld [vmem:[#allocation2 + $0x7dc] sm:$0xf]  ;;  %5849 = vmatpush.bf16.msrb.mxu3 %v9680_v43 }
 0x8c7   :  { %v5393_v53 = vpop.f32.mrf.mxu0  ;;  %v15080_v57 = vpop.eup %10664  ;;  %v9933_v50 = vld [vmem:[#allocation2 + $0x7f8] sm:$0xf0] }
 0x8c8   :  { %v6757_v9 = vmul.f32 %v15080_v57, %v15061_v6  ;;  %v5394_v54 = vadd.f32 %v5393_v53, %v14925_v47  ;;  %v9936_v27 = vor.u32 %v10547_v52, %v9933_v50  ;;  %v9389_v53 = vld [vmem:[#allocation2 + $0x3b8] sm:$0xf0]  ;;  %vm6763_vm9 = vweird.f32 %v15080_v57  ;;  %5751 = vmatpush.bf16.msrb.mxu0 %v9168_v29 }
 0x8c9   :  { %v9392_v61 = vor.u32 %v10411_v25, %v9389_v53  ;;  %v5442_v39 = vpop.f32.mrf.mxu2  ;;  %v10539_v52 = vld [vmem:[#allocation2 + $0x79c] sm:$0xf]  ;;  %v6656_v25 = vmul.f32 %v15067_v0, %v14970_v49  ;;  %v6664_v29 = vmul.f32 %v15067_v0, %v14973_v55  ;;  %v16660_v53 = vld [vmem:[#allocation53_spill] sm:$0xff]  ;;  %vm15134_vm10 = vmor %vm6762_vm7, %vm6763_vm9 }
 0x8ca   :  { %v5537_v24 = vpop.f32.mrf.mxu1  ;;  %v6758_v35 = vmul.f32 %v15080_v57, %v6757_v9  ;;  %5898 = vmatpush.bf16.msrb.mxu1 %v9936_v27  ;;  %v9648_v9 = vor.u32 %v10475_v1, %v9645_v22  ;;  %v9901_v50 = vld [vmem:[#allocation2 + $0x7b8] sm:$0xf0]  ;;  %v6672_v22 = vmul.f32 %v15067_v0, %v14976_v33 }
 0x8cb   :  { %v15105_v19 = vadd.f32 %v5537_v24, %v5489_v16  ;;  %v9133_v24 = vld [vmem:[#allocation2 + $0x1b8] sm:$0xf0]  ;;  %v9904_v43 = vor.u32 %v10539_v52, %v9901_v50  ;;  %5801 = vmatpush.bf16.msrb.mxu2 %v9392_v61  ;;  %v6688_v52 = vmul.f32 %v15067_v0, %v14982_v40  ;;  %v6704_v61 = vmul.f32 %v15067_v0, %v14987_v10  ;;  %v16663_v10 = vld [vmem:[#allocation41_spill] sm:$0xff] }
 0x8cc   :  { %v6759_v16 = vmul.f32 0.5, %v6758_v35  ;;  %v9136_v48 = vor.u32 %v10347_v14, %v9133_v24  ;;  %v9357_v35 = vld [vmem:[#allocation2 + $0x378] sm:$0xf0]  ;;  %5850 = vmatpush.bf16.msrb.mxu3 %v9648_v9 }
 0x8cd   :  { %16657 = vst [vmem:[#allocation58_spill] sm:$0xff] %v15105_v19  ;;  %v15119_v17 = vadd.f32 %v6067_v51, %v15105_v19  ;;  %5637 = vmatmul.bf16.gmra.mxu2 %v16659_v28  ;;  %v10403_v51 = vld [vmem:[#allocation2 + $0x35c] sm:$0xf]  ;;  %v6696_v28 = vmul.f32 %v15067_v0, %v14985_v20 }
 0x8ce   :  { %v10467_v27 = vld [vmem:[#allocation2 + $0x55c] sm:$0xf]  ;;  %v6760_v14 = vsub.f32 1.5, %v6759_v16  ;;  %v9360_v55 = vor.u32 %v10403_v51, %v9357_v35  ;;  %5752 = vmatpush.bf16.msrb.mxu0 %v9136_v48  ;;  %5899 = vmatpush.bf16.msrb.mxu1 %v9904_v43 }
 0x8cf   :  { %v5395_v23 = vpop.f32.mrf.mxu0  ;;  %5686 = vmatmul.bf16.gmra.mxu3 %v16660_v53  ;;  %v9613_v6 = vld [vmem:[#allocation2 + $0x578] sm:$0xf0] }
 0x8d0   :  { %v10339_v24 = vld [vmem:[#allocation2 + $0x15c] sm:$0xf]  ;;  %v9616_v33 = vor.u32 %v10467_v27, %v9613_v6  ;;  %v6761_v51 = vmul.f32 %v15080_v57, %v6760_v14  ;;  %5802 = vmatpush.bf16.msrb.mxu2 %v9360_v55 }
 0x8d1   :  { %5588 = vmatmul.bf16.gmra.mxu0 %v16658_v34  ;;  %v5443_v34 = vadd.f32 %v5442_v39, %v5394_v54  ;;  %v6680_v54 = vmul.f32 %v15067_v0, %v14979_v42  ;;  %v5491_v39 = vpop.f32.mrf.mxu3  ;;  %v9101_v50 = vld [vmem:[#allocation2 + $0x178] sm:$0xf0]  ;;  %v6929_v0 = vperm.slane %v16663_v10, 4 }
 0x8d2   :  { %v5540_v1 = vpop.f32.mrf.mxu1  ;;  %v10531_v42 = vld [vmem:[#allocation2 + $0x75c] sm:$0xf]  ;;  %v9104_v35 = vor.u32 %v10339_v24, %v9101_v50  ;;  %v6765_v20 = vsel %vm15134_vm10, %v15080_v57, %v6761_v51  ;;  %v16664_v24 = vld [vmem:[#allocation54_spill] sm:$0xff]  ;;  %5851 = vmatpush.bf16.msrb.mxu3 %v9616_v33 }
 0x8d3   :  { %v9869_v16 = vld [vmem:[#allocation2 + $0x778] sm:$0xf0]  ;;  %v5492_v53 = vadd.f32 %v5491_v39, %v5443_v34  ;;  %v15148_v34 = vadd.f32 %v5395_v23, %v14925_v47  ;;  %5735 = vmatmul.bf16.gmra.mxu1 %v16664_v24  ;;  %v6824_v23 = vmul.f32 %v6765_v20, %v15088_v30  ;;  %v6832_v57 = vmul.f32 %v6765_v20, %v15092_v45 }
 0x8d4   :  { %v10395_v19 = vld [vmem:[#allocation2 + $0x31c] sm:$0xf]  ;;  %v9872_v9 = vor.u32 %v10531_v42, %v9869_v16  ;;  %v6840_v49 = vmul.f32 %v6765_v20, %v15096_v5  ;;  %v6848_v55 = vmul.f32 %v6765_v20, %v15103_v41  ;;  %5753 = vmatpush.bf16.msrb.mxu0 %v9104_v35  ;;  %v6872_v39 = vmul.f32 %v6765_v20, %v6656_v25 }
 0x8d5   :  { %v10459_v40 = vld [vmem:[#allocation2 + $0x51c] sm:$0xf]  ;;  %v9328_v48 = vor.u32 %v10395_v19, %v9325_v59  ;;  %v15145_v15 = vadd.f32 %v5540_v1, %v5492_v53  ;;  %v6800_v19 = vmul.f32 %v6765_v20, %v15074_v7  ;;  %v6808_v59 = vmul.f32 %v6765_v20, %v15078_v46  ;;  %v15159_v53 = vpop.f32.mrf.mxu2 }
 0x8d6   :  { %v9581_v27 = vld [vmem:[#allocation2 + $0x538] sm:$0xf0]  ;;  %v6816_v1 = vmul.f32 %v6765_v20, %v15084_v37  ;;  %v6864_v7 = vmul.f32 %v6765_v20, %v15115_v44  ;;  %v6880_v46 = vmul.f32 %v6765_v20, %v6664_v29  ;;  %v6888_v50 = vmul.f32 %v6765_v20, %v6672_v22  ;;  %5900 = vmatpush.bf16.msrb.mxu1 %v9872_v9 }
 0x8d7   :  { %v10331_v6 = vld [vmem:[#allocation2 + $0x11c] sm:$0xf]  ;;  %v9584_v43 = vor.u32 %v10459_v40, %v9581_v27  ;;  %v15168_v30 = vpop.f32.mrf.mxu0  ;;  %v6896_v33 = vmul.f32 %v6765_v20, %v6680_v54  ;;  %v6904_v42 = vmul.f32 %v6765_v20, %v6688_v52  ;;  %v6912_v45 = vmul.f32 %v6765_v20, %v6696_v28  ;;  %5803 = vmatpush.bf16.msrb.mxu2 %v9328_v48 }
 0x8d8   :  { %v9072_v14 = vor.u32 %v10331_v6, %v9069_v36  ;;  %v6856_v36 = vmul.f32 %v6765_v20, %v15109_v3  ;;  %v6920_v16 = vmul.f32 %v6765_v20, %v6704_v61  ;;  %v6945_v41 = vadd.f32 %v6929_v0, %v6800_v19  ;;  %v10523_v6 = vld [vmem:[#allocation2 + $0x71c] sm:$0xf] }
 0x8d9   :  { %v15170_v5 = vpop.f32.mrf.mxu3  ;;  %v6953_v3 = vadd.f32 %v6929_v0, %v6808_v59  ;;  %v15172_v51 = vadd.f32 %v6929_v0, %v6816_v1  ;;  %v15174_v44 = vadd.f32 %v6929_v0, %v6824_v23  ;;  %5852 = vmatpush.bf16.msrb.mxu3 %v9584_v43  ;;  %v15176_v25 = vadd.f32 %v6929_v0, %v6832_v57  ;;  %v16665_v20 = vld [vmem:[#allocation35_spill] sm:$0xff] }
 0x8da   :  { %v15166_v37 = vpop.f32.mrf.mxu1  ;;  %v15178_v29 = vadd.f32 %v6929_v0, %v6840_v49  ;;  %v15180_v22 = vadd.f32 %v6929_v0, %v6848_v55  ;;  %v15182_v54 = vadd.f32 %v6929_v0, %v6856_v36  ;;  %5754 = vmatpush.bf16.msrb.mxu0 %v9072_v14  ;;  %v15184_v28 = vadd.f32 %v6929_v0, %v6864_v7  ;;  %v9837_v43 = vld [vmem:[#allocation2 + $0x738] sm:$0xf0]  ;;  %v16666_v14 = vld [vmem:[#allocation36_spill] sm:$0xff] }
 0x8db   :  { %v15186_v52 = vadd.f32 %v6929_v0, %v6872_v39  ;;  %v15188_v61 = vadd.f32 %v6929_v0, %v6880_v46  ;;  %v15190_v35 = vadd.f32 %v6929_v0, %v6888_v50  ;;  %v15192_v40 = vadd.f32 %v6929_v0, %v6896_v33  ;;  %v9293_v59 = vld [vmem:[#allocation2 + $0x2f8] sm:$0xf0] }
 0x8dc   :  { %v15194_v9 = vadd.f32 %v6929_v0, %v6904_v42  ;;  %v15196_v48 = vadd.f32 %v6929_v0, %v6912_v45  ;;  %v15198_v27 = vadd.f32 %v6929_v0, %v6920_v16  ;;  %vm7073_vm11 = vcmp.gt.f32.partialorder %v6945_v41, 0.0  ;;  %v10387_v0 = vld [vmem:[#allocation2 + $0x2dc] sm:$0xf] }
 0x8dd   :  { %vm7081_vm12 = vcmp.gt.f32.partialorder %v6953_v3, 0.0  ;;  %vm7089_vm13 = vcmp.gt.f32.partialorder %v15172_v51, 0.0  ;;  %vm7097_vm14 = vcmp.gt.f32.partialorder %v15174_v44, 0.0  ;;  %vm7105_vm15 = vcmp.gt.f32.partialorder %v15176_v25, 0.0  ;;  %5642 = vmatmul.bf16.gmra.mxu2 %v16666_v14  ;;  %v15208_v19 = vpop.f32.mrf.mxu2  ;;  %v16667_v1 = vld [vmem:[#allocation55_spill] sm:$0xff] }
 0x8de   :  { %vm7113_vm0 = vcmp.gt.f32.partialorder %v15178_v29, 0.0  ;;  %vm7121_vm1 = vcmp.gt.f32.partialorder %v15180_v22, 0.0  ;;  %vm7129_vm2 = vcmp.gt.f32.partialorder %v15182_v54, 0.0  ;;  %vm7137_vm3 = vcmp.gt.f32.partialorder %v15184_v28, 0.0  ;;  %v10323_v24 = vld [vmem:[#allocation2 + $0xdc] sm:$0xf] }
 0x8df   :  { %vm7145_vm4 = vcmp.gt.f32.partialorder %v15186_v52, 0.0  ;;  %vm7153_vm5 = vcmp.gt.f32.partialorder %v15188_v61, 0.0  ;;  %vm7161_vm6 = vcmp.gt.f32.partialorder %v15190_v35, 0.0  ;;  %5691 = vmatmul.bf16.gmra.mxu3 %v16667_v1  ;;  %v15215_v23 = vpop.f32.mrf.mxu0  ;;  %vm7169_vm8 = vcmp.gt.f32.partialorder %v15192_v40, 0.0 }
 0x8e0   :  { %vm7177_vm9 = vcmp.gt.f32.partialorder %v15194_v9, 0.0  ;;  %vm7185_vm7 = vcmp.gt.f32.partialorder %v15196_v48, 0.0  ;;  %vm7193_vm10 = vcmp.gt.f32.partialorder %v15198_v27, 0.0  ;;  %v7201_v55 = vmul.f32 0.2, %v6945_v41 }
 0x8e1   :  { %5593 = vmatmul.bf16.gmra.mxu0 %v16665_v20  ;;  %v15223_v49 = vpop.f32.mrf.mxu3  ;;  %v7209_v36 = vmul.f32 0.2, %v6953_v3  ;;  %v7217_v7 = vmul.f32 0.2, %v15172_v51  ;;  %v9840_v39 = vor.u32 %v10523_v6, %v9837_v43  ;;  %v7225_v46 = vmul.f32 0.2, %v15174_v44 }
 0x8e2   :  { %v15221_v57 = vpop.f32.mrf.mxu1  ;;  %v7233_v50 = vmul.f32 0.2, %v15176_v25  ;;  %v7241_v33 = vmul.f32 0.2, %v15178_v29  ;;  %v9296_v42 = vor.u32 %v10387_v0, %v9293_v59  ;;  %v7249_v45 = vmul.f32 0.2, %v15180_v22 }
 0x8e3   :  { %v7257_v16 = vmul.f32 0.2, %v15182_v54  ;;  %v7265_v1 = vmul.f32 0.2, %v15184_v28  ;;  %v15233_v14 = vsel %vm7073_vm11, %v6945_v41, %v7201_v55  ;;  %5901 = vmatpush.bf16.msrb.mxu1 %v9840_v39  ;;  %v7273_v20 = vmul.f32 0.2, %v15186_v52 }
 0x8e4   :  { %16668 = vst [vmem:[#allocation116_spill] sm:$0xff] %v15233_v14  ;;  %v7281_v6 = vmul.f32 0.2, %v15188_v61  ;;  %v7289_v43 = vmul.f32 0.2, %v15190_v35  ;;  %v15239_v10 = vsel %vm7081_vm12, %v6953_v3, %v7209_v36  ;;  %5804 = vmatpush.bf16.msrb.mxu2 %v9296_v42  ;;  %5740 = vmatmul.bf16.gmra.mxu1 %v16670_v11  ;;  %v15248_v14 = vsel %vm7089_vm13, %v15172_v51, %v7217_v7 }
 0x8e5   :  { %16669 = vst [vmem:[#allocation117_spill] sm:$0xff] %v15239_v10  ;;  %v10451_v0 = vld [vmem:[#allocation2 + $0x4dc] sm:$0xf]  ;;  %v7297_v41 = vmul.f32 0.2, %v15192_v40  ;;  %v15254_v42 = vsel %vm7097_vm14, %v15174_v44, %v7225_v46  ;;  %v15259_v10 = vsel %vm7105_vm15, %v15176_v25, %v7233_v50  ;;  %v15264_v11 = vsel %vm7113_vm0, %v15178_v29, %v7241_v33 }
 0x8e6   :  { %v9549_v59 = vld [vmem:[#allocation2 + $0x4f8] sm:$0xf0]  ;;  %v7305_v55 = vmul.f32 0.2, %v15194_v9  ;;  %v7313_v39 = vmul.f32 0.2, %v15196_v48  ;;  %v15269_v13 = vsel %vm7121_vm1, %v15180_v22, %v7249_v45  ;;  %v15274_v44 = vsel %vm7129_vm2, %v15182_v54, %v7257_v16 }
 0x8e7   :  { %16671 = vst [vmem:[#allocation118_spill] sm:$0xff] %v15248_v14  ;;  %v10515_v3 = vld [vmem:[#allocation2 + $0x6dc] sm:$0xf]  ;;  %v7321_v36 = vmul.f32 0.2, %v15198_v27  ;;  %v5449_v14 = vpop.f32.mrf.mxu2  ;;  %v15279_v25 = vsel %vm7137_vm3, %v15184_v28, %v7265_v1  ;;  %v15284_v29 = vsel %vm7145_vm4, %v15186_v52, %v7273_v20  ;;  %v15289_v22 = vsel %vm7153_vm5, %v15188_v61, %v7281_v6 }
 0x8e8   :  { %16672 = vst [vmem:[#allocation119_spill] sm:$0xff] %v15254_v42  ;;  %v9805_v51 = vld [vmem:[#allocation2 + $0x6f8] sm:$0xf0]  ;;  %v15294_v54 = vsel %vm7161_vm6, %v15190_v35, %v7289_v43  ;;  %v15299_v28 = vsel %vm7169_vm8, %v15192_v40, %v7297_v41  ;;  %v15304_v52 = vsel %vm7177_vm9, %v15194_v9, %v7305_v55  ;;  %v15311_v35 = vsel %vm7185_vm7, %v15196_v48, %v7313_v39 }
 0x8e9   :  { %16673 = vst [vmem:[#allocation120_spill] sm:$0xff] %v15259_v10  ;;  %v10379_v7 = vld [vmem:[#allocation2 + $0x29c] sm:$0xf]  ;;  %v5498_v16 = vpop.f32.mrf.mxu3  ;;  %v15316_v40 = vsel %vm7193_vm10, %v15198_v27, %v7321_v36  ;;  %v9552_v6 = vor.u32 %v10451_v0, %v9549_v59  ;;  %v9040_v43 = vor.u32 %v10323_v24, %v9037_v63  ;;  %v5399_v24 = vadd.f32 %v15168_v30, %v14925_v47 }
 0x8ea   :  { %16674 = vst [vmem:[#allocation121_spill] sm:$0xff] %v15264_v11  ;;  %v9261_v46 = vld [vmem:[#allocation2 + $0x2b8] sm:$0xf0]  ;;  %v15306_v61 = vpop.f32.mrf.mxu1 }
 0x8eb   :  { %16675 = vst [vmem:[#allocation122_spill] sm:$0xff] %v15269_v13  ;;  %v10443_v50 = vld [vmem:[#allocation2 + $0x49c] sm:$0xf]  ;;  %5853 = vmatpush.bf16.msrb.mxu3 %v9552_v6  ;;  %5755 = vmatpush.bf16.msrb.mxu0 %v9040_v43  ;;  %v16714_v13 = vld [vmem:[#allocation36_spill] sm:$0xff] }
 0x8ec   :  { %16676 = vst [vmem:[#allocation123_spill] sm:$0xff] %v15274_v44  ;;  %v9517_v33 = vld [vmem:[#allocation2 + $0x4b8] sm:$0xf0] }
 0x8ed   :  { %16677 = vst [vmem:[#allocation124_spill] sm:$0xff] %v15279_v25  ;;  %v10315_v20 = vld [vmem:[#allocation2 + $0x9c] sm:$0xf]  ;;  %v9520_v48 = vor.u32 %v10443_v50, %v9517_v33  ;;  %v5448_v33 = vadd.f32 %v15208_v19, %v5399_v24  ;;  %5647 = vmatmul.bf16.gmra.mxu2 %v12990_v8 }
 0x8ee   :  { %16678 = vst [vmem:[#allocation125_spill] sm:$0xff] %v15284_v29  ;;  %v9005_v1 = vld [vmem:[#allocation2 + $0xb8] sm:$0xf0] }
 0x8ef   :  { %16679 = vst [vmem:[#allocation126_spill] sm:$0xff] %v15289_v22  ;;  %v10507_v45 = vld [vmem:[#allocation2 + $0x69c] sm:$0xf]  ;;  %v6069_v22 = vadd.f32 %v15119_v17, %v15145_v15  ;;  %v9008_v39 = vor.u32 %v10315_v20, %v9005_v1  ;;  %5854 = vmatpush.bf16.msrb.mxu3 %v9520_v48  ;;  %v5497_v1 = vadd.f32 %v15223_v49, %v5448_v33  ;;  %v5452_v19 = vpop.f32.mrf.mxu2 }
 0x8f0   :  { %16680 = vst [vmem:[#allocation127_spill] sm:$0xff] %v15294_v54  ;;  %v9773_v9 = vld [vmem:[#allocation2 + $0x6b8] sm:$0xf0]  ;;  %v9264_v54 = vor.u32 %v10379_v7, %v9261_v46  ;;  %v5401_v7 = vadd.f32 %v15215_v23, %v14925_v47  ;;  %5696 = vmatmul.bf16.gmra.mxu3 %v12994_v31 }
 0x8f1   :  { %16681 = vst [vmem:[#allocation128_spill] sm:$0xff] %v15299_v28  ;;  %v10371_v41 = vld [vmem:[#allocation2 + $0x25c] sm:$0xf]  ;;  %v9808_v28 = vor.u32 %v10515_v3, %v9805_v51  ;;  %v9776_v63 = vor.u32 %v10507_v45, %v9773_v9  ;;  %5598 = vmatmul.bf16.gmra.mxu0 %v12986_v12  ;;  %v5501_v6 = vpop.f32.mrf.mxu3 }
 0x8f2   :  { %16682 = vst [vmem:[#allocation129_spill] sm:$0xff] %v15304_v52  ;;  %v9229_v55 = vld [vmem:[#allocation2 + $0x278] sm:$0xf0]  ;;  %v5403_v52 = vpop.f32.mrf.mxu0  ;;  %5805 = vmatpush.bf16.msrb.mxu2 %v9264_v54  ;;  %5756 = vmatpush.bf16.msrb.mxu0 %v9008_v39 }
 0x8f3   :  { %16683 = vst [vmem:[#allocation130_spill] sm:$0xff] %v15311_v35  ;;  %v5445_v35 = vadd.f32 %v15159_v53, %v15148_v34  ;;  %v10435_v27 = vld [vmem:[#allocation2 + $0x45c] sm:$0xf]  ;;  %5902 = vmatpush.bf16.msrb.mxu1 %v9808_v28  ;;  %v9232_v0 = vor.u32 %v10371_v41, %v9229_v55  ;;  %v5404_v54 = vadd.f32 %v5403_v52, %v14925_v47  ;;  %v5550_v55 = vpop.f32.mrf.mxu1 }
 0x8f4   :  { %16684 = vst [vmem:[#allocation131_spill] sm:$0xff] %v15316_v40  ;;  %v9485_v36 = vld [vmem:[#allocation2 + $0x478] sm:$0xf0]  ;;  %v5450_v28 = vadd.f32 %v5449_v14, %v5401_v7  ;;  %5745 = vmatmul.bf16.gmra.mxu1 %v16454_v26 }
 0x8f5   :  { %v10307_v59 = vld [vmem:[#allocation2 + $0x5c] sm:$0xf]  ;;  %v5494_v17 = vadd.f32 %v15170_v5, %v5445_v35  ;;  %v9488_v50 = vor.u32 %v10435_v27, %v9485_v36  ;;  %v15338_v27 = vadd.f32 %v15221_v57, %v5497_v1 }
 0x8f6   :  { %v8973_v3 = vld [vmem:[#allocation2 + $0x78] sm:$0xf0]  ;;  %5806 = vmatpush.bf16.msrb.mxu2 %v9232_v0  ;;  %v5499_v41 = vadd.f32 %v5498_v16, %v5450_v28 }
 0x8f7   :  { %v10499_v51 = vld [vmem:[#allocation2 + $0x65c] sm:$0xf]  ;;  %v15332_v30 = vadd.f32 %v15166_v37, %v5494_v17  ;;  %v8976_v5 = vor.u32 %v10307_v59, %v8973_v3  ;;  %5903 = vmatpush.bf16.msrb.mxu1 %v9776_v63  ;;  %v5453_v37 = vadd.f32 %v5452_v19, %v5404_v54  ;;  %5855 = vmatpush.bf16.msrb.mxu3 %v9488_v50  ;;  %v5454_v3 = vpop.f32.mrf.mxu2 }
 0x8f8   :  { %v9741_v46 = vld [vmem:[#allocation2 + $0x678] sm:$0xf0]  ;;  %v15341_v36 = vadd.f32 %v15306_v61, %v5499_v41 }
 0x8f9   :  { %v10363_v34 = vld [vmem:[#allocation2 + $0x21c] sm:$0xf]  ;;  %v9744_v45 = vor.u32 %v10499_v51, %v9741_v46  ;;  %v6070_v9 = vadd.f32 %v6069_v22, %v15332_v30  ;;  %5757 = vmatpush.bf16.msrb.mxu0 %v8976_v5  ;;  %v5502_v63 = vadd.f32 %v5501_v6, %v5453_v37  ;;  %v5503_v51 = vpop.f32.mrf.mxu3  ;;  %v15351_v46 = vperm.slane %v16455_v18, 6 }
 0x8fa   :  { %v9197_v53 = vld [vmem:[#allocation2 + $0x238] sm:$0xf0]  ;;  %v5405_v14 = vpop.f32.mrf.mxu0 }
 0x8fb   :  { %v10427_v23 = vld [vmem:[#allocation2 + $0x41c] sm:$0xf]  ;;  %v9200_v35 = vor.u32 %v10363_v34, %v9197_v53  ;;  %v6071_v22 = vadd.f32 %v6070_v9, %v15338_v27  ;;  %5904 = vmatpush.bf16.msrb.mxu1 %v9744_v45  ;;  %v15345_v0 = vadd.f32 %v5550_v55, %v5502_v63  ;;  %v5406_v59 = vadd.f32 %v5405_v14, %v14925_v47  ;;  %v5552_v17 = vpop.f32.mrf.mxu1  ;;  %v16685_v63 = vld [vmem:[#allocation37_spill] sm:$0xff] }
 0x8fc   :  { %v9453_v20 = vld [vmem:[#allocation2 + $0x438] sm:$0xf0] }
 0x8fd   :  { %v10299_v52 = vld [vmem:[#allocation2 + $0x1c] sm:$0xf]  ;;  %v9456_v49 = vor.u32 %v10427_v23, %v9453_v20  ;;  %5807 = vmatpush.bf16.msrb.mxu2 %v9200_v35  ;;  %v6072_v57 = vadd.f32 %v6071_v22, %v15341_v36  ;;  %v5455_v7 = vadd.f32 %v5454_v3, %v5406_v59  ;;  %v16686_v22 = vld [vmem:[#allocation21_spill] sm:$0xff] }
 0x8fe   :  { %v8941_v43 = vld [vmem:[#allocation2 + $0x38] sm:$0xf0] }
 0x8ff   :  { %v10491_v48 = vld [vmem:[#allocation2 + $0x61c] sm:$0xf]  ;;  %v8944_v24 = vor.u32 %v10299_v52, %v8941_v43  ;;  %5856 = vmatpush.bf16.msrb.mxu3 %v9456_v49  ;;  %v6073_v61 = vadd.f32 %v6072_v57, %v15345_v0  ;;  %v5504_v53 = vadd.f32 %v5503_v51, %v5455_v7  ;;  %v16687_v57 = vld [vmem:[#allocation38_spill] sm:$0xff] }
 0x900   :  { %v9709_v39 = vld [vmem:[#allocation2 + $0x638] sm:$0xf0]  ;;  %5808 = vmatmul.bf16.vlgmr.msrb.gmra.mxu2 %v16457_v21  ;;  %v5613_v54 = vpop.f32.mrf.mxu2 }
 0x901   :  { %v9712_v16 = vor.u32 %v10491_v48, %v9709_v39  ;;  %5758 = vmatpush.bf16.msrb.mxu0 %v8944_v24  ;;  %v5553_v50 = vadd.f32 %v5552_v17, %v5504_v53  ;;  %v16691_v17 = vld [vmem:[#allocation43_spill] sm:$0xff] }
 0x902   :  { %v5564_v34 = vpop.f32.mrf.mxu0  ;;  %v5662_v5 = vpop.f32.mrf.mxu3  ;;  %5857 = vmatmul.bf16.vlgmr.msrb.gmra.mxu3 %v16458_v62 }
 0x903   :  { %5905 = vmatpush.bf16.msrb.mxu1 %v9712_v16  ;;  %v5565_v33 = vadd.f32 %v5564_v34, %v15351_v46  ;;  %v6074_v47 = vadd.f32 %v6073_v61, %v5553_v50  ;;  %v5711_v23 = vpop.f32.mrf.mxu1  ;;  %v16688_v61 = vld [vmem:[#allocation30_spill] sm:$0xff] }
 0x904   :  { %5759 = vmatmul.bf16.vlgmr.msrb.gmra.mxu0 %v16456_v2  ;;  %v16692_v34 = vld [vmem:[#allocation58_spill] sm:$0xff] }
 0x905   :  { %v6075_v28 = vrot.slane %v6074_v47, 4  ;;  %v5614_v20 = vadd.f32 %v5613_v54, %v5565_v33 }
 0x906   :  { %5906 = vmatmul.bf16.vlgmr.msrb.gmra.mxu1 %v16459_v60 }
 0x907   :  { %v6076_v45 = vadd.f32 %v6075_v28, %v6074_v47  ;;  %v5663_v35 = vadd.f32 %v5662_v5, %v5614_v20  ;;  %v16693_v5 = vld [vmem:[#allocation22_spill] sm:$0xff] }
 0x908   :  { %v5615_v21 = vpop.f32.mrf.mxu2 }
 0x909   :  { %v6077_v19 = vrot.slane %v6076_v45, 2  ;;  %v15358_v6 = vadd.f32 %v5711_v23, %v5663_v35 }
 0x90a   :  { %v5566_v1 = vpop.f32.mrf.mxu0  ;;  %v5664_v43 = vpop.f32.mrf.mxu3 }
 0x90b   :  { %v6078_v52 = vadd.f32 %v6077_v19, %v6076_v45  ;;  %v5567_v2 = vadd.f32 %v5566_v1, %v15351_v46  ;;  %v5713_v41 = vpop.f32.mrf.mxu1  ;;  %v16694_v19 = vld [vmem:[#allocation29_spill] sm:$0xff] }
 0x90d   :  { %v6079_v9 = vrot.slane %v6078_v52, 1  ;;  %v5616_v55 = vadd.f32 %v5615_v21, %v5567_v2 }
 0x90f   :  { %v6080_v14 = vadd.f32 %v6079_v9, %v6078_v52  ;;  %v5665_v62 = vadd.f32 %v5664_v43, %v5616_v55 }
 0x910   :  { %5813 = vmatmul.bf16.gmra.mxu2 %v16628_v58 }
 0x911   :  { %v6128_v48 = vmul.f32 %v6080_v14, %v16428_v4  ;;  %v15362_v39 = vadd.f32 %v5713_v41, %v5665_v62 }
 0x912   :  { %v5569_v37 = vpop.f32.mrf.mxu0  ;;  %5862 = vmatmul.bf16.gmra.mxu3 %v16693_v5  ;;  %v5667_v28 = vpop.f32.mrf.mxu3 }
 0x913   :  { %v15367_v60 = vsub.f32 %v14932_v56, %v6128_v48  ;;  %v15370_v49 = vsub.f32 %v14937_v38, %v6128_v48  ;;  %v15373_v24 = vsub.f32 %v16685_v63, %v6128_v48  ;;  %v15376_v16 = vsub.f32 %v16686_v22, %v6128_v48  ;;  %v16690_v56 = vld [vmem:[#allocation39_spill] sm:$0xff]  ;;  %v5618_v38 = vpop.f32.mrf.mxu2  ;;  %v5716_v54 = vpop.f32.mrf.mxu1 }
 0x914   :  { %5764 = vmatmul.bf16.gmra.mxu0 %v12866_v32  ;;  %v15379_v59 = vsub.f32 %v16687_v57, %v6128_v48  ;;  %v15382_v3 = vsub.f32 %v16688_v61, %v6128_v48  ;;  %v16689_v32 = vld [vmem:[#allocation32_spill] sm:$0xff]  ;;  %v15388_v51 = vsub.f32 %v16690_v56, %v6128_v48  ;;  %v15391_v7 = vsub.f32 %v16691_v17, %v6128_v48  ;;  %v16695_v57 = vld [vmem:[#allocation31_spill] sm:$0xff]  ;;  %v16696_v56 = vld [vmem:[#allocation33_spill] sm:$0xff] }
 0x915   :  { %v15385_v58 = vsub.f32 %v16689_v32, %v6128_v48  ;;  %v15394_v53 = vsub.f32 %v16692_v34, %v6128_v48  ;;  %v15397_v33 = vsub.f32 %v15145_v15, %v6128_v48  ;;  %v15400_v47 = vsub.f32 %v15332_v30, %v6128_v48 }
 0x916   :  { %v15404_v23 = vsub.f32 %v15338_v27, %v6128_v48  ;;  %v15407_v20 = vsub.f32 %v15341_v36, %v6128_v48  ;;  %v15410_v1 = vsub.f32 %v15345_v0, %v6128_v48  ;;  %v15412_v45 = vsub.f32 %v5553_v50, %v6128_v48  ;;  %5911 = vmatmul.bf16.gmra.mxu1 %v16694_v19 }
 0x917   :  { %v6264_v30 = vmul.f32 %v15367_v60, %v15367_v60  ;;  %v6272_v35 = vmul.f32 %v15370_v49, %v15370_v49  ;;  %v6280_v27 = vmul.f32 %v15373_v24, %v15373_v24  ;;  %v5570_v36 = vadd.f32 %v5569_v37, %v15351_v46 }
 0x918   :  { %v6288_v0 = vmul.f32 %v15376_v16, %v15376_v16  ;;  %v6296_v41 = vmul.f32 %v15379_v59, %v15379_v59  ;;  %v6081_v14 = vadd.f32 %v15362_v39, %v15358_v6  ;;  %v6304_v37 = vmul.f32 %v15382_v3, %v15382_v3 }
 0x919   :  { %v6492_v52 = vadd.f32 %v6272_v35, %v6264_v30  ;;  %v5619_v62 = vadd.f32 %v5618_v38, %v5570_v36  ;;  %v6312_v17 = vmul.f32 %v15385_v58, %v15385_v58  ;;  %v6320_v30 = vmul.f32 %v15388_v51, %v15388_v51 }
 0x91a   :  { %v5571_v15 = vpop.f32.mrf.mxu0  ;;  %v5669_v43 = vpop.f32.mrf.mxu3 }
 0x91b   :  { %v5620_v2 = vpop.f32.mrf.mxu2  ;;  %v6493_v50 = vadd.f32 %v6492_v52, %v6280_v27  ;;  %v5718_v21 = vpop.f32.mrf.mxu1  ;;  %v5572_v48 = vadd.f32 %v5571_v15, %v15351_v46  ;;  %v5668_v61 = vadd.f32 %v5667_v28, %v5619_v62  ;;  %v16697_v27 = vld [vmem:[#allocation40_spill] sm:$0xff] }
 0x91c   :  { %v16698_v62 = vld [vmem:[#allocation44_spill] sm:$0xff] }
 0x91d   :  { %v6494_v55 = vadd.f32 %v6493_v50, %v6288_v0  ;;  %v5621_v32 = vadd.f32 %v5620_v2, %v5572_v48  ;;  %v15436_v5 = vadd.f32 %v5716_v54, %v5668_v61  ;;  %v6328_v54 = vmul.f32 %v15391_v7, %v15391_v7 }
 0x91f   :  { %v6495_v63 = vadd.f32 %v6494_v55, %v6296_v41  ;;  %v5670_v38 = vadd.f32 %v5669_v43, %v5621_v32  ;;  %v6082_v36 = vadd.f32 %v6081_v14, %v15436_v5  ;;  %v6336_v41 = vmul.f32 %v15394_v53, %v15394_v53 }
 0x920   :  { %5818 = vmatmul.bf16.gmra.mxu2 %v16696_v56 }
 0x921   :  { %v6496_v34 = vadd.f32 %v6495_v63, %v6304_v37  ;;  %v15442_v2 = vadd.f32 %v5718_v21, %v5670_v38  ;;  %v6344_v21 = vmul.f32 %v15397_v33, %v15397_v33  ;;  %v6360_v38 = vmul.f32 %v15404_v23, %v15404_v23 }
 0x922   :  { %v5574_v9 = vpop.f32.mrf.mxu0  ;;  %5867 = vmatmul.bf16.gmra.mxu3 %v16697_v27  ;;  %v5672_v28 = vpop.f32.mrf.mxu3 }
 0x923   :  { %v5575_v22 = vadd.f32 %v5574_v9, %v15351_v46  ;;  %v5623_v15 = vpop.f32.mrf.mxu2  ;;  %v6497_v35 = vadd.f32 %v6496_v34, %v6312_v17  ;;  %v5721_v19 = vpop.f32.mrf.mxu1  ;;  %v6083_v9 = vadd.f32 %v6082_v36, %v15442_v2  ;;  %v16700_v36 = vld [vmem:[#allocation47_spill] sm:$0xff] }
 0x924   :  { %5769 = vmatmul.bf16.gmra.mxu0 %v16695_v57  ;;  %v6352_v57 = vmul.f32 %v15400_v47, %v15400_v47 }
 0x925   :  { %v5624_v52 = vadd.f32 %v5623_v15, %v5575_v22  ;;  %v6498_v50 = vadd.f32 %v6497_v35, %v6320_v30  ;;  %v6368_v35 = vmul.f32 %v15407_v20, %v15407_v20 }
 0x926   :  { %5916 = vmatmul.bf16.gmra.mxu1 %v16698_v62  ;;  %v16701_v62 = vld [vmem:[#allocation48_spill] sm:$0xff] }
 0x927   :  { %v5673_v43 = vadd.f32 %v5672_v28, %v5624_v52  ;;  %v6499_v55 = vadd.f32 %v6498_v50, %v6328_v54  ;;  %v16699_v28 = vld [vmem:[#allocation34_spill] sm:$0xff] }
 0x929   :  { %v15450_v48 = vadd.f32 %v5721_v19, %v5673_v43  ;;  %v6500_v14 = vadd.f32 %v6499_v55, %v6336_v41 }
 0x92a   :  { %v5576_v0 = vpop.f32.mrf.mxu0  ;;  %v5674_v17 = vpop.f32.mrf.mxu3 }
 0x92b   :  { %v6084_v37 = vadd.f32 %v6083_v9, %v15450_v48  ;;  %v5577_v63 = vadd.f32 %v5576_v0, %v15351_v46  ;;  %v5625_v22 = vpop.f32.mrf.mxu2  ;;  %v6501_v61 = vadd.f32 %v6500_v14, %v6344_v21  ;;  %v5723_v32 = vpop.f32.mrf.mxu1  ;;  %v6376_v0 = vmul.f32 %v15410_v1, %v15410_v1 }
 0x92c   :  { %v6384_v9 = vmul.f32 %v15412_v45, %v15412_v45 }
 0x92d   :  { %v5626_v56 = vadd.f32 %v5625_v22, %v5577_v63  ;;  %v6502_v15 = vadd.f32 %v6501_v61, %v6352_v57 }
 0x92f   :  { %v5675_v30 = vadd.f32 %v5674_v17, %v5626_v56  ;;  %v6503_v19 = vadd.f32 %v6502_v15, %v6360_v38 }
 0x930   :  { %5823 = vmatmul.bf16.gmra.mxu2 %v16700_v36 }
 0x931   :  { %v15462_v27 = vadd.f32 %v5723_v32, %v5675_v30  ;;  %v6504_v54 = vadd.f32 %v6503_v19, %v6368_v35  ;;  %v16702_v32 = vld [vmem:[#allocation49_spill] sm:$0xff] }
 0x932   :  { %v5579_v34 = vpop.f32.mrf.mxu0  ;;  %5872 = vmatmul.bf16.gmra.mxu3 %v16701_v62  ;;  %v5677_v14 = vpop.f32.mrf.mxu3 }
 0x933   :  { %v5580_v52 = vadd.f32 %v5579_v34, %v15351_v46  ;;  %v6085_v50 = vadd.f32 %v6084_v37, %v15462_v27  ;;  %v5628_v43 = vpop.f32.mrf.mxu2  ;;  %v6505_v41 = vadd.f32 %v6504_v54, %v6376_v0  ;;  %v5726_v55 = vpop.f32.mrf.mxu1 }
 0x934   :  { %5774 = vmatmul.bf16.gmra.mxu0 %v16699_v28 }
 0x935   :  { %v5629_v21 = vadd.f32 %v5628_v43, %v5580_v52  ;;  %v6506_v22 = vadd.f32 %v6505_v41, %v6384_v9  ;;  %v16703_v9 = vld [vmem:[#allocation50_spill] sm:$0xff] }
 0x936   :  { %5921 = vmatmul.bf16.gmra.mxu1 %v16702_v32  ;;  %v16704_v41 = vld [vmem:[#allocation26_spill] sm:$0xff] }
 0x937   :  { %v5678_v57 = vadd.f32 %v5677_v14, %v5629_v21  ;;  %v6507_v61 = vrot.slane %v6506_v22, 4 }
 0x939   :  { %v15474_v56 = vadd.f32 %v5726_v55, %v5678_v57  ;;  %v6508_v17 = vadd.f32 %v6507_v61, %v6506_v22 }
 0x93a   :  { %v5581_v63 = vpop.f32.mrf.mxu0  ;;  %v5679_v19 = vpop.f32.mrf.mxu3 }
 0x93b   :  { %v6086_v37 = vadd.f32 %v6085_v50, %v15474_v56  ;;  %v5582_v34 = vadd.f32 %v5581_v63, %v15351_v46  ;;  %v5630_v38 = vpop.f32.mrf.mxu2  ;;  %v6509_v15 = vrot.slane %v6508_v17, 2  ;;  %v5728_v30 = vpop.f32.mrf.mxu1  ;;  %v16705_v63 = vld [vmem:[#allocation51_spill] sm:$0xff] }
 0x93d   :  { %v5631_v35 = vadd.f32 %v5630_v38, %v5582_v34  ;;  %v6510_v28 = vadd.f32 %v6509_v15, %v6508_v17  ;;  %v16706_v34 = vld [vmem:[#allocation52_spill] sm:$0xff] }
 0x93f   :  { %v5680_v36 = vadd.f32 %v5679_v19, %v5631_v35  ;;  %v6511_v0 = vrot.slane %v6510_v28, 1 }
 0x940   :  { %5828 = vmatmul.bf16.gmra.mxu2 %v16704_v41 }
 0x941   :  { %v15478_v54 = vadd.f32 %v5728_v30, %v5680_v36  ;;  %v6512_v50 = vadd.f32 %v6511_v0, %v6510_v28 }
 0x942   :  { %v5584_v52 = vpop.f32.mrf.mxu0  ;;  %5877 = vmatmul.bf16.gmra.mxu3 %v16705_v63  ;;  %v5682_v57 = vpop.f32.mrf.mxu3 }
 0x943   :  { %v5585_v43 = vadd.f32 %v5584_v52, %v15351_v46  ;;  %v6087_v55 = vadd.f32 %v6086_v37, %v15478_v54  ;;  %v5633_v62 = vpop.f32.mrf.mxu2  ;;  %v6560_v21 = vmul.f32 %v6512_v50, %v16428_v4  ;;  %v5731_v14 = vpop.f32.mrf.mxu1 }
 0x944   :  { %5779 = vmatmul.bf16.gmra.mxu0 %v16703_v9 }
 0x945   :  { %v5634_v22 = vadd.f32 %v5633_v62, %v5585_v43  ;;  %v6713_v32 = vadd.f32 0.8, %v6560_v21  ;;  %v16707_v43 = vld [vmem:[#allocation57_spill] sm:$0xff]  ;;  %v16708_v62 = vld [vmem:[#allocation27_spill] sm:$0xff] }
 0x946   :  { %5926 = vmatmul.bf16.gmra.mxu1 %v16706_v34  ;;  %v6569_v9 = vperm.slane %v16707_v43, 5 }
 0x947   :  { %v5683_v17 = vadd.f32 %v5682_v57, %v5634_v22  ;;  %10666 = vrsqrt.f32 %v6713_v32  ;;  %vm6772_vm12 = vweird.f32 %v6713_v32 }
 0x948   :  { %v6585_v22 = vmul.f32 %v6569_v9, %v15367_v60  ;;  %v6593_v57 = vmul.f32 %v6569_v9, %v15370_v49  ;;  %v6609_v34 = vmul.f32 %v6569_v9, %v15376_v16  ;;  %v6657_v16 = vmul.f32 %v6569_v9, %v15394_v53  ;;  %v16712_v53 = vld [vmem:[#allocation41_spill] sm:$0xff] }
 0x949   :  { %v15487_v38 = vadd.f32 %v5731_v14, %v5683_v17  ;;  %v6601_v17 = vmul.f32 %v6569_v9, %v15373_v24  ;;  %v6649_v24 = vmul.f32 %v6569_v9, %v15391_v7 }
 0x94a   :  { %v5586_v61 = vpop.f32.mrf.mxu0  ;;  %v5684_v52 = vpop.f32.mrf.mxu3 }
 0x94b   :  { %v6088_v15 = vadd.f32 %v6087_v55, %v15487_v38  ;;  %v5587_v37 = vadd.f32 %v5586_v61, %v15351_v46  ;;  %v5635_v30 = vpop.f32.mrf.mxu2  ;;  %v5733_v35 = vpop.f32.mrf.mxu1  ;;  %v16709_v55 = vld [vmem:[#allocation28_spill] sm:$0xff] }
 0x94d   :  { %v5636_v19 = vadd.f32 %v5635_v30, %v5587_v37  ;;  %v10667_v36 = vpop.eup %10666  ;;  %v6617_v37 = vmul.f32 %v6569_v9, %v15379_v59  ;;  %v6625_v30 = vmul.f32 %v6569_v9, %v15382_v3  ;;  %v6665_v59 = vmul.f32 %v6569_v9, %v15397_v33 }
 0x94e   :  { %v6767_v41 = vmul.f32 %v10667_v36, %v6713_v32  ;;  %vm6773_vm11 = vweird.f32 %v10667_v36  ;;  %v6673_v3 = vmul.f32 %v6569_v9, %v15400_v47  ;;  %v6930_v33 = vperm.slane %v16712_v53, 5 }
 0x94f   :  { %v5685_v0 = vadd.f32 %v5684_v52, %v5636_v19  ;;  %v16710_v19 = vld [vmem:[#allocation53_spill] sm:$0xff]  ;;  %vm6774_vm13 = vmor %vm6772_vm12, %vm6773_vm11 }
 0x950   :  { %v6768_v21 = vmul.f32 %v10667_v36, %v6767_v41  ;;  %5833 = vmatmul.bf16.gmra.mxu2 %v16709_v55  ;;  %v6641_v41 = vmul.f32 %v6569_v9, %v15388_v51  ;;  %v6689_v55 = vmul.f32 %v6569_v9, %v15407_v20  ;;  %v16711_v51 = vld [vmem:[#allocation54_spill] sm:$0xff] }
 0x951   :  { %v15492_v50 = vadd.f32 %v5733_v35, %v5685_v0 }
 0x952   :  { %v5589_v28 = vpop.f32.mrf.mxu0  ;;  %v6769_v61 = vmul.f32 0.5, %v6768_v21  ;;  %5882 = vmatmul.bf16.gmra.mxu3 %v16710_v19  ;;  %v5687_v0 = vpop.f32.mrf.mxu3 }
 0x953   :  { %v5590_v14 = vadd.f32 %v5589_v28, %v15351_v46  ;;  %v15498_v63 = vadd.f32 %v6088_v15, %v15492_v50  ;;  %v5736_v35 = vpop.f32.mrf.mxu1  ;;  %v5638_v52 = vpop.f32.mrf.mxu2  ;;  %v6633_v15 = vmul.f32 %v6569_v9, %v15385_v58  ;;  %v6681_v58 = vmul.f32 %v6569_v9, %v15404_v23 }
 0x954   :  { %5784 = vmatmul.bf16.gmra.mxu0 %v16708_v62  ;;  %v6770_v28 = vsub.f32 1.5, %v6769_v61  ;;  %v6705_v61 = vmul.f32 %v6569_v9, %v15412_v45 }
 0x955   :  { %v5639_v60 = vadd.f32 %v5638_v52, %v5590_v14  ;;  %v6697_v14 = vmul.f32 %v6569_v9, %v15410_v1 }
 0x956   :  { %v6771_v62 = vmul.f32 %v10667_v36, %v6770_v28  ;;  %5931 = vmatmul.bf16.gmra.mxu1 %v16711_v51 }
 0x957   :  { %v5688_v21 = vadd.f32 %v5687_v0, %v5639_v60 }
 0x958   :  { %v6775_v7 = vsel %vm6774_vm13, %v10667_v36, %v6771_v62 }
 0x959   :  { %v15520_v19 = vadd.f32 %v5736_v35, %v5688_v21  ;;  %v6801_v32 = vmul.f32 %v6775_v7, %v6585_v22  ;;  %v6809_v23 = vmul.f32 %v6775_v7, %v6593_v57  ;;  %v6817_v52 = vmul.f32 %v6775_v7, %v6601_v17 }
 0x95a   :  { %v5591_v49 = vpop.f32.mrf.mxu0  ;;  %v6825_v20 = vmul.f32 %v6775_v7, %v6609_v34  ;;  %v6833_v28 = vmul.f32 %v6775_v7, %v6617_v37  ;;  %v6841_v1 = vmul.f32 %v6775_v7, %v6625_v30  ;;  %v6849_v60 = vmul.f32 %v6775_v7, %v6633_v15  ;;  %v15527_v25 = vpop.f32.mrf.mxu3 }
 0x95b   :  { %v15523_v47 = vadd.f32 %v5591_v49, %v15351_v46  ;;  %v6857_v45 = vmul.f32 %v6775_v7, %v6641_v41  ;;  %v6865_v9 = vmul.f32 %v6775_v7, %v6649_v24  ;;  %v6873_v0 = vmul.f32 %v6775_v7, %v6657_v16  ;;  %v15525_v36 = vpop.f32.mrf.mxu1  ;;  %v5640_v62 = vpop.f32.mrf.mxu2 }
 0x95c   :  { %v6881_v40 = vmul.f32 %v6775_v7, %v6665_v59  ;;  %v6889_v51 = vmul.f32 %v6775_v7, %v6673_v3  ;;  %v6897_v35 = vmul.f32 %v6775_v7, %v6681_v58  ;;  %v6905_v21 = vmul.f32 %v6775_v7, %v6689_v55  ;;  %v16713_v58 = vld [vmem:[#allocation35_spill] sm:$0xff] }
 0x95d   :  { %v6913_v29 = vmul.f32 %v6775_v7, %v6697_v14  ;;  %v6921_v49 = vmul.f32 %v6775_v7, %v6705_v61  ;;  %v6946_v57 = vadd.f32 %v6930_v33, %v6801_v32  ;;  %v6954_v17 = vadd.f32 %v6930_v33, %v6809_v23  ;;  %v16715_v32 = vld [vmem:[#allocation55_spill] sm:$0xff] }
 0x95e   :  { %v6962_v34 = vadd.f32 %v6930_v33, %v6817_v52  ;;  %v6970_v37 = vadd.f32 %v6930_v33, %v6825_v20  ;;  %v6978_v30 = vadd.f32 %v6930_v33, %v6833_v28  ;;  %v6986_v15 = vadd.f32 %v6930_v33, %v6841_v1 }
 0x95f   :  { %v6994_v41 = vadd.f32 %v6930_v33, %v6849_v60  ;;  %v7002_v24 = vadd.f32 %v6930_v33, %v6857_v45  ;;  %v7010_v16 = vadd.f32 %v6930_v33, %v6865_v9  ;;  %v7018_v59 = vadd.f32 %v6930_v33, %v6873_v0 }
 0x960   :  { %v7026_v3 = vadd.f32 %v6930_v33, %v6881_v40  ;;  %v7034_v44 = vadd.f32 %v6930_v33, %v6889_v51  ;;  %v7042_v55 = vadd.f32 %v6930_v33, %v6897_v35  ;;  %v7050_v14 = vadd.f32 %v6930_v33, %v6905_v21  ;;  %5838 = vmatmul.bf16.gmra.mxu2 %v16714_v13 }
 0x961   :  { %v7058_v61 = vadd.f32 %v6930_v33, %v6913_v29  ;;  %v7066_v7 = vadd.f32 %v6930_v33, %v6921_v49  ;;  %vm7074_vm14 = vcmp.gt.f32.partialorder %v6946_v57, 0.0  ;;  %vm7082_vm15 = vcmp.gt.f32.partialorder %v6954_v17, 0.0  ;;  %v16717_v49 = vld [vmem:[#allocation56_spill] sm:$0xff] }
 0x962   :  { %v15529_v22 = vpop.f32.mrf.mxu0  ;;  %vm7090_vm0 = vcmp.gt.f32.partialorder %v6962_v34, 0.0  ;;  %vm7098_vm1 = vcmp.gt.f32.partialorder %v6970_v37, 0.0  ;;  %vm7106_vm2 = vcmp.gt.f32.partialorder %v6978_v30, 0.0  ;;  %vm7114_vm3 = vcmp.gt.f32.partialorder %v6986_v15, 0.0  ;;  %5887 = vmatmul.bf16.gmra.mxu3 %v16715_v32  ;;  %v5692_v13 = vpop.f32.mrf.mxu3 }
 0x963   :  { %vm7122_vm4 = vcmp.gt.f32.partialorder %v6994_v41, 0.0  ;;  %vm7130_vm5 = vcmp.gt.f32.partialorder %v7002_v24, 0.0  ;;  %vm7138_vm6 = vcmp.gt.f32.partialorder %v7010_v16, 0.0  ;;  %vm7146_vm8 = vcmp.gt.f32.partialorder %v7018_v59, 0.0  ;;  %v5741_v40 = vpop.f32.mrf.mxu1  ;;  %v5643_v23 = vpop.f32.mrf.mxu2 }
 0x964   :  { %5789 = vmatmul.bf16.gmra.mxu0 %v16713_v58  ;;  %vm7154_vm9 = vcmp.gt.f32.partialorder %v7026_v3, 0.0  ;;  %vm7162_vm7 = vcmp.gt.f32.partialorder %v7034_v44, 0.0  ;;  %vm7170_vm10 = vcmp.gt.f32.partialorder %v7042_v55, 0.0  ;;  %vm7178_vm11 = vcmp.gt.f32.partialorder %v7050_v14, 0.0 }
 0x965   :  { %vm7186_vm12 = vcmp.gt.f32.partialorder %v7058_v61, 0.0  ;;  %vm7194_vm13 = vcmp.gt.f32.partialorder %v7066_v7, 0.0  ;;  %v7202_v33 = vmul.f32 0.2, %v6946_v57  ;;  %v7210_v52 = vmul.f32 0.2, %v6954_v17 }
 0x966   :  { %v7218_v20 = vmul.f32 0.2, %v6962_v34  ;;  %v6090_v28 = vadd.f32 %v15498_v63, %v15520_v19  ;;  %v7226_v1 = vmul.f32 0.2, %v6970_v37  ;;  %v7234_v60 = vmul.f32 0.2, %v6978_v30  ;;  %5936 = vmatmul.bf16.gmra.mxu1 %v16717_v49 }
 0x967   :  { %v7242_v45 = vmul.f32 0.2, %v6986_v15  ;;  %v5641_v9 = vadd.f32 %v5640_v62, %v15523_v47  ;;  %v7250_v0 = vmul.f32 0.2, %v6994_v41  ;;  %v7258_v51 = vmul.f32 0.2, %v7002_v24 }
 0x968   :  { %v7266_v35 = vmul.f32 0.2, %v7010_v16  ;;  %v15538_v21 = vsel %vm7074_vm14, %v6946_v57, %v7202_v33  ;;  %v7274_v58 = vmul.f32 0.2, %v7018_v59  ;;  %v7282_v32 = vmul.f32 0.2, %v7026_v3 }
 0x969   :  { %16716 = vst [vmem:[#allocation37_spill] sm:$0xff] %v15538_v21  ;;  %v7290_v11 = vmul.f32 0.2, %v7034_v44  ;;  %v15542_v10 = vsel %vm7082_vm15, %v6954_v17, %v7210_v52  ;;  %v7298_v63 = vmul.f32 0.2, %v7042_v55  ;;  %v15545_v43 = vsel %vm7090_vm0, %v6962_v34, %v7218_v20 }
 0x96a   :  { %v5596_v29 = vpop.f32.mrf.mxu0  ;;  %16718 = vst [vmem:[#allocation21_spill] sm:$0xff] %v15542_v10  ;;  %v7306_v42 = vmul.f32 0.2, %v7050_v14  ;;  %v7314_v53 = vmul.f32 0.2, %v7058_v61  ;;  %v15548_v62 = vsel %vm7098_vm1, %v6970_v37, %v7226_v1  ;;  %v15551_v57 = vsel %vm7106_vm2, %v6978_v30, %v7234_v60  ;;  %v5694_v1 = vpop.f32.mrf.mxu3 }
 0x96b   :  { %16719 = vst [vmem:[#allocation38_spill] sm:$0xff] %v15545_v43  ;;  %v7322_v47 = vmul.f32 0.2, %v7066_v7  ;;  %v15554_v33 = vsel %vm7114_vm3, %v6986_v15, %v7242_v45  ;;  %v15557_v49 = vsel %vm7122_vm4, %v6994_v41, %v7250_v0  ;;  %v15560_v17 = vsel %vm7130_vm5, %v7002_v24, %v7258_v51  ;;  %v5743_v37 = vpop.f32.mrf.mxu1  ;;  %v5645_v20 = vpop.f32.mrf.mxu2 }
 0x96c   :  { %16720 = vst [vmem:[#allocation30_spill] sm:$0xff] %v15548_v62  ;;  %v15563_v52 = vsel %vm7138_vm6, %v7010_v16, %v7266_v35  ;;  %v15566_v34 = vsel %vm7146_vm8, %v7018_v59, %v7274_v58  ;;  %v15569_v30 = vsel %vm7154_vm9, %v7026_v3, %v7282_v32  ;;  %v15572_v15 = vsel %vm7162_vm7, %v7034_v44, %v7290_v11 }
 0x96d   :  { %16721 = vst [vmem:[#allocation32_spill] sm:$0xff] %v15551_v57  ;;  %v15575_v41 = vsel %vm7170_vm10, %v7042_v55, %v7298_v63  ;;  %v15578_v24 = vsel %vm7178_vm11, %v7050_v14, %v7306_v42  ;;  %v15581_v60 = vsel %vm7186_vm12, %v7058_v61, %v7314_v53  ;;  %v15584_v59 = vsel %vm7194_vm13, %v7066_v7, %v7322_v47 }
 0x96e   :  { %16722 = vst [vmem:[#allocation39_spill] sm:$0xff] %v15554_v33  ;;  %v5690_v3 = vadd.f32 %v15527_v25, %v5641_v9  ;;  %v5595_v11 = vadd.f32 %v15529_v22, %v15351_v46  ;;  %v5597_v44 = vadd.f32 %v5596_v29, %v15351_v46 }
 0x96f   :  { %16723 = vst [vmem:[#allocation43_spill] sm:$0xff] %v15557_v49 }
 0x970   :  { %16724 = vst [vmem:[#allocation58_spill] sm:$0xff] %v15560_v17  ;;  %v15591_v55 = vadd.f32 %v15525_v36, %v5690_v3  ;;  %v5644_v42 = vadd.f32 %v5643_v23, %v5595_v11  ;;  %v5646_v14 = vadd.f32 %v5645_v20, %v5597_v44  ;;  %5843 = vmatmul.bf16.gmra.mxu2 %v12990_v8 }
 0x971   :  { %16725 = vst [vmem:[#allocation22_spill] sm:$0xff] %v15563_v52 }
 0x972   :  { %16726 = vst [vmem:[#allocation29_spill] sm:$0xff] %v15566_v34  ;;  %v5599_v16 = vpop.f32.mrf.mxu0  ;;  %v6091_v61 = vadd.f32 %v6090_v28, %v15591_v55  ;;  %v5693_v7 = vadd.f32 %v5692_v13, %v5644_v42  ;;  %v5695_v25 = vadd.f32 %v5694_v1, %v5646_v14  ;;  %5892 = vmatmul.bf16.gmra.mxu3 %v12994_v31  ;;  %v15601_v31 = vperm.slane %v16455_v18, 7 }
 0x973   :  { %16727 = vst [vmem:[#allocation31_spill] sm:$0xff] %v15569_v30  ;;  %v5600_v53 = vadd.f32 %v5599_v16, %v15351_v46  ;;  %v5648_v22 = vpop.f32.mrf.mxu2  ;;  %v5746_v9 = vpop.f32.mrf.mxu1 }
 0x974   :  { %16728 = vst [vmem:[#allocation33_spill] sm:$0xff] %v15572_v15  ;;  %5794 = vmatmul.bf16.gmra.mxu0 %v12986_v12  ;;  %v5742_v45 = vadd.f32 %v5741_v40, %v5693_v7  ;;  %v5744_v29 = vadd.f32 %v5743_v37, %v5695_v25  ;;  %v5697_v51 = vpop.f32.mrf.mxu3  ;;  %v16733_v15 = vld [vmem:[#allocation57_spill] sm:$0xff] }
 0x975   :  { %16729 = vst [vmem:[#allocation40_spill] sm:$0xff] %v15575_v41  ;;  %v5649_v36 = vadd.f32 %v5648_v22, %v5600_v53  ;;  %v6570_v30 = vperm.slane %v16733_v15, 6 }
 0x976   :  { %16730 = vst [vmem:[#allocation44_spill] sm:$0xff] %v15578_v24  ;;  %v6092_v23 = vadd.f32 %v6091_v61, %v5742_v45  ;;  %5941 = vmatmul.bf16.gmra.mxu1 %v16454_v26 }
 0x977   :  { %16731 = vst [vmem:[#allocation34_spill] sm:$0xff] %v15581_v60  ;;  %v5698_v35 = vadd.f32 %v5697_v51, %v5649_v36 }
 0x978   :  { %16732 = vst [vmem:[#allocation47_spill] sm:$0xff] %v15584_v59  ;;  %v6093_v12 = vadd.f32 %v6092_v23, %v5744_v29 }
 0x979   :  { %v5747_v58 = vadd.f32 %v5746_v9, %v5698_v35 }
 0x97a   :  { %v5601_v0 = vpop.f32.mrf.mxu0 }
 0x97b   :  { %v5602_v8 = vadd.f32 %v5601_v0, %v15351_v46  ;;  %v6094_v28 = vadd.f32 %v6093_v12, %v5747_v58  ;;  %v5650_v13 = vpop.f32.mrf.mxu2  ;;  %v5748_v32 = vpop.f32.mrf.mxu1 }
 0x97c   :  { %v5699_v47 = vpop.f32.mrf.mxu3 }
 0x97d   :  { %v5651_v40 = vadd.f32 %v5650_v13, %v5602_v8 }
 0x97f   :  { %v5700_v37 = vadd.f32 %v5699_v47, %v5651_v40 }
 0x981   :  { %v5749_v1 = vadd.f32 %v5748_v32, %v5700_v37 }
 0x982   :  { %v5760_v63 = vpop.f32.mrf.mxu0 }
 0x983   :  { %v5761_v20 = vadd.f32 %v5760_v63, %v15601_v31  ;;  %v6095_v16 = vadd.f32 %v6094_v28, %v5749_v1  ;;  %v5809_v3 = vpop.f32.mrf.mxu2  ;;  %v5907_v26 = vpop.f32.mrf.mxu1 }
 0x985   :  { %v5810_v11 = vadd.f32 %v5809_v3, %v5761_v20  ;;  %v6096_v42 = vrot.slane %v6095_v16, 4  ;;  %v5858_v46 = vpop.f32.mrf.mxu3 }
 0x987   :  { %v6097_v14 = vadd.f32 %v6096_v42, %v6095_v16  ;;  %v5859_v53 = vadd.f32 %v5858_v46, %v5810_v11 }
 0x989   :  { %v6098_v61 = vrot.slane %v6097_v14, 2  ;;  %v15604_v7 = vadd.f32 %v5907_v26, %v5859_v53 }
 0x98a   :  { %v5762_v44 = vpop.f32.mrf.mxu0 }
 0x98b   :  { %v5763_v18 = vadd.f32 %v5762_v44, %v15601_v31  ;;  %v6099_v25 = vadd.f32 %v6098_v61, %v6097_v14  ;;  %v5811_v22 = vpop.f32.mrf.mxu2  ;;  %v5909_v9 = vpop.f32.mrf.mxu1 }
 0x98d   :  { %v5812_v36 = vadd.f32 %v5811_v22, %v5763_v18  ;;  %v6100_v23 = vrot.slane %v6099_v25, 1  ;;  %v5860_v51 = vpop.f32.mrf.mxu3 }
 0x98f   :  { %v6101_v12 = vadd.f32 %v6100_v23, %v6099_v25  ;;  %v5861_v35 = vadd.f32 %v5860_v51, %v5812_v36 }
 0x991   :  { %v6129_v8 = vmul.f32 %v6101_v12, %v16428_v4  ;;  %v15608_v28 = vadd.f32 %v5909_v9, %v5861_v35 }
 0x992   :  { %v5765_v0 = vpop.f32.mrf.mxu0 }
 0x993   :  { %v15611_v13 = vsub.f32 %v15358_v6, %v6129_v8  ;;  %v15614_v32 = vsub.f32 %v15362_v39, %v6129_v8  ;;  %v15617_v40 = vsub.f32 %v15436_v5, %v6129_v8  ;;  %v15620_v63 = vsub.f32 %v15442_v2, %v6129_v8  ;;  %v5814_v47 = vpop.f32.mrf.mxu2  ;;  %v5912_v39 = vpop.f32.mrf.mxu1 }
 0x994   :  { %v15623_v37 = vsub.f32 %v15450_v48, %v6129_v8  ;;  %v15626_v20 = vsub.f32 %v15462_v27, %v6129_v8  ;;  %v15629_v16 = vsub.f32 %v15474_v56, %v6129_v8  ;;  %v15632_v6 = vsub.f32 %v15478_v54, %v6129_v8 }
 0x995   :  { %v15635_v5 = vsub.f32 %v15487_v38, %v6129_v8  ;;  %v15638_v2 = vsub.f32 %v15492_v50, %v6129_v8  ;;  %v15641_v48 = vsub.f32 %v15520_v19, %v6129_v8  ;;  %v15644_v27 = vsub.f32 %v15591_v55, %v6129_v8  ;;  %v5863_v44 = vpop.f32.mrf.mxu3 }
 0x996   :  { %v15646_v26 = vsub.f32 %v5742_v45, %v6129_v8  ;;  %v15648_v56 = vsub.f32 %v5744_v29, %v6129_v8  ;;  %v15650_v54 = vsub.f32 %v5747_v58, %v6129_v8  ;;  %v15652_v11 = vsub.f32 %v5749_v1, %v6129_v8 }
 0x997   :  { %v6265_v38 = vmul.f32 %v15611_v13, %v15611_v13  ;;  %v6273_v50 = vmul.f32 %v15614_v32, %v15614_v32  ;;  %v6281_v19 = vmul.f32 %v15617_v40, %v15617_v40  ;;  %v5766_v45 = vadd.f32 %v5765_v0, %v15601_v31 }
 0x998   :  { %v6289_v58 = vmul.f32 %v15620_v63, %v15620_v63  ;;  %v6297_v53 = vmul.f32 %v15623_v37, %v15623_v37  ;;  %v6102_v18 = vadd.f32 %v15608_v28, %v15604_v7  ;;  %v6305_v36 = vmul.f32 %v15626_v20, %v15626_v20 }
 0x999   :  { %v6513_v55 = vadd.f32 %v6273_v50, %v6265_v38  ;;  %v5815_v25 = vadd.f32 %v5814_v47, %v5766_v45  ;;  %v6313_v12 = vmul.f32 %v15629_v16, %v15629_v16  ;;  %v6602_v33 = vmul.f32 %v6570_v30, %v15617_v40 }
 0x99a   :  { %v5767_v3 = vpop.f32.mrf.mxu0 }
 0x99b   :  { %v5816_v42 = vpop.f32.mrf.mxu2  ;;  %v5914_v29 = vpop.f32.mrf.mxu1  ;;  %v6514_v1 = vadd.f32 %v6513_v55, %v6281_v19  ;;  %v5768_v22 = vadd.f32 %v5767_v3, %v15601_v31  ;;  %v5864_v23 = vadd.f32 %v5863_v44, %v5815_v25  ;;  %v6321_v3 = vmul.f32 %v15632_v6, %v15632_v6 }
 0x99d   :  { %v5865_v14 = vpop.f32.mrf.mxu3  ;;  %v6515_v61 = vadd.f32 %v6514_v1, %v6289_v58  ;;  %v5817_v51 = vadd.f32 %v5816_v42, %v5768_v22  ;;  %v15673_v38 = vadd.f32 %v5912_v39, %v5864_v23  ;;  %v6329_v42 = vmul.f32 %v15635_v5, %v15635_v5 }
 0x99e   :  { %v6345_v22 = vmul.f32 %v15641_v48, %v15641_v48  ;;  %v6353_v23 = vmul.f32 %v15644_v27, %v15644_v27 }
 0x99f   :  { %v6516_v0 = vadd.f32 %v6515_v61, %v6297_v53  ;;  %v5866_v50 = vadd.f32 %v5865_v14, %v5817_v51  ;;  %v6337_v14 = vmul.f32 %v15638_v2, %v15638_v2 }
 0x9a1   :  { %v6517_v35 = vadd.f32 %v6516_v0, %v6305_v36  ;;  %v15678_v58 = vadd.f32 %v5914_v29, %v5866_v50  ;;  %v6369_v50 = vmul.f32 %v15648_v56, %v15648_v56 }
 0x9a2   :  { %v5770_v46 = vpop.f32.mrf.mxu0 }
 0x9a3   :  { %v5771_v9 = vadd.f32 %v5770_v46, %v15601_v31  ;;  %v5819_v8 = vpop.f32.mrf.mxu2  ;;  %v5917_v19 = vpop.f32.mrf.mxu1  ;;  %v6518_v45 = vadd.f32 %v6517_v35, %v6313_v12  ;;  %v6103_v46 = vadd.f32 %v6102_v18, %v15673_v38  ;;  %v6361_v35 = vmul.f32 %v15646_v26, %v15646_v26 }
 0x9a5   :  { %v5820_v47 = vadd.f32 %v5819_v8, %v5771_v9  ;;  %v5868_v44 = vpop.f32.mrf.mxu3  ;;  %v6519_v1 = vadd.f32 %v6518_v45, %v6321_v3  ;;  %v6104_v39 = vadd.f32 %v6103_v46, %v15678_v58 }
 0x9a7   :  { %v5869_v53 = vadd.f32 %v5868_v44, %v5820_v47  ;;  %v6520_v61 = vadd.f32 %v6519_v1, %v6329_v42  ;;  %v6377_v47 = vmul.f32 %v15650_v54, %v15650_v54  ;;  %v6385_v42 = vmul.f32 %v15652_v11, %v15652_v11 }
 0x9a9   :  { %v15685_v25 = vadd.f32 %v5917_v19, %v5869_v53  ;;  %v6521_v18 = vadd.f32 %v6520_v61, %v6337_v14 }
 0x9aa   :  { %v5772_v55 = vpop.f32.mrf.mxu0 }
 0x9ab   :  { %v15690_v29 = vadd.f32 %v6104_v39, %v15685_v25  ;;  %v5821_v9 = vpop.f32.mrf.mxu2  ;;  %v15692_v36 = vpop.f32.mrf.mxu1  ;;  %v6522_v51 = vadd.f32 %v6521_v18, %v6345_v22 }
 0x9ad   :  { %v5870_v12 = vpop.f32.mrf.mxu3  ;;  %v6523_v8 = vadd.f32 %v6522_v51, %v6353_v23 }
 0x9af   :  { %v6524_v19 = vadd.f32 %v6523_v8, %v6361_v35 }
 0x9b1   :  { %v6525_v3 = vadd.f32 %v6524_v19, %v6369_v50 }
 0x9b2   :  { %v5775_v0 = vpop.f32.mrf.mxu0 }
 0x9b3   :  { %v5824_v45 = vpop.f32.mrf.mxu2  ;;  %v15702_v46 = vpop.f32.mrf.mxu1  ;;  %v6526_v1 = vadd.f32 %v6525_v3, %v6377_v47 }
 0x9b5   :  { %v5873_v53 = vpop.f32.mrf.mxu3  ;;  %v6527_v39 = vadd.f32 %v6526_v1, %v6385_v42  ;;  %v5773_v42 = vadd.f32 %v5772_v55, %v15601_v31  ;;  %v6594_v55 = vmul.f32 %v6570_v30, %v15614_v32 }
 0x9b7   :  { %v6528_v14 = vrot.slane %v6527_v39, 4 }
 0x9b9   :  { %v6529_v61 = vadd.f32 %v6528_v14, %v6527_v39 }
 0x9ba   :  { %v5777_v44 = vpop.f32.mrf.mxu0 }
 0x9bb   :  { %v5826_v22 = vpop.f32.mrf.mxu2  ;;  %v15706_v18 = vpop.f32.mrf.mxu1  ;;  %v6530_v51 = vrot.slane %v6529_v61, 2  ;;  %v5778_v34 = vadd.f32 %v5777_v44, %v15601_v31  ;;  %v6634_v44 = vmul.f32 %v6570_v30, %v15629_v16 }
 0x9bd   :  { %v5875_v35 = vpop.f32.mrf.mxu3  ;;  %v6531_v8 = vadd.f32 %v6530_v51, %v6529_v61  ;;  %v5822_v61 = vadd.f32 %v5821_v9, %v5773_v42  ;;  %v5776_v51 = vadd.f32 %v5775_v0, %v15601_v31  ;;  %v5827_v49 = vadd.f32 %v5826_v22, %v5778_v34 }
 0x9be   :  { %v6610_v9 = vmul.f32 %v6570_v30, %v15620_v63  ;;  %v6618_v0 = vmul.f32 %v6570_v30, %v15623_v37  ;;  %v6626_v42 = vmul.f32 %v6570_v30, %v15626_v20  ;;  %v6650_v34 = vmul.f32 %v6570_v30, %v15635_v5 }
 0x9bf   :  { %v6532_v50 = vrot.slane %v6531_v8, 1  ;;  %v5825_v17 = vadd.f32 %v5824_v45, %v5776_v51  ;;  %v6658_v63 = vmul.f32 %v6570_v30, %v15638_v2  ;;  %v5876_v16 = vadd.f32 %v5875_v35, %v5827_v49  ;;  %v16734_v49 = vld [vmem:[#allocation41_spill] sm:$0xff] }
 0x9c0   :  { %v6682_v5 = vmul.f32 %v6570_v30, %v15646_v26  ;;  %v6698_v2 = vmul.f32 %v6570_v30, %v15650_v54 }
 0x9c1   :  { %v6533_v19 = vadd.f32 %v6532_v50, %v6531_v8  ;;  %v5874_v20 = vadd.f32 %v5873_v53, %v5825_v17 }
 0x9c2   :  { %v5780_v23 = vpop.f32.mrf.mxu0 }
 0x9c3   :  { %v5829_v59 = vpop.f32.mrf.mxu2  ;;  %v15708_v60 = vpop.f32.mrf.mxu1  ;;  %v6561_v41 = vmul.f32 %v6533_v19, %v16428_v4  ;;  %v6586_v19 = vmul.f32 %v6570_v30, %v15611_v13  ;;  %v5781_v62 = vadd.f32 %v5780_v23, %v15601_v31  ;;  %v6642_v13 = vmul.f32 %v6570_v30, %v15632_v6 }
 0x9c5   :  { %v5878_v47 = vpop.f32.mrf.mxu3  ;;  %v6714_v3 = vadd.f32 0.8, %v6561_v41  ;;  %v5871_v41 = vadd.f32 %v5870_v12, %v5822_v61  ;;  %v5830_v22 = vadd.f32 %v5829_v59, %v5781_v62  ;;  %v6690_v61 = vmul.f32 %v6570_v30, %v15648_v56 }
 0x9c6   :  { %v6931_v62 = vperm.slane %v16734_v49, 6 }
 0x9c7   :  { %10668 = vrsqrt.f32 %v6714_v3  ;;  %v15736_v37 = vadd.f32 %v15692_v36, %v5871_v41  ;;  %v6706_v36 = vmul.f32 %v6570_v30, %v15652_v11  ;;  %vm6782_vm15 = vweird.f32 %v6714_v3 }
 0x9c8   :  { %v15757_v56 = vadd.f32 %v5878_v47, %v5830_v22 }
 0x9c9   :  { %v15749_v59 = vadd.f32 %v15690_v29, %v15736_v37 }
 0x9ca   :  { %v5782_v24 = vpop.f32.mrf.mxu0 }
 0x9cb   :  { %v5831_v1 = vpop.f32.mrf.mxu2  ;;  %v15712_v39 = vpop.f32.mrf.mxu1  ;;  %v5783_v40 = vadd.f32 %v5782_v24, %v15601_v31  ;;  %v6674_v24 = vmul.f32 %v6570_v30, %v15644_v27  ;;  %v15755_v27 = vadd.f32 %v15706_v18, %v5876_v16 }
 0x9cd   :  { %v5880_v8 = vpop.f32.mrf.mxu3  ;;  %v10669_v50 = vpop.eup %10668  ;;  %v5832_v6 = vadd.f32 %v5831_v1, %v5783_v40 }
 0x9ce   :  { %v6777_v52 = vmul.f32 %v10669_v50, %v6714_v3  ;;  %vm6783_vm14 = vweird.f32 %v10669_v50 }
 0x9cf   :  { %vm6784_vm0 = vmor %vm6782_vm15, %vm6783_vm14  ;;  %v15759_v54 = vadd.f32 %v5880_v8, %v5832_v6 }
 0x9d0   :  { %v6778_v57 = vmul.f32 %v10669_v50, %v6777_v52 }
 0x9d2   :  { %v5785_v14 = vpop.f32.mrf.mxu0  ;;  %v6779_v32 = vmul.f32 0.5, %v6778_v57  ;;  %v6666_v57 = vmul.f32 %v6570_v30, %v15641_v48  ;;  %v15752_v48 = vadd.f32 %v15702_v46, %v5874_v20 }
 0x9d3   :  { %v15725_v43 = vpop.f32.mrf.mxu2  ;;  %v15730_v52 = vpop.f32.mrf.mxu1  ;;  %v5786_v30 = vadd.f32 %v5785_v14, %v15601_v31 }
 0x9d4   :  { %v6780_v45 = vsub.f32 1.5, %v6779_v32 }
 0x9d5   :  { %v15738_v23 = vpop.f32.mrf.mxu3 }
 0x9d6   :  { %v6781_v17 = vmul.f32 %v10669_v50, %v6780_v45 }
 0x9d8   :  { %v6785_v26 = vsel %vm6784_vm0, %v10669_v50, %v6781_v17 }
 0x9d9   :  { %v6802_v11 = vmul.f32 %v6785_v26, %v6586_v19  ;;  %v6810_v53 = vmul.f32 %v6785_v26, %v6594_v55  ;;  %v6818_v35 = vmul.f32 %v6785_v26, %v6602_v33  ;;  %v6826_v3 = vmul.f32 %v6785_v26, %v6610_v9 }
 0x9da   :  { %v15732_v12 = vpop.f32.mrf.mxu0  ;;  %v6834_v29 = vmul.f32 %v6785_v26, %v6618_v0  ;;  %v6842_v51 = vmul.f32 %v6785_v26, %v6626_v42  ;;  %v6850_v46 = vmul.f32 %v6785_v26, %v6634_v44  ;;  %v6858_v41 = vmul.f32 %v6785_v26, %v6642_v13 }
 0x9db   :  { %v15762_v1 = vpop.f32.mrf.mxu2  ;;  %v15764_v32 = vpop.f32.mrf.mxu1  ;;  %v6866_v47 = vmul.f32 %v6785_v26, %v6650_v34  ;;  %v6874_v50 = vmul.f32 %v6785_v26, %v6658_v63  ;;  %v6882_v8 = vmul.f32 %v6785_v26, %v6666_v57  ;;  %v6890_v40 = vmul.f32 %v6785_v26, %v6674_v24 }
 0x9dc   :  { %v6898_v20 = vmul.f32 %v6785_v26, %v6682_v5  ;;  %v6906_v14 = vmul.f32 %v6785_v26, %v6690_v61  ;;  %v6914_v19 = vmul.f32 %v6785_v26, %v6698_v2  ;;  %v6922_v55 = vmul.f32 %v6785_v26, %v6706_v36 }
 0x9dd   :  { %v15768_v33 = vpop.f32.mrf.mxu3  ;;  %v6947_v9 = vadd.f32 %v6931_v62, %v6802_v11  ;;  %v6955_v16 = vadd.f32 %v6931_v62, %v6810_v53  ;;  %v6963_v0 = vadd.f32 %v6931_v62, %v6818_v35  ;;  %v6971_v42 = vadd.f32 %v6931_v62, %v6826_v3 }
 0x9de   :  { %v6979_v44 = vadd.f32 %v6931_v62, %v6834_v29  ;;  %v6987_v13 = vadd.f32 %v6931_v62, %v6842_v51  ;;  %v6995_v45 = vadd.f32 %v6931_v62, %v6850_v46  ;;  %v7003_v22 = vadd.f32 %v6931_v62, %v6858_v41 }
 0x9df   :  { %v7011_v6 = vadd.f32 %v6931_v62, %v6866_v47  ;;  %v7019_v17 = vadd.f32 %v6931_v62, %v6874_v50  ;;  %v7027_v34 = vadd.f32 %v6931_v62, %v6882_v8  ;;  %v7035_v63 = vadd.f32 %v6931_v62, %v6890_v40 }
 0x9e0   :  { %v7043_v57 = vadd.f32 %v6931_v62, %v6898_v20  ;;  %v7051_v24 = vadd.f32 %v6931_v62, %v6906_v14  ;;  %v7059_v5 = vadd.f32 %v6931_v62, %v6914_v19  ;;  %v7067_v61 = vadd.f32 %v6931_v62, %v6922_v55 }
 0x9e1   :  { %vm7075_vm1 = vcmp.gt.f32.partialorder %v6947_v9, 0.0  ;;  %vm7083_vm2 = vcmp.gt.f32.partialorder %v6955_v16, 0.0  ;;  %vm7091_vm3 = vcmp.gt.f32.partialorder %v6963_v0, 0.0  ;;  %vm7099_vm4 = vcmp.gt.f32.partialorder %v6971_v42, 0.0 }
 0x9e2   :  { %v15766_v18 = vpop.f32.mrf.mxu0  ;;  %vm7107_vm5 = vcmp.gt.f32.partialorder %v6979_v44, 0.0  ;;  %vm7115_vm6 = vcmp.gt.f32.partialorder %v6987_v13, 0.0  ;;  %vm7123_vm8 = vcmp.gt.f32.partialorder %v6995_v45, 0.0  ;;  %vm7131_vm9 = vcmp.gt.f32.partialorder %v7003_v22, 0.0 }
 0x9e3   :  { %v5839_v2 = vpop.f32.mrf.mxu2  ;;  %v15770_v36 = vpop.f32.mrf.mxu1  ;;  %vm7139_vm7 = vcmp.gt.f32.partialorder %v7011_v6, 0.0  ;;  %vm7147_vm10 = vcmp.gt.f32.partialorder %v7019_v17, 0.0  ;;  %vm7155_vm11 = vcmp.gt.f32.partialorder %v7027_v34, 0.0  ;;  %vm7163_vm12 = vcmp.gt.f32.partialorder %v7035_v63, 0.0 }
 0x9e4   :  { %vm7171_vm13 = vcmp.gt.f32.partialorder %v7043_v57, 0.0  ;;  %vm7179_vm14 = vcmp.gt.f32.partialorder %v7051_v24, 0.0  ;;  %vm7187_vm15 = vcmp.gt.f32.partialorder %v7059_v5, 0.0  ;;  %vm7195_vm0 = vcmp.gt.f32.partialorder %v7067_v61, 0.0 }
 0x9e5   :  { %v5888_v62 = vpop.f32.mrf.mxu3  ;;  %v7203_v11 = vmul.f32 0.2, %v6947_v9  ;;  %v7211_v53 = vmul.f32 0.2, %v6955_v16  ;;  %v7219_v35 = vmul.f32 0.2, %v6963_v0  ;;  %v5835_v3 = vadd.f32 %v15725_v43, %v5786_v30 }
 0x9e6   :  { %v7227_v29 = vmul.f32 0.2, %v6971_v42  ;;  %v7235_v51 = vmul.f32 0.2, %v6979_v44  ;;  %v7243_v46 = vmul.f32 0.2, %v6987_v13  ;;  %v5788_v41 = vadd.f32 %v15732_v12, %v15601_v31 }
 0x9e7   :  { %v7251_v47 = vmul.f32 0.2, %v6995_v45  ;;  %v7259_v50 = vmul.f32 0.2, %v7003_v22  ;;  %v7267_v8 = vmul.f32 0.2, %v7011_v6  ;;  %v15776_v40 = vsel %vm7075_vm1, %v6947_v9, %v7203_v11 }
 0x9e8   :  { %16735 = vst [vmem:[#allocation48_spill] sm:$0xff] %v15776_v40  ;;  %v7275_v20 = vmul.f32 0.2, %v7019_v17  ;;  %v7283_v14 = vmul.f32 0.2, %v7027_v34  ;;  %v15779_v55 = vsel %vm7083_vm2, %v6955_v16, %v7211_v53  ;;  %v15782_v21 = vsel %vm7091_vm3, %v6963_v0, %v7219_v35 }
 0x9e9   :  { %v7291_v19 = vmul.f32 0.2, %v7035_v63  ;;  %v7299_v10 = vmul.f32 0.2, %v7043_v57  ;;  %v7307_v43 = vmul.f32 0.2, %v7051_v24  ;;  %v15785_v15 = vsel %vm7099_vm4, %v6971_v42, %v7227_v29 }
 0x9ea   :  { %v5792_v26 = vpop.f32.mrf.mxu0  ;;  %v7315_v30 = vmul.f32 0.2, %v7059_v5  ;;  %v7323_v12 = vmul.f32 0.2, %v7067_v61  ;;  %v15788_v9 = vsel %vm7107_vm5, %v6979_v44, %v7235_v51  ;;  %v15791_v11 = vsel %vm7115_vm6, %v6987_v13, %v7243_v46 }
 0x9eb   :  { %v5841_v49 = vpop.f32.mrf.mxu2  ;;  %v5939_v40 = vpop.f32.mrf.mxu1  ;;  %v15794_v16 = vsel %vm7123_vm8, %v6995_v45, %v7251_v47  ;;  %v15797_v53 = vsel %vm7131_vm9, %v7003_v22, %v7259_v50  ;;  %v15800_v0 = vsel %vm7139_vm7, %v7011_v6, %v7267_v8  ;;  %v15803_v35 = vsel %vm7147_vm10, %v7019_v17, %v7275_v20 }
 0x9ec   :  { %v15806_v44 = vsel %vm7155_vm11, %v7027_v34, %v7283_v14  ;;  %v15809_v13 = vsel %vm7163_vm12, %v7035_v63, %v7291_v19  ;;  %v15812_v29 = vsel %vm7171_vm13, %v7043_v57, %v7299_v10  ;;  %v15815_v45 = vsel %vm7179_vm14, %v7051_v24, %v7307_v43 }
 0x9ed   :  { %v5890_v22 = vpop.f32.mrf.mxu3  ;;  %v15818_v6 = vsel %vm7187_vm15, %v7059_v5, %v7315_v30  ;;  %v15821_v17 = vsel %vm7195_vm0, %v7067_v61, %v7323_v12  ;;  %v5837_v51 = vadd.f32 %v15762_v1, %v5788_v41  ;;  %v5791_v34 = vadd.f32 %v15766_v18, %v15601_v31 }
 0x9ee   :  { %v6107_v63 = vadd.f32 %v15749_v59, %v15752_v48  ;;  %v5928_v10 = vadd.f32 %v15708_v60, %v15757_v56  ;;  %v5884_v57 = vadd.f32 %v15738_v23, %v5835_v3  ;;  %v5793_v5 = vadd.f32 %v5792_v26, %v15601_v31 }
 0x9ef   :  { %v5840_v24 = vadd.f32 %v5839_v2, %v5791_v34  ;;  %v5930_v1 = vadd.f32 %v15712_v39, %v15759_v54  ;;  %v5886_v18 = vadd.f32 %v15768_v33, %v5837_v51 }
 0x9f0   :  { %v6108_v61 = vadd.f32 %v6107_v63, %v15755_v27  ;;  %v5842_v41 = vadd.f32 %v5841_v49, %v5793_v5  ;;  %v5933_v50 = vadd.f32 %v15730_v52, %v5884_v57 }
 0x9f1   :  { %v5889_v60 = vadd.f32 %v5888_v62, %v5840_v24  ;;  %v5935_v26 = vadd.f32 %v15764_v32, %v5886_v18 }
 0x9f2   :  { %v5795_v42 = vpop.f32.mrf.mxu0  ;;  %v6109_v59 = vadd.f32 %v6108_v61, %v5928_v10  ;;  %v5891_v8 = vadd.f32 %v5890_v22, %v5842_v41 }
 0x9f3   :  { %v5796_v46 = vadd.f32 %v5795_v42, %v15601_v31  ;;  %v5844_v47 = vpop.f32.mrf.mxu2  ;;  %v5942_v23 = vpop.f32.mrf.mxu1  ;;  %v5938_v19 = vadd.f32 %v15770_v36, %v5889_v60 }
 0x9f4   :  { %v6110_v3 = vadd.f32 %v6109_v59, %v5930_v1  ;;  %v5940_v33 = vadd.f32 %v5939_v40, %v5891_v8 }
 0x9f5   :  { %v5845_v56 = vadd.f32 %v5844_v47, %v5796_v46  ;;  %v5893_v2 = vpop.f32.mrf.mxu3 }
 0x9f6   :  { %v6111_v14 = vadd.f32 %v6110_v3, %v5933_v50 }
 0x9f7   :  { %v5894_v39 = vadd.f32 %v5893_v2, %v5845_v56 }
 0x9f8   :  { %v6112_v49 = vadd.f32 %v6111_v14, %v5935_v26 }
 0x9f9   :  { %v5943_v62 = vadd.f32 %v5942_v23, %v5894_v39 }
 0x9fa   :  { %v5797_v20 = vpop.f32.mrf.mxu0  ;;  %v6113_v52 = vadd.f32 %v6112_v49, %v5938_v19 }
 0x9fb   :  { %v5798_v54 = vadd.f32 %v5797_v20, %v15601_v31  ;;  %v5846_v43 = vpop.f32.mrf.mxu2  ;;  %v5944_v34 = vpop.f32.mrf.mxu1 }
 0x9fc   :  { %v6114_v42 = vadd.f32 %v6113_v52, %v5940_v33 }
 0x9fd   :  { %v5847_v30 = vadd.f32 %v5846_v43, %v5798_v54  ;;  %v5895_v12 = vpop.f32.mrf.mxu3 }
 0x9fe   :  { %v6115_v63 = vadd.f32 %v6114_v42, %v5943_v62 }
 0x9ff   :  { %v5896_v51 = vadd.f32 %v5895_v12, %v5847_v30 }
 0xa01   :  { %v5945_v32 = vadd.f32 %v5944_v34, %v5896_v51 }
 0xa03   :  { %v6116_v22 = vadd.f32 %v6115_v63, %v5945_v32 }
 0xa05   :  { %v6117_v57 = vrot.slane %v6116_v22, 4 }
 0xa07   :  { %v6118_v24 = vadd.f32 %v6117_v57, %v6116_v22 }
 0xa09   :  { %v6119_v5 = vrot.slane %v6118_v24, 2 }
 0xa0b   :  { %v6120_v36 = vadd.f32 %v6119_v5, %v6118_v24 }
 0xa0d   :  { %v6121_v46 = vrot.slane %v6120_v36, 1 }
 0xa0f   :  { %v6122_v61 = vadd.f32 %v6121_v46, %v6120_v36 }
 0xa11   :  { %v6130_v31 = vmul.f32 %v6122_v61, %v16428_v4 }
 0xa13   :  { %v6138_v40 = vsub.f32 %v15604_v7, %v6130_v31  ;;  %v6146_v18 = vsub.f32 %v15608_v28, %v6130_v31  ;;  %v6154_v41 = vsub.f32 %v15673_v38, %v6130_v31  ;;  %v6162_v47 = vsub.f32 %v15678_v58, %v6130_v31 }
 0xa14   :  { %v15847_v59 = vsub.f32 %v15685_v25, %v6130_v31  ;;  %v6178_v3 = vsub.f32 %v15736_v37, %v6130_v31  ;;  %v6186_v14 = vsub.f32 %v15752_v48, %v6130_v31  ;;  %v6194_v38 = vsub.f32 %v15755_v27, %v6130_v31 }
 0xa15   :  { %v6266_v60 = vmul.f32 %v6138_v40, %v6138_v40  ;;  %v6274_v56 = vmul.f32 %v6146_v18, %v6146_v18  ;;  %v6282_v23 = vmul.f32 %v6154_v41, %v6154_v41  ;;  %v6290_v8 = vmul.f32 %v6162_v47, %v6162_v47 }
 0xa16   :  { %v6298_v7 = vmul.f32 %v15847_v59, %v15847_v59  ;;  %v6306_v58 = vmul.f32 %v6178_v3, %v6178_v3  ;;  %v6202_v25 = vsub.f32 %v5928_v10, %v6130_v31  ;;  %v6314_v54 = vmul.f32 %v6186_v14, %v6186_v14 }
 0xa17   :  { %v6534_v2 = vadd.f32 %v6274_v56, %v6266_v60  ;;  %v6210_v43 = vsub.f32 %v5930_v1, %v6130_v31  ;;  %v6322_v30 = vmul.f32 %v6194_v38, %v6194_v38  ;;  %v6218_v12 = vsub.f32 %v5933_v50, %v6130_v31 }
 0xa18   :  { %v6330_v37 = vmul.f32 %v6202_v25, %v6202_v25  ;;  %v6226_v51 = vsub.f32 %v5935_v26, %v6130_v31  ;;  %v6234_v63 = vsub.f32 %v5938_v19, %v6130_v31  ;;  %v6242_v24 = vsub.f32 %v5940_v33, %v6130_v31 }
 0xa19   :  { %v6535_v20 = vadd.f32 %v6534_v2, %v6282_v23  ;;  %v6338_v34 = vmul.f32 %v6210_v43, %v6210_v43  ;;  %v6346_v22 = vmul.f32 %v6218_v12, %v6218_v12  ;;  %v6250_v36 = vsub.f32 %v5943_v62, %v6130_v31 }
 0xa1a   :  { %v6354_v5 = vmul.f32 %v6226_v51, %v6226_v51  ;;  %v6362_v46 = vmul.f32 %v6234_v63, %v6234_v63  ;;  %v6258_v61 = vsub.f32 %v5945_v32, %v6130_v31  ;;  %v6370_v60 = vmul.f32 %v6242_v24, %v6242_v24  ;;  %v16736_v32 = vld [vmem:[#allocation57_spill] sm:$0xff] }
 0xa1b   :  { %v6536_v28 = vadd.f32 %v6535_v20, %v6290_v8  ;;  %v6378_v56 = vmul.f32 %v6250_v36, %v6250_v36  ;;  %v6571_v31 = vperm.slane %v16736_v32, 7 }
 0xa1c   :  { %v6386_v50 = vmul.f32 %v6258_v61, %v6258_v61 }
 0xa1d   :  { %v6537_v39 = vadd.f32 %v6536_v28, %v6298_v7 }
 0xa1f   :  { %v6538_v49 = vadd.f32 %v6537_v39, %v6306_v58 }
 0xa21   :  { %v6539_v52 = vadd.f32 %v6538_v49, %v6314_v54 }
 0xa23   :  { %v6540_v42 = vadd.f32 %v6539_v52, %v6322_v30  ;;  %v6587_v52 = vmul.f32 %v6571_v31, %v6138_v40  ;;  %v6699_v40 = vmul.f32 %v6571_v31, %v6250_v36 }
 0xa25   :  { %v6541_v48 = vadd.f32 %v6540_v42, %v6330_v37  ;;  %v6595_v37 = vmul.f32 %v6571_v31, %v6146_v18  ;;  %v6603_v42 = vmul.f32 %v6571_v31, %v6154_v41  ;;  %v6707_v18 = vmul.f32 %v6571_v31, %v6258_v61 }
 0xa27   :  { %v6542_v57 = vadd.f32 %v6541_v48, %v6338_v34  ;;  %v6611_v34 = vmul.f32 %v6571_v31, %v6162_v47  ;;  %v16737_v47 = vld [vmem:[#allocation41_spill] sm:$0xff] }
 0xa29   :  { %v6543_v27 = vadd.f32 %v6542_v57, %v6346_v22  ;;  %v6619_v22 = vmul.f32 %v6571_v31, %v15847_v59  ;;  %v6627_v57 = vmul.f32 %v6571_v31, %v6178_v3 }
 0xa2b   :  { %v6544_v10 = vadd.f32 %v6543_v27, %v6354_v5  ;;  %v6635_v5 = vmul.f32 %v6571_v31, %v6186_v14  ;;  %v6643_v27 = vmul.f32 %v6571_v31, %v6194_v38 }
 0xa2d   :  { %v6545_v1 = vadd.f32 %v6544_v10, %v6362_v46  ;;  %v6659_v46 = vmul.f32 %v6571_v31, %v6210_v43 }
 0xa2f   :  { %v6546_v23 = vadd.f32 %v6545_v1, %v6370_v60  ;;  %v6667_v60 = vmul.f32 %v6571_v31, %v6218_v12  ;;  %v6675_v1 = vmul.f32 %v6571_v31, %v6226_v51 }
 0xa31   :  { %v6547_v2 = vadd.f32 %v6546_v23, %v6378_v56  ;;  %v6683_v56 = vmul.f32 %v6571_v31, %v6234_v63  ;;  %v6691_v23 = vmul.f32 %v6571_v31, %v6242_v24 }
 0xa33   :  { %v6548_v8 = vadd.f32 %v6547_v2, %v6386_v50  ;;  %v6932_v50 = vperm.slane %v16737_v47, 7 }
 0xa35   :  { %v6549_v26 = vrot.slane %v6548_v8, 4 }
 0xa37   :  { %v6550_v20 = vadd.f32 %v6549_v26, %v6548_v8 }
 0xa39   :  { %v6551_v7 = vrot.slane %v6550_v20, 2 }
 0xa3b   :  { %v6552_v19 = vadd.f32 %v6551_v7, %v6550_v20 }
 0xa3d   :  { %v6553_v28 = vrot.slane %v6552_v19, 1 }
 0xa3f   :  { %v6554_v58 = vadd.f32 %v6553_v28, %v6552_v19 }
 0xa41   :  { %v6562_v33 = vmul.f32 %v6554_v58, %v16428_v4  ;;  %v6651_v4 = vmul.f32 %v6571_v31, %v6202_v25 }
 0xa43   :  { %v6715_v39 = vadd.f32 0.8, %v6562_v33 }
 0xa45   :  { %10670 = vrsqrt.f32 %v6715_v39  ;;  %vm6792_vm2 = vweird.f32 %v6715_v39 }
 0xa4b   :  { %v10671_v62 = vpop.eup %10670 }
 0xa4c   :  { %v6787_v54 = vmul.f32 %v10671_v62, %v6715_v39  ;;  %vm6793_vm1 = vweird.f32 %v10671_v62 }
 0xa4d   :  { %vm6794_vm3 = vmor %vm6792_vm2, %vm6793_vm1 }
 0xa4e   :  { %v6788_v49 = vmul.f32 %v10671_v62, %v6787_v54 }
 0xa50   :  { %v6789_v30 = vmul.f32 0.5, %v6788_v49 }
 0xa52   :  { %v6790_v48 = vsub.f32 1.5, %v6789_v30 }
 0xa54   :  { %v6791_v10 = vmul.f32 %v10671_v62, %v6790_v48 }
 0xa56   :  { %v6795_v41 = vsel %vm6794_vm3, %v10671_v62, %v6791_v10 }
 0xa57   :  { %v6803_v2 = vmul.f32 %v6795_v41, %v6587_v52  ;;  %v6811_v8 = vmul.f32 %v6795_v41, %v6595_v37  ;;  %v6819_v59 = vmul.f32 %v6795_v41, %v6603_v42  ;;  %v6827_v3 = vmul.f32 %v6795_v41, %v6611_v34 }
 0xa58   :  { %v6835_v14 = vmul.f32 %v6795_v41, %v6619_v22  ;;  %v6843_v38 = vmul.f32 %v6795_v41, %v6627_v57  ;;  %v6851_v25 = vmul.f32 %v6795_v41, %v6635_v5  ;;  %v6859_v43 = vmul.f32 %v6795_v41, %v6643_v27 }
 0xa59   :  { %v6867_v26 = vmul.f32 %v6795_v41, %v6651_v4  ;;  %v6875_v20 = vmul.f32 %v6795_v41, %v6659_v46  ;;  %v6883_v12 = vmul.f32 %v6795_v41, %v6667_v60  ;;  %v6891_v51 = vmul.f32 %v6795_v41, %v6675_v1 }
 0xa5a   :  { %v6899_v63 = vmul.f32 %v6795_v41, %v6683_v56  ;;  %v6907_v24 = vmul.f32 %v6795_v41, %v6691_v23  ;;  %v6915_v7 = vmul.f32 %v6795_v41, %v6699_v40  ;;  %v6923_v36 = vmul.f32 %v6795_v41, %v6707_v18 }
 0xa5b   :  { %v6948_v61 = vadd.f32 %v6932_v50, %v6803_v2  ;;  %v6956_v19 = vadd.f32 %v6932_v50, %v6811_v8  ;;  %v6964_v28 = vadd.f32 %v6932_v50, %v6819_v59  ;;  %v6972_v58 = vadd.f32 %v6932_v50, %v6827_v3 }
 0xa5c   :  { %v6980_v33 = vadd.f32 %v6932_v50, %v6835_v14  ;;  %v6988_v39 = vadd.f32 %v6932_v50, %v6843_v38  ;;  %v6996_v62 = vadd.f32 %v6932_v50, %v6851_v25  ;;  %v7004_v54 = vadd.f32 %v6932_v50, %v6859_v43 }
 0xa5d   :  { %v7012_v32 = vadd.f32 %v6932_v50, %v6867_v26  ;;  %v7020_v31 = vadd.f32 %v6932_v50, %v6875_v20  ;;  %v7028_v49 = vadd.f32 %v6932_v50, %v6883_v12  ;;  %v7036_v30 = vadd.f32 %v6932_v50, %v6891_v51 }
 0xa5e   :  { %v7044_v52 = vadd.f32 %v6932_v50, %v6899_v63  ;;  %v7052_v37 = vadd.f32 %v6932_v50, %v6907_v24  ;;  %v7060_v42 = vadd.f32 %v6932_v50, %v6915_v7  ;;  %v7068_v34 = vadd.f32 %v6932_v50, %v6923_v36 }
 0xa5f   :  { %vm7076_vm4 = vcmp.gt.f32.partialorder %v6948_v61, 0.0  ;;  %vm7084_vm5 = vcmp.gt.f32.partialorder %v6956_v19, 0.0  ;;  %vm7092_vm6 = vcmp.gt.f32.partialorder %v6964_v28, 0.0  ;;  %vm7100_vm8 = vcmp.gt.f32.partialorder %v6972_v58, 0.0 }
 0xa60   :  { %vm7108_vm9 = vcmp.gt.f32.partialorder %v6980_v33, 0.0  ;;  %vm7116_vm7 = vcmp.gt.f32.partialorder %v6988_v39, 0.0  ;;  %vm7124_vm10 = vcmp.gt.f32.partialorder %v6996_v62, 0.0  ;;  %vm7132_vm11 = vcmp.gt.f32.partialorder %v7004_v54, 0.0 }
 0xa61   :  { %vm7140_vm12 = vcmp.gt.f32.partialorder %v7012_v32, 0.0  ;;  %vm7148_vm13 = vcmp.gt.f32.partialorder %v7020_v31, 0.0  ;;  %vm7156_vm14 = vcmp.gt.f32.partialorder %v7028_v49, 0.0  ;;  %vm7164_vm15 = vcmp.gt.f32.partialorder %v7036_v30, 0.0 }
 0xa62   :  { %vm7172_vm0 = vcmp.gt.f32.partialorder %v7044_v52, 0.0  ;;  %vm7180_vm1 = vcmp.gt.f32.partialorder %v7052_v37, 0.0  ;;  %vm7188_vm2 = vcmp.gt.f32.partialorder %v7060_v42, 0.0  ;;  %vm7196_vm3 = vcmp.gt.f32.partialorder %v7068_v34, 0.0 }
 0xa63   :  { %v7204_v48 = vmul.f32 0.2, %v6948_v61  ;;  %v7212_v22 = vmul.f32 0.2, %v6956_v19  ;;  %v7220_v57 = vmul.f32 0.2, %v6964_v28 }
 0xa64   :  { %v7228_v5 = vmul.f32 0.2, %v6972_v58  ;;  %v7236_v27 = vmul.f32 0.2, %v6980_v33  ;;  %v7244_v4 = vmul.f32 0.2, %v6988_v39 }
 0xa65   :  { %v7252_v46 = vmul.f32 0.2, %v6996_v62  ;;  %v7260_v10 = vmul.f32 0.2, %v7004_v54  ;;  %v7268_v60 = vmul.f32 0.2, %v7012_v32  ;;  %v15859_v1 = vsel %vm7076_vm4, %v6948_v61, %v7204_v48 }
 0xa66   :  { %v7276_v56 = vmul.f32 0.2, %v7020_v31  ;;  %v7284_v23 = vmul.f32 0.2, %v7028_v49  ;;  %v7292_v40 = vmul.f32 0.2, %v7036_v30  ;;  %v15862_v18 = vsel %vm7084_vm5, %v6956_v19, %v7212_v22 }
 0xa67   :  { %v7300_v41 = vmul.f32 0.2, %v7044_v52  ;;  %v7308_v47 = vmul.f32 0.2, %v7052_v37  ;;  %v7316_v50 = vmul.f32 0.2, %v7060_v42  ;;  %v15865_v2 = vsel %vm7092_vm6, %v6964_v28, %v7220_v57 }
 0xa68   :  { %v7324_v8 = vmul.f32 0.2, %v7068_v34  ;;  %v15868_v59 = vsel %vm7100_vm8, %v6972_v58, %v7228_v5  ;;  %v15871_v3 = vsel %vm7108_vm9, %v6980_v33, %v7236_v27  ;;  %v15874_v14 = vsel %vm7116_vm7, %v6988_v39, %v7244_v4 }
 0xa69   :  { %v15877_v38 = vsel %vm7124_vm10, %v6996_v62, %v7252_v46  ;;  %v15880_v25 = vsel %vm7132_vm11, %v7004_v54, %v7260_v10  ;;  %v15883_v43 = vsel %vm7140_vm12, %v7012_v32, %v7268_v60  ;;  %v15886_v26 = vsel %vm7148_vm13, %v7020_v31, %v7276_v56 }
 0xa6a   :  { %v15889_v20 = vsel %vm7156_vm14, %v7028_v49, %v7284_v23  ;;  %v15892_v12 = vsel %vm7164_vm15, %v7036_v30, %v7292_v40  ;;  %v15895_v51 = vsel %vm7172_vm0, %v7044_v52, %v7300_v41  ;;  %v15898_v63 = vsel %vm7180_vm1, %v7052_v37, %v7308_v47 }
 0xa6b   :  { %v15901_v24 = vsel %vm7188_vm2, %v7060_v42, %v7316_v50  ;;  %v15904_v7 = vsel %vm7196_vm3, %v7068_v34, %v7324_v8 }
 0xa6c   :  { %10830 = dma.done.wait [#allocation4 + $0x1], 8192 }
 0xa6d   :  { %10831 = vsyncadd [#allocation4 + $0x1], 4294959104  ;;  %v10559_v36 = vld [vmem:[#allocation3 + $0x38] sm:$0xff]  ;;  %v10558_v58 = vld [vmem:[#allocation3 + $0x30] sm:$0xff] }
 0xa6e   :  { %v10567_v61 = vld [vmem:[#allocation3 + $0x78] sm:$0xff]  ;;  %8034 = vmatpush.bf16.msra.mxu0 %v10559_v36  ;;  %v10566_v33 = vld [vmem:[#allocation3 + $0x70] sm:$0xff]  ;;  %v10557_v54 = vld [vmem:[#allocation3 + $0x28] sm:$0xff] }
 0xa6f   :  { %v10575_v19 = vld [vmem:[#allocation3 + $0xb8] sm:$0xff]  ;;  %8083 = vmatpush.bf16.msra.mxu2 %v10567_v61  ;;  %v10574_v39 = vld [vmem:[#allocation3 + $0xb0] sm:$0xff]  ;;  %v10565_v32 = vld [vmem:[#allocation3 + $0x68] sm:$0xff] }
 0xa70   :  { %v10583_v28 = vld [vmem:[#allocation3 + $0xf8] sm:$0xff]  ;;  %8132 = vmatpush.bf16.msra.mxu3 %v10575_v19  ;;  %v10582_v62 = vld [vmem:[#allocation3 + $0xf0] sm:$0xff]  ;;  %v10573_v31 = vld [vmem:[#allocation3 + $0xa8] sm:$0xff] }
 0xa71   :  { %8181 = vmatpush.bf16.msra.mxu1 %v10583_v28  ;;  %v10581_v49 = vld [vmem:[#allocation3 + $0xe8] sm:$0xff]  ;;  %v10556_v30 = vld [vmem:[#allocation3 + $0x20] sm:$0xff]  ;;  %v10555_v34 = vld [vmem:[#allocation3 + $0x18] sm:$0xff] }
 0xa72   :  { %8035 = vmatpush.bf16.msra.mxu0 %v10558_v58  ;;  %v10564_v52 = vld [vmem:[#allocation3 + $0x60] sm:$0xff]  ;;  %v10563_v48 = vld [vmem:[#allocation3 + $0x58] sm:$0xff]  ;;  %v10554_v5 = vld [vmem:[#allocation3 + $0x10] sm:$0xff] }
 0xa73   :  { %8084 = vmatpush.bf16.msra.mxu2 %v10566_v33  ;;  %v10572_v37 = vld [vmem:[#allocation3 + $0xa0] sm:$0xff]  ;;  %v10571_v22 = vld [vmem:[#allocation3 + $0x98] sm:$0xff]  ;;  %v10562_v27 = vld [vmem:[#allocation3 + $0x50] sm:$0xff] }
 0xa74   :  { %8133 = vmatpush.bf16.msra.mxu3 %v10574_v39  ;;  %v10580_v42 = vld [vmem:[#allocation3 + $0xe0] sm:$0xff]  ;;  %v10579_v57 = vld [vmem:[#allocation3 + $0xd8] sm:$0xff]  ;;  %v10570_v4 = vld [vmem:[#allocation3 + $0x90] sm:$0xff] }
 0xa75   :  { %8182 = vmatpush.bf16.msra.mxu1 %v10582_v62  ;;  %v10578_v46 = vld [vmem:[#allocation3 + $0xd0] sm:$0xff]  ;;  %v10553_v10 = vld [vmem:[#allocation3 + $0x8] sm:$0xff]  ;;  %v10552_v40 = vld [vmem:[#allocation3] sm:$0xff] }
 0xa76   :  { %8036 = vmatpush.bf16.msra.mxu0 %v10557_v54  ;;  %v10561_v60 = vld [vmem:[#allocation3 + $0x48] sm:$0xff]  ;;  %v10560_v41 = vld [vmem:[#allocation3 + $0x40] sm:$0xff]  ;;  %v10599_v8 = vld [vmem:[#allocation3 + $0x178] sm:$0xff] }
 0xa77   :  { %8085 = vmatpush.bf16.msra.mxu2 %v10565_v32  ;;  %v10569_v56 = vld [vmem:[#allocation3 + $0x88] sm:$0xff]  ;;  %v10568_v47 = vld [vmem:[#allocation3 + $0x80] sm:$0xff]  ;;  %v10607_v36 = vld [vmem:[#allocation3 + $0x1b8] sm:$0xff] }
 0xa78   :  { %8134 = vmatpush.bf16.msra.mxu3 %v10573_v31  ;;  %v10577_v23 = vld [vmem:[#allocation3 + $0xc8] sm:$0xff]  ;;  %v10576_v50 = vld [vmem:[#allocation3 + $0xc0] sm:$0xff]  ;;  %v16738_v61 = vld [vmem:[#allocation59_spill] sm:$0xff] }
 0xa79   :  { %8183 = vmatpush.bf16.msra.mxu1 %v10581_v49  ;;  %v16739_v19 = vld [vmem:[#allocation60_spill] sm:$0xff]  ;;  %v16740_v58 = vld [vmem:[#allocation42_spill] sm:$0xff]  ;;  %v16741_v33 = vld [vmem:[#allocation69_spill] sm:$0xff] }
 0xa7a   :  { %8037 = vmatpush.bf16.msra.mxu0 %v10556_v30  ;;  %v7585_v28 = vpack.c.bf16 %v16739_v19, %v16738_v61  ;;  %v7586_v39 = vpack.c.bf16 %v16741_v33, %v16740_v58  ;;  %v16742_v62 = vld [vmem:[#allocation85_spill] sm:$0xff]  ;;  %v16743_v54 = vld [vmem:[#allocation86_spill] sm:$0xff]  ;;  %v16744_v31 = vld [vmem:[#allocation84_spill] sm:$0xff] }
 0xa7b   :  { %8086 = vmatpush.bf16.msra.mxu2 %v10564_v52  ;;  %v7587_v32 = vpack.c.bf16 %v16743_v54, %v16742_v62  ;;  %v16745_v49 = vld [vmem:[#allocation101_spill] sm:$0xff]  ;;  %v10591_v52 = vld [vmem:[#allocation3 + $0x138] sm:$0xff]  ;;  %v10596_v19 = vld [vmem:[#allocation3 + $0x160] sm:$0xff] }
 0xa7c   :  { %8135 = vmatpush.bf16.msra.mxu3 %v10572_v37  ;;  %v7588_v30 = vpack.c.bf16 %v16745_v49, %v16744_v31  ;;  %v10615_v37 = vld [vmem:[#allocation3 + $0x1f8] sm:$0xff]  ;;  %v10588_v58 = vld [vmem:[#allocation3 + $0x120] sm:$0xff]  ;;  %v16757_v31 = vld [vmem:[#allocation73_spill] sm:$0xff] }
 0xa7d   :  { %8184 = vmatpush.bf16.msra.mxu1 %v10580_v42  ;;  %v10598_v42 = vld [vmem:[#allocation3 + $0x170] sm:$0xff]  ;;  %v10612_v33 = vld [vmem:[#allocation3 + $0x1e0] sm:$0xff] }
 0xa7e   :  { %8038 = vmatpush.bf16.msra.mxu0 %v10555_v34  ;;  %v10606_v34 = vld [vmem:[#allocation3 + $0x1b0] sm:$0xff]  ;;  %v16755_v62 = vld [vmem:[#allocation24_spill] sm:$0xff] }
 0xa7f   :  { %8087 = vmatpush.bf16.msra.mxu2 %v10563_v48  ;;  %v10590_v48 = vld [vmem:[#allocation3 + $0x130] sm:$0xff] }
 0xa80   :  { %8136 = vmatpush.bf16.msra.mxu3 %v10571_v22  ;;  %v10614_v22 = vld [vmem:[#allocation3 + $0x1f0] sm:$0xff] }
 0xa81   :  { %8185 = vmatpush.bf16.msra.mxu1 %v10579_v57  ;;  %v10597_v57 = vld [vmem:[#allocation3 + $0x168] sm:$0xff] }
 0xa82   :  { %8039 = vmatpush.bf16.msra.mxu0 %v10554_v5  ;;  %v10605_v5 = vld [vmem:[#allocation3 + $0x1a8] sm:$0xff] }
 0xa83   :  { %8088 = vmatpush.bf16.msra.mxu2 %v10562_v27  ;;  %v10589_v27 = vld [vmem:[#allocation3 + $0x128] sm:$0xff] }
 0xa84   :  { %8137 = vmatpush.bf16.msra.mxu3 %v10570_v4  ;;  %v10613_v4 = vld [vmem:[#allocation3 + $0x1e8] sm:$0xff] }
 0xa85   :  { %8186 = vmatpush.bf16.msra.mxu1 %v10578_v46  ;;  %v16746_v46 = vld [vmem:[#allocation45_spill] sm:$0xff] }
 0xa86   :  { %8040 = vmatpush.bf16.msra.mxu0 %v10553_v10  ;;  %v16747_v10 = vld [vmem:[#allocation46_spill] sm:$0xff] }
 0xa87   :  { %8089 = vmatpush.bf16.msra.mxu2 %v10561_v60  ;;  %v7593_v60 = vpack.c.bf16 %v16747_v10, %v16746_v46  ;;  %v16763_v46 = vld [vmem:[#allocation20_spill] sm:$0xff] }
 0xa88   :  { %8138 = vmatpush.bf16.msra.mxu3 %v10569_v56  ;;  %v16748_v56 = vld [vmem:[#allocation70_spill] sm:$0xff] }
 0xa89   :  { %8187 = vmatpush.bf16.msra.mxu1 %v10577_v23  ;;  %v16749_v23 = vld [vmem:[#allocation71_spill] sm:$0xff] }
 0xa8a   :  { %8041 = vmatpush.bf16.msra.mxu0 %v10552_v40  ;;  %v7594_v40 = vpack.c.bf16 %v16749_v23, %v16748_v56  ;;  %v16765_v56 = vld [vmem:[#allocation75_spill] sm:$0xff] }
 0xa8b   :  { %8090 = vmatpush.bf16.msra.mxu2 %v10560_v41  ;;  %v16750_v41 = vld [vmem:[#allocation87_spill] sm:$0xff] }
 0xa8c   :  { %8139 = vmatpush.bf16.msra.mxu3 %v10568_v47  ;;  %v16751_v47 = vld [vmem:[#allocation88_spill] sm:$0xff] }
 0xa8d   :  { %8188 = vmatpush.bf16.msra.mxu1 %v10576_v50  ;;  %8042 = vmatmul.bf16.vlgmr.msra.gmra.mxu0 %v7585_v28  ;;  %v7595_v50 = vpack.c.bf16 %v16751_v47, %v16750_v41  ;;  %v10604_v28 = vld [vmem:[#allocation3 + $0x1a0] sm:$0xff] }
 0xa8e   :  { %8091 = vmatmul.bf16.vlgmr.msra.gmra.mxu2 %v7586_v39  ;;  %8230 = vmatpush.bf16.msrb.mxu0 %v10591_v52  ;;  %v16754_v39 = vld [vmem:[#allocation23_spill] sm:$0xff]  ;;  %v16759_v52 = vld [vmem:[#allocation90_spill] sm:$0xff]  ;;  %v16767_v41 = vld [vmem:[#allocation92_spill] sm:$0xff] }
 0xa8f   :  { %8279 = vmatpush.bf16.msrb.mxu2 %v10599_v8  ;;  %8140 = vmatmul.bf16.vlgmr.msra.gmra.mxu3 %v7587_v32  ;;  %v16752_v8 = vld [vmem:[#allocation102_spill] sm:$0xff]  ;;  %v7601_v54 = vpack.c.bf16 %v16755_v62, %v16754_v39  ;;  %v16756_v32 = vld [vmem:[#allocation72_spill] sm:$0xff] }
 0xa90   :  { %8328 = vmatpush.bf16.msrb.mxu3 %v10607_v36  ;;  %8189 = vmatmul.bf16.vlgmr.msra.gmra.mxu1 %v7588_v30  ;;  %v16753_v36 = vld [vmem:[#allocation103_spill] sm:$0xff]  ;;  %v7602_v49 = vpack.c.bf16 %v16757_v31, %v16756_v32  ;;  %v16758_v30 = vld [vmem:[#allocation89_spill] sm:$0xff]  ;;  %v16771_v39 = vld [vmem:[#allocation62_spill] sm:$0xff] }
 0xa91   :  { %8377 = vmatpush.bf16.msrb.mxu1 %v10615_v37  ;;  %v7596_v61 = vpack.c.bf16 %v16753_v36, %v16752_v8  ;;  %v7603_v37 = vpack.c.bf16 %v16759_v52, %v16758_v30  ;;  %v16769_v8 = vld [vmem:[#allocation107_spill] sm:$0xff]  ;;  %v16773_v32 = vld [vmem:[#allocation77_spill] sm:$0xff]  ;;  %v16775_v30 = vld [vmem:[#allocation94_spill] sm:$0xff] }
 0xa92   :  { %8231 = vmatpush.bf16.msrb.mxu0 %v10590_v48 }
 0xa93   :  { %8280 = vmatpush.bf16.msrb.mxu2 %v10598_v42  ;;  %v16760_v42 = vld [vmem:[#allocation104_spill] sm:$0xff] }
 0xa94   :  { %8329 = vmatpush.bf16.msrb.mxu3 %v10606_v34  ;;  %v16761_v34 = vld [vmem:[#allocation105_spill] sm:$0xff] }
 0xa95   :  { %8378 = vmatpush.bf16.msrb.mxu1 %v10614_v22  ;;  %v7604_v48 = vpack.c.bf16 %v16761_v34, %v16760_v42  ;;  %v10595_v22 = vld [vmem:[#allocation3 + $0x158] sm:$0xff]  ;;  %v16777_v42 = vld [vmem:[#allocation109_spill] sm:$0xff] }
 0xa96   :  { %8232 = vmatpush.bf16.msrb.mxu0 %v10589_v27  ;;  %v10611_v27 = vld [vmem:[#allocation3 + $0x1d8] sm:$0xff] }
 0xa97   :  { %8281 = vmatpush.bf16.msrb.mxu2 %v10597_v57  ;;  %v10603_v57 = vld [vmem:[#allocation3 + $0x198] sm:$0xff] }
 0xa98   :  { %8330 = vmatpush.bf16.msrb.mxu3 %v10605_v5  ;;  %v10587_v5 = vld [vmem:[#allocation3 + $0x118] sm:$0xff] }
 0xa99   :  { %8379 = vmatpush.bf16.msrb.mxu1 %v10613_v4  ;;  %v16762_v4 = vld [vmem:[#allocation25_spill] sm:$0xff] }
 0xa9a   :  { %8233 = vmatpush.bf16.msrb.mxu0 %v10588_v58  ;;  %v7609_v10 = vpack.c.bf16 %v16763_v46, %v16762_v4  ;;  %v10610_v58 = vld [vmem:[#allocation3 + $0x1d0] sm:$0xff]  ;;  %v16779_v4 = vld [vmem:[#allocation64_spill] sm:$0xff] }
 0xa9b   :  { %8282 = vmatpush.bf16.msrb.mxu2 %v10596_v19  ;;  %v10602_v19 = vld [vmem:[#allocation3 + $0x190] sm:$0xff] }
 0xa9c   :  { %8331 = vmatpush.bf16.msrb.mxu3 %v10604_v28  ;;  %v10586_v28 = vld [vmem:[#allocation3 + $0x110] sm:$0xff] }
 0xa9d   :  { %8047 = vmatmul.bf16.gmra.mxu0 %v7593_v60  ;;  %8380 = vmatpush.bf16.msrb.mxu1 %v10612_v33  ;;  %v16764_v60 = vld [vmem:[#allocation74_spill] sm:$0xff]  ;;  %v16770_v33 = vld [vmem:[#allocation61_spill] sm:$0xff] }
 0xa9e   :  { %8096 = vmatmul.bf16.gmra.mxu2 %v7594_v40  ;;  %8234 = vmatpush.bf16.msrb.mxu0 %v10587_v5  ;;  %v7610_v23 = vpack.c.bf16 %v16765_v56, %v16764_v60  ;;  %v16766_v40 = vld [vmem:[#allocation91_spill] sm:$0xff]  ;;  %v7617_v62 = vpack.c.bf16 %v16771_v39, %v16770_v33  ;;  %v10609_v5 = vld [vmem:[#allocation3 + $0x1c8] sm:$0xff]  ;;  %v16787_v33 = vld [vmem:[#allocation66_spill] sm:$0xff] }
 0xa9f   :  { %8145 = vmatmul.bf16.gmra.mxu3 %v7595_v50  ;;  %8283 = vmatpush.bf16.msrb.mxu2 %v10595_v22  ;;  %v7611_v47 = vpack.c.bf16 %v16767_v41, %v16766_v40  ;;  %v16768_v50 = vld [vmem:[#allocation106_spill] sm:$0xff]  ;;  %v10601_v22 = vld [vmem:[#allocation3 + $0x188] sm:$0xff]  ;;  %v16781_v60 = vld [vmem:[#allocation79_spill] sm:$0xff] }
 0xaa0   :  { %8194 = vmatmul.bf16.gmra.mxu1 %v7596_v61  ;;  %8332 = vmatpush.bf16.msrb.mxu3 %v10603_v57  ;;  %v7612_v36 = vpack.c.bf16 %v16769_v8, %v16768_v50  ;;  %v10594_v61 = vld [vmem:[#allocation3 + $0x150] sm:$0xff]  ;;  %v10585_v57 = vld [vmem:[#allocation3 + $0x108] sm:$0xff]  ;;  %v16783_v40 = vld [vmem:[#allocation96_spill] sm:$0xff] }
 0xaa1   :  { %8381 = vmatpush.bf16.msrb.mxu1 %v10611_v27  ;;  %v16778_v27 = vld [vmem:[#allocation63_spill] sm:$0xff] }
 0xaa2   :  { %8235 = vmatpush.bf16.msrb.mxu0 %v10586_v28  ;;  %v7625_v46 = vpack.c.bf16 %v16779_v4, %v16778_v27  ;;  %v16785_v50 = vld [vmem:[#allocation111_spill] sm:$0xff]  ;;  %v10608_v28 = vld [vmem:[#allocation3 + $0x1c0] sm:$0xff] }
 0xaa3   :  { %8284 = vmatpush.bf16.msrb.mxu2 %v10594_v61  ;;  %v10600_v61 = vld [vmem:[#allocation3 + $0x180] sm:$0xff]  ;;  %v16798_v4 = vld [vmem:[#allocation99_spill] sm:$0xff] }
 0xaa4   :  { %8333 = vmatpush.bf16.msrb.mxu3 %v10602_v19  ;;  %v10584_v19 = vld [vmem:[#allocation3 + $0x100] sm:$0xff] }
 0xaa5   :  { %8382 = vmatpush.bf16.msrb.mxu1 %v10610_v58  ;;  %v16786_v58 = vld [vmem:[#allocation65_spill] sm:$0xff] }
 0xaa6   :  { %8236 = vmatpush.bf16.msrb.mxu0 %v10585_v57  ;;  %v7633_v39 = vpack.c.bf16 %v16787_v33, %v16786_v58  ;;  %v16796_v57 = vld [vmem:[#allocation82_spill] sm:$0xff]  ;;  %v7592_v33 = vpack.c.bf16 %v15862_v18, %v15859_v1 }
 0xaa7   :  { %v16807_v18 = vld [vmem:[#allocation118_spill] sm:$0xff] }
 0xaa8   :  { %8334 = vmatpush.bf16.msrb.mxu3 %v10601_v22 }
 0xaa9   :  { %8383 = vmatpush.bf16.msrb.mxu1 %v10609_v5  ;;  %v16797_v5 = vld [vmem:[#allocation83_spill] sm:$0xff] }
 0xaaa   :  { %8237 = vmatpush.bf16.msrb.mxu0 %v10584_v19  ;;  %v7642_v27 = vpack.c.bf16 %v16797_v5, %v16796_v57  ;;  %v16809_v57 = vld [vmem:[#allocation38_spill] sm:$0xff] }
 0xaab   :  { %v16810_v5 = vld [vmem:[#allocation30_spill] sm:$0xff] }
 0xaac   :  { %8335 = vmatpush.bf16.msrb.mxu3 %v10600_v61  ;;  %v15977_v61 = vld [vmem:[%s16158_s7 + $0x42] ss:$0 sm:$0xff] }
 0xaad   :  { %8052 = vmatmul.bf16.gmra.mxu0 %v7601_v54  ;;  %v16772_v54 = vld [vmem:[#allocation76_spill] sm:$0xff]  ;;  %8384 = vmatpush.bf16.msrb.mxu1 %v10608_v28 }
 0xaae   :  { %8101 = vmatmul.bf16.gmra.mxu2 %v7602_v49  ;;  %v7618_v31 = vpack.c.bf16 %v16773_v32, %v16772_v54  ;;  %v16774_v49 = vld [vmem:[#allocation93_spill] sm:$0xff]  ;;  %v16806_v28 = vld [vmem:[#allocation48_spill] sm:$0xff] }
 0xaaf   :  { %8150 = vmatmul.bf16.gmra.mxu3 %v7603_v37  ;;  %v7619_v52 = vpack.c.bf16 %v16775_v30, %v16774_v49  ;;  %v16776_v37 = vld [vmem:[#allocation108_spill] sm:$0xff]  ;;  %v16789_v54 = vld [vmem:[#allocation81_spill] sm:$0xff]  ;;  %v16791_v49 = vld [vmem:[#allocation98_spill] sm:$0xff]  ;;  %v7591_v58 = vpack.c.bf16 %v15779_v55, %v16806_v28 }
 0xab0   :  { %8199 = vmatmul.bf16.gmra.mxu1 %v7604_v48  ;;  %v7620_v34 = vpack.c.bf16 %v16777_v42, %v16776_v37  ;;  %v10593_v48 = vld [vmem:[#allocation3 + $0x148] sm:$0xff] }
 0xab1   :  { %8285 = vmatpush.bf16.msrb.mxu2 %v10593_v48  ;;  %v16793_v37 = vld [vmem:[#allocation113_spill] sm:$0xff]  ;;  %v16795_v48 = vld [vmem:[#allocation68_spill] sm:$0xff] }
 0xabd   :  { %8057 = vmatmul.bf16.gmra.mxu0 %v7609_v10  ;;  %v16780_v10 = vld [vmem:[#allocation78_spill] sm:$0xff] }
 0xabe   :  { %8106 = vmatmul.bf16.gmra.mxu2 %v7610_v23  ;;  %v7626_v56 = vpack.c.bf16 %v16781_v60, %v16780_v10  ;;  %v16782_v23 = vld [vmem:[#allocation95_spill] sm:$0xff]  ;;  %v16800_v60 = vld [vmem:[#allocation114_spill] sm:$0xff] }
 0xabf   :  { %8155 = vmatmul.bf16.gmra.mxu3 %v7611_v47  ;;  %v7627_v41 = vpack.c.bf16 %v16783_v40, %v16782_v23  ;;  %v16784_v47 = vld [vmem:[#allocation110_spill] sm:$0xff]  ;;  %v16802_v40 = vld [vmem:[#allocation116_spill] sm:$0xff] }
 0xac0   :  { %8204 = vmatmul.bf16.gmra.mxu1 %v7612_v36  ;;  %v7628_v8 = vpack.c.bf16 %v16785_v50, %v16784_v47  ;;  %v10592_v36 = vld [vmem:[#allocation3 + $0x140] sm:$0xff]  ;;  %v16804_v50 = vld [vmem:[#allocation37_spill] sm:$0xff] }
 0xac1   :  { %8286 = vmatpush.bf16.msrb.mxu2 %v10592_v36 }
 0xacd   :  { %8062 = vmatmul.bf16.gmra.mxu0 %v7617_v62  ;;  %v16788_v62 = vld [vmem:[#allocation80_spill] sm:$0xff] }
 0xace   :  { %8111 = vmatmul.bf16.gmra.mxu2 %v7618_v31  ;;  %v7634_v32 = vpack.c.bf16 %v16789_v54, %v16788_v62  ;;  %v16790_v31 = vld [vmem:[#allocation97_spill] sm:$0xff] }
 0xacf   :  { %8160 = vmatmul.bf16.gmra.mxu3 %v7619_v52  ;;  %v7635_v30 = vpack.c.bf16 %v16791_v49, %v16790_v31  ;;  %v16792_v52 = vld [vmem:[#allocation112_spill] sm:$0xff] }
 0xad0   :  { %8209 = vmatmul.bf16.gmra.mxu1 %v7620_v34  ;;  %v7636_v42 = vpack.c.bf16 %v16793_v37, %v16792_v52  ;;  %v16794_v34 = vld [vmem:[#allocation67_spill] sm:$0xff] }
 0xad1   :  { %v7641_v22 = vpack.c.bf16 %v16795_v48, %v16794_v34  ;;  %v16808_v48 = vld [vmem:[#allocation119_spill] sm:$0xff] }
 0xadd   :  { %8067 = vmatmul.bf16.gmra.mxu0 %v7625_v46  ;;  %v16799_v46 = vld [vmem:[#allocation100_spill] sm:$0xff] }
 0xade   :  { %8116 = vmatmul.bf16.gmra.mxu2 %v7626_v56  ;;  %v7643_v10 = vpack.c.bf16 %v16799_v46, %v16798_v4  ;;  %v16801_v56 = vld [vmem:[#allocation115_spill] sm:$0xff]  ;;  %v7599_v46 = vpack.c.bf16 %v15785_v15, %v15782_v21 }
 0xadf   :  { %8165 = vmatmul.bf16.gmra.mxu3 %v7627_v41  ;;  %v7644_v23 = vpack.c.bf16 %v16801_v56, %v16800_v60  ;;  %v16803_v41 = vld [vmem:[#allocation117_spill] sm:$0xff] }
 0xae0   :  { %8214 = vmatmul.bf16.gmra.mxu1 %v7628_v8  ;;  %v7589_v47 = vpack.c.bf16 %v16803_v41, %v16802_v40  ;;  %v16805_v8 = vld [vmem:[#allocation21_spill] sm:$0xff] }
 0xae1   :  { %v7590_v36 = vpack.c.bf16 %v16805_v8, %v16804_v50 }
 0xaed   :  { %8072 = vmatmul.bf16.gmra.mxu0 %v7633_v39 }
 0xaee   :  { %8121 = vmatmul.bf16.gmra.mxu2 %v7634_v32 }
 0xaef   :  { %8170 = vmatmul.bf16.gmra.mxu3 %v7635_v30 }
 0xaf0   :  { %8219 = vmatmul.bf16.gmra.mxu1 %v7636_v42 }
 0xafd   :  { %8077 = vmatmul.bf16.gmra.mxu0 %v7641_v22  ;;  %v7597_v22 = vpack.c.bf16 %v16808_v48, %v16807_v18 }
 0xafe   :  { %8126 = vmatmul.bf16.gmra.mxu2 %v7642_v27  ;;  %v7598_v27 = vpack.c.bf16 %v16810_v5, %v16809_v57 }
 0xaff   :  { %8175 = vmatmul.bf16.gmra.mxu3 %v7643_v10  ;;  %v7600_v10 = vpack.c.bf16 %v15868_v59, %v15865_v2 }
 0xb00   :  { %8224 = vmatmul.bf16.gmra.mxu1 %v7644_v23 }
 0xb0a   :  { %v8043_v19 = vpop.f32.mrf.mxu0 }
 0xb0b   :  { %v8044_v62 = vadd.f32 %v8043_v19, %v15977_v61 }
 0xb0d   :  { %v8190_v39 = vpop.f32.mrf.mxu1  ;;  %8238 = vmatmul.bf16.vlgmr.msrb.gmra.mxu0 %v7589_v47 }
 0xb0e   :  { %8287 = vmatmul.bf16.vlgmr.msrb.gmra.mxu2 %v7590_v36 }
 0xb0f   :  { %8336 = vmatmul.bf16.vlgmr.msrb.gmra.mxu3 %v7591_v58  ;;  %v16811_v58 = vld [vmem:[#allocation120_spill] sm:$0xff] }
 0xb10   :  { %8385 = vmatmul.bf16.vlgmr.msrb.gmra.mxu1 %v7592_v33  ;;  %v16812_v33 = vld [vmem:[#allocation121_spill] sm:$0xff] }
 0xb11   :  { %v8092_v54 = vpop.f32.mrf.mxu2 }
 0xb12   :  { %v8093_v32 = vadd.f32 %v8092_v54, %v8044_v62  ;;  %v8141_v31 = vpop.f32.mrf.mxu3  ;;  %v8045_v49 = vpop.f32.mrf.mxu0  ;;  %v16813_v62 = vld [vmem:[#allocation32_spill] sm:$0xff]  ;;  %v16814_v54 = vld [vmem:[#allocation39_spill] sm:$0xff] }
 0xb13   :  { %v8046_v55 = vadd.f32 %v8045_v49, %v15977_v61  ;;  %v7607_v49 = vpack.c.bf16 %v15791_v11, %v15788_v9 }
 0xb14   :  { %v8142_v30 = vadd.f32 %v8141_v31, %v8093_v32  ;;  %v7606_v32 = vpack.c.bf16 %v16814_v54, %v16813_v62  ;;  %v16819_v54 = vld [vmem:[#allocation124_spill] sm:$0xff] }
 0xb15   :  { %v8192_v52 = vpop.f32.mrf.mxu1 }
 0xb16   :  { %v15984_v37 = vadd.f32 %v8190_v39, %v8142_v30  ;;  %v7605_v39 = vpack.c.bf16 %v16812_v33, %v16811_v58  ;;  %v7608_v30 = vpack.c.bf16 %v15874_v14, %v15871_v3 }
 0xb19   :  { %v8094_v42 = vpop.f32.mrf.mxu2 }
 0xb1a   :  { %v8095_v34 = vadd.f32 %v8094_v42, %v8046_v55  ;;  %v8143_v1 = vpop.f32.mrf.mxu3  ;;  %v8048_v4 = vpop.f32.mrf.mxu0 }
 0xb1b   :  { %v8049_v23 = vadd.f32 %v8048_v4, %v15977_v61  ;;  %v16815_v4 = vld [vmem:[#allocation122_spill] sm:$0xff] }
 0xb1c   :  { %v8144_v60 = vadd.f32 %v8143_v1, %v8095_v34 }
 0xb1d   :  { %v8195_v56 = vpop.f32.mrf.mxu1  ;;  %8243 = vmatmul.bf16.gmra.mxu0 %v7597_v22 }
 0xb1e   :  { %8292 = vmatmul.bf16.gmra.mxu2 %v7598_v27  ;;  %v15996_v40 = vadd.f32 %v8192_v52, %v8144_v60  ;;  %v16817_v60 = vld [vmem:[#allocation43_spill] sm:$0xff] }
 0xb1f   :  { %8341 = vmatmul.bf16.gmra.mxu3 %v7599_v46  ;;  %v16816_v46 = vld [vmem:[#allocation123_spill] sm:$0xff] }
 0xb20   :  { %8390 = vmatmul.bf16.gmra.mxu1 %v7600_v10  ;;  %v7613_v10 = vpack.c.bf16 %v16816_v46, %v16815_v4 }
 0xb21   :  { %v8097_v41 = vpop.f32.mrf.mxu2 }
 0xb22   :  { %v8098_v47 = vadd.f32 %v8097_v41, %v8049_v23  ;;  %v8146_v50 = vpop.f32.mrf.mxu3  ;;  %v8050_v8 = vpop.f32.mrf.mxu0 }
 0xb23   :  { %v8051_v15 = vadd.f32 %v8050_v8, %v15977_v61 }
 0xb24   :  { %v8147_v36 = vadd.f32 %v8146_v50, %v8098_v47  ;;  %v7615_v47 = vpack.c.bf16 %v15797_v53, %v15794_v16  ;;  %v7616_v50 = vpack.c.bf16 %v15880_v25, %v15877_v38 }
 0xb25   :  { %v8197_v19 = vpop.f32.mrf.mxu1 }
 0xb26   :  { %v15998_v21 = vadd.f32 %v8195_v56, %v8147_v36  ;;  %v16818_v56 = vld [vmem:[#allocation58_spill] sm:$0xff] }
 0xb27   :  { %v7614_v23 = vpack.c.bf16 %v16818_v56, %v16817_v60  ;;  %v16824_v60 = vld [vmem:[#allocation127_spill] sm:$0xff] }
 0xb29   :  { %v8099_v2 = vpop.f32.mrf.mxu2 }
 0xb2a   :  { %v8100_v59 = vadd.f32 %v8099_v2, %v8051_v15  ;;  %v8148_v28 = vpop.f32.mrf.mxu3  ;;  %v8053_v31 = vpop.f32.mrf.mxu0 }
 0xb2b   :  { %v8054_v42 = vadd.f32 %v8053_v31, %v15977_v61 }
 0xb2c   :  { %v8149_v52 = vadd.f32 %v8148_v28, %v8100_v59 }
 0xb2d   :  { %v8200_v55 = vpop.f32.mrf.mxu1  ;;  %8248 = vmatmul.bf16.gmra.mxu0 %v7605_v39 }
 0xb2e   :  { %8297 = vmatmul.bf16.gmra.mxu2 %v7606_v32  ;;  %v16010_v34 = vadd.f32 %v8197_v19, %v8149_v52  ;;  %v16820_v32 = vld [vmem:[#allocation125_spill] sm:$0xff] }
 0xb2f   :  { %8346 = vmatmul.bf16.gmra.mxu3 %v7607_v49  ;;  %v7621_v31 = vpack.c.bf16 %v16820_v32, %v16819_v54  ;;  %v16821_v49 = vld [vmem:[#allocation22_spill] sm:$0xff]  ;;  %v16827_v54 = vld [vmem:[#allocation128_spill] sm:$0xff]  ;;  %v16828_v32 = vld [vmem:[#allocation129_spill] sm:$0xff] }
 0xb30   :  { %8395 = vmatmul.bf16.gmra.mxu1 %v7608_v30  ;;  %v16822_v30 = vld [vmem:[#allocation29_spill] sm:$0xff] }
 0xb31   :  { %v8102_v1 = vpop.f32.mrf.mxu2  ;;  %v7622_v52 = vpack.c.bf16 %v16822_v30, %v16821_v49  ;;  %v16829_v49 = vld [vmem:[#allocation40_spill] sm:$0xff] }
 0xb32   :  { %v8103_v18 = vadd.f32 %v8102_v1, %v8054_v42  ;;  %v8151_v48 = vpop.f32.mrf.mxu3  ;;  %v8055_v22 = vpop.f32.mrf.mxu0  ;;  %v7623_v42 = vpack.c.bf16 %v15803_v35, %v15800_v0  ;;  %v7624_v1 = vpack.c.bf16 %v15886_v26, %v15883_v43  ;;  %v16830_v30 = vld [vmem:[#allocation44_spill] sm:$0xff] }
 0xb33   :  { %v8056_v11 = vadd.f32 %v8055_v22, %v15977_v61 }
 0xb34   :  { %v8152_v57 = vadd.f32 %v8151_v48, %v8103_v18 }
 0xb35   :  { %v8202_v5 = vpop.f32.mrf.mxu1 }
 0xb36   :  { %v16012_v9 = vadd.f32 %v8200_v55, %v8152_v57 }
 0xb39   :  { %v8104_v3 = vpop.f32.mrf.mxu2 }
 0xb3a   :  { %v8105_v14 = vadd.f32 %v8104_v3, %v8056_v11  ;;  %v8153_v27 = vpop.f32.mrf.mxu3  ;;  %v8058_v41 = vpop.f32.mrf.mxu0 }
 0xb3b   :  { %v8059_v19 = vadd.f32 %v8058_v41, %v15977_v61  ;;  %v16826_v41 = vld [vmem:[#allocation33_spill] sm:$0xff] }
 0xb3c   :  { %v8154_v8 = vadd.f32 %v8153_v27, %v8105_v14 }
 0xb3d   :  { %v8205_v36 = vpop.f32.mrf.mxu1  ;;  %8253 = vmatmul.bf16.gmra.mxu0 %v7613_v10  ;;  %v16823_v10 = vld [vmem:[#allocation126_spill] sm:$0xff] }
 0xb3e   :  { %8302 = vmatmul.bf16.gmra.mxu2 %v7614_v23  ;;  %v16024_v15 = vadd.f32 %v8202_v5, %v8154_v8  ;;  %v7629_v56 = vpack.c.bf16 %v16824_v60, %v16823_v10  ;;  %v16825_v23 = vld [vmem:[#allocation31_spill] sm:$0xff]  ;;  %v7631_v8 = vpack.c.bf16 %v15809_v13, %v15806_v44  ;;  %v16833_v60 = vld [vmem:[#allocation34_spill] sm:$0xff] }
 0xb3f   :  { %8351 = vmatmul.bf16.gmra.mxu3 %v7615_v47  ;;  %v7630_v47 = vpack.c.bf16 %v16826_v41, %v16825_v23 }
 0xb40   :  { %8400 = vmatmul.bf16.gmra.mxu1 %v7616_v50 }
 0xb41   :  { %v8107_v2 = vpop.f32.mrf.mxu2 }
 0xb42   :  { %v8108_v59 = vadd.f32 %v8107_v2, %v8059_v19  ;;  %v8156_v28 = vpop.f32.mrf.mxu3  ;;  %v8060_v58 = vpop.f32.mrf.mxu0 }
 0xb43   :  { %v8061_v53 = vadd.f32 %v8060_v58, %v15977_v61 }
 0xb44   :  { %v8157_v33 = vadd.f32 %v8156_v28, %v8108_v59 }
 0xb45   :  { %v8207_v39 = vpop.f32.mrf.mxu1 }
 0xb46   :  { %v16026_v16 = vadd.f32 %v8205_v36, %v8157_v33  ;;  %v7632_v36 = vpack.c.bf16 %v15892_v12, %v15889_v20 }
 0xb49   :  { %v8109_v38 = vpop.f32.mrf.mxu2 }
 0xb4a   :  { %v8110_v25 = vadd.f32 %v8109_v38, %v8061_v53  ;;  %v8158_v62 = vpop.f32.mrf.mxu3  ;;  %v8063_v55 = vpop.f32.mrf.mxu0 }
 0xb4b   :  { %v8064_v22 = vadd.f32 %v8063_v55, %v15977_v61 }
 0xb4c   :  { %v8159_v18 = vadd.f32 %v8158_v62, %v8110_v25 }
 0xb4d   :  { %v8210_v48 = vpop.f32.mrf.mxu1  ;;  %8258 = vmatmul.bf16.gmra.mxu0 %v7621_v31  ;;  %v7637_v31 = vpack.c.bf16 %v16828_v32, %v16827_v54 }
 0xb4e   :  { %8307 = vmatmul.bf16.gmra.mxu2 %v7622_v52  ;;  %v16038_v57 = vadd.f32 %v8207_v39, %v8159_v18  ;;  %v7638_v52 = vpack.c.bf16 %v16830_v30, %v16829_v49 }
 0xb4f   :  { %8356 = vmatmul.bf16.gmra.mxu3 %v7623_v42  ;;  %v7639_v42 = vpack.c.bf16 %v15815_v45, %v15812_v29 }
 0xb50   :  { %8405 = vmatmul.bf16.gmra.mxu1 %v7624_v1  ;;  %v7640_v1 = vpack.c.bf16 %v15898_v63, %v15895_v51 }
 0xb51   :  { %v8112_v5 = vpop.f32.mrf.mxu2 }
 0xb52   :  { %v8113_v11 = vadd.f32 %v8112_v5, %v8064_v22  ;;  %v8161_v3 = vpop.f32.mrf.mxu3  ;;  %v8065_v14 = vpop.f32.mrf.mxu0 }
 0xb53   :  { %v8066_v35 = vadd.f32 %v8065_v14, %v15977_v61 }
 0xb54   :  { %v8162_v27 = vadd.f32 %v8161_v3, %v8113_v11 }
 0xb55   :  { %v8212_v4 = vpop.f32.mrf.mxu1 }
 0xb56   :  { %v16040_v0 = vadd.f32 %v8210_v48, %v8162_v27 }
 0xb59   :  { %v8114_v43 = vpop.f32.mrf.mxu2 }
 0xb5a   :  { %v8115_v26 = vadd.f32 %v8114_v43, %v8066_v35  ;;  %v8163_v46 = vpop.f32.mrf.mxu3  ;;  %v8068_v50 = vpop.f32.mrf.mxu0 }
 0xb5b   :  { %v8069_v59 = vadd.f32 %v8068_v50, %v15977_v61  ;;  %v7648_v50 = vpack.c.bf16 %v15904_v7, %v15901_v24 }
 0xb5c   :  { %v8164_v19 = vadd.f32 %v8163_v46, %v8115_v26  ;;  %v16831_v26 = vld [vmem:[#allocation130_spill] sm:$0xff]  ;;  %v16832_v46 = vld [vmem:[#allocation131_spill] sm:$0xff] }
 0xb5d   :  { %v8215_v2 = vpop.f32.mrf.mxu1  ;;  %8263 = vmatmul.bf16.gmra.mxu0 %v7629_v56  ;;  %v7645_v10 = vpack.c.bf16 %v16832_v46, %v16831_v26  ;;  %v16834_v56 = vld [vmem:[#allocation47_spill] sm:$0xff] }
 0xb5e   :  { %8312 = vmatmul.bf16.gmra.mxu2 %v7630_v47  ;;  %v16052_v28 = vadd.f32 %v8212_v4, %v8164_v19  ;;  %v7646_v23 = vpack.c.bf16 %v16834_v56, %v16833_v60  ;;  %v7647_v47 = vpack.c.bf16 %v15821_v17, %v15818_v6 }
 0xb5f   :  { %8361 = vmatmul.bf16.gmra.mxu3 %v7631_v8 }
 0xb60   :  { %8410 = vmatmul.bf16.gmra.mxu1 %v7632_v36 }
 0xb61   :  { %v8117_v58 = vpop.f32.mrf.mxu2 }
 0xb62   :  { %v8118_v33 = vadd.f32 %v8117_v58, %v8069_v59  ;;  %v8166_v39 = vpop.f32.mrf.mxu3  ;;  %v8070_v53 = vpop.f32.mrf.mxu0 }
 0xb63   :  { %v8071_v13 = vadd.f32 %v8070_v53, %v15977_v61 }
 0xb64   :  { %v8167_v38 = vadd.f32 %v8166_v39, %v8118_v33 }
 0xb65   :  { %v8217_v25 = vpop.f32.mrf.mxu1 }
 0xb66   :  { %v16054_v44 = vadd.f32 %v8215_v2, %v8167_v38 }
 0xb69   :  { %v8119_v20 = vpop.f32.mrf.mxu2 }
 0xb6a   :  { %v8120_v12 = vadd.f32 %v8119_v20, %v8071_v13  ;;  %v8168_v62 = vpop.f32.mrf.mxu3  ;;  %v8073_v55 = vpop.f32.mrf.mxu0 }
 0xb6b   :  { %v8074_v22 = vadd.f32 %v8073_v55, %v15977_v61 }
 0xb6c   :  { %v8169_v18 = vadd.f32 %v8168_v62, %v8120_v12 }
 0xb6d   :  { %v8220_v48 = vpop.f32.mrf.mxu1  ;;  %8268 = vmatmul.bf16.gmra.mxu0 %v7637_v31 }
 0xb6e   :  { %8317 = vmatmul.bf16.gmra.mxu2 %v7638_v52  ;;  %v16066_v5 = vadd.f32 %v8217_v25, %v8169_v18 }
 0xb6f   :  { %8366 = vmatmul.bf16.gmra.mxu3 %v7639_v42 }
 0xb70   :  { %8415 = vmatmul.bf16.gmra.mxu1 %v7640_v1 }
 0xb71   :  { %v8122_v11 = vpop.f32.mrf.mxu2 }
 0xb72   :  { %v8123_v3 = vadd.f32 %v8122_v11, %v8074_v22  ;;  %v8171_v14 = vpop.f32.mrf.mxu3  ;;  %v8075_v27 = vpop.f32.mrf.mxu0 }
 0xb73   :  { %v8076_v45 = vadd.f32 %v8075_v27, %v15977_v61 }
 0xb74   :  { %v8172_v4 = vadd.f32 %v8171_v14, %v8123_v3 }
 0xb75   :  { %v8222_v35 = vpop.f32.mrf.mxu1 }
 0xb76   :  { %v16068_v29 = vadd.f32 %v8220_v48, %v8172_v4 }
 0xb79   :  { %v8124_v51 = vpop.f32.mrf.mxu2 }
 0xb7a   :  { %v8125_v63 = vadd.f32 %v8124_v51, %v8076_v45  ;;  %v8173_v43 = vpop.f32.mrf.mxu3  ;;  %v8078_v41 = vpop.f32.mrf.mxu0 }
 0xb7b   :  { %v8079_v19 = vadd.f32 %v8078_v41, %v15977_v61 }
 0xb7c   :  { %v8174_v8 = vadd.f32 %v8173_v43, %v8125_v63 }
 0xb7d   :  { %v8225_v36 = vpop.f32.mrf.mxu1  ;;  %8273 = vmatmul.bf16.gmra.mxu0 %v7645_v10 }
 0xb7e   :  { %8322 = vmatmul.bf16.gmra.mxu2 %v7646_v23  ;;  %v16080_v2 = vadd.f32 %v8222_v35, %v8174_v8 }
 0xb7f   :  { %8371 = vmatmul.bf16.gmra.mxu3 %v7647_v47 }
 0xb80   :  { %8420 = vmatmul.bf16.gmra.mxu1 %v7648_v50 }
 0xb81   :  { %v8127_v59 = vpop.f32.mrf.mxu2 }
 0xb82   :  { %v8128_v58 = vadd.f32 %v8127_v59, %v8079_v19  ;;  %v8176_v33 = vpop.f32.mrf.mxu3  ;;  %v8080_v39 = vpop.f32.mrf.mxu0 }
 0xb83   :  { %v8081_v17 = vadd.f32 %v8080_v39, %v15977_v61 }
 0xb84   :  { %v8177_v53 = vadd.f32 %v8176_v33, %v8128_v58 }
 0xb85   :  { %v8227_v38 = vpop.f32.mrf.mxu1 }
 0xb86   :  { %v16082_v6 = vadd.f32 %v8225_v36, %v8177_v53 }
 0xb89   :  { %v8129_v24 = vpop.f32.mrf.mxu2 }
 0xb8a   :  { %v8130_v7 = vadd.f32 %v8129_v24, %v8081_v17  ;;  %v8178_v25 = vpop.f32.mrf.mxu3  ;;  %v8239_v13 = vpop.f32.mrf.mxu0 }
 0xb8b   :  { %v8240_v54 = vadd.f32 %v8239_v13, %v15984_v37 }
 0xb8c   :  { %v8179_v20 = vadd.f32 %v8178_v25, %v8130_v7 }
 0xb8d   :  { %v8386_v12 = vpop.f32.mrf.mxu1 }
 0xb8e   :  { %v16085_v62 = vadd.f32 %v8227_v38, %v8179_v20 }
 0xb91   :  { %v8288_v32 = vpop.f32.mrf.mxu2 }
 0xb92   :  { %v8289_v31 = vadd.f32 %v8288_v32, %v8240_v54  ;;  %v8337_v49 = vpop.f32.mrf.mxu3  ;;  %v8241_v30 = vpop.f32.mrf.mxu0 }
 0xb93   :  { %v8242_v61 = vadd.f32 %v8241_v30, %v15996_v40 }
 0xb94   :  { %v8338_v52 = vadd.f32 %v8337_v49, %v8289_v31 }
 0xb95   :  { %v8388_v55 = vpop.f32.mrf.mxu1 }
 0xb96   :  { %v8387_v42 = vadd.f32 %v8386_v12, %v8338_v52 }
 0xb98   :  { %10672 = vtanh.f32 %v8387_v42 }
 0xb99   :  { %v8290_v1 = vpop.f32.mrf.mxu2 }
 0xb9a   :  { %v8291_v18 = vadd.f32 %v8290_v1, %v8242_v61  ;;  %v8339_v48 = vpop.f32.mrf.mxu3  ;;  %v8244_v22 = vpop.f32.mrf.mxu0 }
 0xb9b   :  { %v8245_v37 = vadd.f32 %v8244_v22, %v15998_v21 }
 0xb9c   :  { %v8340_v11 = vadd.f32 %v8339_v48, %v8291_v18 }
 0xb9d   :  { %v8391_v3 = vpop.f32.mrf.mxu1 }
 0xb9e   :  { %v10673_v14 = vpop.eup %10672  ;;  %v8389_v27 = vadd.f32 %v8388_v55, %v8340_v11 }
 0xb9f   :  { %8442 = vst [vmem:[%s16161_s10] sm:$0xff] %v10673_v14 }
 0xba0   :  { %10674 = vtanh.f32 %v8389_v27 }
 0xba1   :  { %v8293_v4 = vpop.f32.mrf.mxu2 }
 0xba2   :  { %v8294_v35 = vadd.f32 %v8293_v4, %v8245_v37  ;;  %v8342_v45 = vpop.f32.mrf.mxu3  ;;  %v8246_v51 = vpop.f32.mrf.mxu0 }
 0xba3   :  { %v8247_v46 = vadd.f32 %v8246_v51, %v16010_v34 }
 0xba4   :  { %v8343_v40 = vadd.f32 %v8342_v45, %v8294_v35 }
 0xba5   :  { %v8393_v63 = vpop.f32.mrf.mxu1 }
 0xba6   :  { %v10675_v43 = vpop.eup %10674  ;;  %v8392_v26 = vadd.f32 %v8391_v3, %v8343_v40 }
 0xba7   :  { %8443 = vst [vmem:[%s16161_s10 + $0x8] sm:$0xff] %v10675_v43 }
 0xba8   :  { %10676 = vtanh.f32 %v8392_v26 }
 0xba9   :  { %v8295_v10 = vpop.f32.mrf.mxu2 }
 0xbaa   :  { %v8296_v60 = vadd.f32 %v8295_v10, %v8247_v46  ;;  %v8344_v56 = vpop.f32.mrf.mxu3  ;;  %v8249_v23 = vpop.f32.mrf.mxu0 }
 0xbab   :  { %v8250_v8 = vadd.f32 %v8249_v23, %v16012_v9 }
 0xbac   :  { %v8345_v21 = vadd.f32 %v8344_v56, %v8296_v60 }
 0xbad   :  { %v8396_v41 = vpop.f32.mrf.mxu1 }
 0xbae   :  { %v10677_v47 = vpop.eup %10676  ;;  %v8394_v50 = vadd.f32 %v8393_v63, %v8345_v21 }
 0xbaf   :  { %8444 = vst [vmem:[%s16161_s10 + $0x10] sm:$0xff] %v10677_v47 }
 0xbb0   :  { %10678 = vtanh.f32 %v8394_v50 }
 0xbb1   :  { %v8298_v36 = vpop.f32.mrf.mxu2 }
 0xbb2   :  { %v8299_v19 = vadd.f32 %v8298_v36, %v8250_v8  ;;  %v8347_v59 = vpop.f32.mrf.mxu3  ;;  %v8251_v58 = vpop.f32.mrf.mxu0 }
 0xbb3   :  { %v8252_v38 = vadd.f32 %v8251_v58, %v16024_v15 }
 0xbb4   :  { %v8348_v34 = vadd.f32 %v8347_v59, %v8299_v19 }
 0xbb5   :  { %v8398_v33 = vpop.f32.mrf.mxu1 }
 0xbb6   :  { %v10679_v39 = vpop.eup %10678  ;;  %v8397_v53 = vadd.f32 %v8396_v41, %v8348_v34 }
 0xbb7   :  { %8445 = vst [vmem:[%s16161_s10 + $0x18] sm:$0xff] %v10679_v39 }
 0xbb8   :  { %10680 = vtanh.f32 %v8397_v53 }
 0xbb9   :  { %v8300_v17 = vpop.f32.mrf.mxu2 }
 0xbba   :  { %v8301_v24 = vadd.f32 %v8300_v17, %v8252_v38  ;;  %v8349_v7 = vpop.f32.mrf.mxu3  ;;  %v8254_v25 = vpop.f32.mrf.mxu0 }
 0xbbb   :  { %v8255_v54 = vadd.f32 %v8254_v25, %v16026_v16 }
 0xbbc   :  { %v8350_v9 = vadd.f32 %v8349_v7, %v8301_v24 }
 0xbbd   :  { %v8401_v13 = vpop.f32.mrf.mxu1 }
 0xbbe   :  { %v10681_v20 = vpop.eup %10680  ;;  %v8399_v12 = vadd.f32 %v8398_v33, %v8350_v9 }
 0xbbf   :  { %8446 = vst [vmem:[%s16161_s10 + $0x20] sm:$0xff] %v10681_v20 }
 0xbc0   :  { %10682 = vtanh.f32 %v8399_v12 }
 0xbc1   :  { %v8303_v32 = vpop.f32.mrf.mxu2 }
 0xbc2   :  { %v8304_v31 = vadd.f32 %v8303_v32, %v8255_v54  ;;  %v8352_v49 = vpop.f32.mrf.mxu3  ;;  %v8256_v30 = vpop.f32.mrf.mxu0 }
 0xbc3   :  { %v8257_v61 = vadd.f32 %v8256_v30, %v16038_v57 }
 0xbc4   :  { %v8353_v15 = vadd.f32 %v8352_v49, %v8304_v31 }
 0xbc5   :  { %v8403_v52 = vpop.f32.mrf.mxu1 }
 0xbc6   :  { %v10683_v55 = vpop.eup %10682  ;;  %v8402_v42 = vadd.f32 %v8401_v13, %v8353_v15 }
 0xbc7   :  { %8447 = vst [vmem:[%s16161_s10 + $0x28] sm:$0xff] %v10683_v55 }
 0xbc8   :  { %10684 = vtanh.f32 %v8402_v42 }
 0xbc9   :  { %v8305_v1 = vpop.f32.mrf.mxu2 }
 0xbca   :  { %v8306_v18 = vadd.f32 %v8305_v1, %v8257_v61  ;;  %v8354_v48 = vpop.f32.mrf.mxu3  ;;  %v8259_v22 = vpop.f32.mrf.mxu0 }
 0xbcb   :  { %v8260_v27 = vadd.f32 %v8259_v22, %v16040_v0 }
 0xbcc   :  { %v8355_v16 = vadd.f32 %v8354_v48, %v8306_v18 }
 0xbcd   :  { %v8406_v11 = vpop.f32.mrf.mxu1 }
 0xbce   :  { %v10685_v3 = vpop.eup %10684  ;;  %v8404_v14 = vadd.f32 %v8403_v52, %v8355_v16 }
 0xbcf   :  { %8448 = vst [vmem:[%s16161_s10 + $0x30] sm:$0xff] %v10685_v3 }
 0xbd0   :  { %10686 = vtanh.f32 %v8404_v14 }
 0xbd1   :  { %v8308_v37 = vpop.f32.mrf.mxu2 }
 0xbd2   :  { %v8309_v4 = vadd.f32 %v8308_v37, %v8260_v27  ;;  %v8357_v35 = vpop.f32.mrf.mxu3  ;;  %v8261_v45 = vpop.f32.mrf.mxu0 }
 0xbd3   :  { %v8262_v43 = vadd.f32 %v8261_v45, %v16052_v28 }
 0xbd4   :  { %v8358_v57 = vadd.f32 %v8357_v35, %v8309_v4 }
 0xbd5   :  { %v8408_v51 = vpop.f32.mrf.mxu1 }
 0xbd6   :  { %v10687_v40 = vpop.eup %10686  ;;  %v8407_v63 = vadd.f32 %v8406_v11, %v8358_v57 }
 0xbd7   :  { %8449 = vst [vmem:[%s16161_s10 + $0x38] sm:$0xff] %v10687_v40 }
 0xbd8   :  { %10688 = vtanh.f32 %v8407_v63 }
 0xbd9   :  { %v8310_v26 = vpop.f32.mrf.mxu2 }
 0xbda   :  { %v8311_v46 = vadd.f32 %v8310_v26, %v8262_v43  ;;  %v8359_v10 = vpop.f32.mrf.mxu3  ;;  %v8264_v60 = vpop.f32.mrf.mxu0 }
 0xbdb   :  { %v8265_v41 = vadd.f32 %v8264_v60, %v16054_v44 }
 0xbdc   :  { %v8360_v0 = vadd.f32 %v8359_v10, %v8311_v46 }
 0xbdd   :  { %v8411_v56 = vpop.f32.mrf.mxu1 }
 0xbde   :  { %v10689_v23 = vpop.eup %10688  ;;  %v8409_v21 = vadd.f32 %v8408_v51, %v8360_v0 }
 0xbdf   :  { %8450 = vst [vmem:[%s16161_s10 + $0x40] sm:$0xff] %v10689_v23 }
 0xbe0   :  { %10690 = vtanh.f32 %v8409_v21 }
 0xbe1   :  { %v8313_v47 = vpop.f32.mrf.mxu2 }
 0xbe2   :  { %v8314_v50 = vadd.f32 %v8313_v47, %v8265_v41  ;;  %v8362_v8 = vpop.f32.mrf.mxu3  ;;  %v8266_v36 = vpop.f32.mrf.mxu0 }
 0xbe3   :  { %v8267_v34 = vadd.f32 %v8266_v36, %v16066_v5 }
 0xbe4   :  { %v8363_v28 = vadd.f32 %v8362_v8, %v8314_v50 }
 0xbe5   :  { %v8413_v19 = vpop.f32.mrf.mxu1 }
 0xbe6   :  { %v10691_v59 = vpop.eup %10690  ;;  %v8412_v58 = vadd.f32 %v8411_v56, %v8363_v28 }
 0xbe7   :  { %8451 = vst [vmem:[%s16161_s10 + $0x48] sm:$0xff] %v10691_v59 }
 0xbe8   :  { %10692 = vtanh.f32 %v8412_v58 }
 0xbe9   :  { %v8315_v33 = vpop.f32.mrf.mxu2 }
 0xbea   :  { %v8316_v39 = vadd.f32 %v8315_v33, %v8267_v34  ;;  %v8364_v53 = vpop.f32.mrf.mxu3  ;;  %v8269_v38 = vpop.f32.mrf.mxu0 }
 0xbeb   :  { %v8270_v25 = vadd.f32 %v8269_v38, %v16068_v29 }
 0xbec   :  { %v8365_v44 = vadd.f32 %v8364_v53, %v8316_v39 }
 0xbed   :  { %v8416_v7 = vpop.f32.mrf.mxu1 }
 0xbee   :  { %v10693_v17 = vpop.eup %10692  ;;  %v8414_v24 = vadd.f32 %v8413_v19, %v8365_v44 }
 0xbef   :  { %8452 = vst [vmem:[%s16161_s10 + $0x50] sm:$0xff] %v10693_v17 }
 0xbf0   :  { %10694 = vtanh.f32 %v8414_v24 }
 0xbf1   :  { %v8318_v9 = vpop.f32.mrf.mxu2 }
 0xbf2   :  { %v8319_v13 = vadd.f32 %v8318_v9, %v8270_v25  ;;  %v8367_v20 = vpop.f32.mrf.mxu3  ;;  %v8271_v12 = vpop.f32.mrf.mxu0 }
 0xbf3   :  { %v8272_v31 = vadd.f32 %v8271_v12, %v16080_v2 }
 0xbf4   :  { %v8368_v5 = vadd.f32 %v8367_v20, %v8319_v13 }
 0xbf5   :  { %v8418_v49 = vpop.f32.mrf.mxu1 }
 0xbf6   :  { %v10695_v54 = vpop.eup %10694  ;;  %v8417_v32 = vadd.f32 %v8416_v7, %v8368_v5 }
 0xbf7   :  { %8453 = vst [vmem:[%s16161_s10 + $0x58] sm:$0xff] %v10695_v54 }
 0xbf8   :  { %10696 = vtanh.f32 %v8417_v32 }
 0xbf9   :  { %v8320_v30 = vpop.f32.mrf.mxu2 }
 0xbfa   :  { %v8321_v15 = vadd.f32 %v8320_v30, %v8272_v31  ;;  %v8369_v52 = vpop.f32.mrf.mxu3  ;;  %v8274_v55 = vpop.f32.mrf.mxu0 }
 0xbfb   :  { %v8275_v1 = vadd.f32 %v8274_v55, %v16082_v6 }
 0xbfc   :  { %v8370_v29 = vadd.f32 %v8369_v52, %v8321_v15 }
 0xbfd   :  { %v8421_v16 = vpop.f32.mrf.mxu1 }
 0xbfe   :  { %v10697_v42 = vpop.eup %10696  ;;  %v8419_v61 = vadd.f32 %v8418_v49, %v8370_v29 }
 0xbff   :  { %8454 = vst [vmem:[%s16161_s10 + $0x60] sm:$0xff] %v10697_v42 }
 0xc00   :  { %10698 = vtanh.f32 %v8419_v61 }
 0xc01   :  { %v8323_v18 = vpop.f32.mrf.mxu2 }
 0xc02   :  { %v8324_v48 = vadd.f32 %v8323_v18, %v8275_v1  ;;  %v8372_v22 = vpop.f32.mrf.mxu3  ;;  %v8276_v11 = vpop.f32.mrf.mxu0 }
 0xc03   :  { %v8277_v27 = vadd.f32 %v8276_v11, %v16085_v62 }
 0xc04   :  { %v8373_v2 = vadd.f32 %v8372_v22, %v8324_v48 }
 0xc05   :  { %v8423_v6 = vpop.f32.mrf.mxu1 }
 0xc06   :  { %v10699_v3 = vpop.eup %10698  ;;  %v8422_v14 = vadd.f32 %v8421_v16, %v8373_v2 }
 0xc07   :  { %8455 = vst [vmem:[%s16161_s10 + $0x68] sm:$0xff] %v10699_v3 }
 0xc08   :  { %10700 = vtanh.f32 %v8422_v14 }
 0xc09   :  { %v8325_v37 = vpop.f32.mrf.mxu2 }
 0xc0a   :  { %v8326_v4 = vadd.f32 %v8325_v37, %v8277_v27  ;;  %v8374_v35 = vpop.f32.mrf.mxu3 }
 0xc0c   :  { %v8375_v45 = vadd.f32 %v8374_v35, %v8326_v4 }
 0xc0e   :  { %v10701_v57 = vpop.eup %10700  ;;  %v8424_v51 = vadd.f32 %v8423_v6, %v8375_v45 }
 0xc0f   :  { %8456 = vst [vmem:[%s16161_s10 + $0x70] sm:$0xff] %v10701_v57 }
 0xc10   :  { %10702 = vtanh.f32 %v8424_v51 }
 0xc16   :  { %v10703_v40 = vpop.eup %10702 }
 0xc17   :  { %8457 = vst [vmem:[%s16161_s10 + $0x78] sm:$0xff] %v10703_v40 }
 0xc18   :  { %8462 = vsyncpa [#allocation6], 1 }
 0xc19   :  { %8463 = vsyncpa [#allocation8], 1 }
 0xc1a   :  { %8464 = vsyncmov [#allocation4] }
 0xc1d   :  { %s8465_s22 = vpop.sfrf %8464 }
 0xc1e   :  { %p10197_p0 = scmp.ne.s32.totalorder %s8465_s22, 0 }
 0xc20   :  { %8469 = shalt.err (%p10197_p0)  }
 0xc21   :  { %8471 = vsyncmov [#allocation4 + $0x1] }
 0xc24   :  { %s8472_s23 = vpop.sfrf %8471 }
 0xc25   :  { %p10198_p1 = scmp.ne.s32.totalorder %s8472_s23, 0 }
 0xc27   :  { %8476 = shalt.err (%p10198_p1)  }

</bundles_post_ra>
